<compile_context>
chip_gen: v7x
topology: tpu7x:2x2x1
jax: 0.10.0
libtpu: 0.0.40
codegen_flags: <defaults>
</compile_context>

<pallas_src>
import string
from functools import partial

import jax
import jax.numpy as jnp
from jax.experimental import pallas as pl
from jax.experimental.pallas import tpu as pltpu

VOCAB_SIZE = len(string.printable)     # 100
VOCAB_PAD = 128                        # lane-dense padded vocab
EMBED_DIM = 32
HIDDEN_DIM = 64
HIDDEN_PAD = 128                       # lane-dense padded hidden
SEQ_LENGTH = 64
FLAT_DIM = SEQ_LENGTH * EMBED_DIM      # 2048
ENC_DIM = 512
NEG_SLOPE = 0.2                        # nn.LeakyReLU(0.2)

NK = 4                                 # sequence chunks processed per pass
PS = SEQ_LENGTH // NK                  # positions per chunk (16)
CW = PS * EMBED_DIM                    # flattened width per chunk (512)
HALF = FLAT_DIM // 2                   # decoder column half per streamed DMA
E_LOG2 = EMBED_DIM.bit_length() - 1
PS_LOG2 = PS.bit_length() - 1

assert EMBED_DIM & (EMBED_DIM - 1) == 0 and PS & (PS - 1) == 0
assert NK % 2 == 0 and CW % 128 == 0 and PS % 8 == 0


def _lrelu(x):
    return jnp.where(x > 0, x, NEG_SLOPE * x)


# ----------------------------------------------------------------------------
# Fused kernel
# ----------------------------------------------------------------------------
def fused_forward_kernel(tok_ref, embt_ref, b1_ref, w2_ref, b2_ref, w3_ref,
                         b3_ref, b4_ref, wot_ref, bo_ref, w1_hbm, w4_hbm,
                         out_ref, w1_buf, w4_buf, dma_sem, *, batch):
    f32, bf16 = jnp.float32, jnp.bfloat16
    rows = batch * PS                                         # token rows / chunk

    # ---- kick off the heavy weight DMAs so they stream behind compute -------
    w1_cp = pltpu.make_async_copy(w1_hbm, w1_buf, dma_sem.at[0])
    w4_cps = [pltpu.make_async_copy(w4_hbm.at[h], w4_buf.at[h], dma_sem.at[1 + h])
              for h in range(2)]
    w1_cp.start()
    for cp in w4_cps:
        cp.start()

    # ---- shared (tiny) selection masks, built once ---------------------------
    # own[r, c]: token row r (= b*PS + j) owns flat lane-group j of width E.
    r_i = jax.lax.broadcasted_iota(jnp.int32, (rows, CW), 0)
    c_i = jax.lax.broadcasted_iota(jnp.int32, (rows, CW), 1)
    own = (r_i & (PS - 1)) == (c_i >> E_LOG2)                 # (rows, CW) bool
    rb = jax.lax.broadcasted_iota(jnp.int32, (batch, rows), 1)
    bb = jax.lax.broadcasted_iota(jnp.int32, (batch, rows), 0)
    sel = ((rb >> PS_LOG2) == bb).astype(bf16)                # (B, rows) collapse
    rb2 = jax.lax.broadcasted_iota(jnp.int32, (rows, batch), 0)
    bb2 = jax.lax.broadcasted_iota(jnp.int32, (rows, batch), 1)
    sel_t = ((rb2 >> PS_LOG2) == bb2).astype(bf16)            # (rows, B) replicate

    # ---- embedding lookup, chunk by chunk, straight into nn.Flatten layout ---
    v_iota = jax.lax.broadcasted_iota(jnp.int32, (VOCAB_PAD, rows), 0)
    embt = embt_ref[...]                                      # (Vpad, CW) bf16
    z_chunks = []
    for ci in range(NK):
        tok = tok_ref[pl.ds(ci, 1), :]                        # (1, rows) int32
        onehot_t = (v_iota == tok).astype(bf16)               # (Vpad, rows) 0/1
        e_wide = jax.lax.dot_general(                         # exact row select
            onehot_t, embt, dimension_numbers=(((0,), (0,)), ((), ())),
            preferred_element_type=f32)                       # (rows, CW)
        e_sel = jnp.where(own, e_wide, 0.0).astype(bf16)      # keep own E slice
        z_chunks.append(
            jnp.dot(sel, e_sel, preferred_element_type=f32).astype(bf16))
    z = jnp.concatenate(z_chunks, axis=1)                     # (B, S*E) bf16

    # ---- encoder (wait for the streamed w1 just-in-time) ---------------------
    w1_cp.wait()
    h = _lrelu(jnp.dot(z, w1_buf[...], preferred_element_type=f32) + b1_ref[...])
    h = _lrelu(jnp.dot(h.astype(bf16), w2_ref[...],
                       preferred_element_type=f32) + b2_ref[...])
    h = _lrelu(jnp.dot(h.astype(bf16), w3_ref[...],
                       preferred_element_type=f32) + b3_ref[...])
    h3 = h.astype(bf16)                                       # (B, 512)

    # ---- decoder layer 4 + unflatten + vocab projection, in column halves ----
    # (second half of w4's DMA hides behind the first half's compute)
    b4 = b4_ref[...]
    wot = wot_ref[...]
    bo = bo_ref[...]
    for half in range(2):
        w4_cps[half].wait()
        h4 = _lrelu(jnp.dot(h3, w4_buf[half], preferred_element_type=f32)
                    + b4[:, half * HALF:(half + 1) * HALF])   # (B, HALF)
        for cj in range(NK // 2):
            ci = half * (NK // 2) + cj
            h4c = h4[:, cj * CW:(cj + 1) * CW].astype(bf16)   # (B, CW)
            # replicate each batch row PS times (tiny selection matmul), then
            # keep each row's own E slice -> exact .view(-1, S, E)
            d_rep = jnp.dot(sel_t, h4c, preferred_element_type=f32)
            d = jnp.where(own, d_rep, 0.0).astype(bf16)       # (rows, CW)
            logits = jnp.dot(d, wot, preferred_element_type=f32) + bo
            for bi in range(batch):                           # (rows, Vpad)
                out_ref[pl.ds(bi * SEQ_LENGTH + ci * PS, PS), :] = \
                    logits[bi * PS:(bi + 1) * PS, :]


# ----------------------------------------------------------------------------
# Pallas wrapper
# ----------------------------------------------------------------------------
def _full_spec(shape):
    return pl.BlockSpec(shape, lambda: (0,) * len(shape))


def text_autoencoder_forward(tokens, kp):
    """tokens: (B, S) int32 -> logits: (B, S, VOCAB_SIZE) f32."""
    b, s = tokens.shape
    assert s == SEQ_LENGTH
    # chunk-major token layout: tok_chunks[ci, bi*PS + j] = tokens[bi, ci*PS + j]
    tok_chunks = (tokens.astype(jnp.int32)
                  .reshape(b, NK, PS).transpose(1, 0, 2).reshape(NK, b * PS))

    vmem_ops = (tok_chunks, kp["embt"], kp["b1"], kp["w2"], kp["b2"], kp["w3"],
                kp["b3"], kp["b4"], kp["wot"], kp["bo"])
    hbm_ops = (kp["w1"], kp["w4"])
    in_specs = ([_full_spec(a.shape) for a in vmem_ops]
                + [pl.BlockSpec(memory_space=pl.ANY)] * len(hbm_ops))

    logits_pad = pl.pallas_call(
        partial(fused_forward_kernel, batch=b),
        out_shape=jax.ShapeDtypeStruct((b * s, VOCAB_PAD), jnp.float32),
        in_specs=in_specs,
        out_specs=_full_spec((b * s, VOCAB_PAD)),
        scratch_shapes=[
            pltpu.VMEM((FLAT_DIM, ENC_DIM), jnp.bfloat16),    # w1 staging (2 MiB)
            pltpu.VMEM((2, ENC_DIM, HALF), jnp.bfloat16),     # w4 staging (2 MiB)
            pltpu.SemaphoreType.DMA((3,)),
        ],
        compiler_params=pltpu.CompilerParams(
            vmem_limit_bytes=16 * 1024 * 1024),
    )(*vmem_ops, *hbm_ops)
    return logits_pad[:, :VOCAB_SIZE].reshape(b, s, VOCAB_SIZE)


# ----------------------------------------------------------------------------
# Parameters: raw (PyTorch-shaped, f32) and packed (padded / PS-tiled / bf16)
# ----------------------------------------------------------------------------
def init_params(key):
    ks = jax.random.split(key, 11)

    def lin(kw, kb, fan_in, fan_out):
        # nn.Linear default init, stored pre-transposed as (in, out).
        lim = 1.0 / jnp.sqrt(fan_in)
        w = jax.random.uniform(kw, (fan_in, fan_out), jnp.float32, -lim, lim)
        b = jax.random.uniform(kb, (1, fan_out), jnp.float32, -lim, lim)
        return w, b

    emb = jax.random.normal(ks[0], (VOCAB_SIZE, EMBED_DIM), jnp.float32)
    w1, b1 = lin(ks[1], ks[2], FLAT_DIM, ENC_DIM)
    w2, b2 = lin(ks[3], ks[4], ENC_DIM, HIDDEN_DIM)
    w3, b3 = lin(ks[5], ks[6], HIDDEN_DIM, ENC_DIM)
    w4, b4 = lin(ks[7], ks[8], ENC_DIM, FLAT_DIM)
    wo, bo = lin(ks[9], ks[10], EMBED_DIM, VOCAB_SIZE)
    return dict(emb=emb, w1=w1, b1=b1, w2=w2, b2=b2,
                w3=w3, b3=b3, w4=w4, b4=b4, wo=wo, bo=bo)


def pack_params(p):
    """One-time repack: zero-pad vocab/hidden to 128 lanes, PS-tile the
    embedding / output tables (128 KiB each), split w4 into column halves for
    the streamed DMA, store all matmul weights in bf16 (padding is exact)."""
    bf16, f32 = jnp.bfloat16, jnp.float32
    emb_pad = jnp.zeros((VOCAB_PAD, EMBED_DIM), f32).at[:VOCAB_SIZE].set(p["emb"])
    embt = jnp.tile(emb_pad, (1, PS)).astype(bf16)                  # (Vpad, CW)
    w2 = jnp.zeros((ENC_DIM, HIDDEN_PAD), f32).at[:, :HIDDEN_DIM].set(p["w2"])
    b2 = jnp.zeros((1, HIDDEN_PAD), f32).at[:, :HIDDEN_DIM].set(p["b2"])
    w3 = jnp.zeros((HIDDEN_PAD, ENC_DIM), f32).at[:HIDDEN_DIM].set(p["w3"])
    wo_pad = jnp.zeros((EMBED_DIM, VOCAB_PAD), f32).at[:, :VOCAB_SIZE].set(p["wo"])
    wot = jnp.tile(wo_pad, (PS, 1)).astype(bf16)                    # (CW, Vpad)
    bo = jnp.zeros((1, VOCAB_PAD), f32).at[:, :VOCAB_SIZE].set(p["bo"])
    # (2, 512, HALF): column halves of w4, each a contiguous DMA.
    w4 = p["w4"].astype(bf16).reshape(ENC_DIM, 2, HALF).transpose(1, 0, 2)
    return dict(embt=embt,
                w1=p["w1"].astype(bf16), b1=p["b1"],
                w2=w2.astype(bf16), b2=b2,
                w3=w3.astype(bf16), b3=p["b3"],
                w4=w4, b4=p["b4"],
                wot=wot, bo=bo)


# ----------------------------------------------------------------------------
# Pure-JAX reference with matching bf16-operand / f32-accumulate semantics
# ----------------------------------------------------------------------------
def reference_forward(tokens, p):
    b, s = tokens.shape
    bf16, f32 = jnp.bfloat16, jnp.float32
    lrelu = lambda x: jnp.where(x > 0, x, NEG_SLOPE * x)
    mm = lambda x, w: jnp.dot(x.astype(bf16), w.astype(bf16),
                              preferred_element_type=f32)
    e = p["emb"].astype(bf16).astype(f32)[tokens]            # (B, S, E)
    z = e.reshape(b, s * EMBED_DIM)                          # nn.Flatten
    h = lrelu(mm(z, p["w1"]) + p["b1"])
    h = lrelu(mm(h, p["w2"]) + p["b2"])
    h = lrelu(mm(h, p["w3"]) + p["b3"])
    h = lrelu(mm(h, p["w4"]) + p["b4"])
    d = h.reshape(b, s, EMBED_DIM).astype(bf16)              # .view(-1, S, E)
    return jnp.einsum("bse,ev->bsv", d, p["wo"].astype(bf16),
                      preferred_element_type=f32) + p["bo"]


if __name__ == "__main__":
    key = jax.random.PRNGKey(0)
    k_tok, k_par = jax.random.split(key)

    B = 2
    tokens = jax.random.randint(k_tok, (B, SEQ_LENGTH), 0, VOCAB_SIZE, jnp.int32)
    params = init_params(k_par)
    kparams = pack_params(params)

    logits = text_autoencoder_forward(tokens, kparams)
    logits = jax.block_until_ready(logits)

    ref = reference_forward(tokens, params)
    assert logits.shape == (B, SEQ_LENGTH, VOCAB_SIZE), logits.shape
    assert jnp.allclose(logits, ref, atol=5e-3, rtol=5e-3), \
        float(jnp.max(jnp.abs(logits - ref)))

    print("KERNEL_OK")
</pallas_src>

<mosaic_0001>
module attributes {stable_mosaic.version = 11 : i64} {
  func.func @fused_forward_kernel(%arg0: memref<4x32xi32, #tpu.memory_space<vmem>>, %arg1: memref<128x512xbf16, #tpu.memory_space<vmem>>, %arg2: memref<1x512xf32, #tpu.memory_space<vmem>>, %arg3: memref<512x128xbf16, #tpu.memory_space<vmem>>, %arg4: memref<1x128xf32, #tpu.memory_space<vmem>>, %arg5: memref<128x512xbf16, #tpu.memory_space<vmem>>, %arg6: memref<1x512xf32, #tpu.memory_space<vmem>>, %arg7: memref<1x2048xf32, #tpu.memory_space<vmem>>, %arg8: memref<512x128xbf16, #tpu.memory_space<vmem>>, %arg9: memref<1x128xf32, #tpu.memory_space<vmem>>, %arg10: memref<2048x512xbf16, #tpu.memory_space<any>>, %arg11: memref<2x512x1024xbf16, #tpu.memory_space<any>>, %arg12: memref<128x128xf32, #tpu.memory_space<vmem>>, %arg13: memref<2048x512xbf16, #tpu.memory_space<vmem>>, %arg14: memref<2x512x1024xbf16, #tpu.memory_space<vmem>>, %arg15: memref<3x!tpu.dma_semaphore, #tpu.memory_space<semaphore_mem>>) attributes {dimension_semantics = [], scalar_prefetch = 0 : i64, scratch_operands = 3 : i64, tpu.core_type = #tpu.core_type<tc>} {
    %c0_i32 = arith.constant 0 : i32
    %0 = tpu.memref_slice %arg15[%c0_i32] : memref<3x!tpu.dma_semaphore, #tpu.memory_space<semaphore_mem>> -> memref<1x!tpu.dma_semaphore, #tpu.memory_space<semaphore_mem>>
    %1 = tpu.memref_squeeze %0 : memref<1x!tpu.dma_semaphore, #tpu.memory_space<semaphore_mem>> -> memref<!tpu.dma_semaphore, #tpu.memory_space<semaphore_mem>>
    tpu.enqueue_dma source(%arg10 : memref<2048x512xbf16, #tpu.memory_space<any>>) target(%arg13 : memref<2048x512xbf16, #tpu.memory_space<vmem>>) target_semaphore(%1 : memref<!tpu.dma_semaphore, #tpu.memory_space<semaphore_mem>>)
    %c0_i32_0 = arith.constant 0 : i32
    %c0_i32_1 = arith.constant 0 : i32
    %c1_i32 = arith.constant 1 : i32
    %c0_i32_2 = arith.constant 0 : i32
    %c0_i32_3 = arith.constant 0 : i32
    %2 = tpu.memref_slice %arg11[%c0_i32_0, %c0_i32_2, %c0_i32_3] : memref<2x512x1024xbf16, #tpu.memory_space<any>> -> memref<1x512x1024xbf16, #tpu.memory_space<any>>
    %3 = tpu.memref_squeeze %2 : memref<1x512x1024xbf16, #tpu.memory_space<any>> -> memref<512x1024xbf16, #tpu.memory_space<any>>
    %c0_i32_4 = arith.constant 0 : i32
    %c0_i32_5 = arith.constant 0 : i32
    %4 = tpu.memref_slice %arg14[%c0_i32_1, %c0_i32_4, %c0_i32_5] : memref<2x512x1024xbf16, #tpu.memory_space<vmem>> -> memref<1x512x1024xbf16, #tpu.memory_space<vmem>>
    %5 = tpu.memref_squeeze %4 : memref<1x512x1024xbf16, #tpu.memory_space<vmem>> -> memref<512x1024xbf16, #tpu.memory_space<vmem>>
    %6 = tpu.memref_slice %arg15[%c1_i32] : memref<3x!tpu.dma_semaphore, #tpu.memory_space<semaphore_mem>> -> memref<1x!tpu.dma_semaphore, #tpu.memory_space<semaphore_mem>>
    %7 = tpu.memref_squeeze %6 : memref<1x!tpu.dma_semaphore, #tpu.memory_space<semaphore_mem>> -> memref<!tpu.dma_semaphore, #tpu.memory_space<semaphore_mem>>
    tpu.enqueue_dma source(%3 : memref<512x1024xbf16, #tpu.memory_space<any>>) target(%5 : memref<512x1024xbf16, #tpu.memory_space<vmem>>) target_semaphore(%7 : memref<!tpu.dma_semaphore, #tpu.memory_space<semaphore_mem>>)
    %c1_i32_6 = arith.constant 1 : i32
    %c1_i32_7 = arith.constant 1 : i32
    %c2_i32 = arith.constant 2 : i32
    %c0_i32_8 = arith.constant 0 : i32
    %c0_i32_9 = arith.constant 0 : i32
    %8 = tpu.memref_slice %arg11[%c1_i32_6, %c0_i32_8, %c0_i32_9] : memref<2x512x1024xbf16, #tpu.memory_space<any>> -> memref<1x512x1024xbf16, #tpu.memory_space<any>>
    %9 = tpu.memref_squeeze %8 : memref<1x512x1024xbf16, #tpu.memory_space<any>> -> memref<512x1024xbf16, #tpu.memory_space<any>>
    %c0_i32_10 = arith.constant 0 : i32
    %c0_i32_11 = arith.constant 0 : i32
    %10 = tpu.memref_slice %arg14[%c1_i32_7, %c0_i32_10, %c0_i32_11] : memref<2x512x1024xbf16, #tpu.memory_space<vmem>> -> memref<1x512x1024xbf16, #tpu.memory_space<vmem>>
    %11 = tpu.memref_squeeze %10 : memref<1x512x1024xbf16, #tpu.memory_space<vmem>> -> memref<512x1024xbf16, #tpu.memory_space<vmem>>
    %12 = tpu.memref_slice %arg15[%c2_i32] : memref<3x!tpu.dma_semaphore, #tpu.memory_space<semaphore_mem>> -> memref<1x!tpu.dma_semaphore, #tpu.memory_space<semaphore_mem>>
    %13 = tpu.memref_squeeze %12 : memref<1x!tpu.dma_semaphore, #tpu.memory_space<semaphore_mem>> -> memref<!tpu.dma_semaphore, #tpu.memory_space<semaphore_mem>>
    tpu.enqueue_dma source(%9 : memref<512x1024xbf16, #tpu.memory_space<any>>) target(%11 : memref<512x1024xbf16, #tpu.memory_space<vmem>>) target_semaphore(%13 : memref<!tpu.dma_semaphore, #tpu.memory_space<semaphore_mem>>)
    %14 = tpu.iota {dimensions = array<i32: 0>} : vector<32x512xi32>
    %15 = tpu.iota {dimensions = array<i32: 1>} : vector<32x512xi32>
    %c15_i32 = arith.constant 15 : i32
    %16 = vector.broadcast %c15_i32 : i32 to vector<32x512xi32>
    %17 = arith.andi %14, %16 : vector<32x512xi32>
    %c5_i32 = arith.constant 5 : i32
    %18 = vector.broadcast %c5_i32 : i32 to vector<32x512xi32>
    %19 = arith.shrsi %15, %18 : vector<32x512xi32>
    %20 = arith.cmpi eq, %17, %19 : vector<32x512xi32>
    %21 = tpu.iota {dimensions = array<i32: 1>} : vector<2x32xi32>
    %22 = tpu.iota {dimensions = array<i32: 0>} : vector<2x32xi32>
    %c4_i32 = arith.constant 4 : i32
    %23 = vector.broadcast %c4_i32 : i32 to vector<2x32xi32>
    %24 = arith.shrsi %21, %23 : vector<2x32xi32>
    %25 = arith.cmpi eq, %24, %22 : vector<2x32xi32>
    %26 = arith.extui %25 : vector<2x32xi1> to vector<2x32xi32>
    %27 = arith.sitofp %26 : vector<2x32xi32> to vector<2x32xf32>
    %28 = arith.truncf %27 : vector<2x32xf32> to vector<2x32xbf16>
    %29 = tpu.iota {dimensions = array<i32: 0>} : vector<32x2xi32>
    %30 = tpu.iota {dimensions = array<i32: 1>} : vector<32x2xi32>
    %c4_i32_12 = arith.constant 4 : i32
    %31 = vector.broadcast %c4_i32_12 : i32 to vector<32x2xi32>
    %32 = arith.shrsi %29, %31 : vector<32x2xi32>
    %33 = arith.cmpi eq, %32, %30 : vector<32x2xi32>
    %34 = arith.extui %33 : vector<32x2xi1> to vector<32x2xi32>
    %35 = arith.sitofp %34 : vector<32x2xi32> to vector<32x2xf32>
    %36 = arith.truncf %35 : vector<32x2xf32> to vector<32x2xbf16>
    %37 = tpu.iota {dimensions = array<i32: 0>} : vector<128x32xi32>
    %c0 = arith.constant 0 : index
    %c0_13 = arith.constant 0 : index
    %38 = vector.load %arg1[%c0, %c0_13] : memref<128x512xbf16, #tpu.memory_space<vmem>>, vector<128x512xbf16>
    %c0_14 = arith.constant 0 : index
    %c0_15 = arith.constant 0 : index
    %39 = vector.load %arg0[%c0_14, %c0_15] : memref<4x32xi32, #tpu.memory_space<vmem>>, vector<1x32xi32>
    %40 = vector.broadcast %39 : vector<1x32xi32> to vector<128x32xi32>
    %41 = arith.cmpi eq, %37, %40 : vector<128x32xi32>
    %42 = arith.extui %41 : vector<128x32xi1> to vector<128x32xi32>
    %43 = arith.sitofp %42 : vector<128x32xi32> to vector<128x32xf32>
    %44 = arith.truncf %43 : vector<128x32xf32> to vector<128x32xbf16>
    %cst = arith.constant dense<0.000000e+00> : vector<32x512xf32>
    %45 = tpu.matmul %44, %38, %cst {dimension_numbers = #tpu.dot_dimension_numbers<[0], [0], [1], [1], [0, 1, 1, 1], [], []>} : vector<128x32xbf16>, vector<128x512xbf16>, vector<32x512xf32> -> vector<32x512xf32>
    %cst_16 = arith.constant 0.000000e+00 : f32
    %46 = vector.broadcast %cst_16 : f32 to vector<32x512xf32>
    %47 = arith.select %20, %45, %46 : vector<32x512xi1>, vector<32x512xf32>
    %48 = arith.truncf %47 : vector<32x512xf32> to vector<32x512xbf16>
    %cst_17 = arith.constant dense<0.000000e+00> : vector<2x512xf32>
    %49 = tpu.matmul %28, %48, %cst_17 {dimension_numbers = #tpu.dot_dimension_numbers<[1], [0], [0], [1], [0, 0, 1, 1], [], []>} : vector<2x32xbf16>, vector<32x512xbf16>, vector<2x512xf32> -> vector<2x512xf32>
    %50 = arith.truncf %49 : vector<2x512xf32> to vector<2x512xbf16>
    %c1 = arith.constant 1 : index
    %c0_18 = arith.constant 0 : index
    %51 = vector.load %arg0[%c1, %c0_18] : memref<4x32xi32, #tpu.memory_space<vmem>>, vector<1x32xi32>
    %52 = vector.broadcast %51 : vector<1x32xi32> to vector<128x32xi32>
    %53 = arith.cmpi eq, %37, %52 : vector<128x32xi32>
    %54 = arith.extui %53 : vector<128x32xi1> to vector<128x32xi32>
    %55 = arith.sitofp %54 : vector<128x32xi32> to vector<128x32xf32>
    %56 = arith.truncf %55 : vector<128x32xf32> to vector<128x32xbf16>
    %cst_19 = arith.constant dense<0.000000e+00> : vector<32x512xf32>
    %57 = tpu.matmul %56, %38, %cst_19 {dimension_numbers = #tpu.dot_dimension_numbers<[0], [0], [1], [1], [0, 1, 1, 1], [], []>} : vector<128x32xbf16>, vector<128x512xbf16>, vector<32x512xf32> -> vector<32x512xf32>
    %cst_20 = arith.constant 0.000000e+00 : f32
    %58 = vector.broadcast %cst_20 : f32 to vector<32x512xf32>
    %59 = arith.select %20, %57, %58 : vector<32x512xi1>, vector<32x512xf32>
    %60 = arith.truncf %59 : vector<32x512xf32> to vector<32x512xbf16>
    %cst_21 = arith.constant dense<0.000000e+00> : vector<2x512xf32>
    %61 = tpu.matmul %28, %60, %cst_21 {dimension_numbers = #tpu.dot_dimension_numbers<[1], [0], [0], [1], [0, 0, 1, 1], [], []>} : vector<2x32xbf16>, vector<32x512xbf16>, vector<2x512xf32> -> vector<2x512xf32>
    %62 = arith.truncf %61 : vector<2x512xf32> to vector<2x512xbf16>
    %c2 = arith.constant 2 : index
    %c0_22 = arith.constant 0 : index
    %63 = vector.load %arg0[%c2, %c0_22] : memref<4x32xi32, #tpu.memory_space<vmem>>, vector<1x32xi32>
    %64 = vector.broadcast %63 : vector<1x32xi32> to vector<128x32xi32>
    %65 = arith.cmpi eq, %37, %64 : vector<128x32xi32>
    %66 = arith.extui %65 : vector<128x32xi1> to vector<128x32xi32>
    %67 = arith.sitofp %66 : vector<128x32xi32> to vector<128x32xf32>
    %68 = arith.truncf %67 : vector<128x32xf32> to vector<128x32xbf16>
    %cst_23 = arith.constant dense<0.000000e+00> : vector<32x512xf32>
    %69 = tpu.matmul %68, %38, %cst_23 {dimension_numbers = #tpu.dot_dimension_numbers<[0], [0], [1], [1], [0, 1, 1, 1], [], []>} : vector<128x32xbf16>, vector<128x512xbf16>, vector<32x512xf32> -> vector<32x512xf32>
    %cst_24 = arith.constant 0.000000e+00 : f32
    %70 = vector.broadcast %cst_24 : f32 to vector<32x512xf32>
    %71 = arith.select %20, %69, %70 : vector<32x512xi1>, vector<32x512xf32>
    %72 = arith.truncf %71 : vector<32x512xf32> to vector<32x512xbf16>
    %cst_25 = arith.constant dense<0.000000e+00> : vector<2x512xf32>
    %73 = tpu.matmul %28, %72, %cst_25 {dimension_numbers = #tpu.dot_dimension_numbers<[1], [0], [0], [1], [0, 0, 1, 1], [], []>} : vector<2x32xbf16>, vector<32x512xbf16>, vector<2x512xf32> -> vector<2x512xf32>
    %74 = arith.truncf %73 : vector<2x512xf32> to vector<2x512xbf16>
    %c3 = arith.constant 3 : index
    %c0_26 = arith.constant 0 : index
    %75 = vector.load %arg0[%c3, %c0_26] : memref<4x32xi32, #tpu.memory_space<vmem>>, vector<1x32xi32>
    %76 = vector.broadcast %75 : vector<1x32xi32> to vector<128x32xi32>
    %77 = arith.cmpi eq, %37, %76 : vector<128x32xi32>
    %78 = arith.extui %77 : vector<128x32xi1> to vector<128x32xi32>
    %79 = arith.sitofp %78 : vector<128x32xi32> to vector<128x32xf32>
    %80 = arith.truncf %79 : vector<128x32xf32> to vector<128x32xbf16>
    %cst_27 = arith.constant dense<0.000000e+00> : vector<32x512xf32>
    %81 = tpu.matmul %80, %38, %cst_27 {dimension_numbers = #tpu.dot_dimension_numbers<[0], [0], [1], [1], [0, 1, 1, 1], [], []>} : vector<128x32xbf16>, vector<128x512xbf16>, vector<32x512xf32> -> vector<32x512xf32>
    %cst_28 = arith.constant 0.000000e+00 : f32
    %82 = vector.broadcast %cst_28 : f32 to vector<32x512xf32>
    %83 = arith.select %20, %81, %82 : vector<32x512xi1>, vector<32x512xf32>
    %84 = arith.truncf %83 : vector<32x512xf32> to vector<32x512xbf16>
    %cst_29 = arith.constant dense<0.000000e+00> : vector<2x512xf32>
    %85 = tpu.matmul %28, %84, %cst_29 {dimension_numbers = #tpu.dot_dimension_numbers<[1], [0], [0], [1], [0, 0, 1, 1], [], []>} : vector<2x32xbf16>, vector<32x512xbf16>, vector<2x512xf32> -> vector<2x512xf32>
    %86 = arith.truncf %85 : vector<2x512xf32> to vector<2x512xbf16>
    %87 = tpu.concatenate %50, %62, %74, %86 in 1 : vector<2x512xbf16>, vector<2x512xbf16>, vector<2x512xbf16>, vector<2x512xbf16> -> vector<2x2048xbf16>
    %c0_i32_30 = arith.constant 0 : i32
    %88 = tpu.memref_slice %arg15[%c0_i32_30] : memref<3x!tpu.dma_semaphore, #tpu.memory_space<semaphore_mem>> -> memref<1x!tpu.dma_semaphore, #tpu.memory_space<semaphore_mem>>
    %89 = tpu.memref_squeeze %88 : memref<1x!tpu.dma_semaphore, #tpu.memory_space<semaphore_mem>> -> memref<!tpu.dma_semaphore, #tpu.memory_space<semaphore_mem>>
    tpu.wait_dma2 semaphore(%89 : memref<!tpu.dma_semaphore, #tpu.memory_space<semaphore_mem>>) src(%arg10 : memref<2048x512xbf16, #tpu.memory_space<any>>) dst(%arg13 : memref<2048x512xbf16, #tpu.memory_space<vmem>>)
    %c0_31 = arith.constant 0 : index
    %c0_32 = arith.constant 0 : index
    %90 = vector.load %arg13[%c0_31, %c0_32] : memref<2048x512xbf16, #tpu.memory_space<vmem>>, vector<2048x512xbf16>
    %cst_33 = arith.constant dense<0.000000e+00> : vector<2x512xf32>
    %91 = tpu.matmul %87, %90, %cst_33 {dimension_numbers = #tpu.dot_dimension_numbers<[1], [0], [0], [1], [0, 0, 1, 1], [], []>} : vector<2x2048xbf16>, vector<2048x512xbf16>, vector<2x512xf32> -> vector<2x512xf32>
    %c0_34 = arith.constant 0 : index
    %c0_35 = arith.constant 0 : index
    %92 = vector.load %arg2[%c0_34, %c0_35] : memref<1x512xf32, #tpu.memory_space<vmem>>, vector<1x512xf32>
    %93 = vector.broadcast %92 : vector<1x512xf32> to vector<2x512xf32>
    %94 = arith.addf %91, %93 : vector<2x512xf32>
    %cst_36 = arith.constant 0.000000e+00 : f32
    %95 = vector.broadcast %cst_36 : f32 to vector<2x512xf32>
    %96 = arith.cmpf ogt, %94, %95 : vector<2x512xf32>
    %cst_37 = arith.constant 2.000000e-01 : f32
    %97 = vector.broadcast %cst_37 : f32 to vector<2x512xf32>
    %98 = arith.mulf %97, %94 : vector<2x512xf32>
    %99 = arith.select %96, %94, %98 : vector<2x512xi1>, vector<2x512xf32>
    %100 = arith.truncf %99 : vector<2x512xf32> to vector<2x512xbf16>
    %c0_38 = arith.constant 0 : index
    %c0_39 = arith.constant 0 : index
    %101 = vector.load %arg3[%c0_38, %c0_39] : memref<512x128xbf16, #tpu.memory_space<vmem>>, vector<512x128xbf16>
    %cst_40 = arith.constant dense<0.000000e+00> : vector<2x128xf32>
    %102 = tpu.matmul %100, %101, %cst_40 {dimension_numbers = #tpu.dot_dimension_numbers<[1], [0], [0], [1], [0, 0, 1, 1], [], []>} : vector<2x512xbf16>, vector<512x128xbf16>, vector<2x128xf32> -> vector<2x128xf32>
    %c0_41 = arith.constant 0 : index
    %c0_42 = arith.constant 0 : index
    %103 = vector.load %arg4[%c0_41, %c0_42] : memref<1x128xf32, #tpu.memory_space<vmem>>, vector<1x128xf32>
    %104 = vector.broadcast %103 : vector<1x128xf32> to vector<2x128xf32>
    %105 = arith.addf %102, %104 : vector<2x128xf32>
    %cst_43 = arith.constant 0.000000e+00 : f32
    %106 = vector.broadcast %cst_43 : f32 to vector<2x128xf32>
    %107 = arith.cmpf ogt, %105, %106 : vector<2x128xf32>
    %cst_44 = arith.constant 2.000000e-01 : f32
    %108 = vector.broadcast %cst_44 : f32 to vector<2x128xf32>
    %109 = arith.mulf %108, %105 : vector<2x128xf32>
    %110 = arith.select %107, %105, %109 : vector<2x128xi1>, vector<2x128xf32>
    %111 = arith.truncf %110 : vector<2x128xf32> to vector<2x128xbf16>
    %c0_45 = arith.constant 0 : index
    %c0_46 = arith.constant 0 : index
    %112 = vector.load %arg5[%c0_45, %c0_46] : memref<128x512xbf16, #tpu.memory_space<vmem>>, vector<128x512xbf16>
    %cst_47 = arith.constant dense<0.000000e+00> : vector<2x512xf32>
    %113 = tpu.matmul %111, %112, %cst_47 {dimension_numbers = #tpu.dot_dimension_numbers<[1], [0], [0], [1], [0, 0, 1, 1], [], []>} : vector<2x128xbf16>, vector<128x512xbf16>, vector<2x512xf32> -> vector<2x512xf32>
    %c0_48 = arith.constant 0 : index
    %c0_49 = arith.constant 0 : index
    %114 = vector.load %arg6[%c0_48, %c0_49] : memref<1x512xf32, #tpu.memory_space<vmem>>, vector<1x512xf32>
    %115 = vector.broadcast %114 : vector<1x512xf32> to vector<2x512xf32>
    %116 = arith.addf %113, %115 : vector<2x512xf32>
    %cst_50 = arith.constant 0.000000e+00 : f32
    %117 = vector.broadcast %cst_50 : f32 to vector<2x512xf32>
    %118 = arith.cmpf ogt, %116, %117 : vector<2x512xf32>
    %cst_51 = arith.constant 2.000000e-01 : f32
    %119 = vector.broadcast %cst_51 : f32 to vector<2x512xf32>
    %120 = arith.mulf %119, %116 : vector<2x512xf32>
    %121 = arith.select %118, %116, %120 : vector<2x512xi1>, vector<2x512xf32>
    %122 = arith.truncf %121 : vector<2x512xf32> to vector<2x512xbf16>
    %c0_52 = arith.constant 0 : index
    %c0_53 = arith.constant 0 : index
    %123 = vector.load %arg7[%c0_52, %c0_53] : memref<1x2048xf32, #tpu.memory_space<vmem>>, vector<1x2048xf32>
    %c0_54 = arith.constant 0 : index
    %c0_55 = arith.constant 0 : index
    %124 = vector.load %arg8[%c0_54, %c0_55] : memref<512x128xbf16, #tpu.memory_space<vmem>>, vector<512x128xbf16>
    %c0_56 = arith.constant 0 : index
    %c0_57 = arith.constant 0 : index
    %125 = vector.load %arg9[%c0_56, %c0_57] : memref<1x128xf32, #tpu.memory_space<vmem>>, vector<1x128xf32>
    %c0_i32_58 = arith.constant 0 : i32
    %c0_i32_59 = arith.constant 0 : i32
    %c1_i32_60 = arith.constant 1 : i32
    %c0_i32_61 = arith.constant 0 : i32
    %c0_i32_62 = arith.constant 0 : i32
    %126 = tpu.memref_slice %arg11[%c0_i32_58, %c0_i32_61, %c0_i32_62] : memref<2x512x1024xbf16, #tpu.memory_space<any>> -> memref<1x512x1024xbf16, #tpu.memory_space<any>>
    %127 = tpu.memref_squeeze %126 : memref<1x512x1024xbf16, #tpu.memory_space<any>> -> memref<512x1024xbf16, #tpu.memory_space<any>>
    %c0_i32_63 = arith.constant 0 : i32
    %c0_i32_64 = arith.constant 0 : i32
    %128 = tpu.memref_slice %arg14[%c0_i32_59, %c0_i32_63, %c0_i32_64] : memref<2x512x1024xbf16, #tpu.memory_space<vmem>> -> memref<1x512x1024xbf16, #tpu.memory_space<vmem>>
    %129 = tpu.memref_squeeze %128 : memref<1x512x1024xbf16, #tpu.memory_space<vmem>> -> memref<512x1024xbf16, #tpu.memory_space<vmem>>
    %130 = tpu.memref_slice %arg15[%c1_i32_60] : memref<3x!tpu.dma_semaphore, #tpu.memory_space<semaphore_mem>> -> memref<1x!tpu.dma_semaphore, #tpu.memory_space<semaphore_mem>>
    %131 = tpu.memref_squeeze %130 : memref<1x!tpu.dma_semaphore, #tpu.memory_space<semaphore_mem>> -> memref<!tpu.dma_semaphore, #tpu.memory_space<semaphore_mem>>
    tpu.wait_dma2 semaphore(%131 : memref<!tpu.dma_semaphore, #tpu.memory_space<semaphore_mem>>) src(%127 : memref<512x1024xbf16, #tpu.memory_space<any>>) dst(%129 : memref<512x1024xbf16, #tpu.memory_space<vmem>>)
    %c0_65 = arith.constant 0 : index
    %c0_66 = arith.constant 0 : index
    %c0_67 = arith.constant 0 : index
    %132 = vector.load %arg14[%c0_65, %c0_66, %c0_67] : memref<2x512x1024xbf16, #tpu.memory_space<vmem>>, vector<1x512x1024xbf16>
    %133 = vector.shape_cast %132 : vector<1x512x1024xbf16> to vector<512x1024xbf16>
    %cst_68 = arith.constant dense<0.000000e+00> : vector<2x1024xf32>
    %134 = tpu.matmul %122, %133, %cst_68 {dimension_numbers = #tpu.dot_dimension_numbers<[1], [0], [0], [1], [0, 0, 1, 1], [], []>} : vector<2x512xbf16>, vector<512x1024xbf16>, vector<2x1024xf32> -> vector<2x1024xf32>
    %135 = vector.extract_strided_slice %123 {offsets = [0, 0], sizes = [1, 1024], strides = [1, 1]} : vector<1x2048xf32> to vector<1x1024xf32>
    %136 = vector.broadcast %135 : vector<1x1024xf32> to vector<2x1024xf32>
    %137 = arith.addf %134, %136 : vector<2x1024xf32>
    %cst_69 = arith.constant 0.000000e+00 : f32
    %138 = vector.broadcast %cst_69 : f32 to vector<2x1024xf32>
    %139 = arith.cmpf ogt, %137, %138 : vector<2x1024xf32>
    %cst_70 = arith.constant 2.000000e-01 : f32
    %140 = vector.broadcast %cst_70 : f32 to vector<2x1024xf32>
    %141 = arith.mulf %140, %137 : vector<2x1024xf32>
    %142 = arith.select %139, %137, %141 : vector<2x1024xi1>, vector<2x1024xf32>
    %143 = vector.extract_strided_slice %142 {offsets = [0, 0], sizes = [2, 512], strides = [1, 1]} : vector<2x1024xf32> to vector<2x512xf32>
    %144 = arith.truncf %143 : vector<2x512xf32> to vector<2x512xbf16>
    %cst_71 = arith.constant dense<0.000000e+00> : vector<32x512xf32>
    %145 = tpu.matmul %36, %144, %cst_71 {dimension_numbers = #tpu.dot_dimension_numbers<[1], [0], [0], [1], [0, 0, 1, 1], [], []>} : vector<32x2xbf16>, vector<2x512xbf16>, vector<32x512xf32> -> vector<32x512xf32>
    %cst_72 = arith.constant 0.000000e+00 : f32
    %146 = vector.broadcast %cst_72 : f32 to vector<32x512xf32>
    %147 = arith.select %20, %145, %146 : vector<32x512xi1>, vector<32x512xf32>
    %148 = arith.truncf %147 : vector<32x512xf32> to vector<32x512xbf16>
    %cst_73 = arith.constant dense<0.000000e+00> : vector<32x128xf32>
    %149 = tpu.matmul %148, %124, %cst_73 {dimension_numbers = #tpu.dot_dimension_numbers<[1], [0], [0], [1], [0, 0, 1, 1], [], []>} : vector<32x512xbf16>, vector<512x128xbf16>, vector<32x128xf32> -> vector<32x128xf32>
    %150 = vector.broadcast %125 : vector<1x128xf32> to vector<32x128xf32>
    %151 = arith.addf %149, %150 : vector<32x128xf32>
    %152 = vector.extract_strided_slice %151 {offsets = [0, 0], sizes = [16, 128], strides = [1, 1]} : vector<32x128xf32> to vector<16x128xf32>
    %c0_74 = arith.constant 0 : index
    %c0_75 = arith.constant 0 : index
    %153 = vector.load %arg12[%c0_74, %c0_75] : memref<128x128xf32, #tpu.memory_space<vmem>>, vector<16x128xf32>
    tpu.vector_store %arg12[%c0_74, %c0_75], %152 {strides = array<i32>} : memref<128x128xf32, #tpu.memory_space<vmem>>, vector<16x128xf32>,
    %154 = vector.extract_strided_slice %151 {offsets = [16, 0], sizes = [16, 128], strides = [1, 1]} : vector<32x128xf32> to vector<16x128xf32>
    %c64 = arith.constant 64 : index
    %c0_76 = arith.constant 0 : index
    %155 = vector.load %arg12[%c64, %c0_76] : memref<128x128xf32, #tpu.memory_space<vmem>>, vector<16x128xf32>
    tpu.vector_store %arg12[%c64, %c0_76], %154 {strides = array<i32>} : memref<128x128xf32, #tpu.memory_space<vmem>>, vector<16x128xf32>,
    %156 = vector.extract_strided_slice %142 {offsets = [0, 512], sizes = [2, 512], strides = [1, 1]} : vector<2x1024xf32> to vector<2x512xf32>
    %157 = arith.truncf %156 : vector<2x512xf32> to vector<2x512xbf16>
    %cst_77 = arith.constant dense<0.000000e+00> : vector<32x512xf32>
    %158 = tpu.matmul %36, %157, %cst_77 {dimension_numbers = #tpu.dot_dimension_numbers<[1], [0], [0], [1], [0, 0, 1, 1], [], []>} : vector<32x2xbf16>, vector<2x512xbf16>, vector<32x512xf32> -> vector<32x512xf32>
    %cst_78 = arith.constant 0.000000e+00 : f32
    %159 = vector.broadcast %cst_78 : f32 to vector<32x512xf32>
    %160 = arith.select %20, %158, %159 : vector<32x512xi1>, vector<32x512xf32>
    %161 = arith.truncf %160 : vector<32x512xf32> to vector<32x512xbf16>
    %cst_79 = arith.constant dense<0.000000e+00> : vector<32x128xf32>
    %162 = tpu.matmul %161, %124, %cst_79 {dimension_numbers = #tpu.dot_dimension_numbers<[1], [0], [0], [1], [0, 0, 1, 1], [], []>} : vector<32x512xbf16>, vector<512x128xbf16>, vector<32x128xf32> -> vector<32x128xf32>
    %163 = vector.broadcast %125 : vector<1x128xf32> to vector<32x128xf32>
    %164 = arith.addf %162, %163 : vector<32x128xf32>
    %165 = vector.extract_strided_slice %164 {offsets = [0, 0], sizes = [16, 128], strides = [1, 1]} : vector<32x128xf32> to vector<16x128xf32>
    %c16 = arith.constant 16 : index
    %c0_80 = arith.constant 0 : index
    %166 = vector.load %arg12[%c16, %c0_80] : memref<128x128xf32, #tpu.memory_space<vmem>>, vector<16x128xf32>
    tpu.vector_store %arg12[%c16, %c0_80], %165 {strides = array<i32>} : memref<128x128xf32, #tpu.memory_space<vmem>>, vector<16x128xf32>,
    %167 = vector.extract_strided_slice %164 {offsets = [16, 0], sizes = [16, 128], strides = [1, 1]} : vector<32x128xf32> to vector<16x128xf32>
    %c80 = arith.constant 80 : index
    %c0_81 = arith.constant 0 : index
    %168 = vector.load %arg12[%c80, %c0_81] : memref<128x128xf32, #tpu.memory_space<vmem>>, vector<16x128xf32>
    tpu.vector_store %arg12[%c80, %c0_81], %167 {strides = array<i32>} : memref<128x128xf32, #tpu.memory_space<vmem>>, vector<16x128xf32>,
    %c1_i32_82 = arith.constant 1 : i32
    %c1_i32_83 = arith.constant 1 : i32
    %c2_i32_84 = arith.constant 2 : i32
    %c0_i32_85 = arith.constant 0 : i32
    %c0_i32_86 = arith.constant 0 : i32
    %169 = tpu.memref_slice %arg11[%c1_i32_82, %c0_i32_85, %c0_i32_86] : memref<2x512x1024xbf16, #tpu.memory_space<any>> -> memref<1x512x1024xbf16, #tpu.memory_space<any>>
    %170 = tpu.memref_squeeze %169 : memref<1x512x1024xbf16, #tpu.memory_space<any>> -> memref<512x1024xbf16, #tpu.memory_space<any>>
    %c0_i32_87 = arith.constant 0 : i32
    %c0_i32_88 = arith.constant 0 : i32
    %171 = tpu.memref_slice %arg14[%c1_i32_83, %c0_i32_87, %c0_i32_88] : memref<2x512x1024xbf16, #tpu.memory_space<vmem>> -> memref<1x512x1024xbf16, #tpu.memory_space<vmem>>
    %172 = tpu.memref_squeeze %171 : memref<1x512x1024xbf16, #tpu.memory_space<vmem>> -> memref<512x1024xbf16, #tpu.memory_space<vmem>>
    %173 = tpu.memref_slice %arg15[%c2_i32_84] : memref<3x!tpu.dma_semaphore, #tpu.memory_space<semaphore_mem>> -> memref<1x!tpu.dma_semaphore, #tpu.memory_space<semaphore_mem>>
    %174 = tpu.memref_squeeze %173 : memref<1x!tpu.dma_semaphore, #tpu.memory_space<semaphore_mem>> -> memref<!tpu.dma_semaphore, #tpu.memory_space<semaphore_mem>>
    tpu.wait_dma2 semaphore(%174 : memref<!tpu.dma_semaphore, #tpu.memory_space<semaphore_mem>>) src(%170 : memref<512x1024xbf16, #tpu.memory_space<any>>) dst(%172 : memref<512x1024xbf16, #tpu.memory_space<vmem>>)
    %c1_89 = arith.constant 1 : index
    %c0_90 = arith.constant 0 : index
    %c0_91 = arith.constant 0 : index
    %175 = vector.load %arg14[%c1_89, %c0_90, %c0_91] : memref<2x512x1024xbf16, #tpu.memory_space<vmem>>, vector<1x512x1024xbf16>
    %176 = vector.shape_cast %175 : vector<1x512x1024xbf16> to vector<512x1024xbf16>
    %cst_92 = arith.constant dense<0.000000e+00> : vector<2x1024xf32>
    %177 = tpu.matmul %122, %176, %cst_92 {dimension_numbers = #tpu.dot_dimension_numbers<[1], [0], [0], [1], [0, 0, 1, 1], [], []>} : vector<2x512xbf16>, vector<512x1024xbf16>, vector<2x1024xf32> -> vector<2x1024xf32>
    %178 = vector.extract_strided_slice %123 {offsets = [0, 1024], sizes = [1, 1024], strides = [1, 1]} : vector<1x2048xf32> to vector<1x1024xf32>
    %179 = vector.broadcast %178 : vector<1x1024xf32> to vector<2x1024xf32>
    %180 = arith.addf %177, %179 : vector<2x1024xf32>
    %cst_93 = arith.constant 0.000000e+00 : f32
    %181 = vector.broadcast %cst_93 : f32 to vector<2x1024xf32>
    %182 = arith.cmpf ogt, %180, %181 : vector<2x1024xf32>
    %cst_94 = arith.constant 2.000000e-01 : f32
    %183 = vector.broadcast %cst_94 : f32 to vector<2x1024xf32>
    %184 = arith.mulf %183, %180 : vector<2x1024xf32>
    %185 = arith.select %182, %180, %184 : vector<2x1024xi1>, vector<2x1024xf32>
    %186 = vector.extract_strided_slice %185 {offsets = [0, 0], sizes = [2, 512], strides = [1, 1]} : vector<2x1024xf32> to vector<2x512xf32>
    %187 = arith.truncf %186 : vector<2x512xf32> to vector<2x512xbf16>
    %cst_95 = arith.constant dense<0.000000e+00> : vector<32x512xf32>
    %188 = tpu.matmul %36, %187, %cst_95 {dimension_numbers = #tpu.dot_dimension_numbers<[1], [0], [0], [1], [0, 0, 1, 1], [], []>} : vector<32x2xbf16>, vector<2x512xbf16>, vector<32x512xf32> -> vector<32x512xf32>
    %cst_96 = arith.constant 0.000000e+00 : f32
    %189 = vector.broadcast %cst_96 : f32 to vector<32x512xf32>
    %190 = arith.select %20, %188, %189 : vector<32x512xi1>, vector<32x512xf32>
    %191 = arith.truncf %190 : vector<32x512xf32> to vector<32x512xbf16>
    %cst_97 = arith.constant dense<0.000000e+00> : vector<32x128xf32>
    %192 = tpu.matmul %191, %124, %cst_97 {dimension_numbers = #tpu.dot_dimension_numbers<[1], [0], [0], [1], [0, 0, 1, 1], [], []>} : vector<32x512xbf16>, vector<512x128xbf16>, vector<32x128xf32> -> vector<32x128xf32>
    %193 = vector.broadcast %125 : vector<1x128xf32> to vector<32x128xf32>
    %194 = arith.addf %192, %193 : vector<32x128xf32>
    %195 = vector.extract_strided_slice %194 {offsets = [0, 0], sizes = [16, 128], strides = [1, 1]} : vector<32x128xf32> to vector<16x128xf32>
    %c32 = arith.constant 32 : index
    %c0_98 = arith.constant 0 : index
    %196 = vector.load %arg12[%c32, %c0_98] : memref<128x128xf32, #tpu.memory_space<vmem>>, vector<16x128xf32>
    tpu.vector_store %arg12[%c32, %c0_98], %195 {strides = array<i32>} : memref<128x128xf32, #tpu.memory_space<vmem>>, vector<16x128xf32>,
    %197 = vector.extract_strided_slice %194 {offsets = [16, 0], sizes = [16, 128], strides = [1, 1]} : vector<32x128xf32> to vector<16x128xf32>
    %c96 = arith.constant 96 : index
    %c0_99 = arith.constant 0 : index
    %198 = vector.load %arg12[%c96, %c0_99] : memref<128x128xf32, #tpu.memory_space<vmem>>, vector<16x128xf32>
    tpu.vector_store %arg12[%c96, %c0_99], %197 {strides = array<i32>} : memref<128x128xf32, #tpu.memory_space<vmem>>, vector<16x128xf32>,
    %199 = vector.extract_strided_slice %185 {offsets = [0, 512], sizes = [2, 512], strides = [1, 1]} : vector<2x1024xf32> to vector<2x512xf32>
    %200 = arith.truncf %199 : vector<2x512xf32> to vector<2x512xbf16>
    %cst_100 = arith.constant dense<0.000000e+00> : vector<32x512xf32>
    %201 = tpu.matmul %36, %200, %cst_100 {dimension_numbers = #tpu.dot_dimension_numbers<[1], [0], [0], [1], [0, 0, 1, 1], [], []>} : vector<32x2xbf16>, vector<2x512xbf16>, vector<32x512xf32> -> vector<32x512xf32>
    %cst_101 = arith.constant 0.000000e+00 : f32
    %202 = vector.broadcast %cst_101 : f32 to vector<32x512xf32>
    %203 = arith.select %20, %201, %202 : vector<32x512xi1>, vector<32x512xf32>
    %204 = arith.truncf %203 : vector<32x512xf32> to vector<32x512xbf16>
    %cst_102 = arith.constant dense<0.000000e+00> : vector<32x128xf32>
    %205 = tpu.matmul %204, %124, %cst_102 {dimension_numbers = #tpu.dot_dimension_numbers<[1], [0], [0], [1], [0, 0, 1, 1], [], []>} : vector<32x512xbf16>, vector<512x128xbf16>, vector<32x128xf32> -> vector<32x128xf32>
    %206 = vector.broadcast %125 : vector<1x128xf32> to vector<32x128xf32>
    %207 = arith.addf %205, %206 : vector<32x128xf32>
    %208 = vector.extract_strided_slice %207 {offsets = [0, 0], sizes = [16, 128], strides = [1, 1]} : vector<32x128xf32> to vector<16x128xf32>
    %c48 = arith.constant 48 : index
    %c0_103 = arith.constant 0 : index
    %209 = vector.load %arg12[%c48, %c0_103] : memref<128x128xf32, #tpu.memory_space<vmem>>, vector<16x128xf32>
    tpu.vector_store %arg12[%c48, %c0_103], %208 {strides = array<i32>} : memref<128x128xf32, #tpu.memory_space<vmem>>, vector<16x128xf32>,
    %210 = vector.extract_strided_slice %207 {offsets = [16, 0], sizes = [16, 128], strides = [1, 1]} : vector<32x128xf32> to vector<16x128xf32>
    %c112 = arith.constant 112 : index
    %c0_104 = arith.constant 0 : index
    %211 = vector.load %arg12[%c112, %c0_104] : memref<128x128xf32, #tpu.memory_space<vmem>>, vector<16x128xf32>
    tpu.vector_store %arg12[%c112, %c0_104], %210 {strides = array<i32>} : memref<128x128xf32, #tpu.memory_space<vmem>>, vector<16x128xf32>,
    return
  }
}

</mosaic_0001>

<bundles_post_ra>
// kernel: tpu_custom_call.1
= control target key start
LH: loop header
LB: loop body
LE: loop exit
PB: predicated region body
PF: predicated region fallthrough
CT: control target
= control target key end

     0   :  { %17 = vsyncpa [#allocation6], 0  ;;  %s9024_s0 = inlined_call_operand.hbm [shape: s32[4,32], index: 0, kind: input, shape index: {}]   ;;  %s9025_s1 = inlined_call_operand.hbm [shape: bf16[128,512], index: 1, kind: input, shape index: {}]   ;;  %s9026_s2 = inlined_call_operand.hbm [shape: f32[1,512], index: 2, kind: input, shape index: {}]   ;;  %s9027_s3 = inlined_call_operand.hbm [shape: bf16[512,128], index: 3, kind: input, shape index: {}]   ;;  %s9028_s4 = inlined_call_operand.hbm [shape: f32[1,128], index: 4, kind: input, shape index: {}]   ;;  %s9029_s5 = inlined_call_operand.hbm [shape: bf16[128,512], index: 5, kind: input, shape index: {}]   ;;  %s9030_s6 = inlined_call_operand.hbm [shape: f32[1,512], index: 6, kind: input, shape index: {}]   ;;  %s9031_s7 = inlined_call_operand.hbm [shape: f32[1,2048], index: 7, kind: input, shape index: {}]   ;;  %s9032_s8 = inlined_call_operand.hbm [shape: bf16[512,128], index: 8, kind: input, shape index: {}]   ;;  %s9033_s9 = inlined_call_operand.hbm [shape: f32[1,128], index: 9, kind: input, shape index: {}]   ;;  %s9034_s10 = inlined_call_operand.hbm [shape: bf16[2048,512], index: 10, kind: input, shape index: {}]   ;;  %s9035_s11 = inlined_call_operand.hbm [shape: bf16[2,512,1024], index: 11, kind: input, shape index: {}]   ;;  %s9036_s12 = inlined_call_operand.hbm [shape: f32[128,128], index: 12, kind: output, shape index: {}]  }
   0x1   :  { %18 = vsyncpa [#allocation9], 0 }
   0x2   :  { %19 = vsyncpa [#allocation12], 0 }
   0x3   :  { %20 = vsyncpa [#allocation15], 0 }
   0x4   :  { %21 = vsyncpa [#allocation18], 0 }
   0x5   :  { %22 = vsyncpa [#allocation21], 0 }
   0x6   :  { %23 = vsyncpa [#allocation7], 0  ;;  %s7434_s21 = smov [#allocation8]   ;;  %s7172_s25 = scalar_lea.hbm %s9025_s1, 4096 }
   0x7   :  { %s39_s22 = sshll.u32 %s7434_s21, 4  ;;  %p7173_p0 = scmp.ne.s32.totalorder %s9025_s1, %s7172_s25  ;;  %s40_s22 = int_to_ptr.vmem [resolvable:$true] %s39_s22 }
   0x8   :  { %p7176_p1 = scmp.lt.u32.totalorder %s7172_s25, %s9025_s1 }
   0xa   :  { %p7178_p2 = pnand %p7176_p1, %p7173_p0 }
   0xc   :  { %7181 = shalt.err (!%p7178_p2)
}
   0xd   :  { %s7182_s30 = scalar_lea.vmem %s40_s22, 4096  ;;  %p7187_p4 = scmp.lt.s32.totalorder %s40_s22, %s40_s22 }
   0xe   :  { %p7183_p3 = scmp.ne.s32.totalorder %s40_s22, %s7182_s30  ;;  %p7188_p5 = scmp.lt.s32.totalorder %s7182_s30, %s7182_s30 }
  0x10   :  { %p7189_p6 = por %p7188_p5, %p7187_p4 }
  0x12   :  { %p7190_p7 = pnand %p7189_p6, %p7183_p3 }
  0x14   :  { %7193 = shalt.err (!%p7190_p7)
}
  0x15   :  { %s7435_s13 = smov 256   ;;  %s7436_s14 = smov 16  }
  0x16   :  { %45 = dma.hbm_to_vmem [thread:$0]  %s9025_s1, 4096, %s40_s22, [#allocation9], %s7435_s13, %s7435_s13, %s7436_s14  }
  0x17   :  { %s7437_s17 = smov [#allocation11]   ;;  %s7194_s21 = scalar_lea.hbm %s9027_s3, 4096 }
  0x18   :  { %s61_s18 = sshll.u32 %s7437_s17, 4  ;;  %p7195_p8 = scmp.ne.s32.totalorder %s9027_s3, %s7194_s21  ;;  %s62_s18 = int_to_ptr.vmem [resolvable:$true] %s61_s18 }
  0x19   :  { %p7198_p9 = scmp.lt.u32.totalorder %s7194_s21, %s9027_s3 }
  0x1b   :  { %p7200_p10 = pnand %p7198_p9, %p7195_p8 }
  0x1d   :  { %7203 = shalt.err (!%p7200_p10)
}
  0x1e   :  { %s7204_s27 = scalar_lea.vmem %s62_s18, 4096  ;;  %p7209_p12 = scmp.lt.s32.totalorder %s62_s18, %s62_s18 }
  0x1f   :  { %p7205_p11 = scmp.ne.s32.totalorder %s62_s18, %s7204_s27  ;;  %p7210_p13 = scmp.lt.s32.totalorder %s7204_s27, %s7204_s27 }
  0x21   :  { %p7211_p0 = por %p7210_p13, %p7209_p12 }
  0x23   :  { %p7212_p1 = pnand %p7211_p0, %p7205_p11 }
  0x25   :  { %7215 = shalt.err (!%p7212_p1)
}
  0x26   :  { %s7438_s1 = smov 64   ;;  %s7439_s22 = smov 4  }
  0x27   :  { %67 = dma.hbm_to_vmem [thread:$0]  %s9027_s3, 4096, %s62_s18, [#allocation12], %s7438_s1, %s7438_s1, %s7439_s22  }
  0x28   :  { %s7440_s30 = smov [#allocation14]   ;;  %s7441_s16 = smov [#allocation17]  }
  0x29   :  { %s83_s15 = sshll.u32 %s7440_s30, 4  ;;  %s106_s17 = sshll.u32 %s7441_s16, 4  ;;  %s84_s15 = int_to_ptr.vmem [resolvable:$true] %s83_s15  ;;  %s107_s17 = int_to_ptr.vmem [resolvable:$true] %s106_s17 }
  0x2a   :  { %s7216_s21 = scalar_lea.hbm %s9029_s5, 4096 }
  0x2b   :  { %p7217_p2 = scmp.ne.s32.totalorder %s9029_s5, %s7216_s21  ;;  %p7220_p3 = scmp.lt.u32.totalorder %s7216_s21, %s9029_s5 }
  0x2d   :  { %p7222_p4 = pnand %p7220_p3, %p7217_p2 }
  0x2f   :  { %7225 = shalt.err (!%p7222_p4)
}
  0x30   :  { %s7226_s3 = scalar_lea.vmem %s84_s15, 4096  ;;  %p7231_p6 = scmp.lt.s32.totalorder %s84_s15, %s84_s15 }
  0x31   :  { %p7227_p5 = scmp.ne.s32.totalorder %s84_s15, %s7226_s3  ;;  %p7232_p7 = scmp.lt.s32.totalorder %s7226_s3, %s7226_s3 }
  0x33   :  { %p7233_p8 = por %p7232_p7, %p7231_p6 }
  0x35   :  { %p7234_p9 = pnand %p7233_p8, %p7227_p5 }
  0x37   :  { %7237 = shalt.err (!%p7234_p9)
}
  0x38   :  { %89 = dma.hbm_to_vmem [thread:$0]  %s9029_s5, 4096, %s84_s15, [#allocation15], %s7435_s13, %s7435_s13, %s7436_s14  }
  0x39   :  { %s7238_s30 = scalar_lea.hbm %s9031_s7, 256 }
  0x3a   :  { %p7239_p10 = scmp.ne.s32.totalorder %s9031_s7, %s7238_s30  ;;  %p7242_p11 = scmp.lt.u32.totalorder %s7238_s30, %s9031_s7 }
  0x3c   :  { %p7244_p12 = pnand %p7242_p11, %p7239_p10 }
  0x3e   :  { %7247 = shalt.err (!%p7244_p12)
}
  0x3f   :  { %s7248_s23 = scalar_lea.vmem %s107_s17, 256  ;;  %p7253_p0 = scmp.lt.s32.totalorder %s107_s17, %s107_s17 }
  0x40   :  { %p7249_p13 = scmp.ne.s32.totalorder %s107_s17, %s7248_s23  ;;  %p7254_p1 = scmp.lt.s32.totalorder %s7248_s23, %s7248_s23 }
  0x42   :  { %p7255_p2 = por %p7254_p1, %p7253_p0 }
  0x44   :  { %p7256_p3 = pnand %p7255_p2, %p7249_p13 }
  0x46   :  { %7259 = shalt.err (!%p7256_p3)
}
  0x47   :  { %109 = dma.hbm_to_vmem [thread:$0]  %s9031_s7, 256, %s107_s17, [#allocation18]  }
  0x48   :  { %s7442_s15 = smov [#allocation5]   ;;  %s7443_s25 = smov [#allocation10]  }
  0x49   :  { %s30_s24 = sshll.u32 %s7442_s15, 4  ;;  %s52_s26 = sshll.u32 %s7443_s25, 4  ;;  %s31_s24 = int_to_ptr.vmem [resolvable:$true] %s30_s24  ;;  %s53_s26 = int_to_ptr.vmem [resolvable:$true] %s52_s26 }
  0x4a   :  { %s7260_s27 = scalar_lea.hbm %s9024_s0, 64 }
  0x4b   :  { %p7261_p4 = scmp.ne.s32.totalorder %s9024_s0, %s7260_s27  ;;  %p7264_p5 = scmp.lt.u32.totalorder %s7260_s27, %s9024_s0 }
  0x4d   :  { %p7266_p6 = pnand %p7264_p5, %p7261_p4 }
  0x4f   :  { %7269 = shalt.err (!%p7266_p6)
}
  0x50   :  { %s7270_s7 = scalar_lea.vmem %s31_s24, 64  ;;  %p7275_p8 = scmp.lt.s32.totalorder %s31_s24, %s31_s24 }
  0x51   :  { %p7271_p7 = scmp.ne.s32.totalorder %s31_s24, %s7270_s7  ;;  %p7276_p9 = scmp.lt.s32.totalorder %s7270_s7, %s7270_s7 }
  0x53   :  { %p7277_p10 = por %p7276_p9, %p7275_p8 }
  0x55   :  { %p7278_p11 = pnand %p7277_p10, %p7271_p7 }
  0x57   :  { %7281 = shalt.err (!%p7278_p11)
}
  0x58   :  { %33 = dma.hbm_to_vmem [thread:$0]  %s9024_s0, 64, %s31_s24, [#allocation6]  }
  0x59   :  { %s7282_s23 = scalar_lea.hbm %s9026_s2, 64 }
  0x5a   :  { %p7283_p12 = scmp.ne.s32.totalorder %s9026_s2, %s7282_s23  ;;  %p7286_p13 = scmp.lt.u32.totalorder %s7282_s23, %s9026_s2 }
  0x5c   :  { %p7288_p0 = pnand %p7286_p13, %p7283_p12 }
  0x5e   :  { %7291 = shalt.err (!%p7288_p0)
}
  0x5f   :  { %s7292_s3 = scalar_lea.vmem %s53_s26, 64  ;;  %p7297_p2 = scmp.lt.s32.totalorder %s53_s26, %s53_s26 }
  0x60   :  { %p7293_p1 = scmp.ne.s32.totalorder %s53_s26, %s7292_s3  ;;  %p7298_p3 = scmp.lt.s32.totalorder %s7292_s3, %s7292_s3 }
  0x62   :  { %p7299_p4 = por %p7298_p3, %p7297_p2 }
  0x64   :  { %p7300_p5 = pnand %p7299_p4, %p7293_p1 }
  0x66   :  { %7303 = shalt.err (!%p7300_p5)
}
  0x67   :  { %55 = dma.hbm_to_vmem [thread:$0]  %s9026_s2, 64, %s53_s26, [#allocation9]  }
  0x68   :  { %s7444_s18 = smov [#allocation13]   ;;  %s7445_s28 = smov [#allocation16]  }
  0x69   :  { %s74_s27 = sshll.u32 %s7444_s18, 4  ;;  %s96_s29 = sshll.u32 %s7445_s28, 4  ;;  %s75_s27 = int_to_ptr.vmem [resolvable:$true] %s74_s27  ;;  %s97_s29 = int_to_ptr.vmem [resolvable:$true] %s96_s29 }
  0x6a   :  { %s7304_s7 = scalar_lea.hbm %s9028_s4, 16 }
  0x6b   :  { %p7305_p6 = scmp.ne.s32.totalorder %s9028_s4, %s7304_s7  ;;  %p7308_p7 = scmp.lt.u32.totalorder %s7304_s7, %s9028_s4 }
  0x6d   :  { %p7310_p8 = pnand %p7308_p7, %p7305_p6 }
  0x6f   :  { %7313 = shalt.err (!%p7310_p8)
}
  0x70   :  { %s7314_s2 = scalar_lea.vmem %s75_s27, 16  ;;  %s7318_s26 = scalar_lea.vmem %s75_s27, 32 }
  0x71   :  { %p7315_p9 = scmp.ne.s32.totalorder %s75_s27, %s7314_s2  ;;  %p7319_p10 = scmp.lt.s32.totalorder %s75_s27, %s75_s27 }
  0x72   :  { %p7320_p11 = scmp.lt.s32.totalorder %s7318_s26, %s7314_s2 }
  0x74   :  { %p7321_p12 = por %p7320_p11, %p7319_p10 }
  0x76   :  { %p7322_p13 = pnand %p7321_p12, %p7315_p9 }
  0x78   :  { %7325 = shalt.err (!%p7322_p13)
}
  0x79   :  { %77 = dma.hbm_to_vmem [thread:$0]  %s9028_s4, 16, %s75_s27, [#allocation12]  }
  0x7a   :  { %s7326_s25 = scalar_lea.hbm %s9030_s6, 64 }
  0x7b   :  { %p7327_p0 = scmp.ne.s32.totalorder %s9030_s6, %s7326_s25  ;;  %p7330_p1 = scmp.lt.u32.totalorder %s7326_s25, %s9030_s6 }
  0x7d   :  { %p7332_p2 = pnand %p7330_p1, %p7327_p0 }
  0x7f   :  { %7335 = shalt.err (!%p7332_p2)
}
  0x80   :  { %s7336_s28 = scalar_lea.vmem %s97_s29, 64  ;;  %p7341_p4 = scmp.lt.s32.totalorder %s97_s29, %s97_s29 }
  0x81   :  { %p7337_p3 = scmp.ne.s32.totalorder %s97_s29, %s7336_s28  ;;  %p7342_p5 = scmp.lt.s32.totalorder %s7336_s28, %s7336_s28 }
  0x83   :  { %p7343_p6 = por %p7342_p5, %p7341_p4 }
  0x85   :  { %p7344_p7 = pnand %p7343_p6, %p7337_p3 }
  0x87   :  { %7347 = shalt.err (!%p7344_p7)
}
  0x88   :  { %99 = dma.hbm_to_vmem [thread:$0]  %s9030_s6, 64, %s97_s29, [#allocation15]  }
  0x89   :  { %s7446_s30 = smov [#allocation19]   ;;  %s7447_s7 = smov [#allocation20]  }
  0x8a   :  { %s115_s16 = sshll.u32 %s7446_s30, 4  ;;  %s128_s17 = sshll.u32 %s7447_s7, 4  ;;  %s116_s16 = int_to_ptr.vmem [resolvable:$true] %s115_s16  ;;  %s129_s17 = int_to_ptr.vmem [resolvable:$true] %s128_s17 }
  0x8b   :  { %s7348_s21 = scalar_lea.hbm %s9032_s8, 4096 }
  0x8c   :  { %p7349_p8 = scmp.ne.s32.totalorder %s9032_s8, %s7348_s21  ;;  %p7352_p9 = scmp.lt.u32.totalorder %s7348_s21, %s9032_s8 }
  0x8e   :  { %p7354_p10 = pnand %p7352_p9, %p7349_p8 }
  0x90   :  { %7357 = shalt.err (!%p7354_p10)
}
  0x91   :  { %s7358_s6 = scalar_lea.vmem %s116_s16, 4096  ;;  %p7363_p12 = scmp.lt.s32.totalorder %s116_s16, %s116_s16 }
  0x92   :  { %p7359_p11 = scmp.ne.s32.totalorder %s116_s16, %s7358_s6  ;;  %p7364_p13 = scmp.lt.s32.totalorder %s7358_s6, %s7358_s6 }
  0x94   :  { %p7365_p0 = por %p7364_p13, %p7363_p12 }
  0x96   :  { %p7366_p1 = pnand %p7365_p0, %p7359_p11 }
  0x98   :  { %7369 = shalt.err (!%p7366_p1)
}
  0x99   :  { %121 = dma.hbm_to_vmem [thread:$0]  %s9032_s8, 4096, %s116_s16, [#allocation18], %s7438_s1, %s7438_s1, %s7439_s22  }
  0x9a   :  { %s7370_s3 = scalar_lea.hbm %s9033_s9, 16 }
  0x9b   :  { %p7371_p2 = scmp.ne.s32.totalorder %s9033_s9, %s7370_s3  ;;  %p7374_p3 = scmp.lt.u32.totalorder %s7370_s3, %s9033_s9 }
  0x9d   :  { %p7376_p4 = pnand %p7374_p3, %p7371_p2 }
  0x9f   :  { %7379 = shalt.err (!%p7376_p4)
}
  0xa0   :  { %s7380_s4 = scalar_lea.vmem %s129_s17, 16  ;;  %s7384_s27 = scalar_lea.vmem %s129_s17, 32 }
  0xa1   :  { %p7381_p5 = scmp.ne.s32.totalorder %s129_s17, %s7380_s4  ;;  %p7385_p6 = scmp.lt.s32.totalorder %s129_s17, %s129_s17 }
  0xa2   :  { %p7386_p7 = scmp.lt.s32.totalorder %s7384_s27, %s7380_s4 }
  0xa4   :  { %p7387_p8 = por %p7386_p7, %p7385_p6 }
  0xa6   :  { %p7388_p9 = pnand %p7387_p8, %p7381_p5 }
  0xa8   :  { %7391 = shalt.err (!%p7388_p9)
}
  0xa9   :  { %131 = dma.hbm_to_vmem [thread:$0]  %s9033_s9, 16, %s129_s17, [#allocation21]  }
  0xaa   :  { %7414 = dma.done.wait [#allocation6], 64  }
  0xab   :  { %7415 = vsyncadd [#allocation6], 4294967232 }
  0xac   :  { %7416 = dma.done.wait [#allocation9], 4160  }
  0xad   :  { %7417 = vsyncadd [#allocation9], 4294963136 }
  0xae   :  { %7418 = dma.done.wait [#allocation12], 4112  }
  0xaf   :  { %7419 = vsyncadd [#allocation12], 4294963184 }
  0xb0   :  { %7420 = dma.done.wait [#allocation15], 4160  }
  0xb1   :  { %7421 = vsyncadd [#allocation15], 4294963136 }
  0xb2   :  { %7422 = dma.done.wait [#allocation18], 4352  }
  0xb3   :  { %7423 = vsyncadd [#allocation18], 4294962944 }
  0xb4   :  { %7424 = dma.done.wait [#allocation21], 16  }
  0xb5   :  { %7425 = vsyncadd [#allocation21], 4294967280  ;;  %v270_v0 = vlaneseq  ;;  %s167_s16 = sld [smem:[#allocation0]]   ;;  %183 = sst [smem:[#allocation24 + $0x2]] %s7439_s22  ;;  %v9037_v1 = vmov 0   ;;  %v9041_v11 = vmov 0.0  }
  0xb6   :  { %640 = vmatprep.mubr.bf16.mxu0 %v9037_v1  ;;  %693 = vmatprep.mubr.bf16.mxu1 %v9037_v1  ;;  %185 = sst [smem:[#allocation24 + $0x3]] %s7438_s1  ;;  %s7449_s9 = smov [#allocation2]  }
  0xb7   :  { %s7666_s7 = sshll.u32 %s7449_s9, 4  ;;  %v7668_v2 = vshrl.u32 %v270_v0, 7  ;;  %191 = sst [smem:[#allocation24 + $0x6]] %s7435_s13  ;;  %v7672_v3 = vand.u32 127, %v270_v0  ;;  %s176_s7 = int_to_ptr.vmem [resolvable:$true] %s7666_s7 }
  0xb8   :  { %193 = sst [smem:[#allocation24 + $0x7]] %s7438_s1  ;;  %s7450_s17 = smov 512  }
  0xb9   :  { %9105 = vst [vmem:[#allocation39_spill] sm:$0xff] %v7668_v2  ;;  %v7676_v4 = vadd.s32 8, %v7668_v2  ;;  %v309_v5 = vshra.s32 %v7668_v2, 4  ;;  %v7680_v6 = vadd.s32 16, %v7668_v2  ;;  %v7683_v7 = vadd.s32 24, %v7668_v2  ;;  %195 = sst [smem:[#allocation24 + $0x8]] %s7439_s22 }
  0xba   :  { %179 = sst [smem:[#allocation24]] %s7450_s17  ;;  %s7452_s20 = smov 128   ;;  %v7736_v18 = vadd.s32 32, %v7668_v2  ;;  %v7739_v19 = vadd.s32 40, %v7668_v2  ;;  %v7744_v21 = vadd.s32 48, %v7668_v2  ;;  %v7767_v29 = vadd.s32 56, %v7668_v2 }
  0xbb   :  { %9106 = vst [vmem:[#allocation40_spill] sm:$0xff] %v7676_v4  ;;  %9107 = vst [vmem:[#allocation41_spill] sm:$0xff] %v7680_v6  ;;  %v310_v8 = vshra.s32 %v7676_v4, 4  ;;  %vm313_vm0 = vcmp.eq.s32.totalorder %v309_v5, %v7672_v3  ;;  %v311_v9 = vshra.s32 %v7680_v6, 4  ;;  %v312_v10 = vshra.s32 %v7683_v7, 4  ;;  %s6187_s13 = sshll.u32 %s167_s16, 26 }
  0xbc   :  { %181 = sst [smem:[#allocation24 + $0x1]] %s7450_s17  ;;  %v6194_v12 = vsel %vm313_vm0, 1.0, %v9041_v11  ;;  %s7693_s19 = sadd.s32 134217728, %s6187_s13  ;;  %v7793_v39 = vadd.s32 64, %v7668_v2  ;;  %v7796_v40 = vadd.s32 72, %v7668_v2  ;;  %v7819_v49 = vadd.s32 80, %v7668_v2 }
  0xbd   :  { %187 = sst [smem:[#allocation24 + $0x4]] %s7452_s20  ;;  %vm314_vm1 = vcmp.eq.s32.totalorder %v310_v8, %v7672_v3  ;;  %vm315_vm2 = vcmp.eq.s32.totalorder %v311_v9, %v7672_v3  ;;  %vm316_vm3 = vcmp.eq.s32.totalorder %v312_v10, %v7672_v3  ;;  %s7453_s21 = smov 2   ;;  %v7822_v50 = vadd.s32 88, %v7668_v2 }
  0xbe   :  { %189 = sst [smem:[#allocation24 + $0x5]] %s7453_s21  ;;  %v6195_v13 = vsel %vm314_vm1, 1.0, %v9041_v11  ;;  %v6196_v14 = vsel %vm315_vm2, 1.0, %v9041_v11  ;;  %v6197_v15 = vsel %vm316_vm3, 1.0, %v9041_v11  ;;  %s7454_s2 = smov [#allocation4]   ;;  %v7828_v52 = vadd.s32 96, %v7668_v2 }
  0xbf   :  { %s7455_s26 = smov [#allocation23]   ;;  %v7709_v16 = vpack.c.bf16 %v6195_v13, %v6194_v12  ;;  %v7711_v17 = vpack.c.bf16 %v6197_v15, %v6196_v14  ;;  %s7456_s6 = smov 1024   ;;  %v7831_v54 = vadd.s32 104, %v7668_v2  ;;  %v7867_v9 = vadd.s32 112, %v7668_v2 }
  0xc0   :  { %197 = dma.general %s9034_s10, 65536, %s176_s7, %s7454_s2, %s7455_s26, [#allocation24], %s7693_s19, 0   ;;  %v7870_v10 = vadd.s32 120, %v7668_v2 }
  0xc1   :  { %9108 = vst [vmem:[#allocation42_spill] sm:$0xff] %v7709_v16  ;;  %9109 = vst [vmem:[#allocation43_spill] sm:$0xff] %v7711_v17  ;;  %214 = sst [smem:[#allocation26]] %s7456_s6  ;;  %s7457_s29 = smov [#allocation3]   ;;  %v281_v17 = vand.u32 15, %v7676_v4 }
  0xc2   :  { %216 = sst [smem:[#allocation26 + $0x1]] %s7456_s6  ;;  %s210_s14 = sshll.u32 %s7457_s29, 4  ;;  %s211_s14 = int_to_ptr.vmem [resolvable:$true] %s210_s14 }
  0xc3   :  { %s7458_s15 = smov 8   ;;  %220 = sst [smem:[#allocation26 + $0x3]] %s7438_s1 }
  0xc4   :  { %218 = sst [smem:[#allocation26 + $0x2]] %s7458_s15  ;;  %s7459_s10 = smov [#allocation4 + $0x1]  }
  0xc5   :  { %222 = sst [smem:[#allocation26 + $0x4]] %s7452_s20  ;;  %s7460_s25 = smov [#allocation25]  }
  0xc6   :  { %224 = sst [smem:[#allocation26 + $0x5]] %s7453_s21  ;;  %s7461_s24 = smov [#allocation3 + $0x800]  }
  0xc7   :  { %226 = sst [smem:[#allocation26 + $0x6]] %s7450_s17  ;;  %s247_s18 = sshll.u32 %s7461_s24, 4  ;;  %s248_s18 = int_to_ptr.vmem [resolvable:$true] %s247_s18 }
  0xc8   :  { %228 = sst [smem:[#allocation26 + $0x7]] %s7438_s1  ;;  %s233_s27 = scalar_lea.hbm %s9035_s11, 32768 }
  0xc9   :  { %230 = sst [smem:[#allocation26 + $0x8]] %s7439_s22  ;;  %s7462_s8 = smov [#allocation4 + $0x2]  }
  0xca   :  { %232 = dma.general %s9035_s11, 32768, %s211_s14, %s7459_s10, %s7460_s25, [#allocation26], %s7693_s19, 0  }
  0xcb   :  { %251 = sst [smem:[#allocation28]] %s7456_s6  ;;  %s7463_s30 = smov [#allocation27]  }
  0xcc   :  { %253 = sst [smem:[#allocation28 + $0x1]] %s7456_s6 }
  0xcd   :  { %255 = sst [smem:[#allocation28 + $0x2]] %s7458_s15 }
  0xce   :  { %257 = sst [smem:[#allocation28 + $0x3]] %s7438_s1 }
  0xcf   :  { %259 = sst [smem:[#allocation28 + $0x4]] %s7452_s20 }
  0xd0   :  { %261 = sst [smem:[#allocation28 + $0x5]] %s7453_s21 }
  0xd1   :  { %263 = sst [smem:[#allocation28 + $0x6]] %s7450_s17 }
  0xd2   :  { %265 = sst [smem:[#allocation28 + $0x7]] %s7438_s1 }
  0xd3   :  { %267 = sst [smem:[#allocation28 + $0x8]] %s7439_s22 }
  0xd4   :  { %269 = dma.general %s233_s27, 32768, %s248_s18, %s7462_s8, %s7463_s30, [#allocation28], %s7693_s19, 0  }
  0xd5   :  { %9110 = vst [vmem:[#allocation44_spill] sm:$0xff] %v7736_v18  ;;  %9111 = vst [vmem:[#allocation45_spill] sm:$0xff] %v7739_v19  ;;  %v7741_v20 = vld [vmem:[#allocation5] ss:$0 sm:$0xff]  ;;  %v7754_v22 = vld [vmem:[#allocation8 + $0x4] ss:$16 sps:$4 sm:$0xff]  }
  0xd6   :  { %9112 = vst [vmem:[#allocation46_spill] sm:$0xff] %v7744_v21  ;;  %vm376_vm4 = vcmp.eq.s32.totalorder %v7668_v2, %v7741_v20  ;;  %vm377_vm5 = vcmp.eq.s32.totalorder %v7676_v4, %v7741_v20  ;;  %vm378_vm6 = vcmp.eq.s32.totalorder %v7680_v6, %v7741_v20  ;;  %vm379_vm7 = vcmp.eq.s32.totalorder %v7683_v7, %v7741_v20  ;;  %v7760_v27 = vld [vmem:[#allocation8 + $0xc] ss:$16 sps:$4 sm:$0xff]   ;;  %v7770_v30 = vld [vmem:[#allocation8] ss:$16 sps:$4 sm:$0xff]  }
  0xd7   :  { %v6199_v23 = vsel %vm376_vm4, 1.0, %v9041_v11  ;;  %v6200_v24 = vsel %vm377_vm5, 1.0, %v9041_v11  ;;  %v6201_v25 = vsel %vm378_vm6, 1.0, %v9041_v11  ;;  %v6202_v26 = vsel %vm379_vm7, 1.0, %v9041_v11  ;;  %9113 = vst [vmem:[#allocation47_spill] sm:$0xff] %v7767_v29  ;;  %608 = vmatprep.subr.bf16.mxu0 %v7754_v22  ;;  %661 = vmatprep.subr.bf16.mxu1 %v7760_v27  ;;  %9114 = vst [vmem:[#allocation48_spill] sm:$0xff] %v7793_v39 }
  0xd8   :  { %v424_v28 = vpack.c.bf16 %v6200_v24, %v6199_v23  ;;  %vm380_vm8 = vcmp.eq.s32.totalorder %v7736_v18, %v7741_v20  ;;  %vm381_vm9 = vcmp.eq.s32.totalorder %v7739_v19, %v7741_v20  ;;  %v7772_v31 = vld [vmem:[#allocation8 + $0x8] ss:$16 sps:$4 sm:$0xff]   ;;  %v7775_v32 = vld [vmem:[#allocation8 + $0x24] ss:$16 sps:$4 sm:$0xff]   ;;  %v425_v33 = vpack.c.bf16 %v6202_v26, %v6201_v25  ;;  %609 = vmatpush1.bf16.msra.mxu0 %v7770_v30  ;;  %v7779_v35 = vld [vmem:[#allocation8 + $0x2c] ss:$16 sps:$4 sm:$0xff]  }
  0xd9   :  { %v6203_v34 = vsel %vm380_vm8, 1.0, %v9041_v11  ;;  %v6204_v36 = vsel %vm381_vm9, 1.0, %v9041_v11  ;;  %662 = vmatpush1.bf16.msra.mxu1 %v7772_v31  ;;  %610 = vmatprep.subr.bf16.mxu0 %v7775_v32  ;;  %v7784_v37 = vld [vmem:[#allocation8 + $0x20] ss:$16 sps:$4 sm:$0xff]   ;;  %v7786_v38 = vld [vmem:[#allocation8 + $0x28] ss:$16 sps:$4 sm:$0xff]   ;;  %vm382_vm10 = vcmp.eq.s32.totalorder %v7744_v21, %v7741_v20  ;;  %vm383_vm11 = vcmp.eq.s32.totalorder %v7767_v29, %v7741_v20 }
  0xda   :  { %432 = vxpose.xlu0.c.b16.start [1/8] (narrow) %v424_v28, 32  ;;  %9115 = vst [vmem:[#allocation49_spill] sm:$0xff] %v7796_v40  ;;  %663 = vmatprep.subr.bf16.mxu1 %v7779_v35  ;;  %v7799_v41 = vld [vmem:[#allocation8 + $0x44] ss:$16 sps:$4 sm:$0xff]   ;;  %v7801_v42 = vld [vmem:[#allocation8 + $0x4c] ss:$16 sps:$4 sm:$0xff]   ;;  %v426_v43 = vpack.c.bf16 %v6204_v36, %v6203_v34  ;;  %vm384_vm12 = vcmp.eq.s32.totalorder %v7793_v39, %v7741_v20 }
  0xdb   :  { %v7804_v44 = vld [vmem:[#allocation8 + $0x40] ss:$16 sps:$4 sm:$0xff]   ;;  %v7806_v45 = vld [vmem:[#allocation8 + $0x48] ss:$16 sps:$4 sm:$0xff]   ;;  %v6205_v46 = vsel %vm382_vm10, 1.0, %v9041_v11  ;;  %v6206_v47 = vsel %vm383_vm11, 1.0, %v9041_v11  ;;  %vm385_vm13 = vcmp.eq.s32.totalorder %v7796_v40, %v7741_v20  ;;  %vm386_vm14 = vcmp.eq.s32.totalorder %v7819_v49, %v7741_v20 }
  0xdc   :  { %611 = vmatpush1.bf16.msra.mxu0 %v7784_v37  ;;  %v7812_v48 = vld [vmem:[#allocation8 + $0x64] ss:$16 sps:$4 sm:$0xff]   ;;  %9116 = vst [vmem:[#allocation50_spill] sm:$0xff] %v7819_v49  ;;  %9117 = vst [vmem:[#allocation51_spill] sm:$0xff] %v7822_v50  ;;  %v7825_v51 = vld [vmem:[#allocation8 + $0x6c] ss:$16 sps:$4 sm:$0xff]   ;;  %v427_v53 = vpack.c.bf16 %v6206_v47, %v6205_v46  ;;  %vm387_vm15 = vcmp.eq.s32.totalorder %v7822_v50, %v7741_v20  ;;  %vm388_vm0 = vcmp.eq.s32.totalorder %v7828_v52, %v7741_v20 }
  0xdd   :  { %664 = vmatpush1.bf16.msra.mxu1 %v7786_v38  ;;  %612 = vmatprep.subr.bf16.mxu0 %v7799_v41  ;;  %9118 = vst [vmem:[#allocation52_spill] sm:$0xff] %v7831_v54  ;;  %v7834_v55 = vld [vmem:[#allocation8 + $0x60] ss:$16 sps:$4 sm:$0xff]   ;;  %v6207_v56 = vsel %vm384_vm12, 1.0, %v9041_v11  ;;  %v6208_v57 = vsel %vm385_vm13, 1.0, %v9041_v11  ;;  %vm389_vm1 = vcmp.eq.s32.totalorder %v7831_v54, %v7741_v20  ;;  %v6209_v0 = vsel %vm386_vm14, 1.0, %v9041_v11 }
  0xde   :  { %433 = vxpose.xlu0.c.b16.cont [2/8] (narrow) %v425_v33, 32  ;;  %665 = vmatprep.subr.bf16.mxu1 %v7801_v42  ;;  %v7840_v58 = vld [vmem:[#allocation8 + $0x68] ss:$16 sps:$4 sm:$0xff]   ;;  %v7842_v59 = vld [vmem:[#allocation8 + $0x84] ss:$16 sps:$4 sm:$0xff]   ;;  %v428_v61 = vpack.c.bf16 %v6208_v57, %v6207_v56  ;;  %v6210_v5 = vsel %vm387_vm15, 1.0, %v9041_v11  ;;  %vm390_vm2 = vcmp.eq.s32.totalorder %v7867_v9, %v7741_v20  ;;  %vm391_vm3 = vcmp.eq.s32.totalorder %v7870_v10, %v7741_v20 }
  0xdf   :  { %v7849_v60 = vld [vmem:[#allocation8 + $0x8c] ss:$16 sps:$4 sm:$0xff]   ;;  %v7856_v62 = vld [vmem:[#allocation8 + $0x80] ss:$16 sps:$4 sm:$0xff]   ;;  %v7858_v63 = vld [vmem:[#allocation8 + $0x88] ss:$16 sps:$4 sm:$0xff]   ;;  %v429_v15 = vpack.c.bf16 %v6210_v5, %v6209_v0 }
  0xe0   :  { %613 = vmatpush1.bf16.msra.mxu0 %v7804_v44  ;;  %v7864_v8 = vld [vmem:[#allocation8 + $0xa4] ss:$16 sps:$4 sm:$0xff]   ;;  %9119 = vst [vmem:[#allocation53_spill] sm:$0xff] %v7867_v9  ;;  %9120 = vst [vmem:[#allocation54_spill] sm:$0xff] %v7870_v10  ;;  %v7873_v12 = vld [vmem:[#allocation8 + $0xac] ss:$16 sps:$4 sm:$0xff]  }
  0xe1   :  { %666 = vmatpush1.bf16.msra.mxu1 %v7806_v45  ;;  %614 = vmatprep.subr.bf16.mxu0 %v7812_v48  ;;  %v6211_v13 = vsel %vm388_vm0, 1.0, %v9041_v11  ;;  %v6212_v14 = vsel %vm389_vm1, 1.0, %v9041_v11  ;;  %v7878_v23 = vld [vmem:[#allocation8 + $0xa0] ss:$16 sps:$4 sm:$0xff]   ;;  %v7882_v24 = vld [vmem:[#allocation8 + $0xa8] ss:$16 sps:$4 sm:$0xff]  }
  0xe2   :  { %434 = vxpose.xlu0.c.b16.cont [3/8] (narrow) %v426_v43, 32  ;;  %667 = vmatprep.subr.bf16.mxu1 %v7825_v51  ;;  %v7884_v25 = vld [vmem:[#allocation8 + $0xc4] ss:$16 sps:$4 sm:$0xff]   ;;  %v430_v26 = vpack.c.bf16 %v6212_v14, %v6211_v13  ;;  %v7891_v28 = vld [vmem:[#allocation8 + $0xcc] ss:$16 sps:$4 sm:$0xff]   ;;  %v6214_v56 = vsel %vm391_vm3, 1.0, %v9041_v11 }
  0xe3   :  { %v7893_v33 = vld [vmem:[#allocation5 + $0x1] ss:$0 sm:$0xff]  ;;  %v7895_v34 = vld [vmem:[#allocation8 + $0xc0] ss:$16 sps:$4 sm:$0xff]   ;;  %v7920_v57 = vld [vmem:[#allocation8 + $0xc8] ss:$16 sps:$4 sm:$0xff]  }
  0xe4   :  { %615 = vmatpush1.bf16.msra.mxu0 %v7834_v55  ;;  %vm833_vm4 = vcmp.eq.s32.totalorder %v7668_v2, %v7893_v33  ;;  %vm834_vm5 = vcmp.eq.s32.totalorder %v7676_v4, %v7893_v33  ;;  %vm835_vm6 = vcmp.eq.s32.totalorder %v7680_v6, %v7893_v33  ;;  %vm836_vm7 = vcmp.eq.s32.totalorder %v7683_v7, %v7893_v33  ;;  %v7927_v5 = vld [vmem:[#allocation8 + $0xec] ss:$16 sps:$4 sm:$0xff]   ;;  %v7932_v14 = vld [vmem:[#allocation8 + $0xe0] ss:$16 sps:$4 sm:$0xff]  }
  0xe5   :  { %668 = vmatpush1.bf16.msra.mxu1 %v7840_v58  ;;  %616 = vmatprep.subr.bf16.mxu0 %v7842_v59  ;;  %v6274_v36 = vsel %vm833_vm4, 1.0, %v9041_v11  ;;  %v6275_v43 = vsel %vm834_vm5, 1.0, %v9041_v11  ;;  %v6276_v46 = vsel %vm835_vm6, 1.0, %v9041_v11  ;;  %v6277_v47 = vsel %vm836_vm7, 1.0, %v9041_v11 }
  0xe6   :  { %435 = vxpose.xlu0.c.b16.cont [4/8] (narrow) %v427_v53, 32  ;;  %669 = vmatprep.subr.bf16.mxu1 %v7849_v60  ;;  %v6213_v53 = vsel %vm390_vm2, 1.0, %v9041_v11  ;;  %v881_v0 = vpack.c.bf16 %v6275_v43, %v6274_v36  ;;  %vm837_vm8 = vcmp.eq.s32.totalorder %v7736_v18, %v7893_v33  ;;  %vm838_vm9 = vcmp.eq.s32.totalorder %v7739_v19, %v7893_v33  ;;  %v7938_v43 = vld [vmem:[#allocation8 + $0xe8] ss:$16 sps:$4 sm:$0xff]  }
  0xe7   :  { %v882_v20 = vpack.c.bf16 %v6277_v47, %v6276_v46  ;;  %v431_v13 = vpack.c.bf16 %v6214_v56, %v6213_v53  ;;  %v6279_v36 = vsel %vm838_vm9, 1.0, %v9041_v11  ;;  %vm839_vm10 = vcmp.eq.s32.totalorder %v7744_v21, %v7893_v33 }
  0xe8   :  { %617 = vmatpush1.bf16.msra.mxu0 %v7856_v62  ;;  %889 = vxpose.xlu1.c.b16.start [1/8] (narrow) %v881_v0, 32  ;;  %vm840_vm11 = vcmp.eq.s32.totalorder %v7767_v29, %v7893_v33  ;;  %v6280_v46 = vsel %vm839_vm10, 1.0, %v9041_v11  ;;  %vm841_vm12 = vcmp.eq.s32.totalorder %v7793_v39, %v7893_v33  ;;  %vm842_vm13 = vcmp.eq.s32.totalorder %v7796_v40, %v7893_v33 }
  0xe9   :  { %670 = vmatpush1.bf16.msra.mxu1 %v7858_v63  ;;  %618 = vmatprep.subr.bf16.mxu0 %v7864_v8  ;;  %v6281_v47 = vsel %vm840_vm11, 1.0, %v9041_v11  ;;  %v6282_v56 = vsel %vm841_vm12, 1.0, %v9041_v11  ;;  %v6283_v0 = vsel %vm842_vm13, 1.0, %v9041_v11  ;;  %vm843_vm14 = vcmp.eq.s32.totalorder %v7819_v49, %v7893_v33 }
  0xea   :  { %436 = vxpose.xlu0.c.b16.cont [5/8] (narrow) %v428_v61, 32  ;;  %671 = vmatprep.subr.bf16.mxu1 %v7873_v12  ;;  %v7922_v61 = vld [vmem:[#allocation8 + $0xe4] ss:$16 sps:$4 sm:$0xff]   ;;  %v884_v53 = vpack.c.bf16 %v6281_v47, %v6280_v46  ;;  %vm844_vm15 = vcmp.eq.s32.totalorder %v7822_v50, %v7893_v33  ;;  %vm845_vm0 = vcmp.eq.s32.totalorder %v7828_v52, %v7893_v33 }
  0xeb   :  { %vm846_vm1 = vcmp.eq.s32.totalorder %v7831_v54, %v7893_v33  ;;  %vm847_vm2 = vcmp.eq.s32.totalorder %v7867_v9, %v7893_v33  ;;  %vm848_vm3 = vcmp.eq.s32.totalorder %v7870_v10, %v7893_v33  ;;  %v7977_v33 = vld [vmem:[#allocation5 + $0x2] ss:$0 sm:$0xff]  ;;  %v9130_v10 = vmov 0 }
  0xec   :  { %619 = vmatpush1.bf16.msra.mxu0 %v7878_v23  ;;  %890 = vxpose.xlu1.c.b16.cont [2/8] (narrow) %v882_v20, 32  ;;  %v885_v20 = vpack.c.bf16 %v6283_v0, %v6282_v56  ;;  %v6287_v46 = vsel %vm846_vm1, 1.0, %v9041_v11  ;;  %v6289_v56 = vsel %vm848_vm3, 1.0, %v9041_v11  ;;  %vm1126_vm4 = vcmp.eq.s32.totalorder %v7668_v2, %v7977_v33 }
  0xed   :  { %672 = vmatpush1.bf16.msra.mxu1 %v7882_v24  ;;  %620 = vmatprep.subr.bf16.mxu0 %v7884_v25  ;;  %vm1127_vm5 = vcmp.eq.s32.totalorder %v7676_v4, %v7977_v33  ;;  %vm1128_vm6 = vcmp.eq.s32.totalorder %v7680_v6, %v7977_v33  ;;  %vm1129_vm7 = vcmp.eq.s32.totalorder %v7683_v7, %v7977_v33 }
  0xee   :  { %437 = vxpose.xlu0.c.b16.cont [6/8] (narrow) %v429_v15, 32  ;;  %673 = vmatprep.subr.bf16.mxu1 %v7891_v28  ;;  %v6278_v15 = vsel %vm837_vm8, 1.0, %v9041_v11  ;;  %vm1130_vm8 = vcmp.eq.s32.totalorder %v7736_v18, %v7977_v33  ;;  %vm1131_vm9 = vcmp.eq.s32.totalorder %v7739_v19, %v7977_v33  ;;  %vm1132_vm10 = vcmp.eq.s32.totalorder %v7744_v21, %v7977_v33 }
  0xef   :  { %vm1133_vm11 = vcmp.eq.s32.totalorder %v7767_v29, %v7977_v33  ;;  %vm1134_vm12 = vcmp.eq.s32.totalorder %v7793_v39, %v7977_v33  ;;  %vm1135_vm13 = vcmp.eq.s32.totalorder %v7796_v40, %v7977_v33  ;;  %v9127_v19 = vmov 0 }
  0xf0   :  { %621 = vmatpush1.bf16.msra.mxu0 %v7895_v34 }
  0xf1   :  { %674 = vmatpush1.bf16.msra.mxu1 %v7920_v57  ;;  %622 = vmatprep.subr.bf16.mxu0 %v7922_v61 }
  0xf2   :  { %438 = vxpose.xlu0.c.b16.cont [7/8] (narrow) %v430_v26, 32  ;;  %675 = vmatprep.subr.bf16.mxu1 %v7927_v5  ;;  %v883_v26 = vpack.c.bf16 %v6279_v36, %v6278_v15  ;;  %v6285_v15 = vsel %vm844_vm15, 1.0, %v9041_v11  ;;  %vm1137_vm15 = vcmp.eq.s32.totalorder %v7822_v50, %v7977_v33  ;;  %v282_v50 = vand.u32 15, %v7680_v6 }
  0xf3   :  { %v304_v6 = vshra.s32 %v7672_v3, 4 }
  0xf4   :  { %623 = vmatpush1.bf16.msra.mxu0 %v7932_v14  ;;  %891 = vxpose.xlu1.c.b16.cont [3/8] (narrow) %v883_v26, 32  ;;  %v6286_v26 = vsel %vm845_vm0, 1.0, %v9041_v11 }
  0xf5   :  { %676 = vmatpush1.bf16.msra.mxu1 %v7938_v43  ;;  %v887_v47 = vpack.c.bf16 %v6287_v46, %v6286_v26  ;;  %v6319_v26 = vsel %vm1128_vm6, 1.0, %v9041_v11  ;;  %v6320_v46 = vsel %vm1129_vm7, 1.0, %v9041_v11 }
  0xf6   :  { %439 = vxpose.xlu0.c.b16.end [8/8] (narrow) %v431_v13, 32  ;;  %v6284_v13 = vsel %vm843_vm14, 1.0, %v9041_v11  ;;  %vm1136_vm14 = vcmp.eq.s32.totalorder %v7819_v49, %v7977_v33  ;;  %v283_v49 = vand.u32 15, %v7683_v7 }
  0xf7   :  { %v886_v36 = vpack.c.bf16 %v6285_v15, %v6284_v13  ;;  %v6317_v15 = vsel %vm1126_vm4, 1.0, %v9041_v11 }
  0xf8   :  { %892 = vxpose.xlu1.c.b16.cont [4/8] (narrow) %v884_v53, 32  ;;  %v6288_v53 = vsel %vm847_vm2, 1.0, %v9041_v11 }
  0xf9   :  { %v888_v0 = vpack.c.bf16 %v6289_v56, %v6288_v53  ;;  %v1175_v53 = vpack.c.bf16 %v6320_v46, %v6319_v26  ;;  %v6321_v56 = vsel %vm1130_vm8, 1.0, %v9041_v11  ;;  %v6325_v26 = vsel %vm1134_vm12, 1.0, %v9041_v11 }
  0xfa   :  { %v6326_v46 = vsel %vm1135_vm13, 1.0, %v9041_v11 }
  0xfc   :  { %893 = vxpose.xlu1.c.b16.cont [5/8] (narrow) %v885_v20, 32 }
 0x100   :  { %894 = vxpose.xlu1.c.b16.cont [6/8] (narrow) %v886_v36, 32  ;;  %v6318_v36 = vsel %vm1127_vm5, 1.0, %v9041_v11 }
 0x104   :  { %895 = vxpose.xlu1.c.b16.cont [7/8] (narrow) %v887_v47, 32  ;;  %v1174_v47 = vpack.c.bf16 %v6318_v36, %v6317_v15  ;;  %v6324_v15 = vsel %vm1133_vm11, 1.0, %v9041_v11 }
 0x106   :  { %1182 = vxpose.xlu0.c.b16.start [1/8] (narrow) %v1174_v47, 32  ;;  %v1178_v47 = vpack.c.bf16 %v6326_v46, %v6325_v26  ;;  %v284_v26 = vshra.s32 %v7672_v3, 5 }
 0x108   :  { %896 = vxpose.xlu1.c.b16.end [8/8] (narrow) %v888_v0, 32  ;;  %v6322_v0 = vsel %vm1131_vm9, 1.0, %v9041_v11  ;;  %vm292_vm5 = vcmp.eq.s32.totalorder %v281_v17, %v284_v26 }
 0x10a   :  { %1183 = vxpose.xlu0.c.b16.cont [2/8] (narrow) %v1175_v53, 32  ;;  %v6327_v53 = vsel %vm1136_vm14, 1.0, %v9041_v11 }
 0x140   :  { %v440_v20 = vpop.trf.xlu0 }
 0x141   :  { %641 = vmatmul.mubr.bf16.vlgmr.msra.gmra.mrb[0].mxu0 %v440_v20  ;;  %694 = vmatmul.mubr.bf16.vlgmr.msra.gmra.mrb[0].mxu1 %v440_v20  ;;  %v1176_v20 = vpack.c.bf16 %v6322_v0, %v6321_v56  ;;  %v6328_v56 = vsel %vm1137_vm15, 1.0, %v9041_v11 }
 0x142   :  { %650 = vmatprep.mubr.bf16.mxu0 %v9037_v1  ;;  %703 = vmatprep.mubr.bf16.mxu1 %v9037_v1  ;;  %v1179_v0 = vpack.c.bf16 %v6328_v56, %v6327_v53 }
 0x143   :  { %1184 = vxpose.xlu0.c.b16.cont [3/8] (narrow) %v1176_v20, 32  ;;  %v277_v20 = vadd.s32 128, %v7672_v3 }
 0x144   :  { %v441_v13 = vpop.trf.xlu0 }
 0x145   :  { %v285_v16 = vshra.s32 %v277_v20, 5 }
 0x147   :  { %vm293_vm1 = vcmp.eq.s32.totalorder %v281_v17, %v285_v16  ;;  %vm297_vm12 = vcmp.eq.s32.totalorder %v282_v50, %v285_v16  ;;  %vm301_vm13 = vcmp.eq.s32.totalorder %v283_v49, %v285_v16 }
 0x149   :  { %651 = vmatmul.mubr.bf16.gmra.mrb[4].mxu0 %v441_v13  ;;  %704 = vmatmul.mubr.bf16.gmra.mrb[4].mxu1 %v441_v13  ;;  %v6323_v13 = vsel %vm1132_vm10, 1.0, %v9041_v11  ;;  %v9121_v11 = vmov 0 }
 0x14a   :  { %774 = vmatprep.mubr.bf16.mxu0 %v9037_v1  ;;  %815 = vmatprep.mubr.bf16.mxu1 %v9037_v1  ;;  %v1177_v36 = vpack.c.bf16 %v6324_v15, %v6323_v13  ;;  %v279_v13 = vadd.s32 384, %v7672_v3  ;;  %v278_v15 = vadd.s32 256, %v7672_v3  ;;  %v280_v1 = vand.u32 15, %v7668_v2 }
 0x14c   :  { %1185 = vxpose.xlu0.c.b16.cont [4/8] (narrow) %v1177_v36, 32  ;;  %v287_v36 = vshra.s32 %v279_v13, 5  ;;  %v286_v46 = vshra.s32 %v278_v15, 5  ;;  %vm289_vm0 = vcmp.eq.s32.totalorder %v280_v1, %v285_v16  ;;  %vm288_vm4 = vcmp.eq.s32.totalorder %v280_v1, %v284_v26 }
 0x14d   :  { %vm8021_vm6 = vmpackc.low %vm293_vm1, %vm289_vm0  ;;  %v9124_v15 = vmov 0  ;;  %vm296_vm0 = vcmp.eq.s32.totalorder %v282_v50, %v284_v26  ;;  %vm300_vm1 = vcmp.eq.s32.totalorder %v283_v49, %v284_v26 }
 0x14e   :  { %vm291_vm2 = vcmp.eq.s32.totalorder %v280_v1, %v287_v36  ;;  %vm295_vm3 = vcmp.eq.s32.totalorder %v281_v17, %v287_v36  ;;  %v9122_v11 = vsel %vm8021_vm6, 4294967295, %v9121_v11  ;;  %vm290_vm7 = vcmp.eq.s32.totalorder %v280_v1, %v286_v46  ;;  %vm8033_vm10 = vmpackc.low %vm292_vm5, %vm288_vm4 }
 0x14f   :  { %9123 = vst [vmem:[#allocation55_spill] sm:$0xff] %v9122_v11  ;;  %vm294_vm8 = vcmp.eq.s32.totalorder %v281_v17, %v286_v46  ;;  %vm8025_vm9 = vmpackc.low %vm295_vm3, %vm291_vm2  ;;  %v9128_v19 = vsel %vm8033_vm10, 4294967295, %v9127_v19  ;;  %vm299_vm14 = vcmp.eq.s32.totalorder %v282_v50, %v287_v36  ;;  %vm303_vm15 = vcmp.eq.s32.totalorder %v283_v49, %v287_v36 }
 0x150   :  { %1186 = vxpose.xlu0.c.b16.cont [5/8] (narrow) %v1178_v47, 32  ;;  %v9125_v15 = vsel %vm8025_vm9, 4294967295, %v9124_v15  ;;  %9129 = vst [vmem:[#allocation57_spill] sm:$0xff] %v9128_v19  ;;  %vm8037_vm11 = vmpackc.low %vm294_vm8, %vm290_vm7  ;;  %vm305_vm2 = vcmp.eq.s32.totalorder %v304_v6, %v7668_v2  ;;  %vm298_vm4 = vcmp.eq.s32.totalorder %v282_v50, %v286_v46  ;;  %vm302_vm5 = vcmp.eq.s32.totalorder %v283_v49, %v286_v46 }
 0x151   :  { %9126 = vst [vmem:[#allocation56_spill] sm:$0xff] %v9125_v15  ;;  %v9131_v10 = vsel %vm8037_vm11, 4294967295, %v9130_v10  ;;  %vm8051_vm3 = vmpackc.low %vm301_vm13, %vm297_vm12  ;;  %v9139_v6 = vmov 0  ;;  %v9143_v49 = vmov 0  ;;  %vm738_vm13 = vcmask 261120  }
 0x152   :  { %9132 = vst [vmem:[#allocation58_spill] sm:$0xff] %v9131_v10  ;;  %vm8055_vm7 = vmpackc.low %vm303_vm15, %vm299_vm14  ;;  %v9146_v50 = vmov 0   ;;  %v897_v26 = vpop.trf.xlu1  ;;  %vm1138_vm14 = vcmp.eq.s32.totalorder %v7828_v52, %v7977_v33  ;;  %vm1139_vm15 = vcmp.eq.s32.totalorder %v7831_v54, %v7977_v33 }
 0x153   :  { %vm8060_vm8 = vmpackc.low %vm300_vm1, %vm296_vm0  ;;  %vm1140_vm0 = vcmp.eq.s32.totalorder %v7867_v9, %v7977_v33 }
 0x154   :  { %1187 = vxpose.xlu0.c.b16.cont [6/8] (narrow) %v1179_v0, 32  ;;  %v9140_v6 = vsel %vm8060_vm8, 4294967295, %v9139_v6  ;;  %vm8065_vm12 = vmpackc.low %vm302_vm5, %vm298_vm4 }
 0x155   :  { %9141 = vst [vmem:[#allocation61_spill] sm:$0xff] %v9140_v6  ;;  %v9144_v49 = vsel %vm8065_vm12, 4294967295, %v9143_v49 }
 0x156   :  { %9145 = vst [vmem:[#allocation62_spill] sm:$0xff] %v9144_v49 }
 0x214   :  { %v642_v47 = vpop.f32.mrb[0].mxu0  ;;  %v695_v53 = vpop.f32.mrb[0].mxu1 }
 0x215   :  { %v644_v56 = vpop.f32.mrb[1].mxu0  ;;  %v697_v0 = vpop.f32.mrb[1].mxu1 }
 0x216   :  { %v646_v20 = vpop.f32.mrb[2].mxu0  ;;  %v699_v13 = vpop.f32.mrb[2].mxu1 }
 0x217   :  { %v6251_v40 = vpack.c.bf16 %v646_v20, %v642_v47  ;;  %v6264_v39 = vpack.c.bf16 %v699_v13, %v695_v53  ;;  %v648_v29 = vpop.f32.mrb[3].mxu0  ;;  %v701_v21 = vpop.f32.mrb[3].mxu1  ;;  %v9142_v53 = vmov 0.0  }
 0x218   :  { %v6248_v18 = vpack.c.bf16 %v648_v29, %v644_v56  ;;  %v6261_v4 = vpack.c.bf16 %v701_v21, %v697_v0  ;;  %v9136_v29 = vmov 0  ;;  %v6193_v56 = vsel %vm305_vm2, 1.0, %v9142_v53  ;;  %v898_v13 = vpop.trf.xlu1 }
 0x219   :  { %v9137_v29 = vsel %vm8055_vm7, 4294967295, %v9136_v29  ;;  %v8073_v46 = vpack.c.bf16 %v6193_v56, %v6193_v56 }
 0x21a   :  { %6249 = vmatprep.subr.msk.bf16.mxu0 %vm8021_vm6, %v6248_v18  ;;  %6262 = vmatprep.subr.msk.bf16.mxu1 %vm8025_vm9, %v6261_v4  ;;  %v9133_v4 = vmov 0  ;;  %9138 = vst [vmem:[#allocation60_spill] sm:$0xff] %v9137_v29 }
 0x21b   :  { %6252 = vmatpush1.bf16.msk.msra.mxu0 %vm8033_vm10, %v6251_v40  ;;  %6265 = vmatpush1.bf16.msk.msra.mxu1 %vm8037_vm11, %v6264_v39  ;;  %v9134_v4 = vsel %vm8051_vm3, 4294967295, %v9133_v4 }
 0x21c   :  { %v652_v1 = vpop.f32.mrb[4].mxu0  ;;  %v705_v17 = vpop.f32.mrb[4].mxu1  ;;  %9135 = vst [vmem:[#allocation59_spill] sm:$0xff] %v9134_v4 }
 0x21d   :  { %v654_v3 = vpop.f32.mrb[5].mxu0  ;;  %v707_v18 = vpop.f32.mrb[5].mxu1 }
 0x21e   :  { %v656_v16 = vpop.f32.mrb[6].mxu0  ;;  %v709_v21 = vpop.f32.mrb[6].mxu1 }
 0x21f   :  { %v6257_v39 = vpack.c.bf16 %v656_v16, %v652_v1  ;;  %v6270_v40 = vpack.c.bf16 %v709_v21, %v705_v17  ;;  %v658_v36 = vpop.f32.mrb[7].mxu0  ;;  %v711_v47 = vpop.f32.mrb[7].mxu1  ;;  %v6329_v1 = vsel %vm1138_vm14, 1.0, %v9142_v53  ;;  %v6330_v17 = vsel %vm1139_vm15, 1.0, %v9142_v53 }
 0x220   :  { %v6254_v0 = vpack.c.bf16 %v658_v36, %v654_v3  ;;  %v6267_v20 = vpack.c.bf16 %v711_v47, %v707_v18  ;;  %v1180_v3 = vpack.c.bf16 %v6330_v17, %v6329_v1  ;;  %v9147_v18 = vld [vmem:[#allocation54_spill] sm:$0xff]  ;;  %v6331_v16 = vsel %vm1140_vm0, 1.0, %v9142_v53  ;;  %v9148_v36 = vld [vmem:[#allocation40_spill] sm:$0xff]  ;;  %v9149_v47 = vld [vmem:[#allocation41_spill] sm:$0xff] }
 0x221   :  { %vm1141_vm1 = vcmp.eq.s32.totalorder %v9147_v18, %v7977_v33  ;;  %v9151_v1 = vld [vmem:[#allocation45_spill] sm:$0xff] }
 0x222   :  { %6255 = vmatprep.subr.msk.bf16.mxu0 %vm8051_vm3, %v6254_v0  ;;  %6268 = vmatprep.subr.msk.bf16.mxu1 %vm8055_vm7, %v6267_v20  ;;  %v6332_v21 = vsel %vm1141_vm1, 1.0, %v9142_v53 }
 0x223   :  { %6258 = vmatpush1.bf16.msk.msra.mxu0 %vm8060_vm8, %v6257_v39  ;;  %6271 = vmatpush1.bf16.msk.msra.mxu1 %vm8065_vm12, %v6270_v40  ;;  %v1181_v39 = vpack.c.bf16 %v6332_v21, %v6331_v16  ;;  %v8133_v40 = vld [vmem:[#allocation5 + $0x3] ss:$0 sm:$0xff]  ;;  %v9152_v16 = vld [vmem:[#allocation46_spill] sm:$0xff] }
 0x224   :  { %905 = vmatprep.subr.bf16.mxu0 %v7754_v22  ;;  %958 = vmatprep.subr.bf16.mxu1 %v7760_v27  ;;  %vm1419_vm2 = vcmp.eq.s32.totalorder %v7668_v2, %v8133_v40  ;;  %vm1420_vm4 = vcmp.eq.s32.totalorder %v9148_v36, %v8133_v40  ;;  %vm1421_vm5 = vcmp.eq.s32.totalorder %v9149_v47, %v8133_v40  ;;  %v9153_v21 = vld [vmem:[#allocation47_spill] sm:$0xff] }
 0x225   :  { %1188 = vxpose.xlu0.c.b16.cont [7/8] (narrow) %v1180_v3, 32  ;;  %vm1422_vm14 = vcmp.eq.s32.totalorder %v7683_v7, %v8133_v40  ;;  %v6360_v33 = vsel %vm1419_vm2, 1.0, %v9142_v53  ;;  %v6361_v56 = vsel %vm1420_vm4, 1.0, %v9142_v53  ;;  %v6362_v0 = vsel %vm1421_vm5, 1.0, %v9142_v53 }
 0x226   :  { %6259 = vmatmul.mubr.msk.bf16.vlgmr.msra.gmra.mrb[8].mxu0 %vm738_vm13, %v8073_v46  ;;  %6272 = vmatmul.mubr.msk.bf16.vlgmr.msra.gmra.mrb[8].mxu1 %vm738_vm13, %v8073_v46  ;;  %v6363_v20 = vsel %vm1422_vm14, 1.0, %v9142_v53  ;;  %vm1424_vm0 = vcmp.eq.s32.totalorder %v9151_v1, %v8133_v40  ;;  %vm1425_vm1 = vcmp.eq.s32.totalorder %v9152_v16, %v8133_v40  ;;  %vm1426_vm2 = vcmp.eq.s32.totalorder %v9153_v21, %v8133_v40  ;;  %v9157_v1 = vld [vmem:[#allocation51_spill] sm:$0xff] }
 0x227   :  { %906 = vmatpush1.bf16.msra.mxu0 %v7770_v30  ;;  %959 = vmatpush1.bf16.msra.mxu1 %v7772_v31  ;;  %v1468_v17 = vpack.c.bf16 %v6363_v20, %v6362_v0  ;;  %v6365_v7 = vsel %vm1424_vm0, 1.0, %v9142_v53  ;;  %v6366_v36 = vsel %vm1425_vm1, 1.0, %v9142_v53  ;;  %v6367_v47 = vsel %vm1426_vm2, 1.0, %v9142_v53 }
 0x228   :  { %907 = vmatprep.subr.bf16.mxu0 %v7775_v32  ;;  %960 = vmatprep.subr.bf16.mxu1 %v7779_v35  ;;  %v1470_v0 = vpack.c.bf16 %v6367_v47, %v6366_v36  ;;  %vm1431_vm0 = vcmp.eq.s32.totalorder %v7828_v52, %v8133_v40 }
 0x229   :  { %937 = vmatprep.mubr.bf16.mxu0 %v9146_v50  ;;  %990 = vmatprep.mubr.bf16.mxu1 %v9146_v50 }
 0x22a   :  { %1189 = vxpose.xlu0.c.b16.end [8/8] (narrow) %v1181_v39, 32 }
 0x22b   :  { %908 = vmatpush1.bf16.msra.mxu0 %v7784_v37  ;;  %961 = vmatpush1.bf16.msra.mxu1 %v7786_v38 }
 0x22c   :  { %909 = vmatprep.subr.bf16.mxu0 %v7799_v41  ;;  %962 = vmatprep.subr.bf16.mxu1 %v7801_v42 }
 0x22f   :  { %910 = vmatpush1.bf16.msra.mxu0 %v7804_v44  ;;  %963 = vmatpush1.bf16.msra.mxu1 %v7806_v45 }
 0x230   :  { %911 = vmatprep.subr.bf16.mxu0 %v7812_v48  ;;  %964 = vmatprep.subr.bf16.mxu1 %v7825_v51 }
 0x233   :  { %912 = vmatpush1.bf16.msra.mxu0 %v7834_v55  ;;  %965 = vmatpush1.bf16.msra.mxu1 %v7840_v58 }
 0x234   :  { %913 = vmatprep.subr.bf16.mxu0 %v7842_v59  ;;  %966 = vmatprep.subr.bf16.mxu1 %v7849_v60 }
 0x237   :  { %914 = vmatpush1.bf16.msra.mxu0 %v7856_v62  ;;  %967 = vmatpush1.bf16.msra.mxu1 %v7858_v63 }
 0x238   :  { %915 = vmatprep.subr.bf16.mxu0 %v7864_v8  ;;  %968 = vmatprep.subr.bf16.mxu1 %v7873_v12 }
 0x23b   :  { %916 = vmatpush1.bf16.msra.mxu0 %v7878_v23  ;;  %969 = vmatpush1.bf16.msra.mxu1 %v7882_v24 }
 0x23c   :  { %917 = vmatprep.subr.bf16.mxu0 %v7884_v25  ;;  %970 = vmatprep.subr.bf16.mxu1 %v7891_v28 }
 0x23f   :  { %918 = vmatpush1.bf16.msra.mxu0 %v7895_v34  ;;  %971 = vmatpush1.bf16.msra.mxu1 %v7920_v57 }
 0x240   :  { %919 = vmatprep.subr.bf16.mxu0 %v7922_v61  ;;  %972 = vmatprep.subr.bf16.mxu1 %v7927_v5 }
 0x243   :  { %920 = vmatpush1.bf16.msra.mxu0 %v7932_v14  ;;  %973 = vmatpush1.bf16.msra.mxu1 %v7938_v43 }
 0x246   :  { %938 = vmatmul.mubr.bf16.vlgmr.msra.gmra.mrb[12].mxu0 %v897_v26  ;;  %991 = vmatmul.mubr.bf16.vlgmr.msra.gmra.mrb[12].mxu1 %v897_v26  ;;  %v1467_v26 = vpack.c.bf16 %v6361_v56, %v6360_v33  ;;  %v9154_v33 = vld [vmem:[#allocation48_spill] sm:$0xff]  ;;  %v9155_v56 = vld [vmem:[#allocation49_spill] sm:$0xff] }
 0x247   :  { %947 = vmatprep.mubr.bf16.mxu0 %v9146_v50  ;;  %1000 = vmatprep.mubr.bf16.mxu1 %v9146_v50  ;;  %vm1427_vm4 = vcmp.eq.s32.totalorder %v9154_v33, %v8133_v40  ;;  %vm1428_vm5 = vcmp.eq.s32.totalorder %v9155_v56, %v8133_v40 }
 0x248   :  { %1475 = vxpose.xlu1.c.b16.start [1/8] (narrow) %v1467_v26, 32  ;;  %v6368_v20 = vsel %vm1427_vm4, 1.0, %v9142_v53  ;;  %v6369_v26 = vsel %vm1428_vm5, 1.0, %v9142_v53 }
 0x24c   :  { %1476 = vxpose.xlu1.c.b16.cont [2/8] (narrow) %v1468_v17, 32  ;;  %v1471_v17 = vpack.c.bf16 %v6369_v26, %v6368_v20 }
 0x24e   :  { %948 = vmatmul.mubr.bf16.gmra.mrb[16].mxu0 %v898_v13  ;;  %1001 = vmatmul.mubr.bf16.gmra.mrb[16].mxu1 %v898_v13  ;;  %v9150_v13 = vld [vmem:[#allocation44_spill] sm:$0xff] }
 0x24f   :  { %1067 = vmatprep.mubr.bf16.mxu0 %v9146_v50  ;;  %1108 = vmatprep.mubr.bf16.mxu1 %v9146_v50  ;;  %vm1423_vm15 = vcmp.eq.s32.totalorder %v9150_v13, %v8133_v40  ;;  %v9156_v13 = vld [vmem:[#allocation50_spill] sm:$0xff] }
 0x250   :  { %v6364_v3 = vsel %vm1423_vm15, 1.0, %v9142_v53  ;;  %vm1429_vm14 = vcmp.eq.s32.totalorder %v9156_v13, %v8133_v40  ;;  %vm1430_vm15 = vcmp.eq.s32.totalorder %v9157_v1, %v8133_v40 }
 0x251   :  { %v1469_v39 = vpack.c.bf16 %v6365_v7, %v6364_v3  ;;  %v6370_v3 = vsel %vm1429_vm14, 1.0, %v9142_v53  ;;  %v6371_v7 = vsel %vm1430_vm15, 1.0, %v9142_v53 }
 0x252   :  { %v1472_v16 = vpack.c.bf16 %v6371_v7, %v6370_v3 }
 0x253   :  { %1477 = vxpose.xlu1.c.b16.cont [3/8] (narrow) %v1469_v39, 32 }
 0x257   :  { %1478 = vxpose.xlu1.c.b16.cont [4/8] (narrow) %v1470_v0, 32 }
 0x25b   :  { %1479 = vxpose.xlu1.c.b16.cont [5/8] (narrow) %v1471_v17, 32 }
 0x25f   :  { %1480 = vxpose.xlu1.c.b16.cont [6/8] (narrow) %v1472_v16, 32 }
 0x2f9   :  { %v776_v21 = vpop.f32.mrb[8].mxu0  ;;  %v817_v39 = vpop.f32.mrb[8].mxu1 }
 0x2fa   :  { %v8171_v36 = vpack.c.bf16 %v776_v21, %v776_v21  ;;  %v8173_v47 = vpack.c.bf16 %v817_v39, %v817_v39  ;;  %v778_v33 = vpop.f32.mrb[9].mxu0  ;;  %v819_v56 = vpop.f32.mrb[9].mxu1 }
 0x2fb   :  { %v8175_v13 = vpack.c.bf16 %v778_v33, %v778_v33  ;;  %v8177_v1 = vpack.c.bf16 %v819_v56, %v819_v56  ;;  %v780_v0 = vpop.f32.mrb[10].mxu0  ;;  %v821_v20 = vpop.f32.mrb[10].mxu1 }
 0x2fc   :  { %9158 = vst [vmem:[#allocation40_spill] sm:$0xff] %v8171_v36  ;;  %9159 = vst [vmem:[#allocation41_spill] sm:$0xff] %v8173_v47  ;;  %v781_v26 = vpop.f32.mrb[11].mxu0  ;;  %v822_v2 = vpop.f32.mrb[11].mxu1 }
 0x319   :  { %v939_v18 = vpop.f32.mrb[12].mxu0  ;;  %v992_v17 = vpop.f32.mrb[12].mxu1 }
 0x31a   :  { %v941_v3 = vpop.f32.mrb[13].mxu0  ;;  %v994_v7 = vpop.f32.mrb[13].mxu1 }
 0x31b   :  { %v943_v16 = vpop.f32.mrb[14].mxu0  ;;  %v996_v9 = vpop.f32.mrb[14].mxu1 }
 0x31c   :  { %v6294_v21 = vpack.c.bf16 %v943_v16, %v939_v18  ;;  %v6307_v36 = vpack.c.bf16 %v996_v9, %v992_v17  ;;  %v945_v39 = vpop.f32.mrb[15].mxu0  ;;  %v998_v47 = vpop.f32.mrb[15].mxu1 }
 0x31d   :  { %v6291_v53 = vpack.c.bf16 %v945_v39, %v941_v3  ;;  %v6304_v54 = vpack.c.bf16 %v998_v47, %v994_v7 }
 0x31f   :  { %6292 = vmatprep.subr.msk.bf16.mxu0 %vm8021_vm6, %v6291_v53  ;;  %6305 = vmatprep.subr.msk.bf16.mxu1 %vm8025_vm9, %v6304_v54 }
 0x320   :  { %6295 = vmatpush1.bf16.msk.msra.mxu0 %vm8033_vm10, %v6294_v21  ;;  %6308 = vmatpush1.bf16.msk.msra.mxu1 %vm8037_vm11, %v6307_v36 }
 0x321   :  { %v949_v2 = vpop.f32.mrb[16].mxu0  ;;  %v1002_v33 = vpop.f32.mrb[16].mxu1 }
 0x322   :  { %v951_v18 = vpop.f32.mrb[17].mxu0  ;;  %v1004_v9 = vpop.f32.mrb[17].mxu1 }
 0x323   :  { %v953_v56 = vpop.f32.mrb[18].mxu0  ;;  %v1006_v0 = vpop.f32.mrb[18].mxu1 }
 0x324   :  { %v6300_v20 = vpack.c.bf16 %v953_v56, %v949_v2  ;;  %v6313_v47 = vpack.c.bf16 %v1006_v0, %v1002_v33  ;;  %v955_v26 = vpop.f32.mrb[19].mxu0  ;;  %v1008_v17 = vpop.f32.mrb[19].mxu1 }
 0x325   :  { %v6297_v53 = vpack.c.bf16 %v955_v26, %v951_v18  ;;  %v6310_v3 = vpack.c.bf16 %v1008_v17, %v1004_v9 }
 0x327   :  { %6298 = vmatprep.subr.msk.bf16.mxu0 %vm8051_vm3, %v6297_v53  ;;  %6311 = vmatprep.subr.msk.bf16.mxu1 %vm8055_vm7, %v6310_v3 }
 0x328   :  { %6301 = vmatpush1.bf16.msk.msra.mxu0 %vm8060_vm8, %v6300_v20  ;;  %6314 = vmatpush1.bf16.msk.msra.mxu1 %vm8065_vm12, %v6313_v47 }
 0x329   :  { %1198 = vmatprep.subr.bf16.mxu0 %v7754_v22  ;;  %1251 = vmatprep.subr.bf16.mxu1 %v7760_v27  ;;  %v1190_v22 = vpop.trf.xlu0 }
 0x32b   :  { %6302 = vmatmul.mubr.msk.bf16.vlgmr.msra.gmra.mrb[20].mxu0 %vm738_vm13, %v8073_v46  ;;  %6315 = vmatmul.mubr.msk.bf16.vlgmr.msra.gmra.mrb[20].mxu1 %vm738_vm13, %v8073_v46 }
 0x32c   :  { %1199 = vmatpush1.bf16.msra.mxu0 %v7770_v30  ;;  %1252 = vmatpush1.bf16.msra.mxu1 %v7772_v31  ;;  %v9160_v30 = vld [vmem:[#allocation52_spill] sm:$0xff]  ;;  %v9161_v31 = vmov 0.0  }
 0x32d   :  { %1200 = vmatprep.subr.bf16.mxu0 %v7775_v32  ;;  %1253 = vmatprep.subr.bf16.mxu1 %v7779_v35  ;;  %v1191_v27 = vpop.trf.xlu0  ;;  %vm1432_vm1 = vcmp.eq.s32.totalorder %v9160_v30, %v8133_v40  ;;  %v6372_v32 = vsel %vm1431_vm0, 1.0, %v9161_v31 }
 0x32e   :  { %1230 = vmatprep.mubr.bf16.mxu0 %v9146_v50  ;;  %1283 = vmatprep.mubr.bf16.mxu1 %v9146_v50  ;;  %v6373_v35 = vsel %vm1432_vm1, 1.0, %v9161_v31 }
 0x330   :  { %1201 = vmatpush1.bf16.msra.mxu0 %v7784_v37  ;;  %1254 = vmatpush1.bf16.msra.mxu1 %v7786_v38  ;;  %v1473_v37 = vpack.c.bf16 %v6373_v35, %v6372_v32  ;;  %v9162_v38 = vld [vmem:[#allocation53_spill] sm:$0xff] }
 0x331   :  { %1202 = vmatprep.subr.bf16.mxu0 %v7799_v41  ;;  %1255 = vmatprep.subr.bf16.mxu1 %v7801_v42  ;;  %vm1433_vm2 = vcmp.eq.s32.totalorder %v9162_v38, %v8133_v40  ;;  %v9163_v41 = vld [vmem:[#allocation54_spill] sm:$0xff] }
 0x332   :  { %1481 = vxpose.xlu1.c.b16.cont [7/8] (narrow) %v1473_v37, 32  ;;  %vm1434_vm4 = vcmp.eq.s32.totalorder %v9163_v41, %v8133_v40  ;;  %v6374_v42 = vsel %vm1433_vm2, 1.0, %v9161_v31 }
 0x334   :  { %1203 = vmatpush1.bf16.msra.mxu0 %v7804_v44  ;;  %1256 = vmatpush1.bf16.msra.mxu1 %v7806_v45  ;;  %v6375_v44 = vsel %vm1434_vm4, 1.0, %v9161_v31 }
 0x335   :  { %1204 = vmatprep.subr.bf16.mxu0 %v7812_v48  ;;  %1257 = vmatprep.subr.bf16.mxu1 %v7825_v51  ;;  %v1474_v45 = vpack.c.bf16 %v6375_v44, %v6374_v42 }
 0x337   :  { %1482 = vxpose.xlu1.c.b16.end [8/8] (narrow) %v1474_v45, 32 }
 0x338   :  { %1205 = vmatpush1.bf16.msra.mxu0 %v7834_v55  ;;  %1258 = vmatpush1.bf16.msra.mxu1 %v7840_v58 }
 0x339   :  { %1206 = vmatprep.subr.bf16.mxu0 %v7842_v59  ;;  %1259 = vmatprep.subr.bf16.mxu1 %v7849_v60 }
 0x33c   :  { %1207 = vmatpush1.bf16.msra.mxu0 %v7856_v62  ;;  %1260 = vmatpush1.bf16.msra.mxu1 %v7858_v63 }
 0x33d   :  { %1208 = vmatprep.subr.bf16.mxu0 %v7864_v8  ;;  %1261 = vmatprep.subr.bf16.mxu1 %v7873_v12 }
 0x340   :  { %1209 = vmatpush1.bf16.msra.mxu0 %v7878_v23  ;;  %1262 = vmatpush1.bf16.msra.mxu1 %v7882_v24 }
 0x341   :  { %1210 = vmatprep.subr.bf16.mxu0 %v7884_v25  ;;  %1263 = vmatprep.subr.bf16.mxu1 %v7891_v28 }
 0x344   :  { %1211 = vmatpush1.bf16.msra.mxu0 %v7895_v34  ;;  %1264 = vmatpush1.bf16.msra.mxu1 %v7920_v57 }
 0x345   :  { %1212 = vmatprep.subr.bf16.mxu0 %v7922_v61  ;;  %1265 = vmatprep.subr.bf16.mxu1 %v7927_v5 }
 0x348   :  { %1213 = vmatpush1.bf16.msra.mxu0 %v7932_v14  ;;  %1266 = vmatpush1.bf16.msra.mxu1 %v7938_v43 }
 0x34b   :  { %1231 = vmatmul.mubr.bf16.vlgmr.msra.gmra.mrb[24].mxu0 %v1190_v22  ;;  %1284 = vmatmul.mubr.bf16.vlgmr.msra.gmra.mrb[24].mxu1 %v1190_v22 }
 0x34c   :  { %1240 = vmatprep.mubr.bf16.mxu0 %v9146_v50  ;;  %1293 = vmatprep.mubr.bf16.mxu1 %v9146_v50 }
 0x353   :  { %1241 = vmatmul.mubr.bf16.gmra.mrb[28].mxu0 %v1191_v27  ;;  %1294 = vmatmul.mubr.bf16.gmra.mrb[28].mxu1 %v1191_v27 }
 0x354   :  { %1360 = vmatprep.mubr.bf16.mxu0 %v9146_v50  ;;  %1401 = vmatprep.mubr.bf16.mxu1 %v9146_v50 }
 0x3fe   :  { %v1069_v48 = vpop.f32.mrb[20].mxu0  ;;  %v1110_v51 = vpop.f32.mrb[20].mxu1 }
 0x3ff   :  { %v8249_v52 = vpack.c.bf16 %v1069_v48, %v1069_v48  ;;  %v8251_v54 = vpack.c.bf16 %v1110_v51, %v1110_v51  ;;  %v1071_v36 = vpop.f32.mrb[21].mxu0  ;;  %v1112_v7 = vpop.f32.mrb[21].mxu1 }
 0x400   :  { %v8253_v16 = vpack.c.bf16 %v1071_v36, %v1071_v36  ;;  %v8255_v21 = vpack.c.bf16 %v1112_v7, %v1112_v7  ;;  %v1073_v39 = vpop.f32.mrb[22].mxu0  ;;  %v1114_v40 = vpop.f32.mrb[22].mxu1  ;;  %v7078_v36 = vld [vmem:[#allocation8 + $0x4] ss:$16 sps:$4 sm:$0xff]   ;;  %v7079_v7 = vld [vmem:[#allocation8 + $0xc] ss:$16 sps:$4 sm:$0xff]  }
 0x401   :  { %v1074_v2 = vpop.f32.mrb[23].mxu0  ;;  %v1115_v33 = vpop.f32.mrb[23].mxu1  ;;  %v7080_v39 = vld [vmem:[#allocation8] ss:$16 sps:$4 sm:$0xff]   ;;  %v7081_v40 = vld [vmem:[#allocation8 + $0x8] ss:$16 sps:$4 sm:$0xff]  }
 0x402   :  { %v7082_v2 = vld [vmem:[#allocation8 + $0x24] ss:$16 sps:$4 sm:$0xff]   ;;  %v7083_v33 = vld [vmem:[#allocation8 + $0x2c] ss:$16 sps:$4 sm:$0xff]  }
 0x41e   :  { %v1232_v18 = vpop.f32.mrb[24].mxu0  ;;  %v1285_v9 = vpop.f32.mrb[24].mxu1 }
 0x41f   :  { %v1234_v56 = vpop.f32.mrb[25].mxu0  ;;  %v1287_v0 = vpop.f32.mrb[25].mxu1 }
 0x420   :  { %v1236_v20 = vpop.f32.mrb[26].mxu0  ;;  %v1289_v47 = vpop.f32.mrb[26].mxu1 }
 0x421   :  { %v6337_v26 = vpack.c.bf16 %v1236_v20, %v1232_v18  ;;  %v6350_v17 = vpack.c.bf16 %v1289_v47, %v1285_v9  ;;  %v1238_v53 = vpop.f32.mrb[27].mxu0  ;;  %v1291_v3 = vpop.f32.mrb[27].mxu1  ;;  %v7084_v18 = vld [vmem:[#allocation8 + $0x20] ss:$16 sps:$4 sm:$0xff]   ;;  %v7085_v9 = vld [vmem:[#allocation8 + $0x28] ss:$16 sps:$4 sm:$0xff]  }
 0x422   :  { %v6334_v22 = vpack.c.bf16 %v1238_v53, %v1234_v56  ;;  %v6347_v27 = vpack.c.bf16 %v1291_v3, %v1287_v0  ;;  %v7086_v56 = vld [vmem:[#allocation8 + $0x44] ss:$16 sps:$4 sm:$0xff]   ;;  %v7087_v0 = vld [vmem:[#allocation8 + $0x4c] ss:$16 sps:$4 sm:$0xff]   ;;  %v7088_v20 = vld [vmem:[#allocation8 + $0x40] ss:$16 sps:$4 sm:$0xff]  }
 0x423   :  { %v7089_v47 = vld [vmem:[#allocation8 + $0x48] ss:$16 sps:$4 sm:$0xff]  }
 0x424   :  { %6335 = vmatprep.subr.msk.bf16.mxu0 %vm8021_vm6, %v6334_v22  ;;  %6348 = vmatprep.subr.msk.bf16.mxu1 %vm8025_vm9, %v6347_v27 }
 0x425   :  { %6338 = vmatpush1.bf16.msk.msra.mxu0 %vm8033_vm10, %v6337_v26  ;;  %6351 = vmatpush1.bf16.msk.msra.mxu1 %vm8037_vm11, %v6350_v17  ;;  %v7090_v26 = vld [vmem:[#allocation8 + $0x64] ss:$16 sps:$4 sm:$0xff]   ;;  %v7091_v17 = vld [vmem:[#allocation8 + $0x6c] ss:$16 sps:$4 sm:$0xff]  }
 0x426   :  { %v1242_v30 = vpop.f32.mrb[28].mxu0  ;;  %v1295_v31 = vpop.f32.mrb[28].mxu1 }
 0x427   :  { %v1244_v32 = vpop.f32.mrb[29].mxu0  ;;  %v1297_v35 = vpop.f32.mrb[29].mxu1 }
 0x428   :  { %v1246_v37 = vpop.f32.mrb[30].mxu0  ;;  %v1299_v38 = vpop.f32.mrb[30].mxu1 }
 0x429   :  { %v6343_v41 = vpack.c.bf16 %v1246_v37, %v1242_v30  ;;  %v6356_v42 = vpack.c.bf16 %v1299_v38, %v1295_v31  ;;  %v1248_v44 = vpop.f32.mrb[31].mxu0  ;;  %v1301_v45 = vpop.f32.mrb[31].mxu1 }
 0x42a   :  { %v6340_v48 = vpack.c.bf16 %v1248_v44, %v1244_v32  ;;  %v6353_v51 = vpack.c.bf16 %v1301_v45, %v1297_v35 }
 0x42c   :  { %6341 = vmatprep.subr.msk.bf16.mxu0 %vm8051_vm3, %v6340_v48  ;;  %6354 = vmatprep.subr.msk.bf16.mxu1 %vm8055_vm7, %v6353_v51 }
 0x42d   :  { %6344 = vmatpush1.bf16.msk.msra.mxu0 %vm8060_vm8, %v6343_v41  ;;  %6357 = vmatpush1.bf16.msk.msra.mxu1 %vm8065_vm12, %v6356_v42 }
 0x42e   :  { %1491 = vmatprep.subr.bf16.mxu0 %v7078_v36  ;;  %1544 = vmatprep.subr.bf16.mxu1 %v7079_v7 }
 0x430   :  { %6345 = vmatmul.mubr.msk.bf16.vlgmr.msra.gmra.mrb[32].mxu0 %vm738_vm13, %v8073_v46  ;;  %6358 = vmatmul.mubr.msk.bf16.vlgmr.msra.gmra.mrb[32].mxu1 %vm738_vm13, %v8073_v46 }
 0x431   :  { %1492 = vmatpush1.bf16.msra.mxu0 %v7080_v39  ;;  %1545 = vmatpush1.bf16.msra.mxu1 %v7081_v40 }
 0x432   :  { %1493 = vmatprep.subr.bf16.mxu0 %v7082_v2  ;;  %1546 = vmatprep.subr.bf16.mxu1 %v7083_v33 }
 0x433   :  { %1523 = vmatprep.mubr.bf16.mxu0 %v9146_v50  ;;  %1576 = vmatprep.mubr.bf16.mxu1 %v9146_v50 }
 0x435   :  { %1494 = vmatpush1.bf16.msra.mxu0 %v7084_v18  ;;  %1547 = vmatpush1.bf16.msra.mxu1 %v7085_v9 }
 0x436   :  { %1495 = vmatprep.subr.bf16.mxu0 %v7086_v56  ;;  %1548 = vmatprep.subr.bf16.mxu1 %v7087_v0 }
 0x439   :  { %1496 = vmatpush1.bf16.msra.mxu0 %v7088_v20  ;;  %1549 = vmatpush1.bf16.msra.mxu1 %v7089_v47 }
 0x43a   :  { %1497 = vmatprep.subr.bf16.mxu0 %v7090_v26  ;;  %1550 = vmatprep.subr.bf16.mxu1 %v7091_v17 }
 0x43d   :  { %1498 = vmatpush1.bf16.msra.mxu0 %v7834_v55  ;;  %1551 = vmatpush1.bf16.msra.mxu1 %v7840_v58  ;;  %v1483_v55 = vpop.trf.xlu1 }
 0x43e   :  { %1499 = vmatprep.subr.bf16.mxu0 %v7842_v59  ;;  %1552 = vmatprep.subr.bf16.mxu1 %v7849_v60 }
 0x441   :  { %1500 = vmatpush1.bf16.msra.mxu0 %v7856_v62  ;;  %1553 = vmatpush1.bf16.msra.mxu1 %v7858_v63  ;;  %v1484_v58 = vpop.trf.xlu1 }
 0x442   :  { %1501 = vmatprep.subr.bf16.mxu0 %v7864_v8  ;;  %1554 = vmatprep.subr.bf16.mxu1 %v7873_v12 }
 0x445   :  { %1502 = vmatpush1.bf16.msra.mxu0 %v7878_v23  ;;  %1555 = vmatpush1.bf16.msra.mxu1 %v7882_v24 }
 0x446   :  { %1503 = vmatprep.subr.bf16.mxu0 %v7884_v25  ;;  %1556 = vmatprep.subr.bf16.mxu1 %v7891_v28 }
 0x449   :  { %1504 = vmatpush1.bf16.msra.mxu0 %v7895_v34  ;;  %1557 = vmatpush1.bf16.msra.mxu1 %v7920_v57 }
 0x44a   :  { %1505 = vmatprep.subr.bf16.mxu0 %v7922_v61  ;;  %1558 = vmatprep.subr.bf16.mxu1 %v7927_v5 }
 0x44d   :  { %1506 = vmatpush1.bf16.msra.mxu0 %v7932_v14  ;;  %1559 = vmatpush1.bf16.msra.mxu1 %v7938_v43 }
 0x450   :  { %1524 = vmatmul.mubr.bf16.vlgmr.msra.gmra.mrb[36].mxu0 %v1483_v55  ;;  %1577 = vmatmul.mubr.bf16.vlgmr.msra.gmra.mrb[36].mxu1 %v1483_v55 }
 0x451   :  { %1533 = vmatprep.mubr.bf16.mxu0 %v9146_v50  ;;  %1586 = vmatprep.mubr.bf16.mxu1 %v9146_v50 }
 0x458   :  { %1534 = vmatmul.mubr.bf16.gmra.mrb[40].mxu0 %v1484_v58  ;;  %1587 = vmatmul.mubr.bf16.gmra.mrb[40].mxu1 %v1484_v58 }
 0x459   :  { %1653 = vmatprep.mubr.bf16.mxu0 %v9146_v50  ;;  %1694 = vmatprep.mubr.bf16.mxu1 %v9146_v50 }
 0x503   :  { %v1362_v59 = vpop.f32.mrb[32].mxu0  ;;  %v1403_v60 = vpop.f32.mrb[32].mxu1 }
 0x504   :  { %v8301_v62 = vpack.c.bf16 %v1362_v59, %v1362_v59  ;;  %v8303_v63 = vpack.c.bf16 %v1403_v60, %v1403_v60  ;;  %v1364_v8 = vpop.f32.mrb[33].mxu0  ;;  %v1405_v12 = vpop.f32.mrb[33].mxu1 }
 0x505   :  { %v8305_v23 = vpack.c.bf16 %v1364_v8, %v1364_v8  ;;  %v8307_v24 = vpack.c.bf16 %v1405_v12, %v1405_v12  ;;  %v1366_v25 = vpop.f32.mrb[34].mxu0  ;;  %v1407_v28 = vpop.f32.mrb[34].mxu1 }
 0x506   :  { %v1367_v34 = vpop.f32.mrb[35].mxu0  ;;  %v1408_v57 = vpop.f32.mrb[35].mxu1 }
 0x523   :  { %v1525_v61 = vpop.f32.mrb[36].mxu0  ;;  %v1578_v5 = vpop.f32.mrb[36].mxu1 }
 0x524   :  { %v1527_v14 = vpop.f32.mrb[37].mxu0  ;;  %v1580_v43 = vpop.f32.mrb[37].mxu1 }
 0x525   :  { %v1529_v53 = vpop.f32.mrb[38].mxu0  ;;  %v1582_v3 = vpop.f32.mrb[38].mxu1 }
 0x526   :  { %v6380_v22 = vpack.c.bf16 %v1529_v53, %v1525_v61  ;;  %v6393_v27 = vpack.c.bf16 %v1582_v3, %v1578_v5  ;;  %v1531_v30 = vpop.f32.mrb[39].mxu0  ;;  %v1584_v31 = vpop.f32.mrb[39].mxu1 }
 0x527   :  { %v6377_v32 = vpack.c.bf16 %v1531_v30, %v1527_v14  ;;  %v6390_v35 = vpack.c.bf16 %v1584_v31, %v1580_v43 }
 0x529   :  { %6378 = vmatprep.subr.msk.bf16.mxu0 %vm8021_vm6, %v6377_v32  ;;  %6391 = vmatprep.subr.msk.bf16.mxu1 %vm8025_vm9, %v6390_v35 }
 0x52a   :  { %6381 = vmatpush1.bf16.msk.msra.mxu0 %vm8033_vm10, %v6380_v22  ;;  %6394 = vmatpush1.bf16.msk.msra.mxu1 %vm8037_vm11, %v6393_v27 }
 0x52b   :  { %v1535_v37 = vpop.f32.mrb[40].mxu0  ;;  %v1588_v38 = vpop.f32.mrb[40].mxu1 }
 0x52c   :  { %v1537_v41 = vpop.f32.mrb[41].mxu0  ;;  %v1590_v42 = vpop.f32.mrb[41].mxu1 }
 0x52d   :  { %v1539_v44 = vpop.f32.mrb[42].mxu0  ;;  %v1592_v45 = vpop.f32.mrb[42].mxu1 }
 0x52e   :  { %v6386_v48 = vpack.c.bf16 %v1539_v44, %v1535_v37  ;;  %v6399_v51 = vpack.c.bf16 %v1592_v45, %v1588_v38  ;;  %v1541_v36 = vpop.f32.mrb[43].mxu0  ;;  %v1594_v7 = vpop.f32.mrb[43].mxu1 }
 0x52f   :  { %v6383_v39 = vpack.c.bf16 %v1541_v36, %v1537_v41  ;;  %v6396_v40 = vpack.c.bf16 %v1594_v7, %v1590_v42 }
 0x531   :  { %6384 = vmatprep.subr.msk.bf16.mxu0 %vm8051_vm3, %v6383_v39  ;;  %6397 = vmatprep.subr.msk.bf16.mxu1 %vm8055_vm7, %v6396_v40 }
 0x532   :  { %6387 = vmatpush1.bf16.msk.msra.mxu0 %vm8060_vm8, %v6386_v48  ;;  %6400 = vmatpush1.bf16.msk.msra.mxu1 %vm8065_vm12, %v6399_v51 }
 0x535   :  { %6388 = vmatmul.mubr.msk.bf16.vlgmr.msra.gmra.mrb[44].mxu0 %vm738_vm13, %v8073_v46  ;;  %6401 = vmatmul.mubr.msk.bf16.vlgmr.msra.gmra.mrb[44].mxu1 %vm738_vm13, %v8073_v46 }
 0x608   :  { %v1655_v2 = vpop.f32.mrb[44].mxu0  ;;  %v1696_v33 = vpop.f32.mrb[44].mxu1 }
 0x609   :  { %v8329_v18 = vpack.c.bf16 %v1655_v2, %v1655_v2  ;;  %v8331_v9 = vpack.c.bf16 %v1696_v33, %v1696_v33  ;;  %v1657_v56 = vpop.f32.mrb[45].mxu0  ;;  %v1698_v0 = vpop.f32.mrb[45].mxu1 }
 0x60a   :  { %v8333_v20 = vpack.c.bf16 %v1657_v56, %v1657_v56  ;;  %v8335_v47 = vpack.c.bf16 %v1698_v0, %v1698_v0  ;;  %v1659_v26 = vpop.f32.mrb[46].mxu0  ;;  %v1700_v17 = vpop.f32.mrb[46].mxu1 }
 0x60b   :  { %v1660_v55 = vpop.f32.mrb[47].mxu0  ;;  %v1701_v58 = vpop.f32.mrb[47].mxu1 }
 0x60c   :  { %7426 = dma.done.wait [#allocation4], 65536 }
 0x60d   :  { %7427 = vsyncadd [#allocation4], 4294901760  ;;  %2277 = vmatprep.mubr.bf16.mxu0 %v8175_v13  ;;  %2605 = vmatprep.mubr.bf16.mxu1 %v8175_v13  ;;  %v8339_v46 = vld [vmem:[#allocation17] sm:$0xff]  ;;  %v8341_v59 = vld [vmem:[#allocation17 + $0x8] sm:$0xff] }
 0x60e   :  { %9164 = vst [vmem:[#allocation44_spill] sm:$0xff] %v8341_v59  ;;  %v8343_v60 = vld [vmem:[#allocation19] sm:$0xf]  ;;  %v8345_v8 = vld [vmem:[#allocation19 + $0x4] sm:$0xf] }
 0x60f   :  { %v8347_v12 = vld [vmem:[#allocation19 + $0x8] sm:$0xf]  ;;  %v8349_v25 = vld [vmem:[#allocation19 + $0xc] sm:$0xf]  ;;  %v8351_v28 = vld [vmem:[#allocation19 + $0x10] sm:$0xf] }
 0x610   :  { %v8353_v34 = vld [vmem:[#allocation19 + $0x14] sm:$0xf]  ;;  %v8355_v57 = vld [vmem:[#allocation19 + $0x18] sm:$0xf]  ;;  %v8357_v61 = vld [vmem:[#allocation19 + $0x1c] sm:$0xf] }
 0x611   :  { %v8359_v13 = vld [vmem:[#allocation19 + $0x20] sm:$0xf]  ;;  %v8361_v5 = vld [vmem:[#allocation19 + $0x24] sm:$0xf]  ;;  %v8363_v14 = vld [vmem:[#allocation19 + $0x28] sm:$0xf] }
 0x612   :  { %9165 = vst [vmem:[#allocation45_spill] sm:$0xff] %v8359_v13  ;;  %9166 = vst [vmem:[#allocation46_spill] sm:$0xff] %v8361_v5  ;;  %v8365_v43 = vld [vmem:[#allocation19 + $0x2c] sm:$0xf]  ;;  %v8367_v53 = vld [vmem:[#allocation19 + $0x30] sm:$0xf] }
 0x613   :  { %9167 = vst [vmem:[#allocation47_spill] sm:$0xff] %v8363_v14  ;;  %9168 = vst [vmem:[#allocation48_spill] sm:$0xff] %v8365_v43  ;;  %v8369_v3 = vld [vmem:[#allocation19 + $0x34] sm:$0xf]  ;;  %v8371_v22 = vld [vmem:[#allocation19 + $0x38] sm:$0xf] }
 0x614   :  { %9169 = vst [vmem:[#allocation49_spill] sm:$0xff] %v8367_v53  ;;  %9170 = vst [vmem:[#allocation50_spill] sm:$0xff] %v8369_v3  ;;  %v8373_v27 = vld [vmem:[#allocation19 + $0x3c] sm:$0xf]  ;;  %v8375_v30 = vld [vmem:[#allocation19 + $0x40] sm:$0xf] }
 0x615   :  { %9171 = vst [vmem:[#allocation51_spill] sm:$0xff] %v8371_v22  ;;  %9172 = vst [vmem:[#allocation52_spill] sm:$0xff] %v8373_v27  ;;  %v8377_v31 = vld [vmem:[#allocation19 + $0x44] sm:$0xf]  ;;  %v8379_v32 = vld [vmem:[#allocation19 + $0x48] sm:$0xf] }
 0x616   :  { %v8381_v35 = vld [vmem:[#allocation19 + $0x4c] sm:$0xf]  ;;  %v8383_v37 = vld [vmem:[#allocation19 + $0x50] sm:$0xf]  ;;  %v8385_v38 = vld [vmem:[#allocation19 + $0x54] sm:$0xf] }
 0x617   :  { %v8387_v41 = vld [vmem:[#allocation19 + $0x58] sm:$0xf]  ;;  %v8389_v42 = vld [vmem:[#allocation19 + $0x5c] sm:$0xf]  ;;  %v8391_v44 = vld [vmem:[#allocation19 + $0x60] sm:$0xf] }
 0x618   :  { %v8393_v45 = vld [vmem:[#allocation19 + $0x64] sm:$0xf]  ;;  %v8395_v48 = vld [vmem:[#allocation19 + $0x68] sm:$0xf]  ;;  %v8397_v51 = vld [vmem:[#allocation19 + $0x6c] sm:$0xf] }
 0x619   :  { %9173 = vst [vmem:[#allocation53_spill] sm:$0xff] %v8395_v48  ;;  %9174 = vst [vmem:[#allocation54_spill] sm:$0xff] %v8397_v51  ;;  %v8399_v36 = vld [vmem:[#allocation19 + $0x70] sm:$0xf]  ;;  %v8401_v7 = vld [vmem:[#allocation19 + $0x74] sm:$0xf] }
 0x61a   :  { %9175 = vst [vmem:[#allocation63_spill] sm:$0xff] %v8399_v36  ;;  %9176 = vst [vmem:[#allocation64_spill] sm:$0xff] %v8401_v7  ;;  %v8403_v39 = vld [vmem:[#allocation19 + $0x78] sm:$0xf]  ;;  %v8405_v40 = vld [vmem:[#allocation19 + $0x7c] sm:$0xf] }
 0x61b   :  { %9177 = vst [vmem:[#allocation65_spill] sm:$0xff] %v8403_v39  ;;  %9178 = vst [vmem:[#allocation66_spill] sm:$0xff] %v8405_v40  ;;  %v8407_v2 = vld [vmem:[#allocation19 + $0x80] sm:$0xf]  ;;  %v8409_v33 = vld [vmem:[#allocation19 + $0x84] sm:$0xf] }
 0x61c   :  { %v8411_v56 = vld [vmem:[#allocation19 + $0x88] sm:$0xf]  ;;  %v8413_v0 = vld [vmem:[#allocation19 + $0x8c] sm:$0xf]  ;;  %v8415_v26 = vld [vmem:[#allocation19 + $0x90] sm:$0xf] }
 0x61d   :  { %v8417_v17 = vld [vmem:[#allocation19 + $0x94] sm:$0xf]  ;;  %v8419_v55 = vld [vmem:[#allocation19 + $0x98] sm:$0xf]  ;;  %v8421_v58 = vld [vmem:[#allocation19 + $0x9c] sm:$0xf] }
 0x61e   :  { %v8423_v59 = vld [vmem:[#allocation19 + $0xa0] sm:$0xf]  ;;  %v8425_v49 = vld [vmem:[#allocation19 + $0xa4] sm:$0xf]  ;;  %v8427_v6 = vld [vmem:[#allocation19 + $0xa8] sm:$0xf] }
 0x61f   :  { %9179 = vst [vmem:[#allocation67_spill] sm:$0xff] %v8423_v59  ;;  %9180 = vst [vmem:[#allocation68_spill] sm:$0xff] %v8425_v49  ;;  %v8429_v29 = vld [vmem:[#allocation19 + $0xac] sm:$0xf]  ;;  %v8431_v4 = vld [vmem:[#allocation19 + $0xb0] sm:$0xf] }
 0x620   :  { %9181 = vst [vmem:[#allocation69_spill] sm:$0xff] %v8427_v6  ;;  %9182 = vst [vmem:[#allocation70_spill] sm:$0xff] %v8429_v29  ;;  %v8433_v10 = vld [vmem:[#allocation19 + $0xb4] sm:$0xf]  ;;  %v8435_v19 = vld [vmem:[#allocation19 + $0xb8] sm:$0xf] }
 0x621   :  { %9183 = vst [vmem:[#allocation71_spill] sm:$0xff] %v8431_v4  ;;  %9184 = vst [vmem:[#allocation72_spill] sm:$0xff] %v8433_v10  ;;  %v8437_v15 = vld [vmem:[#allocation19 + $0xbc] sm:$0xf]  ;;  %v8439_v11 = vld [vmem:[#allocation19 + $0xc0] sm:$0xf] }
 0x622   :  { %9185 = vst [vmem:[#allocation73_spill] sm:$0xff] %v8435_v19  ;;  %9186 = vst [vmem:[#allocation74_spill] sm:$0xff] %v8437_v15  ;;  %v8441_v22 = vld [vmem:[#allocation19 + $0xc4] sm:$0xf]  ;;  %v8443_v27 = vld [vmem:[#allocation19 + $0xc8] sm:$0xf] }
 0x623   :  { %v8445_v39 = vld [vmem:[#allocation19 + $0xcc] sm:$0xf]  ;;  %v8447_v40 = vld [vmem:[#allocation19 + $0xd0] sm:$0xf]  ;;  %v8449_v53 = vld [vmem:[#allocation19 + $0xd4] sm:$0xf] }
 0x624   :  { %v8451_v3 = vld [vmem:[#allocation19 + $0xd8] sm:$0xf]  ;;  %v8453_v4 = vld [vmem:[#allocation19 + $0xdc] sm:$0xf]  ;;  %v8455_v10 = vld [vmem:[#allocation19 + $0xe0] sm:$0xf] }
 0x625   :  { %v8457_v19 = vld [vmem:[#allocation19 + $0xe4] sm:$0xf]  ;;  %v8459_v15 = vld [vmem:[#allocation19 + $0xe8] sm:$0xf]  ;;  %v8461_v36 = vld [vmem:[#allocation19 + $0xec] sm:$0xf] }
 0x626   :  { %9187 = vst [vmem:[#allocation75_spill] sm:$0xff] %v8459_v15  ;;  %9188 = vst [vmem:[#allocation76_spill] sm:$0xff] %v8461_v36  ;;  %v8463_v7 = vld [vmem:[#allocation19 + $0xf0] sm:$0xf]  ;;  %v8465_v6 = vld [vmem:[#allocation19 + $0xf4] sm:$0xf] }
 0x627   :  { %9189 = vst [vmem:[#allocation77_spill] sm:$0xff] %v8463_v7  ;;  %9190 = vst [vmem:[#allocation78_spill] sm:$0xff] %v8465_v6  ;;  %v8467_v29 = vld [vmem:[#allocation19 + $0xf8] sm:$0xf]  ;;  %v8469_v14 = vld [vmem:[#allocation19 + $0xfc] sm:$0xf] }
 0x628   :  { %9191 = vst [vmem:[#allocation79_spill] sm:$0xff] %v8467_v29  ;;  %9192 = vst [vmem:[#allocation80_spill] sm:$0xff] %v8469_v14  ;;  %v8471_v43 = vld [vmem:[#allocation20] ss:$0 sm:$0xff]  ;;  %v1712_v48 = vld [vmem:[#allocation2 + $0x8] sm:$0xff] }
 0x629   :  { %9193 = vst [vmem:[#allocation81_spill] sm:$0xff] %v8471_v43  ;;  %v1714_v51 = vld [vmem:[#allocation2 + $0x18] sm:$0xff]  ;;  %2245 = vmatprep.subr.bf16.mxu0 %v1712_v48  ;;  %v1711_v59 = vld [vmem:[#allocation2] sm:$0xff]  ;;  %v1713_v49 = vld [vmem:[#allocation2 + $0x10] sm:$0xff] }
 0x62a   :  { %2573 = vmatprep.subr.bf16.mxu1 %v1714_v51  ;;  %v1716_v13 = vld [vmem:[#allocation2 + $0x28] sm:$0xff]  ;;  %2246 = vmatpush1.bf16.msra.mxu0 %v1711_v59  ;;  %v1718_v15 = vld [vmem:[#allocation2 + $0x38] sm:$0xff]  ;;  %v1715_v7 = vld [vmem:[#allocation2 + $0x20] sm:$0xff] }
 0x62b   :  { %2574 = vmatpush1.bf16.msra.mxu1 %v1713_v49  ;;  %2247 = vmatprep.subr.bf16.mxu0 %v1716_v13  ;;  %v1717_v6 = vld [vmem:[#allocation2 + $0x30] sm:$0xff]  ;;  %v1720_v36 = vld [vmem:[#allocation2 + $0x48] sm:$0xff]  ;;  %v1722_v29 = vld [vmem:[#allocation2 + $0x58] sm:$0xff] }
 0x62c   :  { %2575 = vmatprep.subr.bf16.mxu1 %v1718_v15  ;;  %v1719_v43 = vld [vmem:[#allocation2 + $0x40] sm:$0xff]  ;;  %v1721_v14 = vld [vmem:[#allocation2 + $0x50] sm:$0xff]  ;;  %v1724_v48 = vld [vmem:[#allocation2 + $0x68] sm:$0xff] }
 0x62d   :  { %v1726_v51 = vld [vmem:[#allocation2 + $0x78] sm:$0xff]  ;;  %v1723_v49 = vld [vmem:[#allocation2 + $0x60] sm:$0xff]  ;;  %v1725_v59 = vld [vmem:[#allocation2 + $0x70] sm:$0xff] }
 0x62e   :  { %2248 = vmatpush1.bf16.msra.mxu0 %v1715_v7  ;;  %v1728_v13 = vld [vmem:[#allocation2 + $0x88] sm:$0xff]  ;;  %v1730_v15 = vld [vmem:[#allocation2 + $0x98] sm:$0xff]  ;;  %v1727_v7 = vld [vmem:[#allocation2 + $0x80] sm:$0xff] }
 0x62f   :  { %2576 = vmatpush1.bf16.msra.mxu1 %v1717_v6  ;;  %2249 = vmatprep.subr.bf16.mxu0 %v1720_v36  ;;  %v1729_v6 = vld [vmem:[#allocation2 + $0x90] sm:$0xff]  ;;  %v1732_v36 = vld [vmem:[#allocation2 + $0xa8] sm:$0xff] }
 0x630   :  { %2577 = vmatprep.subr.bf16.mxu1 %v1722_v29  ;;  %v1734_v29 = vld [vmem:[#allocation2 + $0xb8] sm:$0xff]  ;;  %v9194_v5 = vld [vmem:[#allocation40_spill] sm:$0xff] }
 0x632   :  { %2250 = vmatpush1.bf16.msra.mxu0 %v1719_v43  ;;  %v1731_v43 = vld [vmem:[#allocation2 + $0xa0] sm:$0xff] }
 0x633   :  { %2578 = vmatpush1.bf16.msra.mxu1 %v1721_v14  ;;  %2251 = vmatprep.subr.bf16.mxu0 %v1724_v48  ;;  %v1733_v14 = vld [vmem:[#allocation2 + $0xb0] sm:$0xff]  ;;  %v1736_v48 = vld [vmem:[#allocation2 + $0xc8] sm:$0xff] }
 0x634   :  { %2579 = vmatprep.subr.bf16.mxu1 %v1726_v51  ;;  %v1738_v51 = vld [vmem:[#allocation2 + $0xd8] sm:$0xff] }
 0x636   :  { %2252 = vmatpush1.bf16.msra.mxu0 %v1723_v49  ;;  %v1735_v49 = vld [vmem:[#allocation2 + $0xc0] sm:$0xff] }
 0x637   :  { %2580 = vmatpush1.bf16.msra.mxu1 %v1725_v59  ;;  %2253 = vmatprep.subr.bf16.mxu0 %v1728_v13  ;;  %v1737_v59 = vld [vmem:[#allocation2 + $0xd0] sm:$0xff]  ;;  %v1740_v13 = vld [vmem:[#allocation2 + $0xe8] sm:$0xff] }
 0x638   :  { %2581 = vmatprep.subr.bf16.mxu1 %v1730_v15  ;;  %v1742_v15 = vld [vmem:[#allocation2 + $0xf8] sm:$0xff] }
 0x63a   :  { %2254 = vmatpush1.bf16.msra.mxu0 %v1727_v7  ;;  %v1739_v7 = vld [vmem:[#allocation2 + $0xe0] sm:$0xff] }
 0x63b   :  { %2582 = vmatpush1.bf16.msra.mxu1 %v1729_v6  ;;  %2255 = vmatprep.subr.bf16.mxu0 %v1732_v36  ;;  %v1741_v6 = vld [vmem:[#allocation2 + $0xf0] sm:$0xff]  ;;  %v1744_v36 = vld [vmem:[#allocation2 + $0x108] sm:$0xff] }
 0x63c   :  { %2583 = vmatprep.subr.bf16.mxu1 %v1734_v29  ;;  %v1746_v29 = vld [vmem:[#allocation2 + $0x118] sm:$0xff] }
 0x63e   :  { %2256 = vmatpush1.bf16.msra.mxu0 %v1731_v43  ;;  %v1743_v43 = vld [vmem:[#allocation2 + $0x100] sm:$0xff] }
 0x63f   :  { %2584 = vmatpush1.bf16.msra.mxu1 %v1733_v14  ;;  %2257 = vmatprep.subr.bf16.mxu0 %v1736_v48  ;;  %v1745_v14 = vld [vmem:[#allocation2 + $0x110] sm:$0xff]  ;;  %v1748_v48 = vld [vmem:[#allocation2 + $0x128] sm:$0xff] }
 0x640   :  { %2585 = vmatprep.subr.bf16.mxu1 %v1738_v51  ;;  %v1750_v51 = vld [vmem:[#allocation2 + $0x138] sm:$0xff] }
 0x642   :  { %2258 = vmatpush1.bf16.msra.mxu0 %v1735_v49  ;;  %v1747_v49 = vld [vmem:[#allocation2 + $0x120] sm:$0xff] }
 0x643   :  { %2586 = vmatpush1.bf16.msra.mxu1 %v1737_v59  ;;  %2259 = vmatprep.subr.bf16.mxu0 %v1740_v13  ;;  %v1749_v59 = vld [vmem:[#allocation2 + $0x130] sm:$0xff]  ;;  %v1752_v13 = vld [vmem:[#allocation2 + $0x148] sm:$0xff] }
 0x644   :  { %2587 = vmatprep.subr.bf16.mxu1 %v1742_v15  ;;  %v1754_v15 = vld [vmem:[#allocation2 + $0x158] sm:$0xff] }
 0x646   :  { %2260 = vmatpush1.bf16.msra.mxu0 %v1739_v7  ;;  %v1751_v7 = vld [vmem:[#allocation2 + $0x140] sm:$0xff] }
 0x647   :  { %2588 = vmatpush1.bf16.msra.mxu1 %v1741_v6  ;;  %2261 = vmatprep.subr.bf16.mxu0 %v1744_v36  ;;  %v1753_v6 = vld [vmem:[#allocation2 + $0x150] sm:$0xff]  ;;  %v1756_v36 = vld [vmem:[#allocation2 + $0x168] sm:$0xff] }
 0x648   :  { %2589 = vmatprep.subr.bf16.mxu1 %v1746_v29  ;;  %v1758_v29 = vld [vmem:[#allocation2 + $0x178] sm:$0xff] }
 0x64a   :  { %2262 = vmatpush1.bf16.msra.mxu0 %v1743_v43  ;;  %v1755_v43 = vld [vmem:[#allocation2 + $0x160] sm:$0xff] }
 0x64b   :  { %2590 = vmatpush1.bf16.msra.mxu1 %v1745_v14  ;;  %2263 = vmatprep.subr.bf16.mxu0 %v1748_v48  ;;  %v1757_v14 = vld [vmem:[#allocation2 + $0x170] sm:$0xff]  ;;  %v1760_v48 = vld [vmem:[#allocation2 + $0x188] sm:$0xff] }
 0x64c   :  { %2591 = vmatprep.subr.bf16.mxu1 %v1750_v51  ;;  %v1762_v51 = vld [vmem:[#allocation2 + $0x198] sm:$0xff] }
 0x64e   :  { %2264 = vmatpush1.bf16.msra.mxu0 %v1747_v49  ;;  %v1759_v49 = vld [vmem:[#allocation2 + $0x180] sm:$0xff] }
 0x64f   :  { %2592 = vmatpush1.bf16.msra.mxu1 %v1749_v59  ;;  %2265 = vmatprep.subr.bf16.mxu0 %v1752_v13  ;;  %v1761_v59 = vld [vmem:[#allocation2 + $0x190] sm:$0xff]  ;;  %v1764_v13 = vld [vmem:[#allocation2 + $0x1a8] sm:$0xff] }
 0x650   :  { %2593 = vmatprep.subr.bf16.mxu1 %v1754_v15  ;;  %v1766_v15 = vld [vmem:[#allocation2 + $0x1b8] sm:$0xff] }
 0x652   :  { %2266 = vmatpush1.bf16.msra.mxu0 %v1751_v7  ;;  %v1763_v7 = vld [vmem:[#allocation2 + $0x1a0] sm:$0xff] }
 0x653   :  { %2594 = vmatpush1.bf16.msra.mxu1 %v1753_v6  ;;  %2267 = vmatprep.subr.bf16.mxu0 %v1756_v36  ;;  %v1765_v6 = vld [vmem:[#allocation2 + $0x1b0] sm:$0xff]  ;;  %v1768_v36 = vld [vmem:[#allocation2 + $0x1c8] sm:$0xff] }
 0x654   :  { %2595 = vmatprep.subr.bf16.mxu1 %v1758_v29  ;;  %v1770_v29 = vld [vmem:[#allocation2 + $0x1d8] sm:$0xff] }
 0x656   :  { %2268 = vmatpush1.bf16.msra.mxu0 %v1755_v43  ;;  %v1767_v43 = vld [vmem:[#allocation2 + $0x1c0] sm:$0xff] }
 0x657   :  { %2596 = vmatpush1.bf16.msra.mxu1 %v1757_v14  ;;  %2269 = vmatprep.subr.bf16.mxu0 %v1760_v48  ;;  %v1769_v14 = vld [vmem:[#allocation2 + $0x1d0] sm:$0xff]  ;;  %v1772_v48 = vld [vmem:[#allocation2 + $0x1e8] sm:$0xff] }
 0x658   :  { %2597 = vmatprep.subr.bf16.mxu1 %v1762_v51  ;;  %v1774_v51 = vld [vmem:[#allocation2 + $0x1f8] sm:$0xff] }
 0x65a   :  { %2270 = vmatpush1.bf16.msra.mxu0 %v1759_v49  ;;  %v1771_v49 = vld [vmem:[#allocation2 + $0x1e0] sm:$0xff] }
 0x65b   :  { %2598 = vmatpush1.bf16.msra.mxu1 %v1761_v59  ;;  %2271 = vmatprep.subr.bf16.mxu0 %v1764_v13  ;;  %v1773_v59 = vld [vmem:[#allocation2 + $0x1f0] sm:$0xff]  ;;  %v1776_v13 = vld [vmem:[#allocation2 + $0x208] sm:$0xff] }
 0x65c   :  { %2599 = vmatprep.subr.bf16.mxu1 %v1766_v15  ;;  %v1778_v15 = vld [vmem:[#allocation2 + $0x218] sm:$0xff] }
 0x65e   :  { %2272 = vmatpush1.bf16.msra.mxu0 %v1763_v7  ;;  %v1775_v7 = vld [vmem:[#allocation2 + $0x200] sm:$0xff] }
 0x65f   :  { %2600 = vmatpush1.bf16.msra.mxu1 %v1765_v6  ;;  %2273 = vmatprep.subr.bf16.mxu0 %v1768_v36  ;;  %v1777_v6 = vld [vmem:[#allocation2 + $0x210] sm:$0xff]  ;;  %v1780_v36 = vld [vmem:[#allocation2 + $0x228] sm:$0xff] }
 0x660   :  { %2601 = vmatprep.subr.bf16.mxu1 %v1770_v29  ;;  %v1782_v29 = vld [vmem:[#allocation2 + $0x238] sm:$0xff] }
 0x662   :  { %2274 = vmatpush1.bf16.msra.mxu0 %v1767_v43  ;;  %v1779_v43 = vld [vmem:[#allocation2 + $0x220] sm:$0xff] }
 0x663   :  { %2602 = vmatpush1.bf16.msra.mxu1 %v1769_v14  ;;  %2275 = vmatprep.subr.bf16.mxu0 %v1772_v48  ;;  %v1781_v14 = vld [vmem:[#allocation2 + $0x230] sm:$0xff]  ;;  %v1784_v48 = vld [vmem:[#allocation2 + $0x248] sm:$0xff] }
 0x664   :  { %2603 = vmatprep.subr.bf16.mxu1 %v1774_v51  ;;  %v1786_v51 = vld [vmem:[#allocation2 + $0x258] sm:$0xff] }
 0x666   :  { %2276 = vmatpush1.bf16.msra.mxu0 %v1771_v49  ;;  %v1783_v49 = vld [vmem:[#allocation2 + $0x240] sm:$0xff] }
 0x667   :  { %2604 = vmatpush1.bf16.msra.mxu1 %v1773_v59  ;;  %2286 = vmatprep.subr.bf16.mxu0 %v1776_v13  ;;  %v1785_v59 = vld [vmem:[#allocation2 + $0x250] sm:$0xff]  ;;  %v1788_v13 = vld [vmem:[#allocation2 + $0x268] sm:$0xff] }
 0x668   :  { %2614 = vmatprep.subr.bf16.mxu1 %v1778_v15  ;;  %v1787_v15 = vld [vmem:[#allocation2 + $0x260] sm:$0xff] }
 0x669   :  { %2278 = vmatmul.mubr.bf16.vlgmr.msra.gmra.mrb[48].mxu0 %v9194_v5 }
 0x66a   :  { %2606 = vmatmul.mubr.bf16.vlgmr.msra.gmra.mrb[48].mxu1 %v9194_v5  ;;  %2287 = vmatpush1.bf16.msra.mxu0 %v1775_v7  ;;  %v1790_v5 = vld [vmem:[#allocation2 + $0x278] sm:$0xff]  ;;  %v1789_v7 = vld [vmem:[#allocation2 + $0x270] sm:$0xff] }
 0x66b   :  { %2615 = vmatpush1.bf16.msra.mxu1 %v1777_v6  ;;  %2288 = vmatprep.subr.bf16.mxu0 %v1780_v36  ;;  %v1792_v6 = vld [vmem:[#allocation2 + $0x288] sm:$0xff]  ;;  %v1794_v36 = vld [vmem:[#allocation2 + $0x298] sm:$0xff] }
 0x66c   :  { %2616 = vmatprep.subr.bf16.mxu1 %v1782_v29  ;;  %2318 = vmatprep.mubr.bf16.mxu0 %v8177_v1  ;;  %v1791_v29 = vld [vmem:[#allocation2 + $0x280] sm:$0xff] }
 0x66d   :  { %2646 = vmatprep.mubr.bf16.mxu1 %v8177_v1  ;;  %v1793_v1 = vld [vmem:[#allocation2 + $0x290] sm:$0xff] }
 0x66e   :  { %2289 = vmatpush1.bf16.msra.mxu0 %v1779_v43  ;;  %v1796_v43 = vld [vmem:[#allocation2 + $0x2a8] sm:$0xff] }
 0x66f   :  { %2617 = vmatpush1.bf16.msra.mxu1 %v1781_v14  ;;  %2290 = vmatprep.subr.bf16.mxu0 %v1784_v48  ;;  %v1798_v14 = vld [vmem:[#allocation2 + $0x2b8] sm:$0xff]  ;;  %v1795_v48 = vld [vmem:[#allocation2 + $0x2a0] sm:$0xff] }
 0x670   :  { %2618 = vmatprep.subr.bf16.mxu1 %v1786_v51  ;;  %v1797_v51 = vld [vmem:[#allocation2 + $0x2b0] sm:$0xff] }
 0x672   :  { %2291 = vmatpush1.bf16.msra.mxu0 %v1783_v49  ;;  %v1800_v49 = vld [vmem:[#allocation2 + $0x2c8] sm:$0xff] }
 0x673   :  { %2619 = vmatpush1.bf16.msra.mxu1 %v1785_v59  ;;  %2292 = vmatprep.subr.bf16.mxu0 %v1788_v13  ;;  %v1802_v59 = vld [vmem:[#allocation2 + $0x2d8] sm:$0xff]  ;;  %v1799_v13 = vld [vmem:[#allocation2 + $0x2c0] sm:$0xff] }
 0x674   :  { %2620 = vmatprep.subr.bf16.mxu1 %v1790_v5  ;;  %v1801_v5 = vld [vmem:[#allocation2 + $0x2d0] sm:$0xff] }
 0x676   :  { %2293 = vmatpush1.bf16.msra.mxu0 %v1787_v15  ;;  %v1804_v15 = vld [vmem:[#allocation2 + $0x2e8] sm:$0xff] }
 0x677   :  { %2621 = vmatpush1.bf16.msra.mxu1 %v1789_v7  ;;  %2294 = vmatprep.subr.bf16.mxu0 %v1792_v6  ;;  %v1806_v7 = vld [vmem:[#allocation2 + $0x2f8] sm:$0xff]  ;;  %v1803_v6 = vld [vmem:[#allocation2 + $0x2e0] sm:$0xff] }
 0x678   :  { %2622 = vmatprep.subr.bf16.mxu1 %v1794_v36  ;;  %v1805_v36 = vld [vmem:[#allocation2 + $0x2f0] sm:$0xff] }
 0x67a   :  { %2295 = vmatpush1.bf16.msra.mxu0 %v1791_v29  ;;  %v1808_v29 = vld [vmem:[#allocation2 + $0x308] sm:$0xff] }
 0x67b   :  { %2623 = vmatpush1.bf16.msra.mxu1 %v1793_v1  ;;  %2296 = vmatprep.subr.bf16.mxu0 %v1796_v43  ;;  %v1810_v1 = vld [vmem:[#allocation2 + $0x318] sm:$0xff]  ;;  %v1807_v43 = vld [vmem:[#allocation2 + $0x300] sm:$0xff] }
 0x67c   :  { %2624 = vmatprep.subr.bf16.mxu1 %v1798_v14  ;;  %v1809_v14 = vld [vmem:[#allocation2 + $0x310] sm:$0xff] }
 0x67e   :  { %2297 = vmatpush1.bf16.msra.mxu0 %v1795_v48  ;;  %v1812_v48 = vld [vmem:[#allocation2 + $0x328] sm:$0xff] }
 0x67f   :  { %2625 = vmatpush1.bf16.msra.mxu1 %v1797_v51  ;;  %2298 = vmatprep.subr.bf16.mxu0 %v1800_v49  ;;  %v1814_v51 = vld [vmem:[#allocation2 + $0x338] sm:$0xff]  ;;  %v1811_v49 = vld [vmem:[#allocation2 + $0x320] sm:$0xff] }
 0x680   :  { %2626 = vmatprep.subr.bf16.mxu1 %v1802_v59  ;;  %v1813_v59 = vld [vmem:[#allocation2 + $0x330] sm:$0xff] }
 0x682   :  { %2299 = vmatpush1.bf16.msra.mxu0 %v1799_v13  ;;  %v1816_v13 = vld [vmem:[#allocation2 + $0x348] sm:$0xff] }
 0x683   :  { %2627 = vmatpush1.bf16.msra.mxu1 %v1801_v5  ;;  %2300 = vmatprep.subr.bf16.mxu0 %v1804_v15  ;;  %v1818_v5 = vld [vmem:[#allocation2 + $0x358] sm:$0xff]  ;;  %v1815_v15 = vld [vmem:[#allocation2 + $0x340] sm:$0xff] }
 0x684   :  { %2628 = vmatprep.subr.bf16.mxu1 %v1806_v7  ;;  %v1817_v7 = vld [vmem:[#allocation2 + $0x350] sm:$0xff] }
 0x686   :  { %2301 = vmatpush1.bf16.msra.mxu0 %v1803_v6  ;;  %v1820_v6 = vld [vmem:[#allocation2 + $0x368] sm:$0xff] }
 0x687   :  { %2629 = vmatpush1.bf16.msra.mxu1 %v1805_v36  ;;  %2302 = vmatprep.subr.bf16.mxu0 %v1808_v29  ;;  %v1822_v36 = vld [vmem:[#allocation2 + $0x378] sm:$0xff]  ;;  %v1819_v29 = vld [vmem:[#allocation2 + $0x360] sm:$0xff] }
 0x688   :  { %2630 = vmatprep.subr.bf16.mxu1 %v1810_v1  ;;  %v1821_v1 = vld [vmem:[#allocation2 + $0x370] sm:$0xff] }
 0x68a   :  { %2303 = vmatpush1.bf16.msra.mxu0 %v1807_v43  ;;  %v1824_v43 = vld [vmem:[#allocation2 + $0x388] sm:$0xff] }
 0x68b   :  { %2631 = vmatpush1.bf16.msra.mxu1 %v1809_v14  ;;  %2304 = vmatprep.subr.bf16.mxu0 %v1812_v48  ;;  %v1826_v14 = vld [vmem:[#allocation2 + $0x398] sm:$0xff]  ;;  %v1823_v48 = vld [vmem:[#allocation2 + $0x380] sm:$0xff] }
 0x68c   :  { %2632 = vmatprep.subr.bf16.mxu1 %v1814_v51  ;;  %v1825_v51 = vld [vmem:[#allocation2 + $0x390] sm:$0xff] }
 0x68e   :  { %2305 = vmatpush1.bf16.msra.mxu0 %v1811_v49  ;;  %v1828_v49 = vld [vmem:[#allocation2 + $0x3a8] sm:$0xff] }
 0x68f   :  { %2633 = vmatpush1.bf16.msra.mxu1 %v1813_v59  ;;  %2306 = vmatprep.subr.bf16.mxu0 %v1816_v13  ;;  %v1830_v59 = vld [vmem:[#allocation2 + $0x3b8] sm:$0xff]  ;;  %v1827_v13 = vld [vmem:[#allocation2 + $0x3a0] sm:$0xff] }
 0x690   :  { %2634 = vmatprep.subr.bf16.mxu1 %v1818_v5  ;;  %v1829_v5 = vld [vmem:[#allocation2 + $0x3b0] sm:$0xff] }
 0x692   :  { %2307 = vmatpush1.bf16.msra.mxu0 %v1815_v15  ;;  %v1832_v15 = vld [vmem:[#allocation2 + $0x3c8] sm:$0xff] }
 0x693   :  { %2635 = vmatpush1.bf16.msra.mxu1 %v1817_v7  ;;  %2308 = vmatprep.subr.bf16.mxu0 %v1820_v6  ;;  %v1834_v7 = vld [vmem:[#allocation2 + $0x3d8] sm:$0xff]  ;;  %v1831_v6 = vld [vmem:[#allocation2 + $0x3c0] sm:$0xff] }
 0x694   :  { %2636 = vmatprep.subr.bf16.mxu1 %v1822_v36  ;;  %v1833_v36 = vld [vmem:[#allocation2 + $0x3d0] sm:$0xff] }
 0x696   :  { %2309 = vmatpush1.bf16.msra.mxu0 %v1819_v29  ;;  %v1836_v29 = vld [vmem:[#allocation2 + $0x3e8] sm:$0xff] }
 0x697   :  { %2637 = vmatpush1.bf16.msra.mxu1 %v1821_v1  ;;  %2310 = vmatprep.subr.bf16.mxu0 %v1824_v43  ;;  %v1838_v1 = vld [vmem:[#allocation2 + $0x3f8] sm:$0xff]  ;;  %v1835_v43 = vld [vmem:[#allocation2 + $0x3e0] sm:$0xff] }
 0x698   :  { %2638 = vmatprep.subr.bf16.mxu1 %v1826_v14  ;;  %v1837_v14 = vld [vmem:[#allocation2 + $0x3f0] sm:$0xff] }
 0x69a   :  { %2311 = vmatpush1.bf16.msra.mxu0 %v1823_v48  ;;  %v1840_v48 = vld [vmem:[#allocation2 + $0x408] sm:$0xff] }
 0x69b   :  { %2639 = vmatpush1.bf16.msra.mxu1 %v1825_v51  ;;  %2312 = vmatprep.subr.bf16.mxu0 %v1828_v49  ;;  %v1842_v51 = vld [vmem:[#allocation2 + $0x418] sm:$0xff]  ;;  %v1839_v49 = vld [vmem:[#allocation2 + $0x400] sm:$0xff] }
 0x69c   :  { %2640 = vmatprep.subr.bf16.mxu1 %v1830_v59  ;;  %v1841_v59 = vld [vmem:[#allocation2 + $0x410] sm:$0xff] }
 0x69e   :  { %2313 = vmatpush1.bf16.msra.mxu0 %v1827_v13  ;;  %v1844_v13 = vld [vmem:[#allocation2 + $0x428] sm:$0xff] }
 0x69f   :  { %2641 = vmatpush1.bf16.msra.mxu1 %v1829_v5  ;;  %2314 = vmatprep.subr.bf16.mxu0 %v1832_v15  ;;  %v1846_v5 = vld [vmem:[#allocation2 + $0x438] sm:$0xff]  ;;  %v9195_v15 = vld [vmem:[#allocation41_spill] sm:$0xff] }
 0x6a0   :  { %2642 = vmatprep.subr.bf16.mxu1 %v1834_v7  ;;  %v1843_v7 = vld [vmem:[#allocation2 + $0x420] sm:$0xff] }
 0x6a2   :  { %2315 = vmatpush1.bf16.msra.mxu0 %v1831_v6  ;;  %v1845_v6 = vld [vmem:[#allocation2 + $0x430] sm:$0xff] }
 0x6a3   :  { %2643 = vmatpush1.bf16.msra.mxu1 %v1833_v36  ;;  %2316 = vmatprep.subr.bf16.mxu0 %v1836_v29  ;;  %v1848_v36 = vld [vmem:[#allocation2 + $0x448] sm:$0xff]  ;;  %v1850_v29 = vld [vmem:[#allocation2 + $0x458] sm:$0xff] }
 0x6a4   :  { %2644 = vmatprep.subr.bf16.mxu1 %v1838_v1  ;;  %v1847_v1 = vld [vmem:[#allocation2 + $0x440] sm:$0xff] }
 0x6a6   :  { %2317 = vmatpush1.bf16.msra.mxu0 %v1835_v43  ;;  %v1849_v43 = vld [vmem:[#allocation2 + $0x450] sm:$0xff] }
 0x6a7   :  { %2645 = vmatpush1.bf16.msra.mxu1 %v1837_v14  ;;  %2327 = vmatprep.subr.bf16.mxu0 %v1840_v48  ;;  %v1852_v14 = vld [vmem:[#allocation2 + $0x468] sm:$0xff]  ;;  %v1854_v48 = vld [vmem:[#allocation2 + $0x478] sm:$0xff] }
 0x6a8   :  { %2655 = vmatprep.subr.bf16.mxu1 %v1842_v51  ;;  %v1851_v51 = vld [vmem:[#allocation2 + $0x460] sm:$0xff] }
 0x6a9   :  { %2319 = vmatmul.mubr.bf16.vlgmr.msra.gmra.mrb[48].mxu0 %v9195_v15 }
 0x6aa   :  { %2647 = vmatmul.mubr.bf16.vlgmr.msra.gmra.mrb[48].mxu1 %v9195_v15  ;;  %2328 = vmatpush1.bf16.msra.mxu0 %v1839_v49  ;;  %v1853_v49 = vld [vmem:[#allocation2 + $0x470] sm:$0xff]  ;;  %v1860_v15 = vld [vmem:[#allocation2 + $0x4a8] sm:$0xff] }
 0x6ab   :  { %2656 = vmatpush1.bf16.msra.mxu1 %v1841_v59  ;;  %2329 = vmatprep.subr.bf16.mxu0 %v1844_v13  ;;  %v1856_v59 = vld [vmem:[#allocation2 + $0x488] sm:$0xff]  ;;  %v1858_v13 = vld [vmem:[#allocation2 + $0x498] sm:$0xff] }
 0x6ac   :  { %2657 = vmatprep.subr.bf16.mxu1 %v1846_v5  ;;  %2359 = vmatprep.mubr.bf16.mxu0 %v8253_v16  ;;  %v1857_v5 = vld [vmem:[#allocation2 + $0x490] sm:$0xff] }
 0x6ad   :  { %2687 = vmatprep.mubr.bf16.mxu1 %v8253_v16  ;;  %v1855_v16 = vld [vmem:[#allocation2 + $0x480] sm:$0xff] }
 0x6ae   :  { %2330 = vmatpush1.bf16.msra.mxu0 %v1843_v7  ;;  %v1862_v7 = vld [vmem:[#allocation2 + $0x4b8] sm:$0xff] }
 0x6af   :  { %2658 = vmatpush1.bf16.msra.mxu1 %v1845_v6  ;;  %2331 = vmatprep.subr.bf16.mxu0 %v1848_v36  ;;  %v1859_v6 = vld [vmem:[#allocation2 + $0x4a0] sm:$0xff]  ;;  %v1861_v36 = vld [vmem:[#allocation2 + $0x4b0] sm:$0xff] }
 0x6b0   :  { %2659 = vmatprep.subr.bf16.mxu1 %v1850_v29  ;;  %v1864_v29 = vld [vmem:[#allocation2 + $0x4c8] sm:$0xff] }
 0x6b2   :  { %2332 = vmatpush1.bf16.msra.mxu0 %v1847_v1  ;;  %v1866_v1 = vld [vmem:[#allocation2 + $0x4d8] sm:$0xff] }
 0x6b3   :  { %2660 = vmatpush1.bf16.msra.mxu1 %v1849_v43  ;;  %2333 = vmatprep.subr.bf16.mxu0 %v1852_v14  ;;  %v1863_v43 = vld [vmem:[#allocation2 + $0x4c0] sm:$0xff]  ;;  %v1865_v14 = vld [vmem:[#allocation2 + $0x4d0] sm:$0xff] }
 0x6b4   :  { %2661 = vmatprep.subr.bf16.mxu1 %v1854_v48  ;;  %v1868_v48 = vld [vmem:[#allocation2 + $0x4e8] sm:$0xff] }
 0x6b6   :  { %2334 = vmatpush1.bf16.msra.mxu0 %v1851_v51  ;;  %v1870_v51 = vld [vmem:[#allocation2 + $0x4f8] sm:$0xff] }
 0x6b7   :  { %2662 = vmatpush1.bf16.msra.mxu1 %v1853_v49  ;;  %2335 = vmatprep.subr.bf16.mxu0 %v1856_v59  ;;  %v1867_v49 = vld [vmem:[#allocation2 + $0x4e0] sm:$0xff]  ;;  %v1869_v59 = vld [vmem:[#allocation2 + $0x4f0] sm:$0xff] }
 0x6b8   :  { %2663 = vmatprep.subr.bf16.mxu1 %v1858_v13  ;;  %v1872_v13 = vld [vmem:[#allocation2 + $0x508] sm:$0xff] }
 0x6ba   :  { %2336 = vmatpush1.bf16.msra.mxu0 %v1855_v16  ;;  %v1874_v16 = vld [vmem:[#allocation2 + $0x518] sm:$0xff] }
 0x6bb   :  { %2664 = vmatpush1.bf16.msra.mxu1 %v1857_v5  ;;  %2337 = vmatprep.subr.bf16.mxu0 %v1860_v15  ;;  %v1871_v5 = vld [vmem:[#allocation2 + $0x500] sm:$0xff]  ;;  %v1873_v15 = vld [vmem:[#allocation2 + $0x510] sm:$0xff] }
 0x6bc   :  { %2665 = vmatprep.subr.bf16.mxu1 %v1862_v7  ;;  %v1876_v7 = vld [vmem:[#allocation2 + $0x528] sm:$0xff] }
 0x6be   :  { %2338 = vmatpush1.bf16.msra.mxu0 %v1859_v6  ;;  %v1878_v6 = vld [vmem:[#allocation2 + $0x538] sm:$0xff] }
 0x6bf   :  { %2666 = vmatpush1.bf16.msra.mxu1 %v1861_v36  ;;  %2339 = vmatprep.subr.bf16.mxu0 %v1864_v29  ;;  %v1875_v36 = vld [vmem:[#allocation2 + $0x520] sm:$0xff]  ;;  %v1877_v29 = vld [vmem:[#allocation2 + $0x530] sm:$0xff] }
 0x6c0   :  { %2667 = vmatprep.subr.bf16.mxu1 %v1866_v1  ;;  %v1880_v1 = vld [vmem:[#allocation2 + $0x548] sm:$0xff] }
 0x6c2   :  { %2340 = vmatpush1.bf16.msra.mxu0 %v1863_v43  ;;  %v1882_v43 = vld [vmem:[#allocation2 + $0x558] sm:$0xff] }
 0x6c3   :  { %2668 = vmatpush1.bf16.msra.mxu1 %v1865_v14  ;;  %2341 = vmatprep.subr.bf16.mxu0 %v1868_v48  ;;  %v1879_v14 = vld [vmem:[#allocation2 + $0x540] sm:$0xff]  ;;  %v1881_v48 = vld [vmem:[#allocation2 + $0x550] sm:$0xff] }
 0x6c4   :  { %2669 = vmatprep.subr.bf16.mxu1 %v1870_v51  ;;  %v1884_v51 = vld [vmem:[#allocation2 + $0x568] sm:$0xff] }
 0x6c6   :  { %2342 = vmatpush1.bf16.msra.mxu0 %v1867_v49  ;;  %v1886_v49 = vld [vmem:[#allocation2 + $0x578] sm:$0xff] }
 0x6c7   :  { %2670 = vmatpush1.bf16.msra.mxu1 %v1869_v59  ;;  %2343 = vmatprep.subr.bf16.mxu0 %v1872_v13  ;;  %v1883_v59 = vld [vmem:[#allocation2 + $0x560] sm:$0xff]  ;;  %v1885_v13 = vld [vmem:[#allocation2 + $0x570] sm:$0xff] }
 0x6c8   :  { %2671 = vmatprep.subr.bf16.mxu1 %v1874_v16  ;;  %v1888_v16 = vld [vmem:[#allocation2 + $0x588] sm:$0xff] }
 0x6ca   :  { %2344 = vmatpush1.bf16.msra.mxu0 %v1871_v5  ;;  %v1890_v5 = vld [vmem:[#allocation2 + $0x598] sm:$0xff] }
 0x6cb   :  { %2672 = vmatpush1.bf16.msra.mxu1 %v1873_v15  ;;  %2345 = vmatprep.subr.bf16.mxu0 %v1876_v7  ;;  %v1887_v15 = vld [vmem:[#allocation2 + $0x580] sm:$0xff]  ;;  %v1889_v7 = vld [vmem:[#allocation2 + $0x590] sm:$0xff] }
 0x6cc   :  { %2673 = vmatprep.subr.bf16.mxu1 %v1878_v6  ;;  %v1892_v6 = vld [vmem:[#allocation2 + $0x5a8] sm:$0xff] }
 0x6ce   :  { %2346 = vmatpush1.bf16.msra.mxu0 %v1875_v36  ;;  %v1894_v36 = vld [vmem:[#allocation2 + $0x5b8] sm:$0xff] }
 0x6cf   :  { %2674 = vmatpush1.bf16.msra.mxu1 %v1877_v29  ;;  %2347 = vmatprep.subr.bf16.mxu0 %v1880_v1  ;;  %v1891_v29 = vld [vmem:[#allocation2 + $0x5a0] sm:$0xff]  ;;  %v1893_v1 = vld [vmem:[#allocation2 + $0x5b0] sm:$0xff] }
 0x6d0   :  { %2675 = vmatprep.subr.bf16.mxu1 %v1882_v43  ;;  %v1896_v43 = vld [vmem:[#allocation2 + $0x5c8] sm:$0xff] }
 0x6d2   :  { %2348 = vmatpush1.bf16.msra.mxu0 %v1879_v14  ;;  %v1898_v14 = vld [vmem:[#allocation2 + $0x5d8] sm:$0xff] }
 0x6d3   :  { %2676 = vmatpush1.bf16.msra.mxu1 %v1881_v48  ;;  %2349 = vmatprep.subr.bf16.mxu0 %v1884_v51  ;;  %v1895_v48 = vld [vmem:[#allocation2 + $0x5c0] sm:$0xff]  ;;  %v1897_v51 = vld [vmem:[#allocation2 + $0x5d0] sm:$0xff] }
 0x6d4   :  { %2677 = vmatprep.subr.bf16.mxu1 %v1886_v49  ;;  %v1900_v49 = vld [vmem:[#allocation2 + $0x5e8] sm:$0xff] }
 0x6d6   :  { %2350 = vmatpush1.bf16.msra.mxu0 %v1883_v59  ;;  %v1902_v59 = vld [vmem:[#allocation2 + $0x5f8] sm:$0xff] }
 0x6d7   :  { %2678 = vmatpush1.bf16.msra.mxu1 %v1885_v13  ;;  %2351 = vmatprep.subr.bf16.mxu0 %v1888_v16  ;;  %v1899_v13 = vld [vmem:[#allocation2 + $0x5e0] sm:$0xff]  ;;  %v1901_v16 = vld [vmem:[#allocation2 + $0x5f0] sm:$0xff] }
 0x6d8   :  { %2679 = vmatprep.subr.bf16.mxu1 %v1890_v5  ;;  %v1904_v5 = vld [vmem:[#allocation2 + $0x608] sm:$0xff] }
 0x6da   :  { %2352 = vmatpush1.bf16.msra.mxu0 %v1887_v15  ;;  %v1906_v15 = vld [vmem:[#allocation2 + $0x618] sm:$0xff] }
 0x6db   :  { %2680 = vmatpush1.bf16.msra.mxu1 %v1889_v7  ;;  %2353 = vmatprep.subr.bf16.mxu0 %v1892_v6  ;;  %v1903_v7 = vld [vmem:[#allocation2 + $0x600] sm:$0xff]  ;;  %v1905_v6 = vld [vmem:[#allocation2 + $0x610] sm:$0xff] }
 0x6dc   :  { %2681 = vmatprep.subr.bf16.mxu1 %v1894_v36  ;;  %v1908_v36 = vld [vmem:[#allocation2 + $0x628] sm:$0xff] }
 0x6de   :  { %2354 = vmatpush1.bf16.msra.mxu0 %v1891_v29  ;;  %v1910_v29 = vld [vmem:[#allocation2 + $0x638] sm:$0xff] }
 0x6df   :  { %2682 = vmatpush1.bf16.msra.mxu1 %v1893_v1  ;;  %2355 = vmatprep.subr.bf16.mxu0 %v1896_v43  ;;  %v1907_v1 = vld [vmem:[#allocation2 + $0x620] sm:$0xff]  ;;  %v1909_v43 = vld [vmem:[#allocation2 + $0x630] sm:$0xff] }
 0x6e0   :  { %2683 = vmatprep.subr.bf16.mxu1 %v1898_v14  ;;  %v1912_v14 = vld [vmem:[#allocation2 + $0x648] sm:$0xff] }
 0x6e2   :  { %2356 = vmatpush1.bf16.msra.mxu0 %v1895_v48  ;;  %v1914_v48 = vld [vmem:[#allocation2 + $0x658] sm:$0xff] }
 0x6e3   :  { %2684 = vmatpush1.bf16.msra.mxu1 %v1897_v51  ;;  %2357 = vmatprep.subr.bf16.mxu0 %v1900_v49  ;;  %v1911_v51 = vld [vmem:[#allocation2 + $0x640] sm:$0xff]  ;;  %v1913_v49 = vld [vmem:[#allocation2 + $0x650] sm:$0xff] }
 0x6e4   :  { %2685 = vmatprep.subr.bf16.mxu1 %v1902_v59  ;;  %v1916_v59 = vld [vmem:[#allocation2 + $0x668] sm:$0xff] }
 0x6e6   :  { %2358 = vmatpush1.bf16.msra.mxu0 %v1899_v13  ;;  %v1915_v13 = vld [vmem:[#allocation2 + $0x660] sm:$0xff] }
 0x6e7   :  { %2686 = vmatpush1.bf16.msra.mxu1 %v1901_v16  ;;  %2368 = vmatprep.subr.bf16.mxu0 %v1904_v5  ;;  %v1917_v16 = vld [vmem:[#allocation2 + $0x670] sm:$0xff]  ;;  %v1920_v5 = vld [vmem:[#allocation2 + $0x688] sm:$0xff] }
 0x6e8   :  { %2696 = vmatprep.subr.bf16.mxu1 %v1906_v15  ;;  %v1922_v15 = vld [vmem:[#allocation2 + $0x698] sm:$0xff] }
 0x6e9   :  { %2360 = vmatmul.mubr.bf16.vlgmr.msra.gmra.mrb[48].mxu0 %v8249_v52 }
 0x6ea   :  { %2688 = vmatmul.mubr.bf16.vlgmr.msra.gmra.mrb[48].mxu1 %v8249_v52  ;;  %2369 = vmatpush1.bf16.msra.mxu0 %v1903_v7  ;;  %v1918_v52 = vld [vmem:[#allocation2 + $0x678] sm:$0xff]  ;;  %v1921_v7 = vld [vmem:[#allocation2 + $0x690] sm:$0xff] }
 0x6eb   :  { %2697 = vmatpush1.bf16.msra.mxu1 %v1905_v6  ;;  %2370 = vmatprep.subr.bf16.mxu0 %v1908_v36  ;;  %v1924_v6 = vld [vmem:[#allocation2 + $0x6a8] sm:$0xff]  ;;  %v1926_v36 = vld [vmem:[#allocation2 + $0x6b8] sm:$0xff] }
 0x6ec   :  { %2698 = vmatprep.subr.bf16.mxu1 %v1910_v29  ;;  %2400 = vmatprep.mubr.bf16.mxu0 %v8255_v21  ;;  %v1923_v29 = vld [vmem:[#allocation2 + $0x6a0] sm:$0xff] }
 0x6ed   :  { %2728 = vmatprep.mubr.bf16.mxu1 %v8255_v21  ;;  %v1919_v21 = vld [vmem:[#allocation2 + $0x680] sm:$0xff] }
 0x6ee   :  { %2371 = vmatpush1.bf16.msra.mxu0 %v1907_v1  ;;  %v1925_v1 = vld [vmem:[#allocation2 + $0x6b0] sm:$0xff] }
 0x6ef   :  { %2699 = vmatpush1.bf16.msra.mxu1 %v1909_v43  ;;  %2372 = vmatprep.subr.bf16.mxu0 %v1912_v14  ;;  %v1928_v43 = vld [vmem:[#allocation2 + $0x6c8] sm:$0xff]  ;;  %v1930_v14 = vld [vmem:[#allocation2 + $0x6d8] sm:$0xff] }
 0x6f0   :  { %2700 = vmatprep.subr.bf16.mxu1 %v1914_v48  ;;  %v1927_v48 = vld [vmem:[#allocation2 + $0x6c0] sm:$0xff] }
 0x6f2   :  { %2373 = vmatpush1.bf16.msra.mxu0 %v1911_v51  ;;  %v1929_v51 = vld [vmem:[#allocation2 + $0x6d0] sm:$0xff] }
 0x6f3   :  { %2701 = vmatpush1.bf16.msra.mxu1 %v1913_v49  ;;  %2374 = vmatprep.subr.bf16.mxu0 %v1916_v59  ;;  %v1932_v49 = vld [vmem:[#allocation2 + $0x6e8] sm:$0xff]  ;;  %v1934_v59 = vld [vmem:[#allocation2 + $0x6f8] sm:$0xff] }
 0x6f4   :  { %2702 = vmatprep.subr.bf16.mxu1 %v1918_v52  ;;  %v1931_v52 = vld [vmem:[#allocation2 + $0x6e0] sm:$0xff] }
 0x6f6   :  { %2375 = vmatpush1.bf16.msra.mxu0 %v1915_v13  ;;  %v1933_v13 = vld [vmem:[#allocation2 + $0x6f0] sm:$0xff] }
 0x6f7   :  { %2703 = vmatpush1.bf16.msra.mxu1 %v1917_v16  ;;  %2376 = vmatprep.subr.bf16.mxu0 %v1920_v5  ;;  %v1936_v16 = vld [vmem:[#allocation2 + $0x708] sm:$0xff]  ;;  %v1938_v5 = vld [vmem:[#allocation2 + $0x718] sm:$0xff] }
 0x6f8   :  { %2704 = vmatprep.subr.bf16.mxu1 %v1922_v15  ;;  %v1935_v15 = vld [vmem:[#allocation2 + $0x700] sm:$0xff] }
 0x6fa   :  { %2377 = vmatpush1.bf16.msra.mxu0 %v1919_v21  ;;  %v1937_v21 = vld [vmem:[#allocation2 + $0x710] sm:$0xff] }
 0x6fb   :  { %2705 = vmatpush1.bf16.msra.mxu1 %v1921_v7  ;;  %2378 = vmatprep.subr.bf16.mxu0 %v1924_v6  ;;  %v1940_v7 = vld [vmem:[#allocation2 + $0x728] sm:$0xff]  ;;  %v1942_v6 = vld [vmem:[#allocation2 + $0x738] sm:$0xff] }
 0x6fc   :  { %2706 = vmatprep.subr.bf16.mxu1 %v1926_v36  ;;  %v1939_v36 = vld [vmem:[#allocation2 + $0x720] sm:$0xff] }
 0x6fe   :  { %2379 = vmatpush1.bf16.msra.mxu0 %v1923_v29  ;;  %v1941_v29 = vld [vmem:[#allocation2 + $0x730] sm:$0xff] }
 0x6ff   :  { %2707 = vmatpush1.bf16.msra.mxu1 %v1925_v1  ;;  %2380 = vmatprep.subr.bf16.mxu0 %v1928_v43  ;;  %v1944_v1 = vld [vmem:[#allocation2 + $0x748] sm:$0xff]  ;;  %v1946_v43 = vld [vmem:[#allocation2 + $0x758] sm:$0xff] }
 0x700   :  { %2708 = vmatprep.subr.bf16.mxu1 %v1930_v14  ;;  %v1943_v14 = vld [vmem:[#allocation2 + $0x740] sm:$0xff] }
 0x702   :  { %2381 = vmatpush1.bf16.msra.mxu0 %v1927_v48  ;;  %v1945_v48 = vld [vmem:[#allocation2 + $0x750] sm:$0xff] }
 0x703   :  { %2709 = vmatpush1.bf16.msra.mxu1 %v1929_v51  ;;  %2382 = vmatprep.subr.bf16.mxu0 %v1932_v49  ;;  %v1948_v51 = vld [vmem:[#allocation2 + $0x768] sm:$0xff]  ;;  %v1950_v49 = vld [vmem:[#allocation2 + $0x778] sm:$0xff] }
 0x704   :  { %2710 = vmatprep.subr.bf16.mxu1 %v1934_v59  ;;  %v1947_v59 = vld [vmem:[#allocation2 + $0x760] sm:$0xff] }
 0x706   :  { %2383 = vmatpush1.bf16.msra.mxu0 %v1931_v52  ;;  %v1949_v52 = vld [vmem:[#allocation2 + $0x770] sm:$0xff] }
 0x707   :  { %2711 = vmatpush1.bf16.msra.mxu1 %v1933_v13  ;;  %2384 = vmatprep.subr.bf16.mxu0 %v1936_v16  ;;  %v1952_v13 = vld [vmem:[#allocation2 + $0x788] sm:$0xff]  ;;  %v1954_v16 = vld [vmem:[#allocation2 + $0x798] sm:$0xff] }
 0x708   :  { %2712 = vmatprep.subr.bf16.mxu1 %v1938_v5  ;;  %v1951_v5 = vld [vmem:[#allocation2 + $0x780] sm:$0xff] }
 0x70a   :  { %2385 = vmatpush1.bf16.msra.mxu0 %v1935_v15  ;;  %v1953_v15 = vld [vmem:[#allocation2 + $0x790] sm:$0xff] }
 0x70b   :  { %2713 = vmatpush1.bf16.msra.mxu1 %v1937_v21  ;;  %2386 = vmatprep.subr.bf16.mxu0 %v1940_v7  ;;  %v1956_v21 = vld [vmem:[#allocation2 + $0x7a8] sm:$0xff]  ;;  %v1958_v7 = vld [vmem:[#allocation2 + $0x7b8] sm:$0xff] }
 0x70c   :  { %2714 = vmatprep.subr.bf16.mxu1 %v1942_v6  ;;  %v1955_v6 = vld [vmem:[#allocation2 + $0x7a0] sm:$0xff] }
 0x70e   :  { %2387 = vmatpush1.bf16.msra.mxu0 %v1939_v36  ;;  %v1957_v36 = vld [vmem:[#allocation2 + $0x7b0] sm:$0xff] }
 0x70f   :  { %2715 = vmatpush1.bf16.msra.mxu1 %v1941_v29  ;;  %2388 = vmatprep.subr.bf16.mxu0 %v1944_v1  ;;  %v1960_v29 = vld [vmem:[#allocation2 + $0x7c8] sm:$0xff]  ;;  %v1962_v1 = vld [vmem:[#allocation2 + $0x7d8] sm:$0xff] }
 0x710   :  { %2716 = vmatprep.subr.bf16.mxu1 %v1946_v43  ;;  %v1959_v43 = vld [vmem:[#allocation2 + $0x7c0] sm:$0xff] }
 0x712   :  { %2389 = vmatpush1.bf16.msra.mxu0 %v1943_v14  ;;  %v1961_v14 = vld [vmem:[#allocation2 + $0x7d0] sm:$0xff] }
 0x713   :  { %2717 = vmatpush1.bf16.msra.mxu1 %v1945_v48  ;;  %2390 = vmatprep.subr.bf16.mxu0 %v1948_v51  ;;  %v1964_v48 = vld [vmem:[#allocation2 + $0x7e8] sm:$0xff]  ;;  %v1966_v51 = vld [vmem:[#allocation2 + $0x7f8] sm:$0xff] }
 0x714   :  { %2718 = vmatprep.subr.bf16.mxu1 %v1950_v49  ;;  %v1963_v49 = vld [vmem:[#allocation2 + $0x7e0] sm:$0xff] }
 0x716   :  { %2391 = vmatpush1.bf16.msra.mxu0 %v1947_v59  ;;  %v1965_v59 = vld [vmem:[#allocation2 + $0x7f0] sm:$0xff] }
 0x717   :  { %2719 = vmatpush1.bf16.msra.mxu1 %v1949_v52  ;;  %2392 = vmatprep.subr.bf16.mxu0 %v1952_v13  ;;  %v1968_v52 = vld [vmem:[#allocation2 + $0x808] sm:$0xff]  ;;  %v1970_v13 = vld [vmem:[#allocation2 + $0x818] sm:$0xff] }
 0x718   :  { %2720 = vmatprep.subr.bf16.mxu1 %v1954_v16  ;;  %v1967_v16 = vld [vmem:[#allocation2 + $0x800] sm:$0xff] }
 0x71a   :  { %2393 = vmatpush1.bf16.msra.mxu0 %v1951_v5  ;;  %v1969_v5 = vld [vmem:[#allocation2 + $0x810] sm:$0xff] }
 0x71b   :  { %2721 = vmatpush1.bf16.msra.mxu1 %v1953_v15  ;;  %2394 = vmatprep.subr.bf16.mxu0 %v1956_v21  ;;  %v1972_v15 = vld [vmem:[#allocation2 + $0x828] sm:$0xff]  ;;  %v1974_v21 = vld [vmem:[#allocation2 + $0x838] sm:$0xff] }
 0x71c   :  { %2722 = vmatprep.subr.bf16.mxu1 %v1958_v7  ;;  %v1971_v7 = vld [vmem:[#allocation2 + $0x820] sm:$0xff] }
 0x71e   :  { %2395 = vmatpush1.bf16.msra.mxu0 %v1955_v6  ;;  %v1973_v6 = vld [vmem:[#allocation2 + $0x830] sm:$0xff] }
 0x71f   :  { %2723 = vmatpush1.bf16.msra.mxu1 %v1957_v36  ;;  %2396 = vmatprep.subr.bf16.mxu0 %v1960_v29  ;;  %v1976_v36 = vld [vmem:[#allocation2 + $0x848] sm:$0xff]  ;;  %v1978_v29 = vld [vmem:[#allocation2 + $0x858] sm:$0xff] }
 0x720   :  { %2724 = vmatprep.subr.bf16.mxu1 %v1962_v1  ;;  %v1975_v1 = vld [vmem:[#allocation2 + $0x840] sm:$0xff] }
 0x722   :  { %2397 = vmatpush1.bf16.msra.mxu0 %v1959_v43  ;;  %v1977_v43 = vld [vmem:[#allocation2 + $0x850] sm:$0xff] }
 0x723   :  { %2725 = vmatpush1.bf16.msra.mxu1 %v1961_v14  ;;  %2398 = vmatprep.subr.bf16.mxu0 %v1964_v48  ;;  %v1980_v14 = vld [vmem:[#allocation2 + $0x868] sm:$0xff]  ;;  %v1979_v48 = vld [vmem:[#allocation2 + $0x860] sm:$0xff] }
 0x724   :  { %2726 = vmatprep.subr.bf16.mxu1 %v1966_v51  ;;  %v1981_v51 = vld [vmem:[#allocation2 + $0x870] sm:$0xff] }
 0x726   :  { %2399 = vmatpush1.bf16.msra.mxu0 %v1963_v49  ;;  %v1984_v49 = vld [vmem:[#allocation2 + $0x888] sm:$0xff] }
 0x727   :  { %2727 = vmatpush1.bf16.msra.mxu1 %v1965_v59  ;;  %2409 = vmatprep.subr.bf16.mxu0 %v1968_v52  ;;  %v1986_v59 = vld [vmem:[#allocation2 + $0x898] sm:$0xff]  ;;  %v1985_v52 = vld [vmem:[#allocation2 + $0x890] sm:$0xff] }
 0x728   :  { %2737 = vmatprep.subr.bf16.mxu1 %v1970_v13  ;;  %v1988_v13 = vld [vmem:[#allocation2 + $0x8a8] sm:$0xff] }
 0x729   :  { %2401 = vmatmul.mubr.bf16.vlgmr.msra.gmra.mrb[48].mxu0 %v8251_v54 }
 0x72a   :  { %2729 = vmatmul.mubr.bf16.vlgmr.msra.gmra.mrb[48].mxu1 %v8251_v54  ;;  %2410 = vmatpush1.bf16.msra.mxu0 %v1967_v16  ;;  %v1982_v54 = vld [vmem:[#allocation2 + $0x878] sm:$0xff] }
 0x72b   :  { %2738 = vmatpush1.bf16.msra.mxu1 %v1969_v5  ;;  %2411 = vmatprep.subr.bf16.mxu0 %v1972_v15  ;;  %v1990_v16 = vld [vmem:[#allocation2 + $0x8b8] sm:$0xff]  ;;  %v1987_v5 = vld [vmem:[#allocation2 + $0x8a0] sm:$0xff]  ;;  %v1989_v15 = vld [vmem:[#allocation2 + $0x8b0] sm:$0xff] }
 0x72c   :  { %2739 = vmatprep.subr.bf16.mxu1 %v1974_v21  ;;  %2441 = vmatprep.mubr.bf16.mxu0 %v8305_v23  ;;  %v1992_v21 = vld [vmem:[#allocation2 + $0x8c8] sm:$0xff] }
 0x72d   :  { %2769 = vmatprep.mubr.bf16.mxu1 %v8305_v23  ;;  %v1983_v23 = vld [vmem:[#allocation2 + $0x880] sm:$0xff] }
 0x72e   :  { %2412 = vmatpush1.bf16.msra.mxu0 %v1971_v7  ;;  %v1994_v7 = vld [vmem:[#allocation2 + $0x8d8] sm:$0xff] }
 0x72f   :  { %2740 = vmatpush1.bf16.msra.mxu1 %v1973_v6  ;;  %2413 = vmatprep.subr.bf16.mxu0 %v1976_v36  ;;  %v1991_v6 = vld [vmem:[#allocation2 + $0x8c0] sm:$0xff]  ;;  %v1993_v36 = vld [vmem:[#allocation2 + $0x8d0] sm:$0xff] }
 0x730   :  { %2741 = vmatprep.subr.bf16.mxu1 %v1978_v29  ;;  %v1996_v29 = vld [vmem:[#allocation2 + $0x8e8] sm:$0xff] }
 0x732   :  { %2414 = vmatpush1.bf16.msra.mxu0 %v1975_v1  ;;  %v1998_v1 = vld [vmem:[#allocation2 + $0x8f8] sm:$0xff] }
 0x733   :  { %2742 = vmatpush1.bf16.msra.mxu1 %v1977_v43  ;;  %2415 = vmatprep.subr.bf16.mxu0 %v1980_v14  ;;  %v1995_v43 = vld [vmem:[#allocation2 + $0x8e0] sm:$0xff]  ;;  %v1997_v14 = vld [vmem:[#allocation2 + $0x8f0] sm:$0xff] }
 0x734   :  { %2743 = vmatprep.subr.bf16.mxu1 %v1982_v54  ;;  %v2000_v54 = vld [vmem:[#allocation2 + $0x908] sm:$0xff] }
 0x736   :  { %2416 = vmatpush1.bf16.msra.mxu0 %v1979_v48  ;;  %v2002_v48 = vld [vmem:[#allocation2 + $0x918] sm:$0xff] }
 0x737   :  { %2744 = vmatpush1.bf16.msra.mxu1 %v1981_v51  ;;  %2417 = vmatprep.subr.bf16.mxu0 %v1984_v49  ;;  %v1999_v51 = vld [vmem:[#allocation2 + $0x900] sm:$0xff]  ;;  %v2001_v49 = vld [vmem:[#allocation2 + $0x910] sm:$0xff] }
 0x738   :  { %2745 = vmatprep.subr.bf16.mxu1 %v1986_v59  ;;  %v2004_v59 = vld [vmem:[#allocation2 + $0x928] sm:$0xff] }
 0x73a   :  { %2418 = vmatpush1.bf16.msra.mxu0 %v1983_v23  ;;  %v2006_v23 = vld [vmem:[#allocation2 + $0x938] sm:$0xff] }
 0x73b   :  { %2746 = vmatpush1.bf16.msra.mxu1 %v1985_v52  ;;  %2419 = vmatprep.subr.bf16.mxu0 %v1988_v13  ;;  %v2003_v52 = vld [vmem:[#allocation2 + $0x920] sm:$0xff]  ;;  %v2005_v13 = vld [vmem:[#allocation2 + $0x930] sm:$0xff] }
 0x73c   :  { %2747 = vmatprep.subr.bf16.mxu1 %v1990_v16  ;;  %v2008_v16 = vld [vmem:[#allocation2 + $0x948] sm:$0xff] }
 0x73e   :  { %2420 = vmatpush1.bf16.msra.mxu0 %v1987_v5  ;;  %v2010_v5 = vld [vmem:[#allocation2 + $0x958] sm:$0xff] }
 0x73f   :  { %2748 = vmatpush1.bf16.msra.mxu1 %v1989_v15  ;;  %2421 = vmatprep.subr.bf16.mxu0 %v1992_v21  ;;  %v2007_v15 = vld [vmem:[#allocation2 + $0x940] sm:$0xff]  ;;  %v2009_v21 = vld [vmem:[#allocation2 + $0x950] sm:$0xff] }
 0x740   :  { %2749 = vmatprep.subr.bf16.mxu1 %v1994_v7  ;;  %v2012_v7 = vld [vmem:[#allocation2 + $0x968] sm:$0xff] }
 0x742   :  { %2422 = vmatpush1.bf16.msra.mxu0 %v1991_v6  ;;  %v2014_v6 = vld [vmem:[#allocation2 + $0x978] sm:$0xff] }
 0x743   :  { %2750 = vmatpush1.bf16.msra.mxu1 %v1993_v36  ;;  %2423 = vmatprep.subr.bf16.mxu0 %v1996_v29  ;;  %v2011_v36 = vld [vmem:[#allocation2 + $0x960] sm:$0xff]  ;;  %v2013_v29 = vld [vmem:[#allocation2 + $0x970] sm:$0xff] }
 0x744   :  { %2751 = vmatprep.subr.bf16.mxu1 %v1998_v1  ;;  %v2016_v1 = vld [vmem:[#allocation2 + $0x988] sm:$0xff] }
 0x746   :  { %2424 = vmatpush1.bf16.msra.mxu0 %v1995_v43  ;;  %v2018_v43 = vld [vmem:[#allocation2 + $0x998] sm:$0xff] }
 0x747   :  { %2752 = vmatpush1.bf16.msra.mxu1 %v1997_v14  ;;  %2425 = vmatprep.subr.bf16.mxu0 %v2000_v54  ;;  %v2015_v14 = vld [vmem:[#allocation2 + $0x980] sm:$0xff]  ;;  %v2017_v54 = vld [vmem:[#allocation2 + $0x990] sm:$0xff] }
 0x748   :  { %2753 = vmatprep.subr.bf16.mxu1 %v2002_v48  ;;  %v2020_v48 = vld [vmem:[#allocation2 + $0x9a8] sm:$0xff] }
 0x74a   :  { %2426 = vmatpush1.bf16.msra.mxu0 %v1999_v51  ;;  %v2022_v51 = vld [vmem:[#allocation2 + $0x9b8] sm:$0xff] }
 0x74b   :  { %2754 = vmatpush1.bf16.msra.mxu1 %v2001_v49  ;;  %2427 = vmatprep.subr.bf16.mxu0 %v2004_v59  ;;  %v2019_v49 = vld [vmem:[#allocation2 + $0x9a0] sm:$0xff]  ;;  %v2021_v59 = vld [vmem:[#allocation2 + $0x9b0] sm:$0xff] }
 0x74c   :  { %2755 = vmatprep.subr.bf16.mxu1 %v2006_v23  ;;  %v2024_v23 = vld [vmem:[#allocation2 + $0x9c8] sm:$0xff] }
 0x74e   :  { %2428 = vmatpush1.bf16.msra.mxu0 %v2003_v52  ;;  %v2026_v52 = vld [vmem:[#allocation2 + $0x9d8] sm:$0xff] }
 0x74f   :  { %2756 = vmatpush1.bf16.msra.mxu1 %v2005_v13  ;;  %2429 = vmatprep.subr.bf16.mxu0 %v2008_v16  ;;  %v2023_v13 = vld [vmem:[#allocation2 + $0x9c0] sm:$0xff]  ;;  %v2025_v16 = vld [vmem:[#allocation2 + $0x9d0] sm:$0xff] }
 0x750   :  { %2757 = vmatprep.subr.bf16.mxu1 %v2010_v5  ;;  %v2028_v5 = vld [vmem:[#allocation2 + $0x9e8] sm:$0xff] }
 0x752   :  { %2430 = vmatpush1.bf16.msra.mxu0 %v2007_v15  ;;  %v2030_v15 = vld [vmem:[#allocation2 + $0x9f8] sm:$0xff] }
 0x753   :  { %2758 = vmatpush1.bf16.msra.mxu1 %v2009_v21  ;;  %2431 = vmatprep.subr.bf16.mxu0 %v2012_v7  ;;  %v2027_v21 = vld [vmem:[#allocation2 + $0x9e0] sm:$0xff]  ;;  %v2029_v7 = vld [vmem:[#allocation2 + $0x9f0] sm:$0xff] }
 0x754   :  { %2759 = vmatprep.subr.bf16.mxu1 %v2014_v6  ;;  %v2032_v6 = vld [vmem:[#allocation2 + $0xa08] sm:$0xff] }
 0x756   :  { %2432 = vmatpush1.bf16.msra.mxu0 %v2011_v36  ;;  %v2034_v36 = vld [vmem:[#allocation2 + $0xa18] sm:$0xff] }
 0x757   :  { %2760 = vmatpush1.bf16.msra.mxu1 %v2013_v29  ;;  %2433 = vmatprep.subr.bf16.mxu0 %v2016_v1  ;;  %v2031_v29 = vld [vmem:[#allocation2 + $0xa00] sm:$0xff]  ;;  %v2033_v1 = vld [vmem:[#allocation2 + $0xa10] sm:$0xff] }
 0x758   :  { %2761 = vmatprep.subr.bf16.mxu1 %v2018_v43  ;;  %v2036_v43 = vld [vmem:[#allocation2 + $0xa28] sm:$0xff] }
 0x75a   :  { %2434 = vmatpush1.bf16.msra.mxu0 %v2015_v14  ;;  %v2038_v14 = vld [vmem:[#allocation2 + $0xa38] sm:$0xff] }
 0x75b   :  { %2762 = vmatpush1.bf16.msra.mxu1 %v2017_v54  ;;  %2435 = vmatprep.subr.bf16.mxu0 %v2020_v48  ;;  %v2035_v54 = vld [vmem:[#allocation2 + $0xa20] sm:$0xff]  ;;  %v2037_v48 = vld [vmem:[#allocation2 + $0xa30] sm:$0xff] }
 0x75c   :  { %2763 = vmatprep.subr.bf16.mxu1 %v2022_v51  ;;  %v2040_v51 = vld [vmem:[#allocation2 + $0xa48] sm:$0xff] }
 0x75e   :  { %2436 = vmatpush1.bf16.msra.mxu0 %v2019_v49  ;;  %v2042_v49 = vld [vmem:[#allocation2 + $0xa58] sm:$0xff] }
 0x75f   :  { %2764 = vmatpush1.bf16.msra.mxu1 %v2021_v59  ;;  %2437 = vmatprep.subr.bf16.mxu0 %v2024_v23  ;;  %v2039_v59 = vld [vmem:[#allocation2 + $0xa40] sm:$0xff]  ;;  %v2041_v23 = vld [vmem:[#allocation2 + $0xa50] sm:$0xff] }
 0x760   :  { %2765 = vmatprep.subr.bf16.mxu1 %v2026_v52  ;;  %v2044_v52 = vld [vmem:[#allocation2 + $0xa68] sm:$0xff] }
 0x762   :  { %2438 = vmatpush1.bf16.msra.mxu0 %v2023_v13  ;;  %v2043_v13 = vld [vmem:[#allocation2 + $0xa60] sm:$0xff] }
 0x763   :  { %2766 = vmatpush1.bf16.msra.mxu1 %v2025_v16  ;;  %2439 = vmatprep.subr.bf16.mxu0 %v2028_v5  ;;  %v2045_v16 = vld [vmem:[#allocation2 + $0xa70] sm:$0xff]  ;;  %v2048_v5 = vld [vmem:[#allocation2 + $0xa88] sm:$0xff] }
 0x764   :  { %2767 = vmatprep.subr.bf16.mxu1 %v2030_v15  ;;  %v2050_v15 = vld [vmem:[#allocation2 + $0xa98] sm:$0xff] }
 0x766   :  { %2440 = vmatpush1.bf16.msra.mxu0 %v2027_v21  ;;  %v2049_v21 = vld [vmem:[#allocation2 + $0xa90] sm:$0xff] }
 0x767   :  { %2768 = vmatpush1.bf16.msra.mxu1 %v2029_v7  ;;  %2450 = vmatprep.subr.bf16.mxu0 %v2032_v6  ;;  %v2052_v7 = vld [vmem:[#allocation2 + $0xaa8] sm:$0xff]  ;;  %v2054_v6 = vld [vmem:[#allocation2 + $0xab8] sm:$0xff] }
 0x768   :  { %2778 = vmatprep.subr.bf16.mxu1 %v2034_v36  ;;  %v2051_v36 = vld [vmem:[#allocation2 + $0xaa0] sm:$0xff] }
 0x769   :  { %2442 = vmatmul.mubr.bf16.vlgmr.msra.gmra.mrb[48].mxu0 %v8301_v62 }
 0x76a   :  { %2770 = vmatmul.mubr.bf16.vlgmr.msra.gmra.mrb[48].mxu1 %v8301_v62  ;;  %2451 = vmatpush1.bf16.msra.mxu0 %v2031_v29  ;;  %v2046_v62 = vld [vmem:[#allocation2 + $0xa78] sm:$0xff]  ;;  %v2053_v29 = vld [vmem:[#allocation2 + $0xab0] sm:$0xff] }
 0x76b   :  { %2779 = vmatpush1.bf16.msra.mxu1 %v2033_v1  ;;  %2452 = vmatprep.subr.bf16.mxu0 %v2036_v43  ;;  %v2056_v1 = vld [vmem:[#allocation2 + $0xac8] sm:$0xff]  ;;  %v2058_v43 = vld [vmem:[#allocation2 + $0xad8] sm:$0xff] }
 0x76c   :  { %2780 = vmatprep.subr.bf16.mxu1 %v2038_v14  ;;  %2482 = vmatprep.mubr.bf16.mxu0 %v8307_v24  ;;  %v2055_v14 = vld [vmem:[#allocation2 + $0xac0] sm:$0xff] }
 0x76d   :  { %2810 = vmatprep.mubr.bf16.mxu1 %v8307_v24  ;;  %v2047_v24 = vld [vmem:[#allocation2 + $0xa80] sm:$0xff] }
 0x76e   :  { %2453 = vmatpush1.bf16.msra.mxu0 %v2035_v54  ;;  %v2057_v54 = vld [vmem:[#allocation2 + $0xad0] sm:$0xff] }
 0x76f   :  { %2781 = vmatpush1.bf16.msra.mxu1 %v2037_v48  ;;  %2454 = vmatprep.subr.bf16.mxu0 %v2040_v51  ;;  %v2060_v48 = vld [vmem:[#allocation2 + $0xae8] sm:$0xff]  ;;  %v2062_v51 = vld [vmem:[#allocation2 + $0xaf8] sm:$0xff] }
 0x770   :  { %2782 = vmatprep.subr.bf16.mxu1 %v2042_v49  ;;  %v2059_v49 = vld [vmem:[#allocation2 + $0xae0] sm:$0xff] }
 0x772   :  { %2455 = vmatpush1.bf16.msra.mxu0 %v2039_v59  ;;  %v2061_v59 = vld [vmem:[#allocation2 + $0xaf0] sm:$0xff] }
 0x773   :  { %2783 = vmatpush1.bf16.msra.mxu1 %v2041_v23  ;;  %2456 = vmatprep.subr.bf16.mxu0 %v2044_v52  ;;  %v2064_v23 = vld [vmem:[#allocation2 + $0xb08] sm:$0xff]  ;;  %v2066_v52 = vld [vmem:[#allocation2 + $0xb18] sm:$0xff] }
 0x774   :  { %2784 = vmatprep.subr.bf16.mxu1 %v2046_v62  ;;  %v2063_v62 = vld [vmem:[#allocation2 + $0xb00] sm:$0xff] }
 0x776   :  { %2457 = vmatpush1.bf16.msra.mxu0 %v2043_v13  ;;  %v2065_v13 = vld [vmem:[#allocation2 + $0xb10] sm:$0xff] }
 0x777   :  { %2785 = vmatpush1.bf16.msra.mxu1 %v2045_v16  ;;  %2458 = vmatprep.subr.bf16.mxu0 %v2048_v5  ;;  %v2068_v16 = vld [vmem:[#allocation2 + $0xb28] sm:$0xff]  ;;  %v2070_v5 = vld [vmem:[#allocation2 + $0xb38] sm:$0xff] }
 0x778   :  { %2786 = vmatprep.subr.bf16.mxu1 %v2050_v15  ;;  %v2067_v15 = vld [vmem:[#allocation2 + $0xb20] sm:$0xff] }
 0x77a   :  { %2459 = vmatpush1.bf16.msra.mxu0 %v2047_v24  ;;  %v2069_v24 = vld [vmem:[#allocation2 + $0xb30] sm:$0xff] }
 0x77b   :  { %2787 = vmatpush1.bf16.msra.mxu1 %v2049_v21  ;;  %2460 = vmatprep.subr.bf16.mxu0 %v2052_v7  ;;  %v2072_v21 = vld [vmem:[#allocation2 + $0xb48] sm:$0xff]  ;;  %v2074_v7 = vld [vmem:[#allocation2 + $0xb58] sm:$0xff] }
 0x77c   :  { %2788 = vmatprep.subr.bf16.mxu1 %v2054_v6  ;;  %v2071_v6 = vld [vmem:[#allocation2 + $0xb40] sm:$0xff] }
 0x77e   :  { %2461 = vmatpush1.bf16.msra.mxu0 %v2051_v36  ;;  %v2073_v36 = vld [vmem:[#allocation2 + $0xb50] sm:$0xff] }
 0x77f   :  { %2789 = vmatpush1.bf16.msra.mxu1 %v2053_v29  ;;  %2462 = vmatprep.subr.bf16.mxu0 %v2056_v1  ;;  %v2076_v29 = vld [vmem:[#allocation2 + $0xb68] sm:$0xff]  ;;  %v2078_v1 = vld [vmem:[#allocation2 + $0xb78] sm:$0xff] }
 0x780   :  { %2790 = vmatprep.subr.bf16.mxu1 %v2058_v43  ;;  %v2075_v43 = vld [vmem:[#allocation2 + $0xb60] sm:$0xff] }
 0x782   :  { %2463 = vmatpush1.bf16.msra.mxu0 %v2055_v14  ;;  %v2077_v14 = vld [vmem:[#allocation2 + $0xb70] sm:$0xff] }
 0x783   :  { %2791 = vmatpush1.bf16.msra.mxu1 %v2057_v54  ;;  %2464 = vmatprep.subr.bf16.mxu0 %v2060_v48  ;;  %v2080_v54 = vld [vmem:[#allocation2 + $0xb88] sm:$0xff]  ;;  %v2082_v48 = vld [vmem:[#allocation2 + $0xb98] sm:$0xff] }
 0x784   :  { %2792 = vmatprep.subr.bf16.mxu1 %v2062_v51  ;;  %v2079_v51 = vld [vmem:[#allocation2 + $0xb80] sm:$0xff] }
 0x786   :  { %2465 = vmatpush1.bf16.msra.mxu0 %v2059_v49  ;;  %v2081_v49 = vld [vmem:[#allocation2 + $0xb90] sm:$0xff] }
 0x787   :  { %2793 = vmatpush1.bf16.msra.mxu1 %v2061_v59  ;;  %2466 = vmatprep.subr.bf16.mxu0 %v2064_v23  ;;  %v2084_v59 = vld [vmem:[#allocation2 + $0xba8] sm:$0xff]  ;;  %v2086_v23 = vld [vmem:[#allocation2 + $0xbb8] sm:$0xff] }
 0x788   :  { %2794 = vmatprep.subr.bf16.mxu1 %v2066_v52  ;;  %v2083_v52 = vld [vmem:[#allocation2 + $0xba0] sm:$0xff] }
 0x78a   :  { %2467 = vmatpush1.bf16.msra.mxu0 %v2063_v62  ;;  %v2085_v62 = vld [vmem:[#allocation2 + $0xbb0] sm:$0xff] }
 0x78b   :  { %2795 = vmatpush1.bf16.msra.mxu1 %v2065_v13  ;;  %2468 = vmatprep.subr.bf16.mxu0 %v2068_v16  ;;  %v2088_v13 = vld [vmem:[#allocation2 + $0xbc8] sm:$0xff]  ;;  %v2090_v16 = vld [vmem:[#allocation2 + $0xbd8] sm:$0xff] }
 0x78c   :  { %2796 = vmatprep.subr.bf16.mxu1 %v2070_v5  ;;  %v2087_v5 = vld [vmem:[#allocation2 + $0xbc0] sm:$0xff] }
 0x78e   :  { %2469 = vmatpush1.bf16.msra.mxu0 %v2067_v15  ;;  %v2089_v15 = vld [vmem:[#allocation2 + $0xbd0] sm:$0xff] }
 0x78f   :  { %2797 = vmatpush1.bf16.msra.mxu1 %v2069_v24  ;;  %2470 = vmatprep.subr.bf16.mxu0 %v2072_v21  ;;  %v2092_v24 = vld [vmem:[#allocation2 + $0xbe8] sm:$0xff]  ;;  %v2094_v21 = vld [vmem:[#allocation2 + $0xbf8] sm:$0xff] }
 0x790   :  { %2798 = vmatprep.subr.bf16.mxu1 %v2074_v7  ;;  %v2091_v7 = vld [vmem:[#allocation2 + $0xbe0] sm:$0xff] }
 0x792   :  { %2471 = vmatpush1.bf16.msra.mxu0 %v2071_v6  ;;  %v2093_v6 = vld [vmem:[#allocation2 + $0xbf0] sm:$0xff] }
 0x793   :  { %2799 = vmatpush1.bf16.msra.mxu1 %v2073_v36  ;;  %2472 = vmatprep.subr.bf16.mxu0 %v2076_v29  ;;  %v2096_v36 = vld [vmem:[#allocation2 + $0xc08] sm:$0xff]  ;;  %v2098_v29 = vld [vmem:[#allocation2 + $0xc18] sm:$0xff] }
 0x794   :  { %2800 = vmatprep.subr.bf16.mxu1 %v2078_v1  ;;  %v2095_v1 = vld [vmem:[#allocation2 + $0xc00] sm:$0xff] }
 0x796   :  { %2473 = vmatpush1.bf16.msra.mxu0 %v2075_v43  ;;  %v2097_v43 = vld [vmem:[#allocation2 + $0xc10] sm:$0xff] }
 0x797   :  { %2801 = vmatpush1.bf16.msra.mxu1 %v2077_v14  ;;  %2474 = vmatprep.subr.bf16.mxu0 %v2080_v54  ;;  %v2100_v14 = vld [vmem:[#allocation2 + $0xc28] sm:$0xff]  ;;  %v2102_v54 = vld [vmem:[#allocation2 + $0xc38] sm:$0xff] }
 0x798   :  { %2802 = vmatprep.subr.bf16.mxu1 %v2082_v48  ;;  %v2099_v48 = vld [vmem:[#allocation2 + $0xc20] sm:$0xff] }
 0x79a   :  { %2475 = vmatpush1.bf16.msra.mxu0 %v2079_v51  ;;  %v2101_v51 = vld [vmem:[#allocation2 + $0xc30] sm:$0xff] }
 0x79b   :  { %2803 = vmatpush1.bf16.msra.mxu1 %v2081_v49  ;;  %2476 = vmatprep.subr.bf16.mxu0 %v2084_v59  ;;  %v2104_v49 = vld [vmem:[#allocation2 + $0xc48] sm:$0xff]  ;;  %v2106_v59 = vld [vmem:[#allocation2 + $0xc58] sm:$0xff] }
 0x79c   :  { %2804 = vmatprep.subr.bf16.mxu1 %v2086_v23  ;;  %v2103_v23 = vld [vmem:[#allocation2 + $0xc40] sm:$0xff] }
 0x79e   :  { %2477 = vmatpush1.bf16.msra.mxu0 %v2083_v52  ;;  %v2105_v52 = vld [vmem:[#allocation2 + $0xc50] sm:$0xff] }
 0x79f   :  { %2805 = vmatpush1.bf16.msra.mxu1 %v2085_v62  ;;  %2478 = vmatprep.subr.bf16.mxu0 %v2088_v13  ;;  %v2108_v62 = vld [vmem:[#allocation2 + $0xc68] sm:$0xff]  ;;  %v2107_v13 = vld [vmem:[#allocation2 + $0xc60] sm:$0xff] }
 0x7a0   :  { %2806 = vmatprep.subr.bf16.mxu1 %v2090_v16  ;;  %v2109_v16 = vld [vmem:[#allocation2 + $0xc70] sm:$0xff] }
 0x7a2   :  { %2479 = vmatpush1.bf16.msra.mxu0 %v2087_v5  ;;  %v2112_v5 = vld [vmem:[#allocation2 + $0xc88] sm:$0xff] }
 0x7a3   :  { %2807 = vmatpush1.bf16.msra.mxu1 %v2089_v15  ;;  %2480 = vmatprep.subr.bf16.mxu0 %v2092_v24  ;;  %v2114_v15 = vld [vmem:[#allocation2 + $0xc98] sm:$0xff]  ;;  %v2113_v24 = vld [vmem:[#allocation2 + $0xc90] sm:$0xff] }
 0x7a4   :  { %2808 = vmatprep.subr.bf16.mxu1 %v2094_v21  ;;  %v2116_v21 = vld [vmem:[#allocation2 + $0xca8] sm:$0xff] }
 0x7a6   :  { %2481 = vmatpush1.bf16.msra.mxu0 %v2091_v7  ;;  %v2118_v7 = vld [vmem:[#allocation2 + $0xcb8] sm:$0xff] }
 0x7a7   :  { %2809 = vmatpush1.bf16.msra.mxu1 %v2093_v6  ;;  %2491 = vmatprep.subr.bf16.mxu0 %v2096_v36  ;;  %v2115_v6 = vld [vmem:[#allocation2 + $0xca0] sm:$0xff]  ;;  %v2117_v36 = vld [vmem:[#allocation2 + $0xcb0] sm:$0xff] }
 0x7a8   :  { %2819 = vmatprep.subr.bf16.mxu1 %v2098_v29  ;;  %v2120_v29 = vld [vmem:[#allocation2 + $0xcc8] sm:$0xff] }
 0x7a9   :  { %2483 = vmatmul.mubr.bf16.vlgmr.msra.gmra.mrb[48].mxu0 %v8303_v63 }
 0x7aa   :  { %2811 = vmatmul.mubr.bf16.vlgmr.msra.gmra.mrb[48].mxu1 %v8303_v63  ;;  %2492 = vmatpush1.bf16.msra.mxu0 %v2095_v1  ;;  %v2110_v63 = vld [vmem:[#allocation2 + $0xc78] sm:$0xff] }
 0x7ab   :  { %2820 = vmatpush1.bf16.msra.mxu1 %v2097_v43  ;;  %2493 = vmatprep.subr.bf16.mxu0 %v2100_v14  ;;  %v2122_v1 = vld [vmem:[#allocation2 + $0xcd8] sm:$0xff]  ;;  %v2119_v43 = vld [vmem:[#allocation2 + $0xcc0] sm:$0xff]  ;;  %v2121_v14 = vld [vmem:[#allocation2 + $0xcd0] sm:$0xff] }
 0x7ac   :  { %2821 = vmatprep.subr.bf16.mxu1 %v2102_v54  ;;  %2523 = vmatprep.mubr.bf16.mxu0 %v8333_v20  ;;  %v2124_v54 = vld [vmem:[#allocation2 + $0xce8] sm:$0xff] }
 0x7ad   :  { %2851 = vmatprep.mubr.bf16.mxu1 %v8333_v20  ;;  %v2111_v20 = vld [vmem:[#allocation2 + $0xc80] sm:$0xff] }
 0x7ae   :  { %2494 = vmatpush1.bf16.msra.mxu0 %v2099_v48  ;;  %v2126_v48 = vld [vmem:[#allocation2 + $0xcf8] sm:$0xff] }
 0x7af   :  { %2822 = vmatpush1.bf16.msra.mxu1 %v2101_v51  ;;  %2495 = vmatprep.subr.bf16.mxu0 %v2104_v49  ;;  %v2123_v51 = vld [vmem:[#allocation2 + $0xce0] sm:$0xff]  ;;  %v2125_v49 = vld [vmem:[#allocation2 + $0xcf0] sm:$0xff] }
 0x7b0   :  { %2823 = vmatprep.subr.bf16.mxu1 %v2106_v59  ;;  %v2128_v59 = vld [vmem:[#allocation2 + $0xd08] sm:$0xff] }
 0x7b2   :  { %2496 = vmatpush1.bf16.msra.mxu0 %v2103_v23  ;;  %v2130_v23 = vld [vmem:[#allocation2 + $0xd18] sm:$0xff] }
 0x7b3   :  { %2824 = vmatpush1.bf16.msra.mxu1 %v2105_v52  ;;  %2497 = vmatprep.subr.bf16.mxu0 %v2108_v62  ;;  %v2127_v52 = vld [vmem:[#allocation2 + $0xd00] sm:$0xff]  ;;  %v2129_v62 = vld [vmem:[#allocation2 + $0xd10] sm:$0xff] }
 0x7b4   :  { %2825 = vmatprep.subr.bf16.mxu1 %v2110_v63  ;;  %v2132_v63 = vld [vmem:[#allocation2 + $0xd28] sm:$0xff] }
 0x7b6   :  { %2498 = vmatpush1.bf16.msra.mxu0 %v2107_v13  ;;  %v2134_v13 = vld [vmem:[#allocation2 + $0xd38] sm:$0xff] }
 0x7b7   :  { %2826 = vmatpush1.bf16.msra.mxu1 %v2109_v16  ;;  %2499 = vmatprep.subr.bf16.mxu0 %v2112_v5  ;;  %v2131_v16 = vld [vmem:[#allocation2 + $0xd20] sm:$0xff]  ;;  %v2133_v5 = vld [vmem:[#allocation2 + $0xd30] sm:$0xff] }
 0x7b8   :  { %2827 = vmatprep.subr.bf16.mxu1 %v2114_v15  ;;  %v2136_v15 = vld [vmem:[#allocation2 + $0xd48] sm:$0xff] }
 0x7ba   :  { %2500 = vmatpush1.bf16.msra.mxu0 %v2111_v20  ;;  %v2138_v20 = vld [vmem:[#allocation2 + $0xd58] sm:$0xff] }
 0x7bb   :  { %2828 = vmatpush1.bf16.msra.mxu1 %v2113_v24  ;;  %2501 = vmatprep.subr.bf16.mxu0 %v2116_v21  ;;  %v2135_v24 = vld [vmem:[#allocation2 + $0xd40] sm:$0xff]  ;;  %v2137_v21 = vld [vmem:[#allocation2 + $0xd50] sm:$0xff] }
 0x7bc   :  { %2829 = vmatprep.subr.bf16.mxu1 %v2118_v7  ;;  %v2140_v7 = vld [vmem:[#allocation2 + $0xd68] sm:$0xff] }
 0x7be   :  { %2502 = vmatpush1.bf16.msra.mxu0 %v2115_v6  ;;  %v2142_v6 = vld [vmem:[#allocation2 + $0xd78] sm:$0xff] }
 0x7bf   :  { %2830 = vmatpush1.bf16.msra.mxu1 %v2117_v36  ;;  %2503 = vmatprep.subr.bf16.mxu0 %v2120_v29  ;;  %v2139_v36 = vld [vmem:[#allocation2 + $0xd60] sm:$0xff]  ;;  %v2141_v29 = vld [vmem:[#allocation2 + $0xd70] sm:$0xff] }
 0x7c0   :  { %2831 = vmatprep.subr.bf16.mxu1 %v2122_v1  ;;  %v2144_v1 = vld [vmem:[#allocation2 + $0xd88] sm:$0xff] }
 0x7c2   :  { %2504 = vmatpush1.bf16.msra.mxu0 %v2119_v43  ;;  %v2146_v43 = vld [vmem:[#allocation2 + $0xd98] sm:$0xff] }
 0x7c3   :  { %2832 = vmatpush1.bf16.msra.mxu1 %v2121_v14  ;;  %2505 = vmatprep.subr.bf16.mxu0 %v2124_v54  ;;  %v2143_v14 = vld [vmem:[#allocation2 + $0xd80] sm:$0xff]  ;;  %v2145_v54 = vld [vmem:[#allocation2 + $0xd90] sm:$0xff] }
 0x7c4   :  { %2833 = vmatprep.subr.bf16.mxu1 %v2126_v48  ;;  %v2148_v48 = vld [vmem:[#allocation2 + $0xda8] sm:$0xff] }
 0x7c6   :  { %2506 = vmatpush1.bf16.msra.mxu0 %v2123_v51  ;;  %v2150_v51 = vld [vmem:[#allocation2 + $0xdb8] sm:$0xff] }
 0x7c7   :  { %2834 = vmatpush1.bf16.msra.mxu1 %v2125_v49  ;;  %2507 = vmatprep.subr.bf16.mxu0 %v2128_v59  ;;  %v2147_v49 = vld [vmem:[#allocation2 + $0xda0] sm:$0xff]  ;;  %v2149_v59 = vld [vmem:[#allocation2 + $0xdb0] sm:$0xff] }
 0x7c8   :  { %2835 = vmatprep.subr.bf16.mxu1 %v2130_v23  ;;  %v2152_v23 = vld [vmem:[#allocation2 + $0xdc8] sm:$0xff] }
 0x7ca   :  { %2508 = vmatpush1.bf16.msra.mxu0 %v2127_v52  ;;  %v2154_v52 = vld [vmem:[#allocation2 + $0xdd8] sm:$0xff] }
 0x7cb   :  { %2836 = vmatpush1.bf16.msra.mxu1 %v2129_v62  ;;  %2509 = vmatprep.subr.bf16.mxu0 %v2132_v63  ;;  %v2151_v62 = vld [vmem:[#allocation2 + $0xdc0] sm:$0xff]  ;;  %v2153_v63 = vld [vmem:[#allocation2 + $0xdd0] sm:$0xff] }
 0x7cc   :  { %2837 = vmatprep.subr.bf16.mxu1 %v2134_v13  ;;  %v2156_v13 = vld [vmem:[#allocation2 + $0xde8] sm:$0xff] }
 0x7ce   :  { %2510 = vmatpush1.bf16.msra.mxu0 %v2131_v16  ;;  %v2158_v16 = vld [vmem:[#allocation2 + $0xdf8] sm:$0xff] }
 0x7cf   :  { %2838 = vmatpush1.bf16.msra.mxu1 %v2133_v5  ;;  %2511 = vmatprep.subr.bf16.mxu0 %v2136_v15  ;;  %v2155_v5 = vld [vmem:[#allocation2 + $0xde0] sm:$0xff]  ;;  %v2157_v15 = vld [vmem:[#allocation2 + $0xdf0] sm:$0xff] }
 0x7d0   :  { %2839 = vmatprep.subr.bf16.mxu1 %v2138_v20  ;;  %v2160_v20 = vld [vmem:[#allocation2 + $0xe08] sm:$0xff] }
 0x7d2   :  { %2512 = vmatpush1.bf16.msra.mxu0 %v2135_v24  ;;  %v2162_v24 = vld [vmem:[#allocation2 + $0xe18] sm:$0xff] }
 0x7d3   :  { %2840 = vmatpush1.bf16.msra.mxu1 %v2137_v21  ;;  %2513 = vmatprep.subr.bf16.mxu0 %v2140_v7  ;;  %v2159_v21 = vld [vmem:[#allocation2 + $0xe00] sm:$0xff]  ;;  %v2161_v7 = vld [vmem:[#allocation2 + $0xe10] sm:$0xff] }
 0x7d4   :  { %2841 = vmatprep.subr.bf16.mxu1 %v2142_v6  ;;  %v2164_v6 = vld [vmem:[#allocation2 + $0xe28] sm:$0xff] }
 0x7d6   :  { %2514 = vmatpush1.bf16.msra.mxu0 %v2139_v36  ;;  %v2166_v36 = vld [vmem:[#allocation2 + $0xe38] sm:$0xff] }
 0x7d7   :  { %2842 = vmatpush1.bf16.msra.mxu1 %v2141_v29  ;;  %2515 = vmatprep.subr.bf16.mxu0 %v2144_v1  ;;  %v2163_v29 = vld [vmem:[#allocation2 + $0xe20] sm:$0xff]  ;;  %v2165_v1 = vld [vmem:[#allocation2 + $0xe30] sm:$0xff] }
 0x7d8   :  { %2843 = vmatprep.subr.bf16.mxu1 %v2146_v43  ;;  %v2168_v43 = vld [vmem:[#allocation2 + $0xe48] sm:$0xff] }
 0x7da   :  { %2516 = vmatpush1.bf16.msra.mxu0 %v2143_v14  ;;  %v2170_v14 = vld [vmem:[#allocation2 + $0xe58] sm:$0xff] }
 0x7db   :  { %2844 = vmatpush1.bf16.msra.mxu1 %v2145_v54  ;;  %2517 = vmatprep.subr.bf16.mxu0 %v2148_v48  ;;  %v2167_v54 = vld [vmem:[#allocation2 + $0xe40] sm:$0xff]  ;;  %v2169_v48 = vld [vmem:[#allocation2 + $0xe50] sm:$0xff] }
 0x7dc   :  { %2845 = vmatprep.subr.bf16.mxu1 %v2150_v51  ;;  %v2172_v51 = vld [vmem:[#allocation2 + $0xe68] sm:$0xff] }
 0x7de   :  { %2518 = vmatpush1.bf16.msra.mxu0 %v2147_v49  ;;  %v2171_v49 = vld [vmem:[#allocation2 + $0xe60] sm:$0xff] }
 0x7df   :  { %2846 = vmatpush1.bf16.msra.mxu1 %v2149_v59  ;;  %2519 = vmatprep.subr.bf16.mxu0 %v2152_v23  ;;  %v2173_v59 = vld [vmem:[#allocation2 + $0xe70] sm:$0xff]  ;;  %v2176_v23 = vld [vmem:[#allocation2 + $0xe88] sm:$0xff] }
 0x7e0   :  { %2847 = vmatprep.subr.bf16.mxu1 %v2154_v52  ;;  %v2178_v52 = vld [vmem:[#allocation2 + $0xe98] sm:$0xff] }
 0x7e2   :  { %2520 = vmatpush1.bf16.msra.mxu0 %v2151_v62  ;;  %v2177_v62 = vld [vmem:[#allocation2 + $0xe90] sm:$0xff] }
 0x7e3   :  { %2848 = vmatpush1.bf16.msra.mxu1 %v2153_v63  ;;  %2521 = vmatprep.subr.bf16.mxu0 %v2156_v13  ;;  %v2180_v63 = vld [vmem:[#allocation2 + $0xea8] sm:$0xff]  ;;  %v2182_v13 = vld [vmem:[#allocation2 + $0xeb8] sm:$0xff] }
 0x7e4   :  { %2849 = vmatprep.subr.bf16.mxu1 %v2158_v16  ;;  %v2179_v16 = vld [vmem:[#allocation2 + $0xea0] sm:$0xff] }
 0x7e6   :  { %2522 = vmatpush1.bf16.msra.mxu0 %v2155_v5  ;;  %v2181_v5 = vld [vmem:[#allocation2 + $0xeb0] sm:$0xff] }
 0x7e7   :  { %2850 = vmatpush1.bf16.msra.mxu1 %v2157_v15  ;;  %2532 = vmatprep.subr.bf16.mxu0 %v2160_v20  ;;  %v2184_v15 = vld [vmem:[#allocation2 + $0xec8] sm:$0xff]  ;;  %v2186_v20 = vld [vmem:[#allocation2 + $0xed8] sm:$0xff] }
 0x7e8   :  { %2860 = vmatprep.subr.bf16.mxu1 %v2162_v24  ;;  %v2183_v24 = vld [vmem:[#allocation2 + $0xec0] sm:$0xff] }
 0x7e9   :  { %2524 = vmatmul.mubr.bf16.vlgmr.msra.gmra.mrb[48].mxu0 %v8329_v18 }
 0x7ea   :  { %2852 = vmatmul.mubr.bf16.vlgmr.msra.gmra.mrb[48].mxu1 %v8329_v18  ;;  %2533 = vmatpush1.bf16.msra.mxu0 %v2159_v21  ;;  %v2174_v18 = vld [vmem:[#allocation2 + $0xe78] sm:$0xff]  ;;  %v2185_v21 = vld [vmem:[#allocation2 + $0xed0] sm:$0xff] }
 0x7eb   :  { %2861 = vmatpush1.bf16.msra.mxu1 %v2161_v7  ;;  %2534 = vmatprep.subr.bf16.mxu0 %v2164_v6  ;;  %v2188_v7 = vld [vmem:[#allocation2 + $0xee8] sm:$0xff]  ;;  %v2190_v6 = vld [vmem:[#allocation2 + $0xef8] sm:$0xff] }
 0x7ec   :  { %2862 = vmatprep.subr.bf16.mxu1 %v2166_v36  ;;  %2564 = vmatprep.mubr.bf16.mxu0 %v8335_v47  ;;  %v2187_v36 = vld [vmem:[#allocation2 + $0xee0] sm:$0xff] }
 0x7ed   :  { %2892 = vmatprep.mubr.bf16.mxu1 %v8335_v47  ;;  %v2175_v47 = vld [vmem:[#allocation2 + $0xe80] sm:$0xff] }
 0x7ee   :  { %2535 = vmatpush1.bf16.msra.mxu0 %v2163_v29  ;;  %v2189_v29 = vld [vmem:[#allocation2 + $0xef0] sm:$0xff] }
 0x7ef   :  { %2863 = vmatpush1.bf16.msra.mxu1 %v2165_v1  ;;  %2536 = vmatprep.subr.bf16.mxu0 %v2168_v43  ;;  %v2192_v1 = vld [vmem:[#allocation2 + $0xf08] sm:$0xff]  ;;  %v2194_v43 = vld [vmem:[#allocation2 + $0xf18] sm:$0xff] }
 0x7f0   :  { %2864 = vmatprep.subr.bf16.mxu1 %v2170_v14  ;;  %v2191_v14 = vld [vmem:[#allocation2 + $0xf00] sm:$0xff] }
 0x7f2   :  { %2537 = vmatpush1.bf16.msra.mxu0 %v2167_v54  ;;  %v2193_v54 = vld [vmem:[#allocation2 + $0xf10] sm:$0xff] }
 0x7f3   :  { %2865 = vmatpush1.bf16.msra.mxu1 %v2169_v48  ;;  %2538 = vmatprep.subr.bf16.mxu0 %v2172_v51  ;;  %v2196_v48 = vld [vmem:[#allocation2 + $0xf28] sm:$0xff]  ;;  %v2198_v51 = vld [vmem:[#allocation2 + $0xf38] sm:$0xff] }
 0x7f4   :  { %2866 = vmatprep.subr.bf16.mxu1 %v2174_v18  ;;  %v2195_v18 = vld [vmem:[#allocation2 + $0xf20] sm:$0xff] }
 0x7f6   :  { %2539 = vmatpush1.bf16.msra.mxu0 %v2171_v49  ;;  %v2197_v49 = vld [vmem:[#allocation2 + $0xf30] sm:$0xff] }
 0x7f7   :  { %2867 = vmatpush1.bf16.msra.mxu1 %v2173_v59  ;;  %2540 = vmatprep.subr.bf16.mxu0 %v2176_v23  ;;  %v2200_v59 = vld [vmem:[#allocation2 + $0xf48] sm:$0xff]  ;;  %v2202_v23 = vld [vmem:[#allocation2 + $0xf58] sm:$0xff] }
 0x7f8   :  { %2868 = vmatprep.subr.bf16.mxu1 %v2178_v52  ;;  %v2199_v52 = vld [vmem:[#allocation2 + $0xf40] sm:$0xff] }
 0x7fa   :  { %2541 = vmatpush1.bf16.msra.mxu0 %v2175_v47  ;;  %v2201_v47 = vld [vmem:[#allocation2 + $0xf50] sm:$0xff] }
 0x7fb   :  { %2869 = vmatpush1.bf16.msra.mxu1 %v2177_v62  ;;  %2542 = vmatprep.subr.bf16.mxu0 %v2180_v63  ;;  %v2204_v62 = vld [vmem:[#allocation2 + $0xf68] sm:$0xff]  ;;  %v2206_v63 = vld [vmem:[#allocation2 + $0xf78] sm:$0xff] }
 0x7fc   :  { %2870 = vmatprep.subr.bf16.mxu1 %v2182_v13  ;;  %v2203_v13 = vld [vmem:[#allocation2 + $0xf60] sm:$0xff] }
 0x7fe   :  { %2543 = vmatpush1.bf16.msra.mxu0 %v2179_v16  ;;  %v2205_v16 = vld [vmem:[#allocation2 + $0xf70] sm:$0xff] }
 0x7ff   :  { %2871 = vmatpush1.bf16.msra.mxu1 %v2181_v5  ;;  %2544 = vmatprep.subr.bf16.mxu0 %v2184_v15  ;;  %v2208_v5 = vld [vmem:[#allocation2 + $0xf88] sm:$0xff]  ;;  %v2210_v15 = vld [vmem:[#allocation2 + $0xf98] sm:$0xff] }
 0x800   :  { %2872 = vmatprep.subr.bf16.mxu1 %v2186_v20  ;;  %v2207_v20 = vld [vmem:[#allocation2 + $0xf80] sm:$0xff] }
 0x802   :  { %2545 = vmatpush1.bf16.msra.mxu0 %v2183_v24  ;;  %v2209_v24 = vld [vmem:[#allocation2 + $0xf90] sm:$0xff] }
 0x803   :  { %2873 = vmatpush1.bf16.msra.mxu1 %v2185_v21  ;;  %2546 = vmatprep.subr.bf16.mxu0 %v2188_v7  ;;  %v2212_v21 = vld [vmem:[#allocation2 + $0xfa8] sm:$0xff]  ;;  %v2214_v7 = vld [vmem:[#allocation2 + $0xfb8] sm:$0xff] }
 0x804   :  { %2874 = vmatprep.subr.bf16.mxu1 %v2190_v6  ;;  %v2211_v6 = vld [vmem:[#allocation2 + $0xfa0] sm:$0xff] }
 0x806   :  { %2547 = vmatpush1.bf16.msra.mxu0 %v2187_v36  ;;  %v2213_v36 = vld [vmem:[#allocation2 + $0xfb0] sm:$0xff] }
 0x807   :  { %2875 = vmatpush1.bf16.msra.mxu1 %v2189_v29  ;;  %2548 = vmatprep.subr.bf16.mxu0 %v2192_v1  ;;  %v2216_v29 = vld [vmem:[#allocation2 + $0xfc8] sm:$0xff]  ;;  %v2218_v1 = vld [vmem:[#allocation2 + $0xfd8] sm:$0xff] }
 0x808   :  { %2876 = vmatprep.subr.bf16.mxu1 %v2194_v43  ;;  %v2215_v43 = vld [vmem:[#allocation2 + $0xfc0] sm:$0xff] }
 0x80a   :  { %2549 = vmatpush1.bf16.msra.mxu0 %v2191_v14  ;;  %v2217_v14 = vld [vmem:[#allocation2 + $0xfd0] sm:$0xff] }
 0x80b   :  { %2877 = vmatpush1.bf16.msra.mxu1 %v2193_v54  ;;  %2550 = vmatprep.subr.bf16.mxu0 %v2196_v48  ;;  %v2220_v54 = vld [vmem:[#allocation2 + $0xfe8] sm:$0xff]  ;;  %v2222_v48 = vld [vmem:[#allocation2 + $0xff8] sm:$0xff] }
 0x80c   :  { %2878 = vmatprep.subr.bf16.mxu1 %v2198_v51  ;;  %v2219_v51 = vld [vmem:[#allocation2 + $0xfe0] sm:$0xff] }
 0x80e   :  { %2551 = vmatpush1.bf16.msra.mxu0 %v2195_v18  ;;  %v2221_v18 = vld [vmem:[#allocation2 + $0xff0] sm:$0xff] }
 0x80f   :  { %2879 = vmatpush1.bf16.msra.mxu1 %v2197_v49  ;;  %2552 = vmatprep.subr.bf16.mxu0 %v2200_v59  ;;  %v7092_v49 = vld [vmem:[#allocation11 + $0x40] sm:$0xff]  }
 0x810   :  { %2880 = vmatprep.subr.bf16.mxu1 %v2202_v23  ;;  %v7093_v59 = vld [vmem:[#allocation11 + $0xc0] sm:$0xff]  }
 0x811   :  { %v7094_v23 = vld [vmem:[#allocation11] sm:$0xff]  }
 0x812   :  { %2553 = vmatpush1.bf16.msra.mxu0 %v2199_v52  ;;  %v7095_v52 = vld [vmem:[#allocation11 + $0x80] sm:$0xff]  }
 0x813   :  { %2881 = vmatpush1.bf16.msra.mxu1 %v2201_v47  ;;  %2554 = vmatprep.subr.bf16.mxu0 %v2204_v62  ;;  %v7096_v47 = vld [vmem:[#allocation11 + $0x48] sm:$0xff]  }
 0x814   :  { %2882 = vmatprep.subr.bf16.mxu1 %v2206_v63  ;;  %v7097_v62 = vld [vmem:[#allocation11 + $0xc8] sm:$0xff]  }
 0x815   :  { %v7098_v63 = vld [vmem:[#allocation11 + $0x8] sm:$0xff]  }
 0x816   :  { %2555 = vmatpush1.bf16.msra.mxu0 %v2203_v13  ;;  %v7099_v13 = vld [vmem:[#allocation11 + $0x88] sm:$0xff]  }
 0x817   :  { %2883 = vmatpush1.bf16.msra.mxu1 %v2205_v16  ;;  %2556 = vmatprep.subr.bf16.mxu0 %v2208_v5  ;;  %v7100_v16 = vld [vmem:[#allocation11 + $0x50] sm:$0xff]  }
 0x818   :  { %2884 = vmatprep.subr.bf16.mxu1 %v2210_v15  ;;  %v7101_v5 = vld [vmem:[#allocation11 + $0xd0] sm:$0xff]  }
 0x819   :  { %v7102_v15 = vld [vmem:[#allocation11 + $0x10] sm:$0xff]  }
 0x81a   :  { %2557 = vmatpush1.bf16.msra.mxu0 %v2207_v20  ;;  %v7103_v20 = vld [vmem:[#allocation11 + $0x90] sm:$0xff]  }
 0x81b   :  { %2885 = vmatpush1.bf16.msra.mxu1 %v2209_v24  ;;  %2558 = vmatprep.subr.bf16.mxu0 %v2212_v21  ;;  %v7104_v24 = vld [vmem:[#allocation11 + $0x58] sm:$0xff]  }
 0x81c   :  { %2886 = vmatprep.subr.bf16.mxu1 %v2214_v7  ;;  %v7105_v21 = vld [vmem:[#allocation11 + $0xd8] sm:$0xff]  }
 0x81d   :  { %v7106_v7 = vld [vmem:[#allocation11 + $0x18] sm:$0xff]  }
 0x81e   :  { %2559 = vmatpush1.bf16.msra.mxu0 %v2211_v6  ;;  %v7108_v6 = vld [vmem:[#allocation11 + $0x60] sm:$0xff]  }
 0x81f   :  { %2887 = vmatpush1.bf16.msra.mxu1 %v2213_v36  ;;  %2560 = vmatprep.subr.bf16.mxu0 %v2216_v29  ;;  %v7109_v36 = vld [vmem:[#allocation11 + $0xe0] sm:$0xff]  }
 0x820   :  { %2888 = vmatprep.subr.bf16.mxu1 %v2218_v1  ;;  %v7110_v29 = vld [vmem:[#allocation11 + $0x20] sm:$0xff]  }
 0x821   :  { %v7111_v1 = vld [vmem:[#allocation11 + $0xa0] sm:$0xff]  }
 0x822   :  { %2561 = vmatpush1.bf16.msra.mxu0 %v2215_v43  ;;  %v7112_v43 = vld [vmem:[#allocation11 + $0x68] sm:$0xff]  }
 0x823   :  { %2889 = vmatpush1.bf16.msra.mxu1 %v2217_v14  ;;  %2562 = vmatprep.subr.bf16.mxu0 %v2220_v54  ;;  %v7113_v14 = vld [vmem:[#allocation11 + $0xe8] sm:$0xff]  }
 0x824   :  { %2890 = vmatprep.subr.bf16.mxu1 %v2222_v48  ;;  %v7114_v54 = vld [vmem:[#allocation11 + $0x28] sm:$0xff]  }
 0x825   :  { %v7115_v48 = vld [vmem:[#allocation11 + $0xa8] sm:$0xff]  }
 0x826   :  { %2563 = vmatpush1.bf16.msra.mxu0 %v2219_v51  ;;  %v7116_v51 = vld [vmem:[#allocation11 + $0x70] sm:$0xff]  }
 0x827   :  { %2891 = vmatpush1.bf16.msra.mxu1 %v2221_v18  ;;  %6623 = vmatprep.subr.bf16.mxu0 %v7092_v49  ;;  %v7117_v18 = vld [vmem:[#allocation11 + $0xf0] sm:$0xff]  }
 0x828   :  { %6645 = vmatprep.subr.bf16.mxu1 %v7093_v59  ;;  %v7118_v49 = vld [vmem:[#allocation11 + $0x30] sm:$0xff]  }
 0x829   :  { %2565 = vmatmul.mubr.bf16.vlgmr.msra.gmra.mrb[48].mxu0 %v8331_v9  ;;  %v7119_v59 = vld [vmem:[#allocation11 + $0xb0] sm:$0xff]  }
 0x82a   :  { %2893 = vmatmul.mubr.bf16.vlgmr.msra.gmra.mrb[48].mxu1 %v8331_v9  ;;  %6624 = vmatpush3.bf16.msra.mxu0 %v7094_v23  ;;  %v7107_v9 = vld [vmem:[#allocation11 + $0x98] sm:$0xff]  }
 0x82b   :  { %6646 = vmatpush3.bf16.msra.mxu1 %v7095_v52  ;;  %6625 = vmatprep.subr.bf16.mxu0 %v7096_v47  ;;  %v7120_v23 = vld [vmem:[#allocation11 + $0x78] sm:$0xff]  }
 0x82c   :  { %6647 = vmatprep.subr.bf16.mxu1 %v7097_v62  ;;  %v7121_v52 = vld [vmem:[#allocation11 + $0xf8] sm:$0xff]  }
 0x82d   :  { %v7122_v47 = vld [vmem:[#allocation11 + $0x38] sm:$0xff]  }
 0x82e   :  { %6626 = vmatpush3.bf16.msra.mxu0 %v7098_v63  ;;  %v7123_v62 = vld [vmem:[#allocation11 + $0xb8] sm:$0xff]  }
 0x82f   :  { %6648 = vmatpush3.bf16.msra.mxu1 %v7099_v13  ;;  %6627 = vmatprep.subr.bf16.mxu0 %v7100_v16  ;;  %v7126_v63 = vld [vmem:[#allocation14 + $0x4] ss:$16 sps:$4 sm:$0xff]   ;;  %v7129_v13 = vld [vmem:[#allocation14 + $0xc] ss:$16 sps:$4 sm:$0xff]  }
 0x830   :  { %6649 = vmatprep.subr.bf16.mxu1 %v7101_v5  ;;  %v9196_v16 = vld [vmem:[#allocation39_spill] sm:$0xff] }
 0x831   :  { %v8504_v5 = vsub.s32 0, %v9196_v16 }
 0x832   :  { %6628 = vmatpush3.bf16.msra.mxu0 %v7102_v15  ;;  %v8507_v15 = vsub.s32 2, %v9196_v16 }
 0x833   :  { %6650 = vmatpush3.bf16.msra.mxu1 %v7103_v20  ;;  %6629 = vmatprep.subr.bf16.mxu0 %v7104_v24  ;;  %9197 = vst [vmem:[#allocation40_spill] sm:$0xff] %v8504_v5  ;;  %v2223_v20 = vld [vmem:[#allocation10] sm:$0xf]  ;;  %v8510_v24 = vsub.s32 1, %v9196_v16 }
 0x834   :  { %6651 = vmatprep.subr.bf16.mxu1 %v7105_v21  ;;  %9198 = vst [vmem:[#allocation41_spill] sm:$0xff] %v8507_v15  ;;  %v8513_v21 = vsub.s32 3, %v9196_v16 }
 0x835   :  { %9199 = vst [vmem:[#allocation82_spill] sm:$0xff] %v8510_v24 }
 0x836   :  { %6630 = vmatpush3.bf16.msra.mxu0 %v7106_v7  ;;  %9200 = vst [vmem:[#allocation83_spill] sm:$0xff] %v8513_v21  ;;  %v2228_v7 = vrot.slane %v2223_v20, %v8504_v5 }
 0x837   :  { %6652 = vmatpush3.bf16.msra.mxu1 %v7107_v9  ;;  %6631 = vmatprep.subr.bf16.mxu0 %v7108_v6  ;;  %v2236_v9 = vrot.slane %v2223_v20, %v8507_v15  ;;  %v2232_v6 = vrot.slane %v2223_v20, %v8510_v24 }
 0x838   :  { %6653 = vmatprep.subr.bf16.mxu1 %v7109_v36  ;;  %v2240_v36 = vrot.slane %v2223_v20, %v8513_v21 }
 0x83a   :  { %6632 = vmatpush3.bf16.msra.mxu0 %v7110_v29 }
 0x83b   :  { %6654 = vmatpush3.bf16.msra.mxu1 %v7111_v1  ;;  %6633 = vmatprep.subr.bf16.mxu0 %v7112_v43 }
 0x83c   :  { %6655 = vmatprep.subr.bf16.mxu1 %v7113_v14 }
 0x83e   :  { %6634 = vmatpush3.bf16.msra.mxu0 %v7114_v54 }
 0x83f   :  { %6656 = vmatpush3.bf16.msra.mxu1 %v7115_v48  ;;  %6635 = vmatprep.subr.bf16.mxu0 %v7116_v51 }
 0x840   :  { %6657 = vmatprep.subr.bf16.mxu1 %v7117_v18 }
 0x842   :  { %6636 = vmatpush3.bf16.msra.mxu0 %v7118_v49 }
 0x843   :  { %6658 = vmatpush3.bf16.msra.mxu1 %v7119_v59  ;;  %6637 = vmatprep.subr.bf16.mxu0 %v7120_v23 }
 0x844   :  { %6659 = vmatprep.subr.bf16.mxu1 %v7121_v52 }
 0x846   :  { %6638 = vmatpush3.bf16.msra.mxu0 %v7122_v47 }
 0x847   :  { %6660 = vmatpush3.bf16.msra.mxu1 %v7123_v62  ;;  %3478 = vmatprep.subr.bf16.mxu0 %v7126_v63 }
 0x848   :  { %3519 = vmatprep.subr.bf16.mxu1 %v7129_v13 }
 0x8fc   :  { %v2566_v29 = vpop.f32.mrb[48].mxu0 }
 0x8fd   :  { %v2894_v1 = vpop.f32.mrb[48].mxu1  ;;  %v6891_v43 = vadd.f32 %v2566_v29, %v2228_v7  ;;  %v2568_v54 = vpop.f32.mrb[49].mxu0 }
 0x8fe   :  { %v6893_v14 = vadd.f32 %v2894_v1, %v2236_v9  ;;  %v2896_v48 = vpop.f32.mrb[49].mxu1  ;;  %v6892_v51 = vadd.f32 %v2568_v54, %v2232_v6  ;;  %v2570_v49 = vpop.f32.mrb[50].mxu0  ;;  %v7124_v6 = vld [vmem:[#allocation14] ss:$16 sps:$4 sm:$0xff]  }
 0x8ff   :  { %v6894_v18 = vadd.f32 %v2896_v48, %v2240_v36  ;;  %v2898_v59 = vpop.f32.mrb[50].mxu1  ;;  %vm2901_vm13 = vcmp.gt.f32.partialorder %v6891_v43, 0.0  ;;  %v2905_v23 = vmul.f32 0.2, %v6891_v43  ;;  %v2571_v20 = vpop.f32.mrb[51].mxu0 }
 0x900   :  { %vm2903_vm5 = vcmp.gt.f32.partialorder %v6893_v14, 0.0  ;;  %v2907_v52 = vmul.f32 0.2, %v6893_v14  ;;  %vm2902_vm14 = vcmp.gt.f32.partialorder %v6892_v51, 0.0  ;;  %v2906_v47 = vmul.f32 0.2, %v6892_v51 }
 0x901   :  { %vm2904_vm15 = vcmp.gt.f32.partialorder %v6894_v18, 0.0  ;;  %v2908_v62 = vmul.f32 0.2, %v6894_v18  ;;  %v2909_v63 = vsel %vm2901_vm13, %v6891_v43, %v2905_v23  ;;  %v2899_v16 = vpop.f32.mrb[51].mxu1  ;;  %v7127_v36 = vld [vmem:[#allocation14 + $0x8] ss:$16 sps:$4 sm:$0xff]  }
 0x902   :  { %v2911_v13 = vsel %vm2903_vm5, %v6893_v14, %v2907_v52  ;;  %v2910_v7 = vsel %vm2902_vm14, %v6892_v51, %v2906_v47  ;;  %v2913_v54 = vpack.c.bf16 %v2909_v63, %v2909_v63  ;;  %v7132_v49 = vld [vmem:[#allocation14 + $0x24] ss:$16 sps:$4 sm:$0xff]   ;;  %v7135_v59 = vld [vmem:[#allocation14 + $0x2c] ss:$16 sps:$4 sm:$0xff]   ;;  %v7130_v43 = vld [vmem:[#allocation14 + $0x20] ss:$16 sps:$4 sm:$0xff]  }
 0x903   :  { %v2912_v9 = vsel %vm2904_vm15, %v6894_v18, %v2908_v62  ;;  %v2914_v29 = vpack.c.bf16 %v2910_v7, %v2910_v7  ;;  %v2915_v48 = vpack.c.bf16 %v2911_v13, %v2911_v13  ;;  %v7133_v14 = vld [vmem:[#allocation14 + $0x28] ss:$16 sps:$4 sm:$0xff]   ;;  %v7138_v16 = vld [vmem:[#allocation14 + $0x44] ss:$16 sps:$4 sm:$0xff]   ;;  %v7141_v51 = vld [vmem:[#allocation14 + $0x4c] ss:$16 sps:$4 sm:$0xff]  }
 0x904   :  { %v2916_v1 = vpack.c.bf16 %v2912_v9, %v2912_v9  ;;  %v7136_v18 = vld [vmem:[#allocation14 + $0x40] ss:$16 sps:$4 sm:$0xff]   ;;  %v7139_v23 = vld [vmem:[#allocation14 + $0x48] ss:$16 sps:$4 sm:$0xff]   ;;  %v7144_v52 = vld [vmem:[#allocation14 + $0x64] ss:$16 sps:$4 sm:$0xff]  }
 0x905   :  { %3212 = vmatprep.mubr.bf16.mxu0 %v2914_v29  ;;  %v7147_v47 = vld [vmem:[#allocation14 + $0x6c] ss:$16 sps:$4 sm:$0xff]   ;;  %v7142_v62 = vld [vmem:[#allocation14 + $0x60] ss:$16 sps:$4 sm:$0xff]   ;;  %v7145_v63 = vld [vmem:[#allocation14 + $0x68] ss:$16 sps:$4 sm:$0xff]  }
 0x906   :  { %3252 = vmatprep.mubr.bf16.mxu1 %v2916_v1  ;;  %3213 = vmatmul.mubr.bf16.vlgmr.msra.gmra.mrb[52].mxu0 %v2913_v54  ;;  %v7150_v13 = vld [vmem:[#allocation14 + $0x84] ss:$16 sps:$4 sm:$0xff]   ;;  %v7153_v20 = vld [vmem:[#allocation14 + $0x8c] ss:$16 sps:$4 sm:$0xff]   ;;  %v7148_v7 = vld [vmem:[#allocation14 + $0x80] ss:$16 sps:$4 sm:$0xff]  }
 0x907   :  { %3253 = vmatmul.mubr.bf16.vlgmr.msra.gmra.mrb[52].mxu1 %v2915_v48  ;;  %3479 = vmatpush1.bf16.msra.mxu0 %v7124_v6  ;;  %v7151_v9 = vld [vmem:[#allocation14 + $0x88] ss:$16 sps:$4 sm:$0xff]   ;;  %v7156_v29 = vld [vmem:[#allocation14 + $0xa4] ss:$16 sps:$4 sm:$0xff]   ;;  %v7159_v1 = vld [vmem:[#allocation14 + $0xac] ss:$16 sps:$4 sm:$0xff]  }
 0x908   :  { %3520 = vmatpush1.bf16.msra.mxu1 %v7127_v36  ;;  %3480 = vmatprep.subr.bf16.mxu0 %v7132_v49  ;;  %v7154_v6 = vld [vmem:[#allocation14 + $0xa0] ss:$16 sps:$4 sm:$0xff]   ;;  %v7157_v36 = vld [vmem:[#allocation14 + $0xa8] ss:$16 sps:$4 sm:$0xff]   ;;  %v7162_v54 = vld [vmem:[#allocation14 + $0xc4] ss:$16 sps:$4 sm:$0xff]  }
 0x909   :  { %3521 = vmatprep.subr.bf16.mxu1 %v7135_v59  ;;  %3510 = vmatprep.mubr.bf16.mxu0 %v9146_v50  ;;  %v7165_v48 = vld [vmem:[#allocation14 + $0xcc] ss:$16 sps:$4 sm:$0xff]   ;;  %v7160_v49 = vld [vmem:[#allocation14 + $0xc0] ss:$16 sps:$4 sm:$0xff]   ;;  %v7163_v59 = vld [vmem:[#allocation14 + $0xc8] ss:$16 sps:$4 sm:$0xff]  }
 0x90a   :  { %3551 = vmatprep.mubr.bf16.mxu1 %v9146_v50 }
 0x90b   :  { %3481 = vmatpush1.bf16.msra.mxu0 %v7130_v43  ;;  %v7168_v43 = vld [vmem:[#allocation14 + $0xe4] ss:$16 sps:$4 sm:$0xff]  }
 0x90c   :  { %3522 = vmatpush1.bf16.msra.mxu1 %v7133_v14  ;;  %3482 = vmatprep.subr.bf16.mxu0 %v7138_v16  ;;  %v7171_v14 = vld [vmem:[#allocation14 + $0xec] ss:$16 sps:$4 sm:$0xff]   ;;  %v7166_v16 = vld [vmem:[#allocation14 + $0xe0] ss:$16 sps:$4 sm:$0xff]  }
 0x90d   :  { %3523 = vmatprep.subr.bf16.mxu1 %v7141_v51  ;;  %v7169_v51 = vld [vmem:[#allocation14 + $0xe8] ss:$16 sps:$4 sm:$0xff]  }
 0x90f   :  { %3483 = vmatpush1.bf16.msra.mxu0 %v7136_v18 }
 0x910   :  { %3524 = vmatpush1.bf16.msra.mxu1 %v7139_v23  ;;  %3484 = vmatprep.subr.bf16.mxu0 %v7144_v52  ;;  %v6402_v52 = vld [vmem:[#allocation13] ss:$0 sm:$0xff] }
 0x911   :  { %3525 = vmatprep.subr.bf16.mxu1 %v7147_v47 }
 0x913   :  { %3485 = vmatpush1.bf16.msra.mxu0 %v7142_v62 }
 0x914   :  { %3526 = vmatpush1.bf16.msra.mxu1 %v7145_v63  ;;  %3486 = vmatprep.subr.bf16.mxu0 %v7150_v13 }
 0x915   :  { %3527 = vmatprep.subr.bf16.mxu1 %v7153_v20 }
 0x917   :  { %3487 = vmatpush1.bf16.msra.mxu0 %v7148_v7 }
 0x918   :  { %3528 = vmatpush1.bf16.msra.mxu1 %v7151_v9  ;;  %3488 = vmatprep.subr.bf16.mxu0 %v7156_v29 }
 0x919   :  { %3529 = vmatprep.subr.bf16.mxu1 %v7159_v1 }
 0x91b   :  { %3489 = vmatpush1.bf16.msra.mxu0 %v7154_v6 }
 0x91c   :  { %3530 = vmatpush1.bf16.msra.mxu1 %v7157_v36  ;;  %3490 = vmatprep.subr.bf16.mxu0 %v7162_v54 }
 0x91d   :  { %3531 = vmatprep.subr.bf16.mxu1 %v7165_v48 }
 0x91f   :  { %3491 = vmatpush1.bf16.msra.mxu0 %v7160_v49  ;;  %v3296_v49 = vld [vmem:[#allocation16] sm:$0xf] }
 0x920   :  { %3532 = vmatpush1.bf16.msra.mxu1 %v7163_v59  ;;  %3492 = vmatprep.subr.bf16.mxu0 %v7168_v43  ;;  %v3301_v59 = vrot.slane %v3296_v49, %v8504_v5  ;;  %v3309_v43 = vrot.slane %v3296_v49, %v8507_v15 }
 0x921   :  { %3533 = vmatprep.subr.bf16.mxu1 %v7171_v14  ;;  %v3305_v14 = vrot.slane %v3296_v49, %v8510_v24 }
 0x923   :  { %3493 = vmatpush1.bf16.msra.mxu0 %v7166_v16  ;;  %v3313_v16 = vrot.slane %v3296_v49, %v8513_v21 }
 0x924   :  { %3534 = vmatpush1.bf16.msra.mxu1 %v7169_v51 }
 0x9d9   :  { %v6639_v18 = vpop.f32.mrb[52].mxu0 }
 0x9da   :  { %v6661_v23 = vpop.f32.mrb[52].mxu1  ;;  %v6640_v47 = vpop.f32.mrb[53].mxu0 }
 0x9db   :  { %v6662_v62 = vpop.f32.mrb[53].mxu1  ;;  %v6641_v63 = vadd.f32 %v6640_v47, %v6639_v18  ;;  %v6642_v20 = vpop.f32.mrb[54].mxu0 }
 0x9dc   :  { %v6663_v13 = vadd.f32 %v6662_v62, %v6661_v23  ;;  %v6664_v7 = vpop.f32.mrb[54].mxu1  ;;  %v6643_v9 = vpop.f32.mrb[55].mxu0 }
 0x9dd   :  { %v6665_v29 = vpop.f32.mrb[55].mxu1  ;;  %v3215_v1 = vadd.f32 %v6641_v63, %v6402_v52 }
 0x9df   :  { %v3255_v6 = vadd.f32 %v6663_v13, %v3215_v1 }
 0x9e1   :  { %vm3260_vm0 = vcmp.gt.f32.partialorder %v3255_v6, 0.0  ;;  %v3261_v36 = vmul.f32 0.2, %v3255_v6 }
 0x9e3   :  { %v3262_v54 = vsel %vm3260_vm0, %v3255_v6, %v3261_v36 }
 0x9e4   :  { %v3263_v48 = vpack.c.bf16 %v3262_v54, %v3262_v54 }
 0x9e6   :  { %3511 = vmatmul.mubr.bf16.vlgmr.msra.gmra.mrb[56].mxu0 %v3263_v48  ;;  %3552 = vmatmul.mubr.bf16.vlgmr.msra.gmra.mrb[56].mxu1 %v3263_v48 }
 0xab9   :  { %v3512_v51 = vpop.f32.mrb[56].mxu0  ;;  %v3553_v18 = vpop.f32.mrb[56].mxu1 }
 0xaba   :  { %v3513_v23 = vadd.f32 %v3512_v51, %v3301_v59  ;;  %v3554_v52 = vadd.f32 %v3553_v18, %v3309_v43  ;;  %v3514_v47 = vpop.f32.mrb[57].mxu0  ;;  %v3555_v62 = vpop.f32.mrb[57].mxu1 }
 0xabb   :  { %v3515_v63 = vadd.f32 %v3514_v47, %v3305_v14  ;;  %v3556_v13 = vadd.f32 %v3555_v62, %v3313_v16  ;;  %v3516_v20 = vpop.f32.mrb[58].mxu0  ;;  %v3557_v7 = vpop.f32.mrb[58].mxu1 }
 0xabc   :  { %vm3560_vm1 = vcmp.gt.f32.partialorder %v3513_v23, 0.0  ;;  %v3564_v9 = vmul.f32 0.2, %v3513_v23  ;;  %vm3562_vm2 = vcmp.gt.f32.partialorder %v3554_v52, 0.0  ;;  %v3566_v29 = vmul.f32 0.2, %v3554_v52 }
 0xabd   :  { %vm3561_vm4 = vcmp.gt.f32.partialorder %v3515_v63, 0.0  ;;  %v3565_v1 = vmul.f32 0.2, %v3515_v63  ;;  %vm3563_vm13 = vcmp.gt.f32.partialorder %v3556_v13, 0.0  ;;  %v3567_v6 = vmul.f32 0.2, %v3556_v13 }
 0xabe   :  { %v3568_v36 = vsel %vm3560_vm1, %v3513_v23, %v3564_v9  ;;  %v3570_v54 = vsel %vm3562_vm2, %v3554_v52, %v3566_v29  ;;  %v3517_v48 = vpop.f32.mrb[59].mxu0  ;;  %v3558_v49 = vpop.f32.mrb[59].mxu1 }
 0xabf   :  { %v8525_v59 = vpack.c.bf16 %v3568_v36, %v3568_v36  ;;  %v8527_v43 = vpack.c.bf16 %v3570_v54, %v3570_v54  ;;  %v3569_v14 = vsel %vm3561_vm4, %v3515_v63, %v3565_v1  ;;  %v3571_v16 = vsel %vm3563_vm13, %v3556_v13, %v3567_v6 }
 0xac0   :  { %v8529_v51 = vpack.c.bf16 %v3569_v14, %v3569_v14  ;;  %v8531_v18 = vpack.c.bf16 %v3571_v16, %v3571_v16 }
 0xac1   :  { %7428 = dma.done.wait [#allocation4 + $0x1], 32768 }
 0xac2   :  { %7429 = vsyncadd [#allocation4 + $0x1], 4294934528  ;;  %3976 = vmatprep.mubr.bf16.mxu0 %v8529_v51  ;;  %4058 = vmatprep.mubr.bf16.mxu1 %v8529_v51  ;;  %v3648_v23 = vld [vmem:[#allocation3 + $0x8] sm:$0xff]  ;;  %v3650_v52 = vld [vmem:[#allocation3 + $0x18] sm:$0xff]  ;;  %vm4307_vm1 = vcmask 1040384   ;;  %vm4300_vm2 = vcmask 15360  }
 0xac3   :  { %v3647_v47 = vld [vmem:[#allocation3] sm:$0xff]  ;;  %3944 = vmatprep.subr.bf16.mxu0 %v3648_v23  ;;  %4026 = vmatprep.subr.bf16.mxu1 %v3650_v52  ;;  %v3649_v62 = vld [vmem:[#allocation3 + $0x10] sm:$0xff]  ;;  %v3656_v20 = vld [vmem:[#allocation3 + $0x48] sm:$0xff] }
 0xac4   :  { %v3658_v7 = vld [vmem:[#allocation3 + $0x58] sm:$0xff]  ;;  %3945 = vmatpush1.bf16.msra.mxu0 %v3647_v47  ;;  %4027 = vmatpush1.bf16.msra.mxu1 %v3649_v62  ;;  %v3655_v63 = vld [vmem:[#allocation3 + $0x40] sm:$0xff]  ;;  %v3657_v13 = vld [vmem:[#allocation3 + $0x50] sm:$0xff] }
 0xac5   :  { %3946 = vmatprep.subr.bf16.mxu0 %v3656_v20  ;;  %4028 = vmatprep.subr.bf16.mxu1 %v3658_v7  ;;  %v3664_v9 = vld [vmem:[#allocation3 + $0x88] sm:$0xff]  ;;  %v3666_v29 = vld [vmem:[#allocation3 + $0x98] sm:$0xff]  ;;  %v3663_v1 = vld [vmem:[#allocation3 + $0x80] sm:$0xff] }
 0xac6   :  { %v3665_v6 = vld [vmem:[#allocation3 + $0x90] sm:$0xff]  ;;  %v3672_v36 = vld [vmem:[#allocation3 + $0xc8] sm:$0xff]  ;;  %v3674_v54 = vld [vmem:[#allocation3 + $0xd8] sm:$0xff] }
 0xac7   :  { %v3671_v48 = vld [vmem:[#allocation3 + $0xc0] sm:$0xff]  ;;  %v3673_v49 = vld [vmem:[#allocation3 + $0xd0] sm:$0xff]  ;;  %v3680_v14 = vld [vmem:[#allocation3 + $0x108] sm:$0xff] }
 0xac8   :  { %3947 = vmatpush1.bf16.msra.mxu0 %v3655_v63  ;;  %4029 = vmatpush1.bf16.msra.mxu1 %v3657_v13  ;;  %v3682_v16 = vld [vmem:[#allocation3 + $0x118] sm:$0xff]  ;;  %v3679_v23 = vld [vmem:[#allocation3 + $0x100] sm:$0xff]  ;;  %v3681_v52 = vld [vmem:[#allocation3 + $0x110] sm:$0xff] }
 0xac9   :  { %3948 = vmatprep.subr.bf16.mxu0 %v3664_v9  ;;  %4030 = vmatprep.subr.bf16.mxu1 %v3666_v29  ;;  %v3688_v47 = vld [vmem:[#allocation3 + $0x148] sm:$0xff]  ;;  %v3690_v62 = vld [vmem:[#allocation3 + $0x158] sm:$0xff]  ;;  %v3687_v20 = vld [vmem:[#allocation3 + $0x140] sm:$0xff] }
 0xaca   :  { %v3689_v7 = vld [vmem:[#allocation3 + $0x150] sm:$0xff]  ;;  %v3696_v63 = vld [vmem:[#allocation3 + $0x188] sm:$0xff]  ;;  %v3698_v13 = vld [vmem:[#allocation3 + $0x198] sm:$0xff] }
 0xacb   :  { %v3695_v9 = vld [vmem:[#allocation3 + $0x180] sm:$0xff]  ;;  %v3697_v29 = vld [vmem:[#allocation3 + $0x190] sm:$0xff] }
 0xacc   :  { %3949 = vmatpush1.bf16.msra.mxu0 %v3663_v1  ;;  %4031 = vmatpush1.bf16.msra.mxu1 %v3665_v6  ;;  %v3704_v1 = vld [vmem:[#allocation3 + $0x1c8] sm:$0xff]  ;;  %v3706_v6 = vld [vmem:[#allocation3 + $0x1d8] sm:$0xff] }
 0xacd   :  { %3950 = vmatprep.subr.bf16.mxu0 %v3672_v36  ;;  %4032 = vmatprep.subr.bf16.mxu1 %v3674_v54  ;;  %v3703_v36 = vld [vmem:[#allocation3 + $0x1c0] sm:$0xff]  ;;  %v3705_v54 = vld [vmem:[#allocation3 + $0x1d0] sm:$0xff] }
 0xad0   :  { %3951 = vmatpush1.bf16.msra.mxu0 %v3671_v48  ;;  %4033 = vmatpush1.bf16.msra.mxu1 %v3673_v49  ;;  %v3712_v48 = vld [vmem:[#allocation3 + $0x208] sm:$0xff]  ;;  %v3714_v49 = vld [vmem:[#allocation3 + $0x218] sm:$0xff] }
 0xad1   :  { %3952 = vmatprep.subr.bf16.mxu0 %v3680_v14  ;;  %4034 = vmatprep.subr.bf16.mxu1 %v3682_v16  ;;  %v3711_v14 = vld [vmem:[#allocation3 + $0x200] sm:$0xff]  ;;  %v3713_v16 = vld [vmem:[#allocation3 + $0x210] sm:$0xff] }
 0xad4   :  { %3953 = vmatpush1.bf16.msra.mxu0 %v3679_v23  ;;  %4035 = vmatpush1.bf16.msra.mxu1 %v3681_v52  ;;  %v3720_v23 = vld [vmem:[#allocation3 + $0x248] sm:$0xff]  ;;  %v3722_v52 = vld [vmem:[#allocation3 + $0x258] sm:$0xff] }
 0xad5   :  { %3954 = vmatprep.subr.bf16.mxu0 %v3688_v47  ;;  %4036 = vmatprep.subr.bf16.mxu1 %v3690_v62  ;;  %v3719_v47 = vld [vmem:[#allocation3 + $0x240] sm:$0xff]  ;;  %v3721_v62 = vld [vmem:[#allocation3 + $0x250] sm:$0xff] }
 0xad8   :  { %3955 = vmatpush1.bf16.msra.mxu0 %v3687_v20  ;;  %4037 = vmatpush1.bf16.msra.mxu1 %v3689_v7  ;;  %v3728_v20 = vld [vmem:[#allocation3 + $0x288] sm:$0xff]  ;;  %v3730_v7 = vld [vmem:[#allocation3 + $0x298] sm:$0xff] }
 0xad9   :  { %3956 = vmatprep.subr.bf16.mxu0 %v3696_v63  ;;  %4038 = vmatprep.subr.bf16.mxu1 %v3698_v13  ;;  %v3727_v63 = vld [vmem:[#allocation3 + $0x280] sm:$0xff]  ;;  %v3729_v13 = vld [vmem:[#allocation3 + $0x290] sm:$0xff] }
 0xadc   :  { %3957 = vmatpush1.bf16.msra.mxu0 %v3695_v9  ;;  %4039 = vmatpush1.bf16.msra.mxu1 %v3697_v29  ;;  %v3736_v9 = vld [vmem:[#allocation3 + $0x2c8] sm:$0xff]  ;;  %v3738_v29 = vld [vmem:[#allocation3 + $0x2d8] sm:$0xff] }
 0xadd   :  { %3958 = vmatprep.subr.bf16.mxu0 %v3704_v1  ;;  %4040 = vmatprep.subr.bf16.mxu1 %v3706_v6  ;;  %v3735_v1 = vld [vmem:[#allocation3 + $0x2c0] sm:$0xff]  ;;  %v3737_v6 = vld [vmem:[#allocation3 + $0x2d0] sm:$0xff] }
 0xae0   :  { %3959 = vmatpush1.bf16.msra.mxu0 %v3703_v36  ;;  %4041 = vmatpush1.bf16.msra.mxu1 %v3705_v54  ;;  %v3744_v36 = vld [vmem:[#allocation3 + $0x308] sm:$0xff]  ;;  %v3746_v54 = vld [vmem:[#allocation3 + $0x318] sm:$0xff] }
 0xae1   :  { %3960 = vmatprep.subr.bf16.mxu0 %v3712_v48  ;;  %4042 = vmatprep.subr.bf16.mxu1 %v3714_v49  ;;  %v3743_v48 = vld [vmem:[#allocation3 + $0x300] sm:$0xff]  ;;  %v3745_v49 = vld [vmem:[#allocation3 + $0x310] sm:$0xff] }
 0xae4   :  { %3961 = vmatpush1.bf16.msra.mxu0 %v3711_v14  ;;  %4043 = vmatpush1.bf16.msra.mxu1 %v3713_v16  ;;  %v3752_v14 = vld [vmem:[#allocation3 + $0x348] sm:$0xff]  ;;  %v3754_v16 = vld [vmem:[#allocation3 + $0x358] sm:$0xff] }
 0xae5   :  { %3962 = vmatprep.subr.bf16.mxu0 %v3720_v23  ;;  %4044 = vmatprep.subr.bf16.mxu1 %v3722_v52  ;;  %v3751_v23 = vld [vmem:[#allocation3 + $0x340] sm:$0xff]  ;;  %v3753_v52 = vld [vmem:[#allocation3 + $0x350] sm:$0xff] }
 0xae8   :  { %3963 = vmatpush1.bf16.msra.mxu0 %v3719_v47  ;;  %4045 = vmatpush1.bf16.msra.mxu1 %v3721_v62  ;;  %v3760_v47 = vld [vmem:[#allocation3 + $0x388] sm:$0xff]  ;;  %v3762_v62 = vld [vmem:[#allocation3 + $0x398] sm:$0xff] }
 0xae9   :  { %3964 = vmatprep.subr.bf16.mxu0 %v3728_v20  ;;  %4046 = vmatprep.subr.bf16.mxu1 %v3730_v7  ;;  %v3759_v20 = vld [vmem:[#allocation3 + $0x380] sm:$0xff]  ;;  %v3761_v7 = vld [vmem:[#allocation3 + $0x390] sm:$0xff] }
 0xaec   :  { %3965 = vmatpush1.bf16.msra.mxu0 %v3727_v63  ;;  %4047 = vmatpush1.bf16.msra.mxu1 %v3729_v13  ;;  %v3768_v63 = vld [vmem:[#allocation3 + $0x3c8] sm:$0xff]  ;;  %v3770_v13 = vld [vmem:[#allocation3 + $0x3d8] sm:$0xff] }
 0xaed   :  { %3966 = vmatprep.subr.bf16.mxu0 %v3736_v9  ;;  %4048 = vmatprep.subr.bf16.mxu1 %v3738_v29  ;;  %v3767_v9 = vld [vmem:[#allocation3 + $0x3c0] sm:$0xff]  ;;  %v3769_v29 = vld [vmem:[#allocation3 + $0x3d0] sm:$0xff] }
 0xaf0   :  { %3967 = vmatpush1.bf16.msra.mxu0 %v3735_v1  ;;  %4049 = vmatpush1.bf16.msra.mxu1 %v3737_v6  ;;  %v3776_v1 = vld [vmem:[#allocation3 + $0x408] sm:$0xff]  ;;  %v3778_v6 = vld [vmem:[#allocation3 + $0x418] sm:$0xff] }
 0xaf1   :  { %3968 = vmatprep.subr.bf16.mxu0 %v3744_v36  ;;  %4050 = vmatprep.subr.bf16.mxu1 %v3746_v54  ;;  %v3775_v36 = vld [vmem:[#allocation3 + $0x400] sm:$0xff]  ;;  %v3777_v54 = vld [vmem:[#allocation3 + $0x410] sm:$0xff] }
 0xaf4   :  { %3969 = vmatpush1.bf16.msra.mxu0 %v3743_v48  ;;  %4051 = vmatpush1.bf16.msra.mxu1 %v3745_v49  ;;  %v3784_v48 = vld [vmem:[#allocation3 + $0x448] sm:$0xff]  ;;  %v3786_v49 = vld [vmem:[#allocation3 + $0x458] sm:$0xff] }
 0xaf5   :  { %3970 = vmatprep.subr.bf16.mxu0 %v3752_v14  ;;  %4052 = vmatprep.subr.bf16.mxu1 %v3754_v16  ;;  %v3783_v14 = vld [vmem:[#allocation3 + $0x440] sm:$0xff]  ;;  %v3785_v16 = vld [vmem:[#allocation3 + $0x450] sm:$0xff] }
 0xaf8   :  { %3971 = vmatpush1.bf16.msra.mxu0 %v3751_v23  ;;  %4053 = vmatpush1.bf16.msra.mxu1 %v3753_v52  ;;  %v3792_v23 = vld [vmem:[#allocation3 + $0x488] sm:$0xff]  ;;  %v3794_v52 = vld [vmem:[#allocation3 + $0x498] sm:$0xff] }
 0xaf9   :  { %3972 = vmatprep.subr.bf16.mxu0 %v3760_v47  ;;  %4054 = vmatprep.subr.bf16.mxu1 %v3762_v62  ;;  %v3791_v47 = vld [vmem:[#allocation3 + $0x480] sm:$0xff]  ;;  %v3793_v62 = vld [vmem:[#allocation3 + $0x490] sm:$0xff] }
 0xafc   :  { %3973 = vmatpush1.bf16.msra.mxu0 %v3759_v20  ;;  %4055 = vmatpush1.bf16.msra.mxu1 %v3761_v7  ;;  %v3800_v20 = vld [vmem:[#allocation3 + $0x4c8] sm:$0xff]  ;;  %v3802_v7 = vld [vmem:[#allocation3 + $0x4d8] sm:$0xff] }
 0xafd   :  { %3974 = vmatprep.subr.bf16.mxu0 %v3768_v63  ;;  %4056 = vmatprep.subr.bf16.mxu1 %v3770_v13  ;;  %v3799_v63 = vld [vmem:[#allocation3 + $0x4c0] sm:$0xff]  ;;  %v3801_v13 = vld [vmem:[#allocation3 + $0x4d0] sm:$0xff] }
 0xb00   :  { %3975 = vmatpush1.bf16.msra.mxu0 %v3767_v9  ;;  %4057 = vmatpush1.bf16.msra.mxu1 %v3769_v29  ;;  %v3808_v9 = vld [vmem:[#allocation3 + $0x508] sm:$0xff]  ;;  %v3810_v29 = vld [vmem:[#allocation3 + $0x518] sm:$0xff] }
 0xb01   :  { %3985 = vmatprep.subr.bf16.mxu0 %v3776_v1  ;;  %4067 = vmatprep.subr.bf16.mxu1 %v3778_v6  ;;  %v3807_v1 = vld [vmem:[#allocation3 + $0x500] sm:$0xff]  ;;  %v3809_v6 = vld [vmem:[#allocation3 + $0x510] sm:$0xff] }
 0xb03   :  { %3977 = vmatmul.mubr.bf16.vlgmr.msra.gmra.mrb[60].mxu0 %v8525_v59  ;;  %4059 = vmatmul.mubr.bf16.vlgmr.msra.gmra.mrb[60].mxu1 %v8525_v59 }
 0xb04   :  { %3986 = vmatpush1.bf16.msra.mxu0 %v3775_v36  ;;  %4068 = vmatpush1.bf16.msra.mxu1 %v3777_v54  ;;  %v3816_v36 = vld [vmem:[#allocation3 + $0x548] sm:$0xff]  ;;  %v3818_v54 = vld [vmem:[#allocation3 + $0x558] sm:$0xff] }
 0xb05   :  { %3987 = vmatprep.subr.bf16.mxu0 %v3784_v48  ;;  %4069 = vmatprep.subr.bf16.mxu1 %v3786_v49  ;;  %v3815_v48 = vld [vmem:[#allocation3 + $0x540] sm:$0xff]  ;;  %v3817_v49 = vld [vmem:[#allocation3 + $0x550] sm:$0xff] }
 0xb06   :  { %4017 = vmatprep.mubr.bf16.mxu0 %v8531_v18  ;;  %4099 = vmatprep.mubr.bf16.mxu1 %v8531_v18 }
 0xb08   :  { %3988 = vmatpush1.bf16.msra.mxu0 %v3783_v14  ;;  %4070 = vmatpush1.bf16.msra.mxu1 %v3785_v16  ;;  %v3824_v14 = vld [vmem:[#allocation3 + $0x588] sm:$0xff]  ;;  %v3826_v16 = vld [vmem:[#allocation3 + $0x598] sm:$0xff] }
 0xb09   :  { %3989 = vmatprep.subr.bf16.mxu0 %v3792_v23  ;;  %4071 = vmatprep.subr.bf16.mxu1 %v3794_v52  ;;  %v3823_v23 = vld [vmem:[#allocation3 + $0x580] sm:$0xff]  ;;  %v3825_v52 = vld [vmem:[#allocation3 + $0x590] sm:$0xff] }
 0xb0c   :  { %3990 = vmatpush1.bf16.msra.mxu0 %v3791_v47  ;;  %4072 = vmatpush1.bf16.msra.mxu1 %v3793_v62  ;;  %v3832_v47 = vld [vmem:[#allocation3 + $0x5c8] sm:$0xff]  ;;  %v3834_v62 = vld [vmem:[#allocation3 + $0x5d8] sm:$0xff] }
 0xb0d   :  { %3991 = vmatprep.subr.bf16.mxu0 %v3800_v20  ;;  %4073 = vmatprep.subr.bf16.mxu1 %v3802_v7  ;;  %v3831_v20 = vld [vmem:[#allocation3 + $0x5c0] sm:$0xff]  ;;  %v3833_v7 = vld [vmem:[#allocation3 + $0x5d0] sm:$0xff] }
 0xb10   :  { %3992 = vmatpush1.bf16.msra.mxu0 %v3799_v63  ;;  %4074 = vmatpush1.bf16.msra.mxu1 %v3801_v13  ;;  %v3840_v63 = vld [vmem:[#allocation3 + $0x608] sm:$0xff]  ;;  %v3842_v13 = vld [vmem:[#allocation3 + $0x618] sm:$0xff] }
 0xb11   :  { %3993 = vmatprep.subr.bf16.mxu0 %v3808_v9  ;;  %4075 = vmatprep.subr.bf16.mxu1 %v3810_v29  ;;  %v3839_v9 = vld [vmem:[#allocation3 + $0x600] sm:$0xff]  ;;  %v3841_v29 = vld [vmem:[#allocation3 + $0x610] sm:$0xff] }
 0xb14   :  { %3994 = vmatpush1.bf16.msra.mxu0 %v3807_v1  ;;  %4076 = vmatpush1.bf16.msra.mxu1 %v3809_v6  ;;  %v3848_v1 = vld [vmem:[#allocation3 + $0x648] sm:$0xff]  ;;  %v3850_v6 = vld [vmem:[#allocation3 + $0x658] sm:$0xff] }
 0xb15   :  { %3995 = vmatprep.subr.bf16.mxu0 %v3816_v36  ;;  %4077 = vmatprep.subr.bf16.mxu1 %v3818_v54  ;;  %v3847_v36 = vld [vmem:[#allocation3 + $0x640] sm:$0xff]  ;;  %v3849_v54 = vld [vmem:[#allocation3 + $0x650] sm:$0xff] }
 0xb18   :  { %3996 = vmatpush1.bf16.msra.mxu0 %v3815_v48  ;;  %4078 = vmatpush1.bf16.msra.mxu1 %v3817_v49  ;;  %v3856_v48 = vld [vmem:[#allocation3 + $0x688] sm:$0xff]  ;;  %v3858_v49 = vld [vmem:[#allocation3 + $0x698] sm:$0xff] }
 0xb19   :  { %3997 = vmatprep.subr.bf16.mxu0 %v3824_v14  ;;  %4079 = vmatprep.subr.bf16.mxu1 %v3826_v16  ;;  %v3855_v14 = vld [vmem:[#allocation3 + $0x680] sm:$0xff]  ;;  %v3857_v16 = vld [vmem:[#allocation3 + $0x690] sm:$0xff] }
 0xb1c   :  { %3998 = vmatpush1.bf16.msra.mxu0 %v3823_v23  ;;  %4080 = vmatpush1.bf16.msra.mxu1 %v3825_v52  ;;  %v3864_v23 = vld [vmem:[#allocation3 + $0x6c8] sm:$0xff]  ;;  %v3866_v52 = vld [vmem:[#allocation3 + $0x6d8] sm:$0xff] }
 0xb1d   :  { %3999 = vmatprep.subr.bf16.mxu0 %v3832_v47  ;;  %4081 = vmatprep.subr.bf16.mxu1 %v3834_v62  ;;  %v3863_v47 = vld [vmem:[#allocation3 + $0x6c0] sm:$0xff]  ;;  %v3865_v62 = vld [vmem:[#allocation3 + $0x6d0] sm:$0xff] }
 0xb20   :  { %4000 = vmatpush1.bf16.msra.mxu0 %v3831_v20  ;;  %4082 = vmatpush1.bf16.msra.mxu1 %v3833_v7  ;;  %v3872_v20 = vld [vmem:[#allocation3 + $0x708] sm:$0xff]  ;;  %v3874_v7 = vld [vmem:[#allocation3 + $0x718] sm:$0xff] }
 0xb21   :  { %4001 = vmatprep.subr.bf16.mxu0 %v3840_v63  ;;  %4083 = vmatprep.subr.bf16.mxu1 %v3842_v13  ;;  %v3871_v63 = vld [vmem:[#allocation3 + $0x700] sm:$0xff]  ;;  %v3873_v13 = vld [vmem:[#allocation3 + $0x710] sm:$0xff] }
 0xb24   :  { %4002 = vmatpush1.bf16.msra.mxu0 %v3839_v9  ;;  %4084 = vmatpush1.bf16.msra.mxu1 %v3841_v29  ;;  %v3880_v9 = vld [vmem:[#allocation3 + $0x748] sm:$0xff]  ;;  %v3882_v29 = vld [vmem:[#allocation3 + $0x758] sm:$0xff] }
 0xb25   :  { %4003 = vmatprep.subr.bf16.mxu0 %v3848_v1  ;;  %4085 = vmatprep.subr.bf16.mxu1 %v3850_v6  ;;  %v3879_v1 = vld [vmem:[#allocation3 + $0x740] sm:$0xff]  ;;  %v3881_v6 = vld [vmem:[#allocation3 + $0x750] sm:$0xff] }
 0xb28   :  { %4004 = vmatpush1.bf16.msra.mxu0 %v3847_v36  ;;  %4086 = vmatpush1.bf16.msra.mxu1 %v3849_v54  ;;  %v3888_v36 = vld [vmem:[#allocation3 + $0x788] sm:$0xff]  ;;  %v3890_v54 = vld [vmem:[#allocation3 + $0x798] sm:$0xff] }
 0xb29   :  { %4005 = vmatprep.subr.bf16.mxu0 %v3856_v48  ;;  %4087 = vmatprep.subr.bf16.mxu1 %v3858_v49  ;;  %v3887_v48 = vld [vmem:[#allocation3 + $0x780] sm:$0xff]  ;;  %v3889_v49 = vld [vmem:[#allocation3 + $0x790] sm:$0xff] }
 0xb2c   :  { %4006 = vmatpush1.bf16.msra.mxu0 %v3855_v14  ;;  %4088 = vmatpush1.bf16.msra.mxu1 %v3857_v16  ;;  %v3896_v14 = vld [vmem:[#allocation3 + $0x7c8] sm:$0xff]  ;;  %v3898_v16 = vld [vmem:[#allocation3 + $0x7d8] sm:$0xff] }
 0xb2d   :  { %4007 = vmatprep.subr.bf16.mxu0 %v3864_v23  ;;  %4089 = vmatprep.subr.bf16.mxu1 %v3866_v52  ;;  %v3895_v23 = vld [vmem:[#allocation3 + $0x7c0] sm:$0xff]  ;;  %v3897_v52 = vld [vmem:[#allocation3 + $0x7d0] sm:$0xff] }
 0xb30   :  { %4008 = vmatpush1.bf16.msra.mxu0 %v3863_v47  ;;  %4090 = vmatpush1.bf16.msra.mxu1 %v3865_v62  ;;  %v3652_v47 = vld [vmem:[#allocation3 + $0x28] sm:$0xff]  ;;  %v3654_v62 = vld [vmem:[#allocation3 + $0x38] sm:$0xff] }
 0xb31   :  { %4009 = vmatprep.subr.bf16.mxu0 %v3872_v20  ;;  %4091 = vmatprep.subr.bf16.mxu1 %v3874_v7  ;;  %v3651_v20 = vld [vmem:[#allocation3 + $0x20] sm:$0xff]  ;;  %v3653_v7 = vld [vmem:[#allocation3 + $0x30] sm:$0xff] }
 0xb34   :  { %4010 = vmatpush1.bf16.msra.mxu0 %v3871_v63  ;;  %4092 = vmatpush1.bf16.msra.mxu1 %v3873_v13  ;;  %v3660_v63 = vld [vmem:[#allocation3 + $0x68] sm:$0xff]  ;;  %v3662_v13 = vld [vmem:[#allocation3 + $0x78] sm:$0xff] }
 0xb35   :  { %4011 = vmatprep.subr.bf16.mxu0 %v3880_v9  ;;  %4093 = vmatprep.subr.bf16.mxu1 %v3882_v29  ;;  %v3659_v9 = vld [vmem:[#allocation3 + $0x60] sm:$0xff]  ;;  %v3661_v29 = vld [vmem:[#allocation3 + $0x70] sm:$0xff] }
 0xb38   :  { %4012 = vmatpush1.bf16.msra.mxu0 %v3879_v1  ;;  %4094 = vmatpush1.bf16.msra.mxu1 %v3881_v6  ;;  %v3668_v1 = vld [vmem:[#allocation3 + $0xa8] sm:$0xff]  ;;  %v3670_v6 = vld [vmem:[#allocation3 + $0xb8] sm:$0xff] }
 0xb39   :  { %4013 = vmatprep.subr.bf16.mxu0 %v3888_v36  ;;  %4095 = vmatprep.subr.bf16.mxu1 %v3890_v54  ;;  %v3667_v36 = vld [vmem:[#allocation3 + $0xa0] sm:$0xff]  ;;  %v3669_v54 = vld [vmem:[#allocation3 + $0xb0] sm:$0xff] }
 0xb3c   :  { %4014 = vmatpush1.bf16.msra.mxu0 %v3887_v48  ;;  %4096 = vmatpush1.bf16.msra.mxu1 %v3889_v49  ;;  %v3676_v48 = vld [vmem:[#allocation3 + $0xe8] sm:$0xff]  ;;  %v3678_v49 = vld [vmem:[#allocation3 + $0xf8] sm:$0xff] }
 0xb3d   :  { %4015 = vmatprep.subr.bf16.mxu0 %v3896_v14  ;;  %4097 = vmatprep.subr.bf16.mxu1 %v3898_v16  ;;  %v3675_v14 = vld [vmem:[#allocation3 + $0xe0] sm:$0xff]  ;;  %v3677_v16 = vld [vmem:[#allocation3 + $0xf0] sm:$0xff] }
 0xb40   :  { %4016 = vmatpush1.bf16.msra.mxu0 %v3895_v23  ;;  %4098 = vmatpush1.bf16.msra.mxu1 %v3897_v52  ;;  %v3684_v23 = vld [vmem:[#allocation3 + $0x128] sm:$0xff]  ;;  %v3686_v52 = vld [vmem:[#allocation3 + $0x138] sm:$0xff] }
 0xb41   :  { %4108 = vmatprep.subr.bf16.mxu0 %v3652_v47  ;;  %4190 = vmatprep.subr.bf16.mxu1 %v3654_v62  ;;  %v3683_v47 = vld [vmem:[#allocation3 + $0x120] sm:$0xff]  ;;  %v3685_v62 = vld [vmem:[#allocation3 + $0x130] sm:$0xff] }
 0xb43   :  { %4018 = vmatmul.mubr.bf16.vlgmr.msra.gmra.mrb[60].mxu0 %v8527_v43  ;;  %4100 = vmatmul.mubr.bf16.vlgmr.msra.gmra.mrb[60].mxu1 %v8527_v43 }
 0xb44   :  { %4109 = vmatpush1.bf16.msra.mxu0 %v3651_v20  ;;  %4191 = vmatpush1.bf16.msra.mxu1 %v3653_v7  ;;  %v3692_v20 = vld [vmem:[#allocation3 + $0x168] sm:$0xff]  ;;  %v3694_v7 = vld [vmem:[#allocation3 + $0x178] sm:$0xff] }
 0xb45   :  { %4110 = vmatprep.subr.bf16.mxu0 %v3660_v63  ;;  %4192 = vmatprep.subr.bf16.mxu1 %v3662_v13  ;;  %v3691_v63 = vld [vmem:[#allocation3 + $0x160] sm:$0xff]  ;;  %v3693_v13 = vld [vmem:[#allocation3 + $0x170] sm:$0xff] }
 0xb46   :  { %4140 = vmatprep.mubr.bf16.mxu0 %v8529_v51  ;;  %4222 = vmatprep.mubr.bf16.mxu1 %v8529_v51 }
 0xb48   :  { %4111 = vmatpush1.bf16.msra.mxu0 %v3659_v9  ;;  %4193 = vmatpush1.bf16.msra.mxu1 %v3661_v29  ;;  %v3700_v9 = vld [vmem:[#allocation3 + $0x1a8] sm:$0xff]  ;;  %v3702_v29 = vld [vmem:[#allocation3 + $0x1b8] sm:$0xff] }
 0xb49   :  { %4112 = vmatprep.subr.bf16.mxu0 %v3668_v1  ;;  %4194 = vmatprep.subr.bf16.mxu1 %v3670_v6  ;;  %v3699_v1 = vld [vmem:[#allocation3 + $0x1a0] sm:$0xff]  ;;  %v3701_v6 = vld [vmem:[#allocation3 + $0x1b0] sm:$0xff] }
 0xb4c   :  { %4113 = vmatpush1.bf16.msra.mxu0 %v3667_v36  ;;  %4195 = vmatpush1.bf16.msra.mxu1 %v3669_v54  ;;  %v3708_v36 = vld [vmem:[#allocation3 + $0x1e8] sm:$0xff]  ;;  %v3710_v54 = vld [vmem:[#allocation3 + $0x1f8] sm:$0xff] }
 0xb4d   :  { %4114 = vmatprep.subr.bf16.mxu0 %v3676_v48  ;;  %4196 = vmatprep.subr.bf16.mxu1 %v3678_v49  ;;  %v3707_v48 = vld [vmem:[#allocation3 + $0x1e0] sm:$0xff]  ;;  %v3709_v49 = vld [vmem:[#allocation3 + $0x1f0] sm:$0xff] }
 0xb50   :  { %4115 = vmatpush1.bf16.msra.mxu0 %v3675_v14  ;;  %4197 = vmatpush1.bf16.msra.mxu1 %v3677_v16  ;;  %v3716_v14 = vld [vmem:[#allocation3 + $0x228] sm:$0xff]  ;;  %v3718_v16 = vld [vmem:[#allocation3 + $0x238] sm:$0xff] }
 0xb51   :  { %4116 = vmatprep.subr.bf16.mxu0 %v3684_v23  ;;  %4198 = vmatprep.subr.bf16.mxu1 %v3686_v52  ;;  %v3715_v23 = vld [vmem:[#allocation3 + $0x220] sm:$0xff]  ;;  %v3717_v52 = vld [vmem:[#allocation3 + $0x230] sm:$0xff] }
 0xb54   :  { %4117 = vmatpush1.bf16.msra.mxu0 %v3683_v47  ;;  %4199 = vmatpush1.bf16.msra.mxu1 %v3685_v62  ;;  %v3724_v47 = vld [vmem:[#allocation3 + $0x268] sm:$0xff]  ;;  %v3726_v62 = vld [vmem:[#allocation3 + $0x278] sm:$0xff] }
 0xb55   :  { %4118 = vmatprep.subr.bf16.mxu0 %v3692_v20  ;;  %4200 = vmatprep.subr.bf16.mxu1 %v3694_v7  ;;  %v3723_v20 = vld [vmem:[#allocation3 + $0x260] sm:$0xff]  ;;  %v3725_v7 = vld [vmem:[#allocation3 + $0x270] sm:$0xff] }
 0xb58   :  { %4119 = vmatpush1.bf16.msra.mxu0 %v3691_v63  ;;  %4201 = vmatpush1.bf16.msra.mxu1 %v3693_v13  ;;  %v3732_v63 = vld [vmem:[#allocation3 + $0x2a8] sm:$0xff]  ;;  %v3734_v13 = vld [vmem:[#allocation3 + $0x2b8] sm:$0xff] }
 0xb59   :  { %4120 = vmatprep.subr.bf16.mxu0 %v3700_v9  ;;  %4202 = vmatprep.subr.bf16.mxu1 %v3702_v29  ;;  %v3731_v9 = vld [vmem:[#allocation3 + $0x2a0] sm:$0xff]  ;;  %v3733_v29 = vld [vmem:[#allocation3 + $0x2b0] sm:$0xff] }
 0xb5c   :  { %4121 = vmatpush1.bf16.msra.mxu0 %v3699_v1  ;;  %4203 = vmatpush1.bf16.msra.mxu1 %v3701_v6  ;;  %v3740_v1 = vld [vmem:[#allocation3 + $0x2e8] sm:$0xff]  ;;  %v3742_v6 = vld [vmem:[#allocation3 + $0x2f8] sm:$0xff] }
 0xb5d   :  { %4122 = vmatprep.subr.bf16.mxu0 %v3708_v36  ;;  %4204 = vmatprep.subr.bf16.mxu1 %v3710_v54  ;;  %v3739_v36 = vld [vmem:[#allocation3 + $0x2e0] sm:$0xff]  ;;  %v3741_v54 = vld [vmem:[#allocation3 + $0x2f0] sm:$0xff] }
 0xb60   :  { %4123 = vmatpush1.bf16.msra.mxu0 %v3707_v48  ;;  %4205 = vmatpush1.bf16.msra.mxu1 %v3709_v49  ;;  %v3748_v48 = vld [vmem:[#allocation3 + $0x328] sm:$0xff]  ;;  %v3750_v49 = vld [vmem:[#allocation3 + $0x338] sm:$0xff] }
 0xb61   :  { %4124 = vmatprep.subr.bf16.mxu0 %v3716_v14  ;;  %4206 = vmatprep.subr.bf16.mxu1 %v3718_v16  ;;  %v3747_v14 = vld [vmem:[#allocation3 + $0x320] sm:$0xff]  ;;  %v3749_v16 = vld [vmem:[#allocation3 + $0x330] sm:$0xff] }
 0xb64   :  { %4125 = vmatpush1.bf16.msra.mxu0 %v3715_v23  ;;  %4207 = vmatpush1.bf16.msra.mxu1 %v3717_v52  ;;  %v3756_v23 = vld [vmem:[#allocation3 + $0x368] sm:$0xff]  ;;  %v3758_v52 = vld [vmem:[#allocation3 + $0x378] sm:$0xff] }
 0xb65   :  { %4126 = vmatprep.subr.bf16.mxu0 %v3724_v47  ;;  %4208 = vmatprep.subr.bf16.mxu1 %v3726_v62  ;;  %v3755_v47 = vld [vmem:[#allocation3 + $0x360] sm:$0xff]  ;;  %v3757_v62 = vld [vmem:[#allocation3 + $0x370] sm:$0xff] }
 0xb68   :  { %4127 = vmatpush1.bf16.msra.mxu0 %v3723_v20  ;;  %4209 = vmatpush1.bf16.msra.mxu1 %v3725_v7  ;;  %v3764_v20 = vld [vmem:[#allocation3 + $0x3a8] sm:$0xff]  ;;  %v3766_v7 = vld [vmem:[#allocation3 + $0x3b8] sm:$0xff] }
 0xb69   :  { %4128 = vmatprep.subr.bf16.mxu0 %v3732_v63  ;;  %4210 = vmatprep.subr.bf16.mxu1 %v3734_v13  ;;  %v3763_v63 = vld [vmem:[#allocation3 + $0x3a0] sm:$0xff]  ;;  %v3765_v13 = vld [vmem:[#allocation3 + $0x3b0] sm:$0xff] }
 0xb6c   :  { %4129 = vmatpush1.bf16.msra.mxu0 %v3731_v9  ;;  %4211 = vmatpush1.bf16.msra.mxu1 %v3733_v29  ;;  %v3772_v9 = vld [vmem:[#allocation3 + $0x3e8] sm:$0xff]  ;;  %v3774_v29 = vld [vmem:[#allocation3 + $0x3f8] sm:$0xff] }
 0xb6d   :  { %4130 = vmatprep.subr.bf16.mxu0 %v3740_v1  ;;  %4212 = vmatprep.subr.bf16.mxu1 %v3742_v6  ;;  %v3771_v1 = vld [vmem:[#allocation3 + $0x3e0] sm:$0xff]  ;;  %v3773_v6 = vld [vmem:[#allocation3 + $0x3f0] sm:$0xff] }
 0xb70   :  { %4131 = vmatpush1.bf16.msra.mxu0 %v3739_v36  ;;  %4213 = vmatpush1.bf16.msra.mxu1 %v3741_v54  ;;  %v3780_v36 = vld [vmem:[#allocation3 + $0x428] sm:$0xff]  ;;  %v3782_v54 = vld [vmem:[#allocation3 + $0x438] sm:$0xff] }
 0xb71   :  { %4132 = vmatprep.subr.bf16.mxu0 %v3748_v48  ;;  %4214 = vmatprep.subr.bf16.mxu1 %v3750_v49  ;;  %v3779_v48 = vld [vmem:[#allocation3 + $0x420] sm:$0xff]  ;;  %v3781_v49 = vld [vmem:[#allocation3 + $0x430] sm:$0xff] }
 0xb74   :  { %4133 = vmatpush1.bf16.msra.mxu0 %v3747_v14  ;;  %4215 = vmatpush1.bf16.msra.mxu1 %v3749_v16  ;;  %v3788_v14 = vld [vmem:[#allocation3 + $0x468] sm:$0xff]  ;;  %v3790_v16 = vld [vmem:[#allocation3 + $0x478] sm:$0xff] }
 0xb75   :  { %4134 = vmatprep.subr.bf16.mxu0 %v3756_v23  ;;  %4216 = vmatprep.subr.bf16.mxu1 %v3758_v52  ;;  %v3787_v23 = vld [vmem:[#allocation3 + $0x460] sm:$0xff]  ;;  %v3789_v52 = vld [vmem:[#allocation3 + $0x470] sm:$0xff] }
 0xb78   :  { %4135 = vmatpush1.bf16.msra.mxu0 %v3755_v47  ;;  %4217 = vmatpush1.bf16.msra.mxu1 %v3757_v62  ;;  %v3796_v47 = vld [vmem:[#allocation3 + $0x4a8] sm:$0xff]  ;;  %v3798_v62 = vld [vmem:[#allocation3 + $0x4b8] sm:$0xff] }
 0xb79   :  { %4136 = vmatprep.subr.bf16.mxu0 %v3764_v20  ;;  %4218 = vmatprep.subr.bf16.mxu1 %v3766_v7  ;;  %v3795_v20 = vld [vmem:[#allocation3 + $0x4a0] sm:$0xff]  ;;  %v3797_v7 = vld [vmem:[#allocation3 + $0x4b0] sm:$0xff] }
 0xb7c   :  { %4137 = vmatpush1.bf16.msra.mxu0 %v3763_v63  ;;  %4219 = vmatpush1.bf16.msra.mxu1 %v3765_v13  ;;  %v3804_v63 = vld [vmem:[#allocation3 + $0x4e8] sm:$0xff]  ;;  %v3806_v13 = vld [vmem:[#allocation3 + $0x4f8] sm:$0xff] }
 0xb7d   :  { %4138 = vmatprep.subr.bf16.mxu0 %v3772_v9  ;;  %4220 = vmatprep.subr.bf16.mxu1 %v3774_v29  ;;  %v3803_v9 = vld [vmem:[#allocation3 + $0x4e0] sm:$0xff]  ;;  %v3805_v29 = vld [vmem:[#allocation3 + $0x4f0] sm:$0xff] }
 0xb80   :  { %4139 = vmatpush1.bf16.msra.mxu0 %v3771_v1  ;;  %4221 = vmatpush1.bf16.msra.mxu1 %v3773_v6  ;;  %v3812_v1 = vld [vmem:[#allocation3 + $0x528] sm:$0xff]  ;;  %v3814_v6 = vld [vmem:[#allocation3 + $0x538] sm:$0xff] }
 0xb81   :  { %4149 = vmatprep.subr.bf16.mxu0 %v3780_v36  ;;  %4231 = vmatprep.subr.bf16.mxu1 %v3782_v54  ;;  %v3811_v36 = vld [vmem:[#allocation3 + $0x520] sm:$0xff]  ;;  %v3813_v54 = vld [vmem:[#allocation3 + $0x530] sm:$0xff] }
 0xb83   :  { %4141 = vmatmul.mubr.bf16.vlgmr.msra.gmra.mrb[64].mxu0 %v8525_v59  ;;  %4223 = vmatmul.mubr.bf16.vlgmr.msra.gmra.mrb[64].mxu1 %v8525_v59 }
 0xb84   :  { %4150 = vmatpush1.bf16.msra.mxu0 %v3779_v48  ;;  %4232 = vmatpush1.bf16.msra.mxu1 %v3781_v49  ;;  %v3820_v48 = vld [vmem:[#allocation3 + $0x568] sm:$0xff]  ;;  %v3822_v49 = vld [vmem:[#allocation3 + $0x578] sm:$0xff] }
 0xb85   :  { %4151 = vmatprep.subr.bf16.mxu0 %v3788_v14  ;;  %4233 = vmatprep.subr.bf16.mxu1 %v3790_v16  ;;  %v3819_v14 = vld [vmem:[#allocation3 + $0x560] sm:$0xff]  ;;  %v3821_v16 = vld [vmem:[#allocation3 + $0x570] sm:$0xff] }
 0xb86   :  { %4181 = vmatprep.mubr.bf16.mxu0 %v8531_v18  ;;  %4263 = vmatprep.mubr.bf16.mxu1 %v8531_v18 }
 0xb88   :  { %4152 = vmatpush1.bf16.msra.mxu0 %v3787_v23  ;;  %4234 = vmatpush1.bf16.msra.mxu1 %v3789_v52  ;;  %v3828_v23 = vld [vmem:[#allocation3 + $0x5a8] sm:$0xff]  ;;  %v3830_v52 = vld [vmem:[#allocation3 + $0x5b8] sm:$0xff] }
 0xb89   :  { %4153 = vmatprep.subr.bf16.mxu0 %v3796_v47  ;;  %4235 = vmatprep.subr.bf16.mxu1 %v3798_v62  ;;  %v3827_v47 = vld [vmem:[#allocation3 + $0x5a0] sm:$0xff]  ;;  %v3829_v62 = vld [vmem:[#allocation3 + $0x5b0] sm:$0xff] }
 0xb8c   :  { %4154 = vmatpush1.bf16.msra.mxu0 %v3795_v20  ;;  %4236 = vmatpush1.bf16.msra.mxu1 %v3797_v7  ;;  %v3836_v20 = vld [vmem:[#allocation3 + $0x5e8] sm:$0xff]  ;;  %v3838_v7 = vld [vmem:[#allocation3 + $0x5f8] sm:$0xff] }
 0xb8d   :  { %4155 = vmatprep.subr.bf16.mxu0 %v3804_v63  ;;  %4237 = vmatprep.subr.bf16.mxu1 %v3806_v13  ;;  %v3835_v63 = vld [vmem:[#allocation3 + $0x5e0] sm:$0xff]  ;;  %v3837_v13 = vld [vmem:[#allocation3 + $0x5f0] sm:$0xff] }
 0xb90   :  { %4156 = vmatpush1.bf16.msra.mxu0 %v3803_v9  ;;  %4238 = vmatpush1.bf16.msra.mxu1 %v3805_v29  ;;  %v3844_v9 = vld [vmem:[#allocation3 + $0x628] sm:$0xff]  ;;  %v3846_v29 = vld [vmem:[#allocation3 + $0x638] sm:$0xff] }
 0xb91   :  { %4157 = vmatprep.subr.bf16.mxu0 %v3812_v1  ;;  %4239 = vmatprep.subr.bf16.mxu1 %v3814_v6  ;;  %v3843_v1 = vld [vmem:[#allocation3 + $0x620] sm:$0xff]  ;;  %v3845_v6 = vld [vmem:[#allocation3 + $0x630] sm:$0xff] }
 0xb94   :  { %4158 = vmatpush1.bf16.msra.mxu0 %v3811_v36  ;;  %4240 = vmatpush1.bf16.msra.mxu1 %v3813_v54  ;;  %v3852_v36 = vld [vmem:[#allocation3 + $0x668] sm:$0xff]  ;;  %v3854_v54 = vld [vmem:[#allocation3 + $0x678] sm:$0xff] }
 0xb95   :  { %4159 = vmatprep.subr.bf16.mxu0 %v3820_v48  ;;  %4241 = vmatprep.subr.bf16.mxu1 %v3822_v49  ;;  %v3851_v48 = vld [vmem:[#allocation3 + $0x660] sm:$0xff]  ;;  %v3853_v49 = vld [vmem:[#allocation3 + $0x670] sm:$0xff] }
 0xb98   :  { %4160 = vmatpush1.bf16.msra.mxu0 %v3819_v14  ;;  %4242 = vmatpush1.bf16.msra.mxu1 %v3821_v16  ;;  %v3860_v14 = vld [vmem:[#allocation3 + $0x6a8] sm:$0xff]  ;;  %v3862_v16 = vld [vmem:[#allocation3 + $0x6b8] sm:$0xff] }
 0xb99   :  { %4161 = vmatprep.subr.bf16.mxu0 %v3828_v23  ;;  %4243 = vmatprep.subr.bf16.mxu1 %v3830_v52  ;;  %v3859_v23 = vld [vmem:[#allocation3 + $0x6a0] sm:$0xff]  ;;  %v3861_v52 = vld [vmem:[#allocation3 + $0x6b0] sm:$0xff] }
 0xb9c   :  { %4162 = vmatpush1.bf16.msra.mxu0 %v3827_v47  ;;  %4244 = vmatpush1.bf16.msra.mxu1 %v3829_v62  ;;  %v3868_v47 = vld [vmem:[#allocation3 + $0x6e8] sm:$0xff]  ;;  %v3870_v62 = vld [vmem:[#allocation3 + $0x6f8] sm:$0xff] }
 0xb9d   :  { %4163 = vmatprep.subr.bf16.mxu0 %v3836_v20  ;;  %4245 = vmatprep.subr.bf16.mxu1 %v3838_v7  ;;  %v3867_v20 = vld [vmem:[#allocation3 + $0x6e0] sm:$0xff]  ;;  %v3869_v7 = vld [vmem:[#allocation3 + $0x6f0] sm:$0xff] }
 0xba0   :  { %4164 = vmatpush1.bf16.msra.mxu0 %v3835_v63  ;;  %4246 = vmatpush1.bf16.msra.mxu1 %v3837_v13  ;;  %v3876_v63 = vld [vmem:[#allocation3 + $0x728] sm:$0xff]  ;;  %v3878_v13 = vld [vmem:[#allocation3 + $0x738] sm:$0xff] }
 0xba1   :  { %4165 = vmatprep.subr.bf16.mxu0 %v3844_v9  ;;  %4247 = vmatprep.subr.bf16.mxu1 %v3846_v29  ;;  %v3875_v9 = vld [vmem:[#allocation3 + $0x720] sm:$0xff]  ;;  %v3877_v29 = vld [vmem:[#allocation3 + $0x730] sm:$0xff] }
 0xba4   :  { %4166 = vmatpush1.bf16.msra.mxu0 %v3843_v1  ;;  %4248 = vmatpush1.bf16.msra.mxu1 %v3845_v6  ;;  %v3884_v1 = vld [vmem:[#allocation3 + $0x768] sm:$0xff]  ;;  %v3886_v6 = vld [vmem:[#allocation3 + $0x778] sm:$0xff] }
 0xba5   :  { %4167 = vmatprep.subr.bf16.mxu0 %v3852_v36  ;;  %4249 = vmatprep.subr.bf16.mxu1 %v3854_v54  ;;  %v3883_v36 = vld [vmem:[#allocation3 + $0x760] sm:$0xff]  ;;  %v3885_v54 = vld [vmem:[#allocation3 + $0x770] sm:$0xff] }
 0xba8   :  { %4168 = vmatpush1.bf16.msra.mxu0 %v3851_v48  ;;  %4250 = vmatpush1.bf16.msra.mxu1 %v3853_v49  ;;  %v3892_v48 = vld [vmem:[#allocation3 + $0x7a8] sm:$0xff]  ;;  %v3894_v49 = vld [vmem:[#allocation3 + $0x7b8] sm:$0xff] }
 0xba9   :  { %4169 = vmatprep.subr.bf16.mxu0 %v3860_v14  ;;  %4251 = vmatprep.subr.bf16.mxu1 %v3862_v16  ;;  %v3891_v14 = vld [vmem:[#allocation3 + $0x7a0] sm:$0xff]  ;;  %v3893_v16 = vld [vmem:[#allocation3 + $0x7b0] sm:$0xff] }
 0xbac   :  { %4170 = vmatpush1.bf16.msra.mxu0 %v3859_v23  ;;  %4252 = vmatpush1.bf16.msra.mxu1 %v3861_v52  ;;  %v3900_v23 = vld [vmem:[#allocation3 + $0x7e8] sm:$0xff]  ;;  %v3902_v52 = vld [vmem:[#allocation3 + $0x7f8] sm:$0xff] }
 0xbad   :  { %4171 = vmatprep.subr.bf16.mxu0 %v3868_v47  ;;  %4253 = vmatprep.subr.bf16.mxu1 %v3870_v62  ;;  %v3899_v47 = vld [vmem:[#allocation3 + $0x7e0] sm:$0xff]  ;;  %v3901_v62 = vld [vmem:[#allocation3 + $0x7f0] sm:$0xff] }
 0xbb0   :  { %4172 = vmatpush1.bf16.msra.mxu0 %v3867_v20  ;;  %4254 = vmatpush1.bf16.msra.mxu1 %v3869_v7  ;;  %v3907_v20 = vrot.slane %v8339_v46, %v8504_v5  ;;  %v3915_v7 = vrot.slane %v8339_v46, %v8507_v15 }
 0xbb1   :  { %4173 = vmatprep.subr.bf16.mxu0 %v3876_v63  ;;  %4255 = vmatprep.subr.bf16.mxu1 %v3878_v13  ;;  %v3911_v63 = vrot.slane %v8339_v46, %v8510_v24  ;;  %v3919_v13 = vrot.slane %v8339_v46, %v8513_v21 }
 0xbb4   :  { %4174 = vmatpush1.bf16.msra.mxu0 %v3875_v9  ;;  %4256 = vmatpush1.bf16.msra.mxu1 %v3877_v29 }
 0xbb5   :  { %4175 = vmatprep.subr.bf16.mxu0 %v3884_v1  ;;  %4257 = vmatprep.subr.bf16.mxu1 %v3886_v6 }
 0xbb8   :  { %4176 = vmatpush1.bf16.msra.mxu0 %v3883_v36  ;;  %4258 = vmatpush1.bf16.msra.mxu1 %v3885_v54 }
 0xbb9   :  { %4177 = vmatprep.subr.bf16.mxu0 %v3892_v48  ;;  %4259 = vmatprep.subr.bf16.mxu1 %v3894_v49 }
 0xbbc   :  { %4178 = vmatpush1.bf16.msra.mxu0 %v3891_v14  ;;  %4260 = vmatpush1.bf16.msra.mxu1 %v3893_v16 }
 0xbbd   :  { %4179 = vmatprep.subr.bf16.mxu0 %v3900_v23  ;;  %4261 = vmatprep.subr.bf16.mxu1 %v3902_v52 }
 0xbc0   :  { %4180 = vmatpush1.bf16.msra.mxu0 %v3899_v47  ;;  %4262 = vmatpush1.bf16.msra.mxu1 %v3901_v62 }
 0xbc3   :  { %4182 = vmatmul.mubr.bf16.vlgmr.msra.gmra.mrb[64].mxu0 %v8527_v43  ;;  %4264 = vmatmul.mubr.bf16.vlgmr.msra.gmra.mrb[64].mxu1 %v8527_v43 }
 0xbc4   :  { %4352 = vmatprep.mubr.bf16.mxu0 %v9146_v50  ;;  %4405 = vmatprep.mubr.bf16.mxu1 %v9146_v50 }
 0xc16   :  { %v4019_v9 = vpop.f32.mrb[60].mxu0  ;;  %v4101_v29 = vpop.f32.mrb[60].mxu1 }
 0xc17   :  { %v6895_v1 = vadd.f32 %v4019_v9, %v3907_v20  ;;  %v6897_v6 = vadd.f32 %v4101_v29, %v3915_v7  ;;  %v4021_v36 = vpop.f32.mrb[61].mxu0  ;;  %v4103_v54 = vpop.f32.mrb[61].mxu1 }
 0xc18   :  { %v6896_v48 = vadd.f32 %v4021_v36, %v3911_v63  ;;  %v6898_v49 = vadd.f32 %v4103_v54, %v3919_v13  ;;  %v4023_v14 = vpop.f32.mrb[62].mxu0  ;;  %v4105_v16 = vpop.f32.mrb[62].mxu1  ;;  %v8561_v36 = vcombine.low %v8375_v30, %v8377_v31  ;;  %v8565_v54 = vcombine.low %v8439_v11, %v8441_v22 }
 0xc19   :  { %vm4272_vm5 = vcmp.gt.f32.partialorder %v6895_v1, 0.0  ;;  %v4280_v23 = vmul.f32 0.2, %v6895_v1  ;;  %vm4274_vm14 = vcmp.gt.f32.partialorder %v6897_v6, 0.0  ;;  %v4282_v52 = vmul.f32 0.2, %v6897_v6 }
 0xc1a   :  { %vm4273_vm15 = vcmp.gt.f32.partialorder %v6896_v48, 0.0  ;;  %v4281_v47 = vmul.f32 0.2, %v6896_v48  ;;  %vm4275_vm0 = vcmp.gt.f32.partialorder %v6898_v49, 0.0  ;;  %v4283_v62 = vmul.f32 0.2, %v6898_v49 }
 0xc1b   :  { %v4288_v24 = vsel %vm4272_vm5, %v6895_v1, %v4280_v23  ;;  %v4290_v21 = vsel %vm4274_vm14, %v6897_v6, %v4282_v52  ;;  %v4024_v15 = vpop.f32.mrb[63].mxu0  ;;  %v4106_v5 = vpop.f32.mrb[63].mxu1  ;;  %v8574_v30 = vcombine.low %v8343_v60, %v8345_v8  ;;  %v8579_v11 = vcombine.low %v8407_v2, %v8409_v33  ;;  %v9211_v33 = vld [vmem:[#allocation48_spill] sm:$0xff]  ;;  %v9217_v6 = vld [vmem:[#allocation78_spill] sm:$0xff]  ;;  %v9221_v16 = vld [vmem:[#allocation49_spill] sm:$0xff] }
 0xc1c   :  { %v4296_v20 = vpack.c.bf16 %v4288_v24, %v4288_v24  ;;  %v4298_v7 = vpack.c.bf16 %v4290_v21, %v4290_v21  ;;  %v4289_v9 = vsel %vm4273_vm15, %v6896_v48, %v4281_v47  ;;  %v4291_v63 = vsel %vm4275_vm0, %v6898_v49, %v4283_v62  ;;  %v9201_v5 = vld [vmem:[#allocation42_spill] sm:$0xff]  ;;  %v9216_v24 = vld [vmem:[#allocation63_spill] sm:$0xff]  ;;  %v9218_v48 = vld [vmem:[#allocation77_spill] sm:$0xff] }
 0xc1d   :  { %v4297_v13 = vpack.c.bf16 %v4289_v9, %v4289_v9  ;;  %v4299_v29 = vpack.c.bf16 %v4291_v63, %v4291_v63  ;;  %v8583_v22 = vcombine.low %v8379_v32, %v8381_v35  ;;  %v8587_v31 = vcombine.low %v8443_v27, %v8445_v39  ;;  %v9220_v14 = vld [vmem:[#allocation50_spill] sm:$0xff]  ;;  %v9223_v52 = vld [vmem:[#allocation72_spill] sm:$0xff]  ;;  %v9224_v47 = vld [vmem:[#allocation71_spill] sm:$0xff] }
 0xc1e   :  { %v4309_v1 = vsel %vm4307_vm1, %v4296_v20, 0  ;;  %v4315_v15 = vsel %vm4307_vm1, %v4298_v7, 0  ;;  %v8599_v60 = vcombine.low %v8347_v12, %v8349_v25  ;;  %v8603_v8 = vcombine.low %v8411_v56, %v8413_v0  ;;  %v9212_v56 = vld [vmem:[#allocation47_spill] sm:$0xff]  ;;  %v9226_v20 = vld [vmem:[#allocation66_spill] sm:$0xff]  ;;  %v9227_v7 = vld [vmem:[#allocation65_spill] sm:$0xff] }
 0xc1f   :  { %6467 = vmatprep.subr.msk.bf16.mxu0 %vm4307_vm1, %v4297_v13  ;;  %6470 = vmatprep.subr.msk.bf16.mxu1 %vm4307_vm1, %v4299_v29  ;;  %v8609_v27 = vcombine.low %v8383_v37, %v8385_v38  ;;  %v8613_v32 = vcombine.low %v8447_v40, %v8449_v53  ;;  %v8619_v12 = vcombine.low %v8351_v28, %v8353_v34  ;;  %v9202_v37 = vld [vmem:[#allocation43_spill] sm:$0xff]  ;;  %v9229_v63 = vld [vmem:[#allocation80_spill] sm:$0xff] }
 0xc20   :  { %4321 = vmatpush1.bf16.msra.mxu0 %v4309_v1  ;;  %4374 = vmatpush1.bf16.msra.mxu1 %v4315_v15  ;;  %v8623_v25 = vcombine.low %v8415_v26, %v8417_v17  ;;  %v8629_v53 = vcombine.low %v8387_v41, %v8389_v42  ;;  %v8633_v35 = vcombine.low %v8451_v3, %v8453_v4  ;;  %v9205_v41 = vld [vmem:[#allocation68_spill] sm:$0xff]  ;;  %v9206_v42 = vld [vmem:[#allocation67_spill] sm:$0xff]  ;;  %v9213_v26 = vld [vmem:[#allocation70_spill] sm:$0xff] }
 0xc21   :  { %6667 = vmatprep.subr.bf16.mxu0 %v8561_v36  ;;  %6695 = vmatprep.subr.bf16.mxu1 %v8565_v54  ;;  %v8643_v28 = vcombine.low %v8355_v57, %v8357_v61  ;;  %v8647_v34 = vcombine.low %v8419_v55, %v8421_v58  ;;  %v8653_v4 = vcombine.low %v8391_v44, %v8393_v45  ;;  %v9203_v57 = vld [vmem:[#allocation46_spill] sm:$0xff]  ;;  %v9204_v61 = vld [vmem:[#allocation45_spill] sm:$0xff]  ;;  %v9210_v40 = vld [vmem:[#allocation75_spill] sm:$0xff] }
 0xc22   :  { %v8657_v3 = vcombine.low %v8455_v10, %v8457_v19  ;;  %v8663_v38 = vcombine.low %v9204_v61, %v9203_v57  ;;  %v8667_v39 = vcombine.low %v9206_v42, %v9205_v41  ;;  %v9207_v44 = vld [vmem:[#allocation54_spill] sm:$0xff]  ;;  %v9208_v45 = vld [vmem:[#allocation53_spill] sm:$0xff]  ;;  %v9209_v10 = vld [vmem:[#allocation76_spill] sm:$0xff]  ;;  %v8683_v0 = vcombine.low %v9212_v56, %v9211_v33 }
 0xc23   :  { %6468 = vmatmul.mubr.msk.bf16.vlgmr.msra.gmra.mrb[68].mxu0 %vm4300_vm2, %v9201_v5  ;;  %6471 = vmatmul.mubr.msk.bf16.vlgmr.msra.gmra.mrb[68].mxu1 %vm4300_vm2, %v9201_v5  ;;  %v8673_v19 = vcombine.low %v9208_v45, %v9207_v44  ;;  %v8677_v2 = vcombine.low %v9210_v40, %v9209_v10  ;;  %v9214_v17 = vld [vmem:[#allocation69_spill] sm:$0xff]  ;;  %v9215_v58 = vld [vmem:[#allocation64_spill] sm:$0xff]  ;;  %v8697_v49 = vcombine.low %v9218_v48, %v9217_v6  ;;  %v9230_v13 = vld [vmem:[#allocation79_spill] sm:$0xff] }
 0xc24   :  { %4362 = vmatprep.mubr.bf16.mxu0 %v9146_v50  ;;  %4415 = vmatprep.mubr.bf16.mxu1 %v9146_v50  ;;  %v8687_v55 = vcombine.low %v9214_v17, %v9213_v26  ;;  %v8693_v21 = vcombine.low %v9216_v24, %v9215_v58  ;;  %v8703_v23 = vcombine.low %v9221_v16, %v9220_v14  ;;  %v9232_v1 = vld [vmem:[#allocation52_spill] sm:$0xff]  ;;  %v9233_v15 = vld [vmem:[#allocation51_spill] sm:$0xff]  ;;  %v9235_v61 = vld [vmem:[#allocation74_spill] sm:$0xff] }
 0xc25   :  { %6668 = vmatpush3.bf16.msra.mxu0 %v8574_v30  ;;  %6696 = vmatpush3.bf16.msra.mxu1 %v8579_v11  ;;  %9219 = vst [vmem:[#allocation42_spill] sm:$0xff] %v8697_v49  ;;  %v8707_v62 = vcombine.low %v9224_v47, %v9223_v52  ;;  %v8713_v9 = vcombine.low %v9227_v7, %v9226_v20  ;;  %v9236_v41 = vld [vmem:[#allocation73_spill] sm:$0xff]  ;;  %v9238_v44 = vld [vmem:[#allocation39_spill] sm:$0xff] }
 0xc26   :  { %6669 = vmatprep.subr.bf16.mxu0 %v8583_v22  ;;  %6697 = vmatprep.subr.bf16.mxu1 %v8587_v31  ;;  %9222 = vst [vmem:[#allocation43_spill] sm:$0xff] %v8703_v23  ;;  %v8717_v29 = vcombine.low %v9230_v13, %v9229_v63  ;;  %v8723_v57 = vcombine.low %v9233_v15, %v9232_v1  ;;  %v9088_v45 = vsub.s32 5, %v9238_v44  ;;  %v9086_v10 = vsub.s32 7, %v9238_v44 }
 0xc27   :  { %9225 = vst [vmem:[#allocation46_spill] sm:$0xff] %v8707_v62  ;;  %9228 = vst [vmem:[#allocation45_spill] sm:$0xff] %v8713_v9  ;;  %v8727_v42 = vcombine.low %v9236_v41, %v9235_v61  ;;  %v9085_v15 = vsub.s32 4, %v9238_v44  ;;  %v9087_v61 = vsub.s32 6, %v9238_v44 }
 0xc28   :  { %9231 = vst [vmem:[#allocation68_spill] sm:$0xff] %v8717_v29  ;;  %9234 = vst [vmem:[#allocation67_spill] sm:$0xff] %v8723_v57  ;;  %v3927_v40 = vrot.slane %v8339_v46, %v9088_v45  ;;  %v3935_v33 = vrot.slane %v8339_v46, %v9086_v10 }
 0xc29   :  { %6670 = vmatpush3.bf16.msra.mxu0 %v8599_v60  ;;  %6698 = vmatpush3.bf16.msra.mxu1 %v8603_v8  ;;  %9237 = vst [vmem:[#allocation54_spill] sm:$0xff] %v8727_v42  ;;  %v3923_v41 = vrot.slane %v8339_v46, %v9085_v15 }
 0xc2a   :  { %6671 = vmatprep.subr.bf16.mxu0 %v8609_v27  ;;  %6699 = vmatprep.subr.bf16.mxu1 %v8613_v32 }
 0xc2b   :  { %6469 = vmatmul.mubr.msk.bf16.gmra.mrb[72].mxu0 %vm4300_vm2, %v9202_v37  ;;  %6472 = vmatmul.mubr.msk.bf16.gmra.mrb[72].mxu1 %vm4300_vm2, %v9202_v37 }
 0xc2d   :  { %6672 = vmatpush3.bf16.msra.mxu0 %v8619_v12  ;;  %6700 = vmatpush3.bf16.msra.mxu1 %v8623_v25 }
 0xc2e   :  { %6673 = vmatprep.subr.bf16.mxu0 %v8629_v53  ;;  %6701 = vmatprep.subr.bf16.mxu1 %v8633_v35 }
 0xc31   :  { %6674 = vmatpush3.bf16.msra.mxu0 %v8643_v28  ;;  %6702 = vmatpush3.bf16.msra.mxu1 %v8647_v34 }
 0xc32   :  { %6675 = vmatprep.subr.bf16.mxu0 %v8653_v4  ;;  %6703 = vmatprep.subr.bf16.mxu1 %v8657_v3 }
 0xc35   :  { %6676 = vmatpush3.bf16.msra.mxu0 %v8663_v38  ;;  %6704 = vmatpush3.bf16.msra.mxu1 %v8667_v39 }
 0xc36   :  { %6677 = vmatprep.subr.bf16.mxu0 %v8673_v19  ;;  %6705 = vmatprep.subr.bf16.mxu1 %v8677_v2 }
 0xc39   :  { %6678 = vmatpush3.bf16.msra.mxu0 %v8683_v0  ;;  %6706 = vmatpush3.bf16.msra.mxu1 %v8687_v55 }
 0xc3a   :  { %6679 = vmatprep.subr.bf16.mxu0 %v8693_v21  ;;  %6707 = vmatprep.subr.bf16.mxu1 %v8697_v49 }
 0xc3d   :  { %6680 = vmatpush3.bf16.msra.mxu0 %v8703_v23  ;;  %6708 = vmatpush3.bf16.msra.mxu1 %v8707_v62 }
 0xc3e   :  { %6681 = vmatprep.subr.bf16.mxu0 %v8713_v9  ;;  %6709 = vmatprep.subr.bf16.mxu1 %v8717_v29 }
 0xc41   :  { %6682 = vmatpush3.bf16.msra.mxu0 %v8723_v57  ;;  %6710 = vmatpush3.bf16.msra.mxu1 %v8727_v42 }
 0xc96   :  { %v4183_v56 = vpop.f32.mrb[64].mxu0  ;;  %v4265_v26 = vpop.f32.mrb[64].mxu1 }
 0xc97   :  { %v4185_v17 = vpop.f32.mrb[65].mxu0  ;;  %v4267_v58 = vpop.f32.mrb[65].mxu1 }
 0xc98   :  { %v6900_v24 = vadd.f32 %v4185_v17, %v3927_v40  ;;  %v4187_v6 = vpop.f32.mrb[66].mxu0  ;;  %v6902_v48 = vadd.f32 %v4267_v58, %v3935_v33  ;;  %v4269_v14 = vpop.f32.mrb[66].mxu1  ;;  %v3931_v40 = vrot.slane %v8339_v46, %v9087_v61  ;;  %v6899_v33 = vadd.f32 %v4183_v56, %v3923_v41 }
 0xc99   :  { %v4188_v52 = vpop.f32.mrb[67].mxu0  ;;  %v4270_v47 = vpop.f32.mrb[67].mxu1 }
 0xc9a   :  { %vm4277_vm4 = vcmp.gt.f32.partialorder %v6900_v24, 0.0  ;;  %v4285_v16 = vmul.f32 0.2, %v6900_v24  ;;  %vm4279_vm13 = vcmp.gt.f32.partialorder %v6902_v48, 0.0  ;;  %v4287_v20 = vmul.f32 0.2, %v6902_v48 }
 0xc9b   :  { %v6901_v17 = vadd.f32 %v4265_v26, %v3931_v40  ;;  %v4284_v58 = vmul.f32 0.2, %v6899_v33  ;;  %vm4276_vm5 = vcmp.gt.f32.partialorder %v6899_v33, 0.0 }
 0xc9c   :  { %v4293_v7 = vsel %vm4277_vm4, %v6900_v24, %v4285_v16  ;;  %v4295_v13 = vsel %vm4279_vm13, %v6902_v48, %v4287_v20 }
 0xc9d   :  { %v4751_v63 = vpack.c.bf16 %v4293_v7, %v4293_v7  ;;  %v4753_v1 = vpack.c.bf16 %v4295_v13, %v4295_v13  ;;  %v4286_v24 = vmul.f32 0.2, %v6901_v17  ;;  %vm4278_vm14 = vcmp.gt.f32.partialorder %v6901_v17, 0.0 }
 0xc9e   :  { %v4292_v6 = vsel %vm4276_vm5, %v6899_v33, %v4284_v58 }
 0xc9f   :  { %6530 = vmatprep.subr.msk.bf16.mxu0 %vm4307_vm1, %v4751_v63  ;;  %6533 = vmatprep.subr.msk.bf16.mxu1 %vm4307_vm1, %v4753_v1  ;;  %v4294_v48 = vsel %vm4278_vm14, %v6901_v17, %v4286_v24  ;;  %v4750_v63 = vpack.c.bf16 %v4292_v6, %v4292_v6 }
 0xca0   :  { %v4752_v13 = vpack.c.bf16 %v4294_v48, %v4294_v48 }
 0xca1   :  { %v4755_v58 = vsel %vm4307_vm1, %v4750_v63, 0 }
 0xca2   :  { %v4761_v24 = vsel %vm4307_vm1, %v4752_v13, 0 }
 0xcf6   :  { %v4354_v14 = vpop.f32.mrb[68].mxu0  ;;  %v4407_v16 = vpop.f32.mrb[68].mxu1 }
 0xcf7   :  { %v4356_v52 = vpop.f32.mrb[69].mxu0  ;;  %v4409_v47 = vpop.f32.mrb[69].mxu1 }
 0xcf8   :  { %v4358_v20 = vpop.f32.mrb[70].mxu0  ;;  %v4411_v7 = vpop.f32.mrb[70].mxu1 }
 0xcf9   :  { %v6510_v1 = vpack.c.bf16 %v4358_v20, %v4354_v14  ;;  %v6522_v15 = vpack.c.bf16 %v4411_v7, %v4407_v16  ;;  %v4360_v10 = vpop.f32.mrb[71].mxu0  ;;  %v4413_v46 = vpop.f32.mrb[71].mxu1 }
 0xcfa   :  { %v6507_v56 = vpack.c.bf16 %v4360_v10, %v4356_v52  ;;  %v6519_v26 = vpack.c.bf16 %v4413_v46, %v4409_v47 }
 0xcfc   :  { %6508 = vmatprep.mubr.msk.bf16.mxu0 %vm8021_vm6, %v6507_v56  ;;  %6520 = vmatprep.mubr.msk.bf16.mxu1 %vm8025_vm9, %v6519_v26 }
 0xcfd   :  { %6511 = vmatmul.mubr.msk.bf16.vlgmr.msra.gmra.mrb[76].mxu0 %vm8033_vm10, %v6510_v1  ;;  %6523 = vmatmul.mubr.msk.bf16.vlgmr.msra.gmra.mrb[76].mxu1 %vm8037_vm11, %v6522_v15 }
 0xcfe   :  { %4767 = vmatpush1.bf16.msra.mxu0 %v4755_v58  ;;  %4820 = vmatpush1.bf16.msra.mxu1 %v4761_v24  ;;  %v4364_v10 = vpop.f32.mrb[72].mxu0  ;;  %v4417_v6 = vpop.f32.mrb[72].mxu1 }
 0xcff   :  { %v4366_v48 = vpop.f32.mrb[73].mxu0  ;;  %v4419_v14 = vpop.f32.mrb[73].mxu1  ;;  %6723 = vmatprep.subr.bf16.mxu0 %v8561_v36  ;;  %6751 = vmatprep.subr.bf16.mxu1 %v8565_v54 }
 0xd00   :  { %v4368_v16 = vpop.f32.mrb[74].mxu0  ;;  %v4421_v52 = vpop.f32.mrb[74].mxu1 }
 0xd01   :  { %v6516_v47 = vpack.c.bf16 %v4368_v16, %v4364_v10  ;;  %v6528_v20 = vpack.c.bf16 %v4421_v52, %v4417_v6  ;;  %v4370_v7 = vpop.f32.mrb[75].mxu0  ;;  %v4423_v15 = vpop.f32.mrb[75].mxu1 }
 0xd02   :  { %v6513_v1 = vpack.c.bf16 %v4370_v7, %v4366_v48  ;;  %v6525_v63 = vpack.c.bf16 %v4423_v15, %v4419_v14  ;;  %v9247_v7 = vld [vmem:[#allocation81_spill] sm:$0xff] }
 0xd04   :  { %6514 = vmatprep.mubr.msk.bf16.mxu0 %vm8051_vm3, %v6513_v1  ;;  %6526 = vmatprep.mubr.msk.bf16.mxu1 %vm8055_vm7, %v6525_v63 }
 0xd05   :  { %6517 = vmatmul.mubr.msk.bf16.gmra.mrb[80].mxu0 %vm8060_vm8, %v6516_v47  ;;  %6529 = vmatmul.mubr.msk.bf16.gmra.mrb[80].mxu1 %vm8065_vm12, %v6528_v20 }
 0xd06   :  { %4798 = vmatprep.mubr.bf16.mxu0 %v9146_v50  ;;  %4851 = vmatprep.mubr.bf16.mxu1 %v9146_v50 }
 0xd0d   :  { %6531 = vmatmul.mubr.msk.bf16.vlgmr.msra.gmra.mrb[84].mxu0 %vm4300_vm2, %v9201_v5  ;;  %6534 = vmatmul.mubr.msk.bf16.vlgmr.msra.gmra.mrb[84].mxu1 %vm4300_vm2, %v9201_v5 }
 0xd0e   :  { %4808 = vmatprep.mubr.bf16.mxu0 %v9146_v50  ;;  %4861 = vmatprep.mubr.bf16.mxu1 %v9146_v50 }
 0xd0f   :  { %6724 = vmatpush3.bf16.msra.mxu0 %v8574_v30  ;;  %6752 = vmatpush3.bf16.msra.mxu1 %v8579_v11 }
 0xd10   :  { %6725 = vmatprep.subr.bf16.mxu0 %v8583_v22  ;;  %6753 = vmatprep.subr.bf16.mxu1 %v8587_v31 }
 0xd13   :  { %6726 = vmatpush3.bf16.msra.mxu0 %v8599_v60  ;;  %6754 = vmatpush3.bf16.msra.mxu1 %v8603_v8 }
 0xd14   :  { %6727 = vmatprep.subr.bf16.mxu0 %v8609_v27  ;;  %6755 = vmatprep.subr.bf16.mxu1 %v8613_v32 }
 0xd15   :  { %6532 = vmatmul.mubr.msk.bf16.gmra.mrb[88].mxu0 %vm4300_vm2, %v9202_v37  ;;  %6535 = vmatmul.mubr.msk.bf16.gmra.mrb[88].mxu1 %vm4300_vm2, %v9202_v37 }
 0xd17   :  { %6728 = vmatpush3.bf16.msra.mxu0 %v8619_v12  ;;  %6756 = vmatpush3.bf16.msra.mxu1 %v8623_v25 }
 0xd18   :  { %6729 = vmatprep.subr.bf16.mxu0 %v8629_v53  ;;  %6757 = vmatprep.subr.bf16.mxu1 %v8633_v35 }
 0xd1b   :  { %6730 = vmatpush3.bf16.msra.mxu0 %v8643_v28  ;;  %6758 = vmatpush3.bf16.msra.mxu1 %v8647_v34 }
 0xd1c   :  { %6731 = vmatprep.subr.bf16.mxu0 %v8653_v4  ;;  %6759 = vmatprep.subr.bf16.mxu1 %v8657_v3 }
 0xd1f   :  { %6732 = vmatpush3.bf16.msra.mxu0 %v8663_v38  ;;  %6760 = vmatpush3.bf16.msra.mxu1 %v8667_v39 }
 0xd20   :  { %6733 = vmatprep.subr.bf16.mxu0 %v8673_v19  ;;  %6761 = vmatprep.subr.bf16.mxu1 %v8677_v2 }
 0xd23   :  { %6734 = vmatpush3.bf16.msra.mxu0 %v8683_v0  ;;  %6762 = vmatpush3.bf16.msra.mxu1 %v8687_v55 }
 0xd24   :  { %6735 = vmatprep.subr.bf16.mxu0 %v8693_v21  ;;  %6763 = vmatprep.subr.bf16.mxu1 %v8697_v49 }
 0xd27   :  { %6736 = vmatpush3.bf16.msra.mxu0 %v8703_v23  ;;  %6764 = vmatpush3.bf16.msra.mxu1 %v8707_v62 }
 0xd28   :  { %6737 = vmatprep.subr.bf16.mxu0 %v8713_v9  ;;  %6765 = vmatprep.subr.bf16.mxu1 %v8717_v29 }
 0xd2b   :  { %6738 = vmatpush3.bf16.msra.mxu0 %v8723_v57  ;;  %6766 = vmatpush3.bf16.msra.mxu1 %v8727_v42 }
 0xdd0   :  { %v6683_v58 = vpop.f32.mrb[76].mxu0  ;;  %v6711_v24 = vpop.f32.mrb[76].mxu1 }
 0xdd1   :  { %v6684_v10 = vpop.f32.mrb[77].mxu0  ;;  %v6712_v6 = vpop.f32.mrb[77].mxu1 }
 0xdd2   :  { %v6685_v48 = vadd.f32 %v6684_v10, %v6683_v58  ;;  %v6713_v14 = vadd.f32 %v6712_v6, %v6711_v24  ;;  %v6686_v16 = vpop.f32.mrb[78].mxu0  ;;  %v6714_v52 = vpop.f32.mrb[78].mxu1 }
 0xdd3   :  { %v6687_v47 = vpop.f32.mrb[79].mxu0  ;;  %v6715_v20 = vpop.f32.mrb[79].mxu1 }
 0xdd4   :  { %v4683_v15 = vadd.f32 %v6685_v48, %v9247_v7  ;;  %v6688_v1 = vadd.f32 %v6687_v47, %v6686_v16  ;;  %v6716_v63 = vadd.f32 %v6715_v20, %v6714_v52 }
 0xdd6   :  { %v4732_v61 = vadd.f32 %v6713_v14, %v4683_v15  ;;  %v4686_v45 = vadd.f32 %v6688_v1, %v9247_v7 }
 0xdd8   :  { %4746 = vst [vmem:[#allocation22] sm:$0xff] %v4732_v61  ;;  %v4735_v44 = vadd.f32 %v6716_v63, %v4686_v45  ;;  %v6689_v42 = vpop.f32.mrb[80].mxu0  ;;  %v6717_v57 = vpop.f32.mrb[80].mxu1 }
 0xdd9   :  { %v6690_v29 = vpop.f32.mrb[81].mxu0  ;;  %v6718_v9 = vpop.f32.mrb[81].mxu1 }
 0xdda   :  { %4747 = vst [vmem:[#allocation22 + $0x8] sm:$0xff] %v4735_v44  ;;  %v6691_v58 = vadd.f32 %v6690_v29, %v6689_v42  ;;  %v6719_v24 = vadd.f32 %v6718_v9, %v6717_v57  ;;  %v6692_v10 = vpop.f32.mrb[82].mxu0  ;;  %v6720_v6 = vpop.f32.mrb[82].mxu1 }
 0xddb   :  { %v6693_v62 = vpop.f32.mrb[83].mxu0  ;;  %v6721_v23 = vpop.f32.mrb[83].mxu1 }
 0xddc   :  { %v4691_v48 = vadd.f32 %v6691_v58, %v9247_v7  ;;  %v6694_v16 = vadd.f32 %v6693_v62, %v6692_v10  ;;  %v6722_v52 = vadd.f32 %v6721_v23, %v6720_v6 }
 0xdde   :  { %v4740_v14 = vadd.f32 %v6719_v24, %v4691_v48  ;;  %v4694_v47 = vadd.f32 %v6694_v16, %v9247_v7 }
 0xde0   :  { %4748 = vst [vmem:[#allocation22 + $0x40] sm:$0xff] %v4740_v14  ;;  %v4743_v45 = vadd.f32 %v6722_v52, %v4694_v47  ;;  %v4800_v61 = vpop.f32.mrb[84].mxu0  ;;  %v4853_v20 = vpop.f32.mrb[84].mxu1 }
 0xde1   :  { %v4802_v15 = vpop.f32.mrb[85].mxu0  ;;  %v4855_v1 = vpop.f32.mrb[85].mxu1 }
 0xde2   :  { %4749 = vst [vmem:[#allocation22 + $0x48] sm:$0xff] %v4743_v45  ;;  %v4804_v29 = vpop.f32.mrb[86].mxu0  ;;  %v4857_v9 = vpop.f32.mrb[86].mxu1 }
 0xde3   :  { %v6540_v57 = vpack.c.bf16 %v4804_v29, %v4800_v61  ;;  %v6552_v42 = vpack.c.bf16 %v4857_v9, %v4853_v20  ;;  %v4806_v44 = vpop.f32.mrb[87].mxu0  ;;  %v4859_v63 = vpop.f32.mrb[87].mxu1 }
 0xde4   :  { %v6537_v49 = vpack.c.bf16 %v4806_v44, %v4802_v15  ;;  %v6549_v58 = vpack.c.bf16 %v4859_v63, %v4855_v1 }
 0xde6   :  { %6538 = vmatprep.mubr.msk.bf16.mxu0 %vm8021_vm6, %v6537_v49  ;;  %6550 = vmatprep.mubr.msk.bf16.mxu1 %vm8025_vm9, %v6549_v58 }
 0xde7   :  { %6541 = vmatmul.mubr.msk.bf16.vlgmr.msra.gmra.mrb[92].mxu0 %vm8033_vm10, %v6540_v57  ;;  %6553 = vmatmul.mubr.msk.bf16.vlgmr.msra.gmra.mrb[92].mxu1 %vm8037_vm11, %v6552_v42 }
 0xde8   :  { %v4810_v23 = vpop.f32.mrb[88].mxu0  ;;  %v4863_v62 = vpop.f32.mrb[88].mxu1 }
 0xde9   :  { %v4812_v24 = vpop.f32.mrb[89].mxu0  ;;  %v4865_v10 = vpop.f32.mrb[89].mxu1 }
 0xdea   :  { %v4814_v6 = vpop.f32.mrb[90].mxu0  ;;  %v4867_v48 = vpop.f32.mrb[90].mxu1 }
 0xdeb   :  { %v6546_v16 = vpack.c.bf16 %v4814_v6, %v4810_v23  ;;  %v6558_v52 = vpack.c.bf16 %v4867_v48, %v4863_v62  ;;  %v4816_v14 = vpop.f32.mrb[91].mxu0  ;;  %v4869_v47 = vpop.f32.mrb[91].mxu1 }
 0xdec   :  { %v6543_v49 = vpack.c.bf16 %v4816_v14, %v4812_v24  ;;  %v6555_v45 = vpack.c.bf16 %v4869_v47, %v4865_v10 }
 0xdee   :  { %6544 = vmatprep.mubr.msk.bf16.mxu0 %vm8051_vm3, %v6543_v49  ;;  %6556 = vmatprep.mubr.msk.bf16.mxu1 %vm8055_vm7, %v6555_v45 }
 0xdef   :  { %6547 = vmatmul.mubr.msk.bf16.gmra.mrb[96].mxu0 %vm8060_vm8, %v6546_v16  ;;  %6559 = vmatmul.mubr.msk.bf16.gmra.mrb[96].mxu1 %vm8065_vm12, %v6558_v52 }
 0xeba   :  { %v6739_v61 = vpop.f32.mrb[92].mxu0  ;;  %v6767_v20 = vpop.f32.mrb[92].mxu1 }
 0xebb   :  { %v6740_v15 = vpop.f32.mrb[93].mxu0  ;;  %v6768_v1 = vpop.f32.mrb[93].mxu1 }
 0xebc   :  { %v6741_v29 = vadd.f32 %v6740_v15, %v6739_v61  ;;  %v6769_v9 = vadd.f32 %v6768_v1, %v6767_v20  ;;  %v6742_v57 = vpop.f32.mrb[94].mxu0  ;;  %v6770_v42 = vpop.f32.mrb[94].mxu1 }
 0xebd   :  { %v6743_v44 = vpop.f32.mrb[95].mxu0  ;;  %v6771_v63 = vpop.f32.mrb[95].mxu1 }
 0xebe   :  { %v4931_v58 = vadd.f32 %v6741_v29, %v9247_v7  ;;  %v6744_v23 = vadd.f32 %v6743_v44, %v6742_v57  ;;  %v6772_v62 = vadd.f32 %v6771_v63, %v6770_v42 }
 0xec0   :  { %v4980_v24 = vadd.f32 %v6769_v9, %v4931_v58  ;;  %v4934_v10 = vadd.f32 %v6744_v23, %v9247_v7 }
 0xec2   :  { %4994 = vst [vmem:[#allocation22 + $0x10] sm:$0xff] %v4980_v24  ;;  %v4983_v6 = vadd.f32 %v6772_v62, %v4934_v10  ;;  %v6745_v48 = vpop.f32.mrb[96].mxu0  ;;  %v6773_v16 = vpop.f32.mrb[96].mxu1 }
 0xec3   :  { %v6746_v52 = vpop.f32.mrb[97].mxu0  ;;  %v6774_v14 = vpop.f32.mrb[97].mxu1 }
 0xec4   :  { %4995 = vst [vmem:[#allocation22 + $0x18] sm:$0xff] %v4983_v6  ;;  %v6747_v47 = vadd.f32 %v6746_v52, %v6745_v48  ;;  %v6775_v49 = vadd.f32 %v6774_v14, %v6773_v16  ;;  %v6748_v45 = vpop.f32.mrb[98].mxu0  ;;  %v6776_v61 = vpop.f32.mrb[98].mxu1 }
 0xec5   :  { %v6749_v20 = vpop.f32.mrb[99].mxu0  ;;  %v6777_v15 = vpop.f32.mrb[99].mxu1 }
 0xec6   :  { %v4939_v1 = vadd.f32 %v6747_v47, %v9247_v7  ;;  %v6750_v29 = vadd.f32 %v6749_v20, %v6748_v45  ;;  %v6778_v57 = vadd.f32 %v6777_v15, %v6776_v61 }
 0xec8   :  { %v4988_v9 = vadd.f32 %v6775_v49, %v4939_v1  ;;  %v4942_v42 = vadd.f32 %v6750_v29, %v9247_v7 }
 0xeca   :  { %4996 = vst [vmem:[#allocation22 + $0x50] sm:$0xff] %v4988_v9  ;;  %v4991_v44 = vadd.f32 %v6778_v57, %v4942_v42 }
 0xecc   :  { %4997 = vst [vmem:[#allocation22 + $0x58] sm:$0xff] %v4991_v44 }
 0xecd   :  { %7430 = dma.done.wait [#allocation4 + $0x2], 32768 }
 0xece   :  { %7431 = vsyncadd [#allocation4 + $0x2], 4294934528  ;;  %5329 = vmatprep.mubr.bf16.mxu0 %v8529_v51  ;;  %5411 = vmatprep.mubr.bf16.mxu1 %v8529_v51  ;;  %v5001_v63 = vld [vmem:[#allocation3 + $0x808] sm:$0xff]  ;;  %v5003_v58 = vld [vmem:[#allocation3 + $0x818] sm:$0xff]  ;;  %s7464_s11 = smov [#allocation22]  }
 0xecf   :  { %v5000_v23 = vld [vmem:[#allocation3 + $0x800] sm:$0xff]  ;;  %5297 = vmatprep.subr.bf16.mxu0 %v5001_v63  ;;  %5379 = vmatprep.subr.bf16.mxu1 %v5003_v58  ;;  %v5002_v62 = vld [vmem:[#allocation3 + $0x810] sm:$0xff]  ;;  %v5009_v24 = vld [vmem:[#allocation3 + $0x848] sm:$0xff]  ;;  %s6150_s1 = sshll.u32 %s7464_s11, 4  ;;  %s6151_s1 = int_to_ptr.vmem [resolvable:$true] %s6150_s1 }
 0xed0   :  { %v5011_v10 = vld [vmem:[#allocation3 + $0x858] sm:$0xff]  ;;  %5298 = vmatpush1.bf16.msra.mxu0 %v5000_v23  ;;  %5380 = vmatpush1.bf16.msra.mxu1 %v5002_v62  ;;  %v5008_v6 = vld [vmem:[#allocation3 + $0x840] sm:$0xff]  ;;  %v5010_v48 = vld [vmem:[#allocation3 + $0x850] sm:$0xff]  ;;  %s7392_s22 = scalar_lea.vmem %s6151_s1, 2048  ;;  %p7397_p11 = scmp.lt.s32.totalorder %s6151_s1, %s6151_s1 }
 0xed1   :  { %5299 = vmatprep.subr.bf16.mxu0 %v5009_v24  ;;  %5381 = vmatprep.subr.bf16.mxu1 %v5011_v10  ;;  %v5017_v16 = vld [vmem:[#allocation3 + $0x888] sm:$0xff]  ;;  %v5019_v52 = vld [vmem:[#allocation3 + $0x898] sm:$0xff]  ;;  %v5016_v14 = vld [vmem:[#allocation3 + $0x880] sm:$0xff]  ;;  %p7393_p10 = scmp.ne.s32.totalorder %s6151_s1, %s7392_s22  ;;  %p7398_p12 = scmp.lt.s32.totalorder %s7392_s22, %s7392_s22 }
 0xed2   :  { %v5018_v47 = vld [vmem:[#allocation3 + $0x890] sm:$0xff]  ;;  %v5025_v49 = vld [vmem:[#allocation3 + $0x8c8] sm:$0xff]  ;;  %v5027_v45 = vld [vmem:[#allocation3 + $0x8d8] sm:$0xff] }
 0xed3   :  { %v5024_v61 = vld [vmem:[#allocation3 + $0x8c0] sm:$0xff]  ;;  %v5026_v20 = vld [vmem:[#allocation3 + $0x8d0] sm:$0xff]  ;;  %v5033_v15 = vld [vmem:[#allocation3 + $0x908] sm:$0xff]  ;;  %p7399_p13 = por %p7398_p12, %p7397_p11 }
 0xed4   :  { %5300 = vmatpush1.bf16.msra.mxu0 %v5008_v6  ;;  %5382 = vmatpush1.bf16.msra.mxu1 %v5010_v48  ;;  %v5035_v1 = vld [vmem:[#allocation3 + $0x918] sm:$0xff]  ;;  %v5032_v29 = vld [vmem:[#allocation3 + $0x900] sm:$0xff]  ;;  %v5034_v57 = vld [vmem:[#allocation3 + $0x910] sm:$0xff] }
 0xed5   :  { %5301 = vmatprep.subr.bf16.mxu0 %v5017_v16  ;;  %5383 = vmatprep.subr.bf16.mxu1 %v5019_v52  ;;  %v5041_v9 = vld [vmem:[#allocation3 + $0x948] sm:$0xff]  ;;  %v5043_v42 = vld [vmem:[#allocation3 + $0x958] sm:$0xff]  ;;  %v5040_v44 = vld [vmem:[#allocation3 + $0x940] sm:$0xff]  ;;  %p7400_p0 = pnand %p7399_p13, %p7393_p10 }
 0xed6   :  { %v5042_v63 = vld [vmem:[#allocation3 + $0x950] sm:$0xff]  ;;  %v5049_v58 = vld [vmem:[#allocation3 + $0x988] sm:$0xff]  ;;  %v5051_v23 = vld [vmem:[#allocation3 + $0x998] sm:$0xff] }
 0xed7   :  { %v5048_v62 = vld [vmem:[#allocation3 + $0x980] sm:$0xff]  ;;  %v5050_v24 = vld [vmem:[#allocation3 + $0x990] sm:$0xff]  ;;  %v5057_v10 = vld [vmem:[#allocation3 + $0x9c8] sm:$0xff] }
 0xed8   :  { %5302 = vmatpush1.bf16.msra.mxu0 %v5016_v14  ;;  %5384 = vmatpush1.bf16.msra.mxu1 %v5018_v47  ;;  %v5059_v6 = vld [vmem:[#allocation3 + $0x9d8] sm:$0xff]  ;;  %v5056_v48 = vld [vmem:[#allocation3 + $0x9c0] sm:$0xff]  ;;  %v5058_v16 = vld [vmem:[#allocation3 + $0x9d0] sm:$0xff] }
 0xed9   :  { %5303 = vmatprep.subr.bf16.mxu0 %v5025_v49  ;;  %5385 = vmatprep.subr.bf16.mxu1 %v5027_v45  ;;  %v5065_v52 = vld [vmem:[#allocation3 + $0xa08] sm:$0xff]  ;;  %v5067_v14 = vld [vmem:[#allocation3 + $0xa18] sm:$0xff]  ;;  %v5064_v47 = vld [vmem:[#allocation3 + $0xa00] sm:$0xff] }
 0xeda   :  { %v5066_v49 = vld [vmem:[#allocation3 + $0xa10] sm:$0xff]  ;;  %v5073_v45 = vld [vmem:[#allocation3 + $0xa48] sm:$0xff] }
 0xedc   :  { %5304 = vmatpush1.bf16.msra.mxu0 %v5024_v61  ;;  %5386 = vmatpush1.bf16.msra.mxu1 %v5026_v20  ;;  %v5075_v61 = vld [vmem:[#allocation3 + $0xa58] sm:$0xff]  ;;  %v5072_v20 = vld [vmem:[#allocation3 + $0xa40] sm:$0xff] }
 0xedd   :  { %5305 = vmatprep.subr.bf16.mxu0 %v5033_v15  ;;  %5387 = vmatprep.subr.bf16.mxu1 %v5035_v1  ;;  %v5074_v15 = vld [vmem:[#allocation3 + $0xa50] sm:$0xff]  ;;  %v5081_v1 = vld [vmem:[#allocation3 + $0xa88] sm:$0xff] }
 0xee0   :  { %5306 = vmatpush1.bf16.msra.mxu0 %v5032_v29  ;;  %5388 = vmatpush1.bf16.msra.mxu1 %v5034_v57  ;;  %v5083_v29 = vld [vmem:[#allocation3 + $0xa98] sm:$0xff]  ;;  %v5080_v57 = vld [vmem:[#allocation3 + $0xa80] sm:$0xff] }
 0xee1   :  { %5307 = vmatprep.subr.bf16.mxu0 %v5041_v9  ;;  %5389 = vmatprep.subr.bf16.mxu1 %v5043_v42  ;;  %v5082_v9 = vld [vmem:[#allocation3 + $0xa90] sm:$0xff]  ;;  %v5089_v42 = vld [vmem:[#allocation3 + $0xac8] sm:$0xff] }
 0xee4   :  { %5308 = vmatpush1.bf16.msra.mxu0 %v5040_v44  ;;  %5390 = vmatpush1.bf16.msra.mxu1 %v5042_v63  ;;  %v5091_v44 = vld [vmem:[#allocation3 + $0xad8] sm:$0xff]  ;;  %v5088_v63 = vld [vmem:[#allocation3 + $0xac0] sm:$0xff] }
 0xee5   :  { %5309 = vmatprep.subr.bf16.mxu0 %v5049_v58  ;;  %5391 = vmatprep.subr.bf16.mxu1 %v5051_v23  ;;  %v5090_v58 = vld [vmem:[#allocation3 + $0xad0] sm:$0xff]  ;;  %v5097_v23 = vld [vmem:[#allocation3 + $0xb08] sm:$0xff] }
 0xee8   :  { %5310 = vmatpush1.bf16.msra.mxu0 %v5048_v62  ;;  %5392 = vmatpush1.bf16.msra.mxu1 %v5050_v24  ;;  %v5099_v62 = vld [vmem:[#allocation3 + $0xb18] sm:$0xff]  ;;  %v5096_v24 = vld [vmem:[#allocation3 + $0xb00] sm:$0xff] }
 0xee9   :  { %5311 = vmatprep.subr.bf16.mxu0 %v5057_v10  ;;  %5393 = vmatprep.subr.bf16.mxu1 %v5059_v6  ;;  %v5098_v10 = vld [vmem:[#allocation3 + $0xb10] sm:$0xff]  ;;  %v5105_v6 = vld [vmem:[#allocation3 + $0xb48] sm:$0xff] }
 0xeec   :  { %5312 = vmatpush1.bf16.msra.mxu0 %v5056_v48  ;;  %5394 = vmatpush1.bf16.msra.mxu1 %v5058_v16  ;;  %v5107_v48 = vld [vmem:[#allocation3 + $0xb58] sm:$0xff]  ;;  %v5104_v16 = vld [vmem:[#allocation3 + $0xb40] sm:$0xff] }
 0xeed   :  { %5313 = vmatprep.subr.bf16.mxu0 %v5065_v52  ;;  %5395 = vmatprep.subr.bf16.mxu1 %v5067_v14  ;;  %v5106_v52 = vld [vmem:[#allocation3 + $0xb50] sm:$0xff]  ;;  %v5113_v14 = vld [vmem:[#allocation3 + $0xb88] sm:$0xff] }
 0xef0   :  { %5314 = vmatpush1.bf16.msra.mxu0 %v5064_v47  ;;  %5396 = vmatpush1.bf16.msra.mxu1 %v5066_v49  ;;  %v5115_v47 = vld [vmem:[#allocation3 + $0xb98] sm:$0xff]  ;;  %v5112_v49 = vld [vmem:[#allocation3 + $0xb80] sm:$0xff] }
 0xef1   :  { %5315 = vmatprep.subr.bf16.mxu0 %v5073_v45  ;;  %5397 = vmatprep.subr.bf16.mxu1 %v5075_v61  ;;  %v5114_v45 = vld [vmem:[#allocation3 + $0xb90] sm:$0xff]  ;;  %v5121_v61 = vld [vmem:[#allocation3 + $0xbc8] sm:$0xff] }
 0xef4   :  { %5316 = vmatpush1.bf16.msra.mxu0 %v5072_v20  ;;  %5398 = vmatpush1.bf16.msra.mxu1 %v5074_v15  ;;  %v5123_v20 = vld [vmem:[#allocation3 + $0xbd8] sm:$0xff]  ;;  %v5120_v15 = vld [vmem:[#allocation3 + $0xbc0] sm:$0xff] }
 0xef5   :  { %5317 = vmatprep.subr.bf16.mxu0 %v5081_v1  ;;  %5399 = vmatprep.subr.bf16.mxu1 %v5083_v29  ;;  %v5122_v1 = vld [vmem:[#allocation3 + $0xbd0] sm:$0xff]  ;;  %v5129_v29 = vld [vmem:[#allocation3 + $0xc08] sm:$0xff] }
 0xef8   :  { %5318 = vmatpush1.bf16.msra.mxu0 %v5080_v57  ;;  %5400 = vmatpush1.bf16.msra.mxu1 %v5082_v9  ;;  %v5131_v57 = vld [vmem:[#allocation3 + $0xc18] sm:$0xff]  ;;  %v5128_v9 = vld [vmem:[#allocation3 + $0xc00] sm:$0xff] }
 0xef9   :  { %5319 = vmatprep.subr.bf16.mxu0 %v5089_v42  ;;  %5401 = vmatprep.subr.bf16.mxu1 %v5091_v44  ;;  %v5130_v42 = vld [vmem:[#allocation3 + $0xc10] sm:$0xff]  ;;  %v5137_v44 = vld [vmem:[#allocation3 + $0xc48] sm:$0xff] }
 0xefc   :  { %5320 = vmatpush1.bf16.msra.mxu0 %v5088_v63  ;;  %5402 = vmatpush1.bf16.msra.mxu1 %v5090_v58  ;;  %v5139_v63 = vld [vmem:[#allocation3 + $0xc58] sm:$0xff]  ;;  %v5136_v58 = vld [vmem:[#allocation3 + $0xc40] sm:$0xff] }
 0xefd   :  { %5321 = vmatprep.subr.bf16.mxu0 %v5097_v23  ;;  %5403 = vmatprep.subr.bf16.mxu1 %v5099_v62  ;;  %v5138_v23 = vld [vmem:[#allocation3 + $0xc50] sm:$0xff]  ;;  %v5145_v62 = vld [vmem:[#allocation3 + $0xc88] sm:$0xff] }
 0xf00   :  { %5322 = vmatpush1.bf16.msra.mxu0 %v5096_v24  ;;  %5404 = vmatpush1.bf16.msra.mxu1 %v5098_v10  ;;  %v5147_v24 = vld [vmem:[#allocation3 + $0xc98] sm:$0xff]  ;;  %v5144_v10 = vld [vmem:[#allocation3 + $0xc80] sm:$0xff] }
 0xf01   :  { %5323 = vmatprep.subr.bf16.mxu0 %v5105_v6  ;;  %5405 = vmatprep.subr.bf16.mxu1 %v5107_v48  ;;  %v5146_v6 = vld [vmem:[#allocation3 + $0xc90] sm:$0xff]  ;;  %v5153_v48 = vld [vmem:[#allocation3 + $0xcc8] sm:$0xff] }
 0xf04   :  { %5324 = vmatpush1.bf16.msra.mxu0 %v5104_v16  ;;  %5406 = vmatpush1.bf16.msra.mxu1 %v5106_v52  ;;  %v5155_v16 = vld [vmem:[#allocation3 + $0xcd8] sm:$0xff]  ;;  %v5152_v52 = vld [vmem:[#allocation3 + $0xcc0] sm:$0xff] }
 0xf05   :  { %5325 = vmatprep.subr.bf16.mxu0 %v5113_v14  ;;  %5407 = vmatprep.subr.bf16.mxu1 %v5115_v47  ;;  %v5154_v14 = vld [vmem:[#allocation3 + $0xcd0] sm:$0xff]  ;;  %v5161_v47 = vld [vmem:[#allocation3 + $0xd08] sm:$0xff] }
 0xf08   :  { %5326 = vmatpush1.bf16.msra.mxu0 %v5112_v49  ;;  %5408 = vmatpush1.bf16.msra.mxu1 %v5114_v45  ;;  %v5163_v49 = vld [vmem:[#allocation3 + $0xd18] sm:$0xff]  ;;  %v5160_v45 = vld [vmem:[#allocation3 + $0xd00] sm:$0xff] }
 0xf09   :  { %5327 = vmatprep.subr.bf16.mxu0 %v5121_v61  ;;  %5409 = vmatprep.subr.bf16.mxu1 %v5123_v20  ;;  %v5162_v61 = vld [vmem:[#allocation3 + $0xd10] sm:$0xff]  ;;  %v5169_v20 = vld [vmem:[#allocation3 + $0xd48] sm:$0xff] }
 0xf0c   :  { %5328 = vmatpush1.bf16.msra.mxu0 %v5120_v15  ;;  %5410 = vmatpush1.bf16.msra.mxu1 %v5122_v1  ;;  %v5171_v15 = vld [vmem:[#allocation3 + $0xd58] sm:$0xff]  ;;  %v5168_v1 = vld [vmem:[#allocation3 + $0xd40] sm:$0xff] }
 0xf0d   :  { %5338 = vmatprep.subr.bf16.mxu0 %v5129_v29  ;;  %5420 = vmatprep.subr.bf16.mxu1 %v5131_v57  ;;  %v5170_v29 = vld [vmem:[#allocation3 + $0xd50] sm:$0xff]  ;;  %v5177_v57 = vld [vmem:[#allocation3 + $0xd88] sm:$0xff] }
 0xf0f   :  { %5330 = vmatmul.mubr.bf16.vlgmr.msra.gmra.mrb[100].mxu0 %v8525_v59  ;;  %5412 = vmatmul.mubr.bf16.vlgmr.msra.gmra.mrb[100].mxu1 %v8525_v59 }
 0xf10   :  { %5339 = vmatpush1.bf16.msra.mxu0 %v5128_v9  ;;  %5421 = vmatpush1.bf16.msra.mxu1 %v5130_v42  ;;  %v5179_v9 = vld [vmem:[#allocation3 + $0xd98] sm:$0xff]  ;;  %v5176_v42 = vld [vmem:[#allocation3 + $0xd80] sm:$0xff] }
 0xf11   :  { %5340 = vmatprep.subr.bf16.mxu0 %v5137_v44  ;;  %5422 = vmatprep.subr.bf16.mxu1 %v5139_v63  ;;  %v5178_v44 = vld [vmem:[#allocation3 + $0xd90] sm:$0xff]  ;;  %v5185_v63 = vld [vmem:[#allocation3 + $0xdc8] sm:$0xff] }
 0xf12   :  { %5370 = vmatprep.mubr.bf16.mxu0 %v8531_v18  ;;  %5452 = vmatprep.mubr.bf16.mxu1 %v8531_v18 }
 0xf14   :  { %5341 = vmatpush1.bf16.msra.mxu0 %v5136_v58  ;;  %5423 = vmatpush1.bf16.msra.mxu1 %v5138_v23  ;;  %v5187_v58 = vld [vmem:[#allocation3 + $0xdd8] sm:$0xff]  ;;  %v5184_v23 = vld [vmem:[#allocation3 + $0xdc0] sm:$0xff] }
 0xf15   :  { %5342 = vmatprep.subr.bf16.mxu0 %v5145_v62  ;;  %5424 = vmatprep.subr.bf16.mxu1 %v5147_v24  ;;  %v5186_v62 = vld [vmem:[#allocation3 + $0xdd0] sm:$0xff]  ;;  %v5193_v24 = vld [vmem:[#allocation3 + $0xe08] sm:$0xff] }
 0xf18   :  { %5343 = vmatpush1.bf16.msra.mxu0 %v5144_v10  ;;  %5425 = vmatpush1.bf16.msra.mxu1 %v5146_v6  ;;  %v5195_v10 = vld [vmem:[#allocation3 + $0xe18] sm:$0xff]  ;;  %v5192_v6 = vld [vmem:[#allocation3 + $0xe00] sm:$0xff] }
 0xf19   :  { %5344 = vmatprep.subr.bf16.mxu0 %v5153_v48  ;;  %5426 = vmatprep.subr.bf16.mxu1 %v5155_v16  ;;  %v5194_v48 = vld [vmem:[#allocation3 + $0xe10] sm:$0xff]  ;;  %v5201_v16 = vld [vmem:[#allocation3 + $0xe48] sm:$0xff] }
 0xf1c   :  { %5345 = vmatpush1.bf16.msra.mxu0 %v5152_v52  ;;  %5427 = vmatpush1.bf16.msra.mxu1 %v5154_v14  ;;  %v5203_v52 = vld [vmem:[#allocation3 + $0xe58] sm:$0xff]  ;;  %v5200_v14 = vld [vmem:[#allocation3 + $0xe40] sm:$0xff] }
 0xf1d   :  { %5346 = vmatprep.subr.bf16.mxu0 %v5161_v47  ;;  %5428 = vmatprep.subr.bf16.mxu1 %v5163_v49  ;;  %v5202_v47 = vld [vmem:[#allocation3 + $0xe50] sm:$0xff]  ;;  %v5209_v49 = vld [vmem:[#allocation3 + $0xe88] sm:$0xff] }
 0xf20   :  { %5347 = vmatpush1.bf16.msra.mxu0 %v5160_v45  ;;  %5429 = vmatpush1.bf16.msra.mxu1 %v5162_v61  ;;  %v5211_v45 = vld [vmem:[#allocation3 + $0xe98] sm:$0xff]  ;;  %v5208_v61 = vld [vmem:[#allocation3 + $0xe80] sm:$0xff] }
 0xf21   :  { %5348 = vmatprep.subr.bf16.mxu0 %v5169_v20  ;;  %5430 = vmatprep.subr.bf16.mxu1 %v5171_v15  ;;  %v5210_v20 = vld [vmem:[#allocation3 + $0xe90] sm:$0xff]  ;;  %v5217_v15 = vld [vmem:[#allocation3 + $0xec8] sm:$0xff] }
 0xf24   :  { %5349 = vmatpush1.bf16.msra.mxu0 %v5168_v1  ;;  %5431 = vmatpush1.bf16.msra.mxu1 %v5170_v29  ;;  %v5219_v1 = vld [vmem:[#allocation3 + $0xed8] sm:$0xff]  ;;  %v5216_v29 = vld [vmem:[#allocation3 + $0xec0] sm:$0xff] }
 0xf25   :  { %5350 = vmatprep.subr.bf16.mxu0 %v5177_v57  ;;  %5432 = vmatprep.subr.bf16.mxu1 %v5179_v9  ;;  %v5218_v57 = vld [vmem:[#allocation3 + $0xed0] sm:$0xff]  ;;  %v5225_v9 = vld [vmem:[#allocation3 + $0xf08] sm:$0xff] }
 0xf28   :  { %5351 = vmatpush1.bf16.msra.mxu0 %v5176_v42  ;;  %5433 = vmatpush1.bf16.msra.mxu1 %v5178_v44  ;;  %v5227_v42 = vld [vmem:[#allocation3 + $0xf18] sm:$0xff]  ;;  %v5224_v44 = vld [vmem:[#allocation3 + $0xf00] sm:$0xff] }
 0xf29   :  { %5352 = vmatprep.subr.bf16.mxu0 %v5185_v63  ;;  %5434 = vmatprep.subr.bf16.mxu1 %v5187_v58  ;;  %v5226_v63 = vld [vmem:[#allocation3 + $0xf10] sm:$0xff]  ;;  %v5233_v58 = vld [vmem:[#allocation3 + $0xf48] sm:$0xff] }
 0xf2c   :  { %5353 = vmatpush1.bf16.msra.mxu0 %v5184_v23  ;;  %5435 = vmatpush1.bf16.msra.mxu1 %v5186_v62  ;;  %v5235_v23 = vld [vmem:[#allocation3 + $0xf58] sm:$0xff]  ;;  %v5232_v62 = vld [vmem:[#allocation3 + $0xf40] sm:$0xff] }
 0xf2d   :  { %5354 = vmatprep.subr.bf16.mxu0 %v5193_v24  ;;  %5436 = vmatprep.subr.bf16.mxu1 %v5195_v10  ;;  %v5234_v24 = vld [vmem:[#allocation3 + $0xf50] sm:$0xff]  ;;  %v5241_v10 = vld [vmem:[#allocation3 + $0xf88] sm:$0xff] }
 0xf30   :  { %5355 = vmatpush1.bf16.msra.mxu0 %v5192_v6  ;;  %5437 = vmatpush1.bf16.msra.mxu1 %v5194_v48  ;;  %v5243_v6 = vld [vmem:[#allocation3 + $0xf98] sm:$0xff]  ;;  %v5240_v48 = vld [vmem:[#allocation3 + $0xf80] sm:$0xff] }
 0xf31   :  { %5356 = vmatprep.subr.bf16.mxu0 %v5201_v16  ;;  %5438 = vmatprep.subr.bf16.mxu1 %v5203_v52  ;;  %v5242_v16 = vld [vmem:[#allocation3 + $0xf90] sm:$0xff]  ;;  %v5249_v52 = vld [vmem:[#allocation3 + $0xfc8] sm:$0xff] }
 0xf34   :  { %5357 = vmatpush1.bf16.msra.mxu0 %v5200_v14  ;;  %5439 = vmatpush1.bf16.msra.mxu1 %v5202_v47  ;;  %v5251_v14 = vld [vmem:[#allocation3 + $0xfd8] sm:$0xff]  ;;  %v5248_v47 = vld [vmem:[#allocation3 + $0xfc0] sm:$0xff] }
 0xf35   :  { %5358 = vmatprep.subr.bf16.mxu0 %v5209_v49  ;;  %5440 = vmatprep.subr.bf16.mxu1 %v5211_v45  ;;  %v5250_v49 = vld [vmem:[#allocation3 + $0xfd0] sm:$0xff]  ;;  %v5005_v45 = vld [vmem:[#allocation3 + $0x828] sm:$0xff] }
 0xf38   :  { %5359 = vmatpush1.bf16.msra.mxu0 %v5208_v61  ;;  %5441 = vmatpush1.bf16.msra.mxu1 %v5210_v20  ;;  %v5007_v61 = vld [vmem:[#allocation3 + $0x838] sm:$0xff]  ;;  %v5004_v20 = vld [vmem:[#allocation3 + $0x820] sm:$0xff] }
 0xf39   :  { %5360 = vmatprep.subr.bf16.mxu0 %v5217_v15  ;;  %5442 = vmatprep.subr.bf16.mxu1 %v5219_v1  ;;  %v5006_v15 = vld [vmem:[#allocation3 + $0x830] sm:$0xff]  ;;  %v5013_v1 = vld [vmem:[#allocation3 + $0x868] sm:$0xff] }
 0xf3c   :  { %5361 = vmatpush1.bf16.msra.mxu0 %v5216_v29  ;;  %5443 = vmatpush1.bf16.msra.mxu1 %v5218_v57  ;;  %v5015_v29 = vld [vmem:[#allocation3 + $0x878] sm:$0xff]  ;;  %v5012_v57 = vld [vmem:[#allocation3 + $0x860] sm:$0xff] }
 0xf3d   :  { %5362 = vmatprep.subr.bf16.mxu0 %v5225_v9  ;;  %5444 = vmatprep.subr.bf16.mxu1 %v5227_v42  ;;  %v5014_v9 = vld [vmem:[#allocation3 + $0x870] sm:$0xff]  ;;  %v5021_v42 = vld [vmem:[#allocation3 + $0x8a8] sm:$0xff] }
 0xf40   :  { %5363 = vmatpush1.bf16.msra.mxu0 %v5224_v44  ;;  %5445 = vmatpush1.bf16.msra.mxu1 %v5226_v63  ;;  %v5023_v44 = vld [vmem:[#allocation3 + $0x8b8] sm:$0xff]  ;;  %v5020_v63 = vld [vmem:[#allocation3 + $0x8a0] sm:$0xff] }
 0xf41   :  { %5364 = vmatprep.subr.bf16.mxu0 %v5233_v58  ;;  %5446 = vmatprep.subr.bf16.mxu1 %v5235_v23  ;;  %v5022_v58 = vld [vmem:[#allocation3 + $0x8b0] sm:$0xff]  ;;  %v5029_v23 = vld [vmem:[#allocation3 + $0x8e8] sm:$0xff] }
 0xf44   :  { %5365 = vmatpush1.bf16.msra.mxu0 %v5232_v62  ;;  %5447 = vmatpush1.bf16.msra.mxu1 %v5234_v24  ;;  %v5031_v62 = vld [vmem:[#allocation3 + $0x8f8] sm:$0xff]  ;;  %v5028_v24 = vld [vmem:[#allocation3 + $0x8e0] sm:$0xff] }
 0xf45   :  { %5366 = vmatprep.subr.bf16.mxu0 %v5241_v10  ;;  %5448 = vmatprep.subr.bf16.mxu1 %v5243_v6  ;;  %v5030_v10 = vld [vmem:[#allocation3 + $0x8f0] sm:$0xff]  ;;  %v5037_v6 = vld [vmem:[#allocation3 + $0x928] sm:$0xff] }
 0xf48   :  { %5367 = vmatpush1.bf16.msra.mxu0 %v5240_v48  ;;  %5449 = vmatpush1.bf16.msra.mxu1 %v5242_v16  ;;  %v5039_v48 = vld [vmem:[#allocation3 + $0x938] sm:$0xff]  ;;  %v5038_v16 = vld [vmem:[#allocation3 + $0x930] sm:$0xff] }
 0xf49   :  { %5368 = vmatprep.subr.bf16.mxu0 %v5249_v52  ;;  %5450 = vmatprep.subr.bf16.mxu1 %v5251_v14  ;;  %v5045_v52 = vld [vmem:[#allocation3 + $0x968] sm:$0xff]  ;;  %v5047_v14 = vld [vmem:[#allocation3 + $0x978] sm:$0xff] }
 0xf4c   :  { %5369 = vmatpush1.bf16.msra.mxu0 %v5248_v47  ;;  %5451 = vmatpush1.bf16.msra.mxu1 %v5250_v49  ;;  %v5044_v47 = vld [vmem:[#allocation3 + $0x960] sm:$0xff]  ;;  %v5046_v49 = vld [vmem:[#allocation3 + $0x970] sm:$0xff] }
 0xf4d   :  { %5461 = vmatprep.subr.bf16.mxu0 %v5005_v45  ;;  %5543 = vmatprep.subr.bf16.mxu1 %v5007_v61  ;;  %v5053_v45 = vld [vmem:[#allocation3 + $0x9a8] sm:$0xff]  ;;  %v5055_v61 = vld [vmem:[#allocation3 + $0x9b8] sm:$0xff] }
 0xf4f   :  { %5371 = vmatmul.mubr.bf16.vlgmr.msra.gmra.mrb[100].mxu0 %v8527_v43  ;;  %5453 = vmatmul.mubr.bf16.vlgmr.msra.gmra.mrb[100].mxu1 %v8527_v43 }
 0xf50   :  { %5462 = vmatpush1.bf16.msra.mxu0 %v5004_v20  ;;  %5544 = vmatpush1.bf16.msra.mxu1 %v5006_v15  ;;  %v5052_v20 = vld [vmem:[#allocation3 + $0x9a0] sm:$0xff]  ;;  %v5054_v15 = vld [vmem:[#allocation3 + $0x9b0] sm:$0xff] }
 0xf51   :  { %5463 = vmatprep.subr.bf16.mxu0 %v5013_v1  ;;  %5545 = vmatprep.subr.bf16.mxu1 %v5015_v29  ;;  %v5061_v1 = vld [vmem:[#allocation3 + $0x9e8] sm:$0xff]  ;;  %v5063_v29 = vld [vmem:[#allocation3 + $0x9f8] sm:$0xff] }
 0xf52   :  { %5493 = vmatprep.mubr.bf16.mxu0 %v8529_v51  ;;  %5575 = vmatprep.mubr.bf16.mxu1 %v8529_v51  ;;  %v5036_v51 = vld [vmem:[#allocation3 + $0x920] sm:$0xff] }
 0xf54   :  { %5464 = vmatpush1.bf16.msra.mxu0 %v5012_v57  ;;  %5546 = vmatpush1.bf16.msra.mxu1 %v5014_v9  ;;  %v5060_v57 = vld [vmem:[#allocation3 + $0x9e0] sm:$0xff]  ;;  %v5062_v9 = vld [vmem:[#allocation3 + $0x9f0] sm:$0xff] }
 0xf55   :  { %5465 = vmatprep.subr.bf16.mxu0 %v5021_v42  ;;  %5547 = vmatprep.subr.bf16.mxu1 %v5023_v44  ;;  %v5069_v42 = vld [vmem:[#allocation3 + $0xa28] sm:$0xff]  ;;  %v5071_v44 = vld [vmem:[#allocation3 + $0xa38] sm:$0xff] }
 0xf58   :  { %5466 = vmatpush1.bf16.msra.mxu0 %v5020_v63  ;;  %5548 = vmatpush1.bf16.msra.mxu1 %v5022_v58  ;;  %v5068_v63 = vld [vmem:[#allocation3 + $0xa20] sm:$0xff]  ;;  %v5070_v58 = vld [vmem:[#allocation3 + $0xa30] sm:$0xff] }
 0xf59   :  { %5467 = vmatprep.subr.bf16.mxu0 %v5029_v23  ;;  %5549 = vmatprep.subr.bf16.mxu1 %v5031_v62  ;;  %v5077_v23 = vld [vmem:[#allocation3 + $0xa68] sm:$0xff]  ;;  %v5079_v62 = vld [vmem:[#allocation3 + $0xa78] sm:$0xff] }
 0xf5c   :  { %5468 = vmatpush1.bf16.msra.mxu0 %v5028_v24  ;;  %5550 = vmatpush1.bf16.msra.mxu1 %v5030_v10  ;;  %v5076_v24 = vld [vmem:[#allocation3 + $0xa60] sm:$0xff]  ;;  %v5078_v10 = vld [vmem:[#allocation3 + $0xa70] sm:$0xff] }
 0xf5d   :  { %5469 = vmatprep.subr.bf16.mxu0 %v5037_v6  ;;  %5551 = vmatprep.subr.bf16.mxu1 %v5039_v48  ;;  %v5085_v6 = vld [vmem:[#allocation3 + $0xaa8] sm:$0xff]  ;;  %v5087_v48 = vld [vmem:[#allocation3 + $0xab8] sm:$0xff] }
 0xf60   :  { %5470 = vmatpush1.bf16.msra.mxu0 %v5036_v51  ;;  %5552 = vmatpush1.bf16.msra.mxu1 %v5038_v16  ;;  %v5084_v51 = vld [vmem:[#allocation3 + $0xaa0] sm:$0xff]  ;;  %v5086_v16 = vld [vmem:[#allocation3 + $0xab0] sm:$0xff] }
 0xf61   :  { %5471 = vmatprep.subr.bf16.mxu0 %v5045_v52  ;;  %5553 = vmatprep.subr.bf16.mxu1 %v5047_v14  ;;  %v5093_v52 = vld [vmem:[#allocation3 + $0xae8] sm:$0xff]  ;;  %v5095_v14 = vld [vmem:[#allocation3 + $0xaf8] sm:$0xff] }
 0xf64   :  { %5472 = vmatpush1.bf16.msra.mxu0 %v5044_v47  ;;  %5554 = vmatpush1.bf16.msra.mxu1 %v5046_v49  ;;  %v5092_v47 = vld [vmem:[#allocation3 + $0xae0] sm:$0xff]  ;;  %v5094_v49 = vld [vmem:[#allocation3 + $0xaf0] sm:$0xff] }
 0xf65   :  { %5473 = vmatprep.subr.bf16.mxu0 %v5053_v45  ;;  %5555 = vmatprep.subr.bf16.mxu1 %v5055_v61  ;;  %v5101_v45 = vld [vmem:[#allocation3 + $0xb28] sm:$0xff]  ;;  %v5103_v61 = vld [vmem:[#allocation3 + $0xb38] sm:$0xff] }
 0xf68   :  { %5474 = vmatpush1.bf16.msra.mxu0 %v5052_v20  ;;  %5556 = vmatpush1.bf16.msra.mxu1 %v5054_v15  ;;  %v5100_v20 = vld [vmem:[#allocation3 + $0xb20] sm:$0xff]  ;;  %v5102_v15 = vld [vmem:[#allocation3 + $0xb30] sm:$0xff] }
 0xf69   :  { %5475 = vmatprep.subr.bf16.mxu0 %v5061_v1  ;;  %5557 = vmatprep.subr.bf16.mxu1 %v5063_v29  ;;  %v5109_v1 = vld [vmem:[#allocation3 + $0xb68] sm:$0xff]  ;;  %v5111_v29 = vld [vmem:[#allocation3 + $0xb78] sm:$0xff] }
 0xf6c   :  { %5476 = vmatpush1.bf16.msra.mxu0 %v5060_v57  ;;  %5558 = vmatpush1.bf16.msra.mxu1 %v5062_v9  ;;  %v5108_v57 = vld [vmem:[#allocation3 + $0xb60] sm:$0xff]  ;;  %v5110_v9 = vld [vmem:[#allocation3 + $0xb70] sm:$0xff] }
 0xf6d   :  { %5477 = vmatprep.subr.bf16.mxu0 %v5069_v42  ;;  %5559 = vmatprep.subr.bf16.mxu1 %v5071_v44  ;;  %v5117_v42 = vld [vmem:[#allocation3 + $0xba8] sm:$0xff]  ;;  %v5119_v44 = vld [vmem:[#allocation3 + $0xbb8] sm:$0xff] }
 0xf70   :  { %5478 = vmatpush1.bf16.msra.mxu0 %v5068_v63  ;;  %5560 = vmatpush1.bf16.msra.mxu1 %v5070_v58  ;;  %v5116_v63 = vld [vmem:[#allocation3 + $0xba0] sm:$0xff]  ;;  %v5118_v58 = vld [vmem:[#allocation3 + $0xbb0] sm:$0xff] }
 0xf71   :  { %5479 = vmatprep.subr.bf16.mxu0 %v5077_v23  ;;  %5561 = vmatprep.subr.bf16.mxu1 %v5079_v62  ;;  %v5125_v23 = vld [vmem:[#allocation3 + $0xbe8] sm:$0xff]  ;;  %v5127_v62 = vld [vmem:[#allocation3 + $0xbf8] sm:$0xff] }
 0xf74   :  { %5480 = vmatpush1.bf16.msra.mxu0 %v5076_v24  ;;  %5562 = vmatpush1.bf16.msra.mxu1 %v5078_v10  ;;  %v5124_v24 = vld [vmem:[#allocation3 + $0xbe0] sm:$0xff]  ;;  %v5126_v10 = vld [vmem:[#allocation3 + $0xbf0] sm:$0xff] }
 0xf75   :  { %5481 = vmatprep.subr.bf16.mxu0 %v5085_v6  ;;  %5563 = vmatprep.subr.bf16.mxu1 %v5087_v48  ;;  %v5133_v6 = vld [vmem:[#allocation3 + $0xc28] sm:$0xff]  ;;  %v5135_v48 = vld [vmem:[#allocation3 + $0xc38] sm:$0xff] }
 0xf78   :  { %5482 = vmatpush1.bf16.msra.mxu0 %v5084_v51  ;;  %5564 = vmatpush1.bf16.msra.mxu1 %v5086_v16  ;;  %v5132_v51 = vld [vmem:[#allocation3 + $0xc20] sm:$0xff]  ;;  %v5134_v16 = vld [vmem:[#allocation3 + $0xc30] sm:$0xff] }
 0xf79   :  { %5483 = vmatprep.subr.bf16.mxu0 %v5093_v52  ;;  %5565 = vmatprep.subr.bf16.mxu1 %v5095_v14  ;;  %v5141_v52 = vld [vmem:[#allocation3 + $0xc68] sm:$0xff]  ;;  %v5143_v14 = vld [vmem:[#allocation3 + $0xc78] sm:$0xff] }
 0xf7c   :  { %5484 = vmatpush1.bf16.msra.mxu0 %v5092_v47  ;;  %5566 = vmatpush1.bf16.msra.mxu1 %v5094_v49  ;;  %v5140_v47 = vld [vmem:[#allocation3 + $0xc60] sm:$0xff]  ;;  %v5142_v49 = vld [vmem:[#allocation3 + $0xc70] sm:$0xff] }
 0xf7d   :  { %5485 = vmatprep.subr.bf16.mxu0 %v5101_v45  ;;  %5567 = vmatprep.subr.bf16.mxu1 %v5103_v61  ;;  %v5149_v45 = vld [vmem:[#allocation3 + $0xca8] sm:$0xff]  ;;  %v5151_v61 = vld [vmem:[#allocation3 + $0xcb8] sm:$0xff] }
 0xf80   :  { %5486 = vmatpush1.bf16.msra.mxu0 %v5100_v20  ;;  %5568 = vmatpush1.bf16.msra.mxu1 %v5102_v15  ;;  %v5148_v20 = vld [vmem:[#allocation3 + $0xca0] sm:$0xff]  ;;  %v5150_v15 = vld [vmem:[#allocation3 + $0xcb0] sm:$0xff] }
 0xf81   :  { %5487 = vmatprep.subr.bf16.mxu0 %v5109_v1  ;;  %5569 = vmatprep.subr.bf16.mxu1 %v5111_v29  ;;  %v5157_v1 = vld [vmem:[#allocation3 + $0xce8] sm:$0xff]  ;;  %v5156_v29 = vld [vmem:[#allocation3 + $0xce0] sm:$0xff] }
 0xf84   :  { %5488 = vmatpush1.bf16.msra.mxu0 %v5108_v57  ;;  %5570 = vmatpush1.bf16.msra.mxu1 %v5110_v9  ;;  %v5158_v57 = vld [vmem:[#allocation3 + $0xcf0] sm:$0xff]  ;;  %v5165_v9 = vld [vmem:[#allocation3 + $0xd28] sm:$0xff] }
 0xf85   :  { %5489 = vmatprep.subr.bf16.mxu0 %v5117_v42  ;;  %5571 = vmatprep.subr.bf16.mxu1 %v5119_v44  ;;  %v5167_v42 = vld [vmem:[#allocation3 + $0xd38] sm:$0xff]  ;;  %v5166_v44 = vld [vmem:[#allocation3 + $0xd30] sm:$0xff] }
 0xf88   :  { %5490 = vmatpush1.bf16.msra.mxu0 %v5116_v63  ;;  %5572 = vmatpush1.bf16.msra.mxu1 %v5118_v58  ;;  %v5173_v63 = vld [vmem:[#allocation3 + $0xd68] sm:$0xff]  ;;  %v5175_v58 = vld [vmem:[#allocation3 + $0xd78] sm:$0xff] }
 0xf89   :  { %5491 = vmatprep.subr.bf16.mxu0 %v5125_v23  ;;  %5573 = vmatprep.subr.bf16.mxu1 %v5127_v62  ;;  %v5172_v23 = vld [vmem:[#allocation3 + $0xd60] sm:$0xff]  ;;  %v5174_v62 = vld [vmem:[#allocation3 + $0xd70] sm:$0xff] }
 0xf8c   :  { %5492 = vmatpush1.bf16.msra.mxu0 %v5124_v24  ;;  %5574 = vmatpush1.bf16.msra.mxu1 %v5126_v10  ;;  %v5181_v24 = vld [vmem:[#allocation3 + $0xda8] sm:$0xff]  ;;  %v5183_v10 = vld [vmem:[#allocation3 + $0xdb8] sm:$0xff] }
 0xf8d   :  { %5502 = vmatprep.subr.bf16.mxu0 %v5133_v6  ;;  %5584 = vmatprep.subr.bf16.mxu1 %v5135_v48  ;;  %v5180_v6 = vld [vmem:[#allocation3 + $0xda0] sm:$0xff]  ;;  %v5182_v48 = vld [vmem:[#allocation3 + $0xdb0] sm:$0xff] }
 0xf8f   :  { %5494 = vmatmul.mubr.bf16.vlgmr.msra.gmra.mrb[104].mxu0 %v8525_v59  ;;  %5576 = vmatmul.mubr.bf16.vlgmr.msra.gmra.mrb[104].mxu1 %v8525_v59  ;;  %v5159_v59 = vld [vmem:[#allocation3 + $0xcf8] sm:$0xff] }
 0xf90   :  { %5503 = vmatpush1.bf16.msra.mxu0 %v5132_v51  ;;  %5585 = vmatpush1.bf16.msra.mxu1 %v5134_v16  ;;  %v5189_v51 = vld [vmem:[#allocation3 + $0xde8] sm:$0xff]  ;;  %v5191_v16 = vld [vmem:[#allocation3 + $0xdf8] sm:$0xff] }
 0xf91   :  { %5504 = vmatprep.subr.bf16.mxu0 %v5141_v52  ;;  %5586 = vmatprep.subr.bf16.mxu1 %v5143_v14  ;;  %v5188_v52 = vld [vmem:[#allocation3 + $0xde0] sm:$0xff]  ;;  %v5190_v14 = vld [vmem:[#allocation3 + $0xdf0] sm:$0xff] }
 0xf92   :  { %5534 = vmatprep.mubr.bf16.mxu0 %v8531_v18  ;;  %5616 = vmatprep.mubr.bf16.mxu1 %v8531_v18  ;;  %v5164_v18 = vld [vmem:[#allocation3 + $0xd20] sm:$0xff] }
 0xf94   :  { %5505 = vmatpush1.bf16.msra.mxu0 %v5140_v47  ;;  %5587 = vmatpush1.bf16.msra.mxu1 %v5142_v49  ;;  %v5197_v47 = vld [vmem:[#allocation3 + $0xe28] sm:$0xff]  ;;  %v5199_v49 = vld [vmem:[#allocation3 + $0xe38] sm:$0xff] }
 0xf95   :  { %5506 = vmatprep.subr.bf16.mxu0 %v5149_v45  ;;  %5588 = vmatprep.subr.bf16.mxu1 %v5151_v61  ;;  %v5196_v45 = vld [vmem:[#allocation3 + $0xe20] sm:$0xff]  ;;  %v5198_v61 = vld [vmem:[#allocation3 + $0xe30] sm:$0xff] }
 0xf98   :  { %5507 = vmatpush1.bf16.msra.mxu0 %v5148_v20  ;;  %5589 = vmatpush1.bf16.msra.mxu1 %v5150_v15  ;;  %v5205_v20 = vld [vmem:[#allocation3 + $0xe68] sm:$0xff]  ;;  %v5207_v15 = vld [vmem:[#allocation3 + $0xe78] sm:$0xff] }
 0xf99   :  { %5508 = vmatprep.subr.bf16.mxu0 %v5157_v1  ;;  %5590 = vmatprep.subr.bf16.mxu1 %v5159_v59  ;;  %v5204_v1 = vld [vmem:[#allocation3 + $0xe60] sm:$0xff]  ;;  %v5206_v59 = vld [vmem:[#allocation3 + $0xe70] sm:$0xff] }
 0xf9c   :  { %5509 = vmatpush1.bf16.msra.mxu0 %v5156_v29  ;;  %5591 = vmatpush1.bf16.msra.mxu1 %v5158_v57  ;;  %v5213_v29 = vld [vmem:[#allocation3 + $0xea8] sm:$0xff]  ;;  %v5215_v57 = vld [vmem:[#allocation3 + $0xeb8] sm:$0xff] }
 0xf9d   :  { %5510 = vmatprep.subr.bf16.mxu0 %v5165_v9  ;;  %5592 = vmatprep.subr.bf16.mxu1 %v5167_v42  ;;  %v5212_v9 = vld [vmem:[#allocation3 + $0xea0] sm:$0xff]  ;;  %v5214_v42 = vld [vmem:[#allocation3 + $0xeb0] sm:$0xff] }
 0xfa0   :  { %5511 = vmatpush1.bf16.msra.mxu0 %v5164_v18  ;;  %5593 = vmatpush1.bf16.msra.mxu1 %v5166_v44  ;;  %v5221_v18 = vld [vmem:[#allocation3 + $0xee8] sm:$0xff]  ;;  %v5223_v44 = vld [vmem:[#allocation3 + $0xef8] sm:$0xff] }
 0xfa1   :  { %5512 = vmatprep.subr.bf16.mxu0 %v5173_v63  ;;  %5594 = vmatprep.subr.bf16.mxu1 %v5175_v58  ;;  %v5220_v63 = vld [vmem:[#allocation3 + $0xee0] sm:$0xff]  ;;  %v5222_v58 = vld [vmem:[#allocation3 + $0xef0] sm:$0xff] }
 0xfa4   :  { %5513 = vmatpush1.bf16.msra.mxu0 %v5172_v23  ;;  %5595 = vmatpush1.bf16.msra.mxu1 %v5174_v62  ;;  %v5229_v23 = vld [vmem:[#allocation3 + $0xf28] sm:$0xff]  ;;  %v5231_v62 = vld [vmem:[#allocation3 + $0xf38] sm:$0xff] }
 0xfa5   :  { %5514 = vmatprep.subr.bf16.mxu0 %v5181_v24  ;;  %5596 = vmatprep.subr.bf16.mxu1 %v5183_v10  ;;  %v5228_v24 = vld [vmem:[#allocation3 + $0xf20] sm:$0xff]  ;;  %v5230_v10 = vld [vmem:[#allocation3 + $0xf30] sm:$0xff] }
 0xfa8   :  { %5515 = vmatpush1.bf16.msra.mxu0 %v5180_v6  ;;  %5597 = vmatpush1.bf16.msra.mxu1 %v5182_v48  ;;  %v5237_v6 = vld [vmem:[#allocation3 + $0xf68] sm:$0xff]  ;;  %v5239_v48 = vld [vmem:[#allocation3 + $0xf78] sm:$0xff] }
 0xfa9   :  { %5516 = vmatprep.subr.bf16.mxu0 %v5189_v51  ;;  %5598 = vmatprep.subr.bf16.mxu1 %v5191_v16  ;;  %v5236_v51 = vld [vmem:[#allocation3 + $0xf60] sm:$0xff]  ;;  %v5238_v16 = vld [vmem:[#allocation3 + $0xf70] sm:$0xff] }
 0xfac   :  { %5517 = vmatpush1.bf16.msra.mxu0 %v5188_v52  ;;  %5599 = vmatpush1.bf16.msra.mxu1 %v5190_v14  ;;  %v5245_v52 = vld [vmem:[#allocation3 + $0xfa8] sm:$0xff]  ;;  %v5247_v14 = vld [vmem:[#allocation3 + $0xfb8] sm:$0xff] }
 0xfad   :  { %5518 = vmatprep.subr.bf16.mxu0 %v5197_v47  ;;  %5600 = vmatprep.subr.bf16.mxu1 %v5199_v49  ;;  %v5244_v47 = vld [vmem:[#allocation3 + $0xfa0] sm:$0xff]  ;;  %v5246_v49 = vld [vmem:[#allocation3 + $0xfb0] sm:$0xff] }
 0xfb0   :  { %5519 = vmatpush1.bf16.msra.mxu0 %v5196_v45  ;;  %5601 = vmatpush1.bf16.msra.mxu1 %v5198_v61  ;;  %v5253_v45 = vld [vmem:[#allocation3 + $0xfe8] sm:$0xff]  ;;  %v5255_v61 = vld [vmem:[#allocation3 + $0xff8] sm:$0xff] }
 0xfb1   :  { %5520 = vmatprep.subr.bf16.mxu0 %v5205_v20  ;;  %5602 = vmatprep.subr.bf16.mxu1 %v5207_v15  ;;  %v5252_v20 = vld [vmem:[#allocation3 + $0xfe0] sm:$0xff]  ;;  %v5254_v15 = vld [vmem:[#allocation3 + $0xff0] sm:$0xff] }
 0xfb4   :  { %5521 = vmatpush1.bf16.msra.mxu0 %v5204_v1  ;;  %5603 = vmatpush1.bf16.msra.mxu1 %v5206_v59  ;;  %v9248_v1 = vld [vmem:[#allocation40_spill] sm:$0xff] }
 0xfb5   :  { %5522 = vmatprep.subr.bf16.mxu0 %v5213_v29  ;;  %5604 = vmatprep.subr.bf16.mxu1 %v5215_v57  ;;  %v9249_v59 = vld [vmem:[#allocation44_spill] sm:$0xff]  ;;  %v9250_v57 = vld [vmem:[#allocation41_spill] sm:$0xff] }
 0xfb6   :  { %v5260_v29 = vrot.slane %v9249_v59, %v9248_v1 }
 0xfb8   :  { %5523 = vmatpush1.bf16.msra.mxu0 %v5212_v9  ;;  %5605 = vmatpush1.bf16.msra.mxu1 %v5214_v42  ;;  %v5268_v9 = vrot.slane %v9249_v59, %v9250_v57  ;;  %v9251_v42 = vld [vmem:[#allocation82_spill] sm:$0xff] }
 0xfb9   :  { %5524 = vmatprep.subr.bf16.mxu0 %v5221_v18  ;;  %5606 = vmatprep.subr.bf16.mxu1 %v5223_v44  ;;  %v5264_v18 = vrot.slane %v9249_v59, %v9251_v42  ;;  %v9252_v44 = vld [vmem:[#allocation83_spill] sm:$0xff] }
 0xfbc   :  { %5525 = vmatpush1.bf16.msra.mxu0 %v5220_v63  ;;  %5607 = vmatpush1.bf16.msra.mxu1 %v5222_v58  ;;  %v5272_v63 = vrot.slane %v9249_v59, %v9252_v44 }
 0xfbd   :  { %5526 = vmatprep.subr.bf16.mxu0 %v5229_v23  ;;  %5608 = vmatprep.subr.bf16.mxu1 %v5231_v62 }
 0xfc0   :  { %5527 = vmatpush1.bf16.msra.mxu0 %v5228_v24  ;;  %5609 = vmatpush1.bf16.msra.mxu1 %v5230_v10 }
 0xfc1   :  { %5528 = vmatprep.subr.bf16.mxu0 %v5237_v6  ;;  %5610 = vmatprep.subr.bf16.mxu1 %v5239_v48 }
 0xfc4   :  { %5529 = vmatpush1.bf16.msra.mxu0 %v5236_v51  ;;  %5611 = vmatpush1.bf16.msra.mxu1 %v5238_v16 }
 0xfc5   :  { %5530 = vmatprep.subr.bf16.mxu0 %v5245_v52  ;;  %5612 = vmatprep.subr.bf16.mxu1 %v5247_v14 }
 0xfc8   :  { %5531 = vmatpush1.bf16.msra.mxu0 %v5244_v47  ;;  %5613 = vmatpush1.bf16.msra.mxu1 %v5246_v49 }
 0xfc9   :  { %5532 = vmatprep.subr.bf16.mxu0 %v5253_v45  ;;  %5614 = vmatprep.subr.bf16.mxu1 %v5255_v61 }
 0xfcc   :  { %5533 = vmatpush1.bf16.msra.mxu0 %v5252_v20  ;;  %5615 = vmatpush1.bf16.msra.mxu1 %v5254_v15 }
 0xfcf   :  { %5535 = vmatmul.mubr.bf16.vlgmr.msra.gmra.mrb[104].mxu0 %v8527_v43  ;;  %5617 = vmatmul.mubr.bf16.vlgmr.msra.gmra.mrb[104].mxu1 %v8527_v43 }
 0xfd0   :  { %5697 = vmatprep.mubr.bf16.mxu0 %v9146_v50  ;;  %5750 = vmatprep.mubr.bf16.mxu1 %v9146_v50 }
0x1022   :  { %v5372_v58 = vpop.f32.mrb[100].mxu0  ;;  %v5454_v23 = vpop.f32.mrb[100].mxu1 }
0x1023   :  { %v6903_v62 = vadd.f32 %v5372_v58, %v5260_v29  ;;  %v6905_v43 = vadd.f32 %v5454_v23, %v5268_v9  ;;  %v5374_v24 = vpop.f32.mrb[101].mxu0  ;;  %v5456_v10 = vpop.f32.mrb[101].mxu1  ;;  %v9253_v58 = vld [vmem:[#allocation42_spill] sm:$0xff]  ;;  %v9254_v23 = vld [vmem:[#allocation43_spill] sm:$0xff] }
0x1024   :  { %v6904_v6 = vadd.f32 %v5374_v24, %v5264_v18  ;;  %v6906_v48 = vadd.f32 %v5456_v10, %v5272_v63  ;;  %v5376_v51 = vpop.f32.mrb[102].mxu0  ;;  %v5458_v16 = vpop.f32.mrb[102].mxu1  ;;  %v9257_v24 = vld [vmem:[#allocation68_spill] sm:$0xff]  ;;  %v9258_v10 = vld [vmem:[#allocation67_spill] sm:$0xff] }
0x1025   :  { %vm5625_vm15 = vcmp.gt.f32.partialorder %v6903_v62, 0.0  ;;  %v5633_v52 = vmul.f32 0.2, %v6903_v62  ;;  %vm5627_vm0 = vcmp.gt.f32.partialorder %v6905_v43, 0.0  ;;  %v5635_v14 = vmul.f32 0.2, %v6905_v43 }
0x1026   :  { %vm5626_vm4 = vcmp.gt.f32.partialorder %v6904_v6, 0.0  ;;  %v5634_v47 = vmul.f32 0.2, %v6904_v6  ;;  %vm5628_vm13 = vcmp.gt.f32.partialorder %v6906_v48, 0.0  ;;  %v5636_v49 = vmul.f32 0.2, %v6906_v48 }
0x1027   :  { %v5377_v45 = vpop.f32.mrb[103].mxu0  ;;  %v5459_v61 = vpop.f32.mrb[103].mxu1  ;;  %v5641_v20 = vsel %vm5625_vm15, %v6903_v62, %v5633_v52  ;;  %v5643_v15 = vsel %vm5627_vm0, %v6905_v43, %v5635_v14  ;;  %v9255_v62 = vld [vmem:[#allocation46_spill] sm:$0xff]  ;;  %v9256_v43 = vld [vmem:[#allocation45_spill] sm:$0xff] }
0x1028   :  { %v5642_v1 = vsel %vm5626_vm4, %v6904_v6, %v5634_v47  ;;  %v5644_v29 = vsel %vm5628_vm13, %v6906_v48, %v5636_v49  ;;  %v5649_v57 = vpack.c.bf16 %v5641_v20, %v5641_v20  ;;  %v5651_v9 = vpack.c.bf16 %v5643_v15, %v5643_v15  ;;  %v9259_v6 = vld [vmem:[#allocation54_spill] sm:$0xff]  ;;  %v9260_v48 = vld [vmem:[#allocation39_spill] sm:$0xff] }
0x1029   :  { %v5650_v42 = vpack.c.bf16 %v5642_v1, %v5642_v1  ;;  %v5652_v18 = vpack.c.bf16 %v5644_v29, %v5644_v29  ;;  %v9261_v51 = vsub.s32 5, %v9260_v48  ;;  %v9262_v52 = vsub.s32 7, %v9260_v48 }
0x102a   :  { %v5654_v44 = vsel %vm4307_vm1, %v5649_v57, 0  ;;  %v5660_v63 = vsel %vm4307_vm1, %v5651_v9, 0 }
0x102b   :  { %6560 = vmatprep.subr.msk.bf16.mxu0 %vm4307_vm1, %v5650_v42  ;;  %6563 = vmatprep.subr.msk.bf16.mxu1 %vm4307_vm1, %v5652_v18  ;;  %v5280_v16 = vrot.slane %v9249_v59, %v9261_v51  ;;  %v5288_v14 = vrot.slane %v9249_v59, %v9262_v52  ;;  %v9263_v52 = vsub.s32 4, %v9260_v48 }
0x102c   :  { %5666 = vmatpush1.bf16.msra.mxu0 %v5654_v44  ;;  %5719 = vmatpush1.bf16.msra.mxu1 %v5660_v63 }
0x102d   :  { %6779 = vmatprep.subr.bf16.mxu0 %v8561_v36  ;;  %6807 = vmatprep.subr.bf16.mxu1 %v8565_v54 }
0x102f   :  { %6561 = vmatmul.mubr.msk.bf16.vlgmr.msra.gmra.mrb[108].mxu0 %vm4300_vm2, %v9201_v5  ;;  %6564 = vmatmul.mubr.msk.bf16.vlgmr.msra.gmra.mrb[108].mxu1 %vm4300_vm2, %v9201_v5 }
0x1030   :  { %5707 = vmatprep.mubr.bf16.mxu0 %v9146_v50  ;;  %5760 = vmatprep.mubr.bf16.mxu1 %v9146_v50 }
0x1031   :  { %6780 = vmatpush3.bf16.msra.mxu0 %v8574_v30  ;;  %6808 = vmatpush3.bf16.msra.mxu1 %v8579_v11 }
0x1032   :  { %6781 = vmatprep.subr.bf16.mxu0 %v8583_v22  ;;  %6809 = vmatprep.subr.bf16.mxu1 %v8587_v31 }
0x1035   :  { %6782 = vmatpush3.bf16.msra.mxu0 %v8599_v60  ;;  %6810 = vmatpush3.bf16.msra.mxu1 %v8603_v8 }
0x1036   :  { %6783 = vmatprep.subr.bf16.mxu0 %v8609_v27  ;;  %6811 = vmatprep.subr.bf16.mxu1 %v8613_v32 }
0x1037   :  { %6562 = vmatmul.mubr.msk.bf16.gmra.mrb[112].mxu0 %vm4300_vm2, %v9202_v37  ;;  %6565 = vmatmul.mubr.msk.bf16.gmra.mrb[112].mxu1 %vm4300_vm2, %v9202_v37 }
0x1039   :  { %6784 = vmatpush3.bf16.msra.mxu0 %v8619_v12  ;;  %6812 = vmatpush3.bf16.msra.mxu1 %v8623_v25 }
0x103a   :  { %6785 = vmatprep.subr.bf16.mxu0 %v8629_v53  ;;  %6813 = vmatprep.subr.bf16.mxu1 %v8633_v35 }
0x103d   :  { %6786 = vmatpush3.bf16.msra.mxu0 %v8643_v28  ;;  %6814 = vmatpush3.bf16.msra.mxu1 %v8647_v34 }
0x103e   :  { %6787 = vmatprep.subr.bf16.mxu0 %v8653_v4  ;;  %6815 = vmatprep.subr.bf16.mxu1 %v8657_v3 }
0x1041   :  { %6788 = vmatpush3.bf16.msra.mxu0 %v8663_v38  ;;  %6816 = vmatpush3.bf16.msra.mxu1 %v8667_v39 }
0x1042   :  { %6789 = vmatprep.subr.bf16.mxu0 %v8673_v19  ;;  %6817 = vmatprep.subr.bf16.mxu1 %v8677_v2 }
0x1045   :  { %6790 = vmatpush3.bf16.msra.mxu0 %v8683_v0  ;;  %6818 = vmatpush3.bf16.msra.mxu1 %v8687_v55 }
0x1046   :  { %6791 = vmatprep.subr.bf16.mxu0 %v8693_v21  ;;  %6819 = vmatprep.subr.bf16.mxu1 %v9253_v58 }
0x1049   :  { %6792 = vmatpush3.bf16.msra.mxu0 %v9254_v23  ;;  %6820 = vmatpush3.bf16.msra.mxu1 %v9255_v62 }
0x104a   :  { %6793 = vmatprep.subr.bf16.mxu0 %v9256_v43  ;;  %6821 = vmatprep.subr.bf16.mxu1 %v9257_v24 }
0x104d   :  { %6794 = vmatpush3.bf16.msra.mxu0 %v9258_v10  ;;  %6822 = vmatpush3.bf16.msra.mxu1 %v9259_v6 }
0x10a2   :  { %v5536_v47 = vpop.f32.mrb[104].mxu0  ;;  %v5618_v49 = vpop.f32.mrb[104].mxu1 }
0x10a3   :  { %v5538_v45 = vpop.f32.mrb[105].mxu0  ;;  %v5620_v61 = vpop.f32.mrb[105].mxu1 }
0x10a4   :  { %v6908_v20 = vadd.f32 %v5538_v45, %v5280_v16  ;;  %v5540_v15 = vpop.f32.mrb[106].mxu0  ;;  %v6910_v1 = vadd.f32 %v5620_v61, %v5288_v14  ;;  %v5622_v29 = vpop.f32.mrb[106].mxu1  ;;  %v5276_v16 = vrot.slane %v9249_v59, %v9263_v52  ;;  %v9264_v14 = vsub.s32 6, %v9260_v48 }
0x10a5   :  { %v5541_v9 = vpop.f32.mrb[107].mxu0  ;;  %v5623_v42 = vpop.f32.mrb[107].mxu1 }
0x10a6   :  { %vm5630_vm5 = vcmp.gt.f32.partialorder %v6908_v20, 0.0  ;;  %v5638_v57 = vmul.f32 0.2, %v6908_v20  ;;  %vm5632_vm14 = vcmp.gt.f32.partialorder %v6910_v1, 0.0  ;;  %v5640_v18 = vmul.f32 0.2, %v6910_v1 }
0x10a7   :  { %v5284_v45 = vrot.slane %v9249_v59, %v9264_v14  ;;  %v6907_v61 = vadd.f32 %v5536_v47, %v5276_v16 }
0x10a8   :  { %v5646_v44 = vsel %vm5630_vm5, %v6908_v20, %v5638_v57  ;;  %v5648_v51 = vsel %vm5632_vm14, %v6910_v1, %v5640_v18 }
0x10a9   :  { %v5898_v63 = vpack.c.bf16 %v5646_v44, %v5646_v44  ;;  %v5900_v7 = vpack.c.bf16 %v5648_v51, %v5648_v51  ;;  %v6909_v15 = vadd.f32 %v5618_v49, %v5284_v45  ;;  %v5637_v29 = vmul.f32 0.2, %v6907_v61 }
0x10aa   :  { %vm5629_vm15 = vcmp.gt.f32.partialorder %v6907_v61, 0.0 }
0x10ab   :  { %6590 = vmatprep.subr.msk.bf16.mxu0 %vm4307_vm1, %v5898_v63  ;;  %6593 = vmatprep.subr.msk.bf16.mxu1 %vm4307_vm1, %v5900_v7  ;;  %v5639_v9 = vmul.f32 0.2, %v6909_v15  ;;  %vm5631_vm0 = vcmp.gt.f32.partialorder %v6909_v15, 0.0  ;;  %v5645_v57 = vsel %vm5629_vm15, %v6907_v61, %v5637_v29 }
0x10ac   :  { %v5897_v10 = vpack.c.bf16 %v5645_v57, %v5645_v57 }
0x10ad   :  { %v5647_v42 = vsel %vm5631_vm0, %v6909_v15, %v5639_v9 }
0x10ae   :  { %v5899_v59 = vpack.c.bf16 %v5647_v42, %v5647_v42  ;;  %v5902_v16 = vsel %vm4307_vm1, %v5897_v10, 0 }
0x10b0   :  { %v5908_v14 = vsel %vm4307_vm1, %v5899_v59, 0 }
0x1102   :  { %v5699_v20 = vpop.f32.mrb[108].mxu0  ;;  %v5752_v1 = vpop.f32.mrb[108].mxu1 }
0x1103   :  { %v5701_v18 = vpop.f32.mrb[109].mxu0  ;;  %v5754_v7 = vpop.f32.mrb[109].mxu1 }
0x1104   :  { %v5703_v44 = vpop.f32.mrb[110].mxu0  ;;  %v5756_v63 = vpop.f32.mrb[110].mxu1 }
0x1105   :  { %v6570_v51 = vpack.c.bf16 %v5703_v44, %v5699_v20  ;;  %v6582_v52 = vpack.c.bf16 %v5756_v63, %v5752_v1  ;;  %v5705_v6 = vpop.f32.mrb[111].mxu0  ;;  %v5758_v48 = vpop.f32.mrb[111].mxu1 }
0x1106   :  { %v6567_v47 = vpack.c.bf16 %v5705_v6, %v5701_v18  ;;  %v6579_v49 = vpack.c.bf16 %v5758_v48, %v5754_v7 }
0x1108   :  { %6568 = vmatprep.mubr.msk.bf16.mxu0 %vm8021_vm6, %v6567_v47  ;;  %6580 = vmatprep.mubr.msk.bf16.mxu1 %vm8025_vm9, %v6579_v49 }
0x1109   :  { %6571 = vmatmul.mubr.msk.bf16.vlgmr.msra.gmra.mrb[116].mxu0 %vm8033_vm10, %v6570_v51  ;;  %6583 = vmatmul.mubr.msk.bf16.vlgmr.msra.gmra.mrb[116].mxu1 %vm8037_vm11, %v6582_v52 }
0x110a   :  { %5914 = vmatpush1.bf16.msra.mxu0 %v5902_v16  ;;  %5967 = vmatpush1.bf16.msra.mxu1 %v5908_v14  ;;  %v5709_v6 = vpop.f32.mrb[112].mxu0  ;;  %v5762_v45 = vpop.f32.mrb[112].mxu1 }
0x110b   :  { %v5711_v61 = vpop.f32.mrb[113].mxu0  ;;  %v5764_v15 = vpop.f32.mrb[113].mxu1  ;;  %6835 = vmatprep.subr.bf16.mxu0 %v8561_v36  ;;  %6863 = vmatprep.subr.bf16.mxu1 %v8565_v54  ;;  %v9266_v36 = vld [vmem:[#allocation54_spill] sm:$0xff] }
0x110c   :  { %v5713_v29 = vpop.f32.mrb[114].mxu0  ;;  %v5766_v9 = vpop.f32.mrb[114].mxu1 }
0x110d   :  { %v6576_v20 = vpack.c.bf16 %v5713_v29, %v5709_v6  ;;  %v6588_v1 = vpack.c.bf16 %v5766_v9, %v5762_v45  ;;  %v5715_v57 = vpop.f32.mrb[115].mxu0  ;;  %v5768_v42 = vpop.f32.mrb[115].mxu1 }
0x110e   :  { %v6573_v18 = vpack.c.bf16 %v5715_v57, %v5711_v61  ;;  %v6585_v10 = vpack.c.bf16 %v5768_v42, %v5764_v15 }
0x1110   :  { %6574 = vmatprep.mubr.msk.bf16.mxu0 %vm8051_vm3, %v6573_v18  ;;  %6586 = vmatprep.mubr.msk.bf16.mxu1 %vm8055_vm7, %v6585_v10 }
0x1111   :  { %6577 = vmatmul.mubr.msk.bf16.gmra.mrb[120].mxu0 %vm8060_vm8, %v6576_v20  ;;  %6589 = vmatmul.mubr.msk.bf16.gmra.mrb[120].mxu1 %vm8065_vm12, %v6588_v1 }
0x1112   :  { %5945 = vmatprep.mubr.bf16.mxu0 %v9146_v50  ;;  %5998 = vmatprep.mubr.bf16.mxu1 %v9146_v50 }
0x1119   :  { %6591 = vmatmul.mubr.msk.bf16.vlgmr.msra.gmra.mrb[124].mxu0 %vm4300_vm2, %v9201_v5  ;;  %6594 = vmatmul.mubr.msk.bf16.vlgmr.msra.gmra.mrb[124].mxu1 %vm4300_vm2, %v9201_v5 }
0x111a   :  { %5955 = vmatprep.mubr.bf16.mxu0 %v9146_v50  ;;  %6008 = vmatprep.mubr.bf16.mxu1 %v9146_v50  ;;  %v9265_v50 = vld [vmem:[#allocation67_spill] sm:$0xff] }
0x111b   :  { %6836 = vmatpush3.bf16.msra.mxu0 %v8574_v30  ;;  %6864 = vmatpush3.bf16.msra.mxu1 %v8579_v11 }
0x111c   :  { %6837 = vmatprep.subr.bf16.mxu0 %v8583_v22  ;;  %6865 = vmatprep.subr.bf16.mxu1 %v8587_v31 }
0x111f   :  { %6838 = vmatpush3.bf16.msra.mxu0 %v8599_v60  ;;  %6866 = vmatpush3.bf16.msra.mxu1 %v8603_v8 }
0x1120   :  { %6839 = vmatprep.subr.bf16.mxu0 %v8609_v27  ;;  %6867 = vmatprep.subr.bf16.mxu1 %v8613_v32 }
0x1121   :  { %6592 = vmatmul.mubr.msk.bf16.gmra.mrb[128].mxu0 %vm4300_vm2, %v9202_v37  ;;  %6595 = vmatmul.mubr.msk.bf16.gmra.mrb[128].mxu1 %vm4300_vm2, %v9202_v37 }
0x1123   :  { %6840 = vmatpush3.bf16.msra.mxu0 %v8619_v12  ;;  %6868 = vmatpush3.bf16.msra.mxu1 %v8623_v25  ;;  %v9267_v12 = vld [vmem:[#allocation81_spill] sm:$0xff] }
0x1124   :  { %6841 = vmatprep.subr.bf16.mxu0 %v8629_v53  ;;  %6869 = vmatprep.subr.bf16.mxu1 %v8633_v35 }
0x1127   :  { %6842 = vmatpush3.bf16.msra.mxu0 %v8643_v28  ;;  %6870 = vmatpush3.bf16.msra.mxu1 %v8647_v34 }
0x1128   :  { %6843 = vmatprep.subr.bf16.mxu0 %v8653_v4  ;;  %6871 = vmatprep.subr.bf16.mxu1 %v8657_v3 }
0x112b   :  { %6844 = vmatpush3.bf16.msra.mxu0 %v8663_v38  ;;  %6872 = vmatpush3.bf16.msra.mxu1 %v8667_v39 }
0x112c   :  { %6845 = vmatprep.subr.bf16.mxu0 %v8673_v19  ;;  %6873 = vmatprep.subr.bf16.mxu1 %v8677_v2 }
0x112f   :  { %6846 = vmatpush3.bf16.msra.mxu0 %v8683_v0  ;;  %6874 = vmatpush3.bf16.msra.mxu1 %v8687_v55 }
0x1130   :  { %6847 = vmatprep.subr.bf16.mxu0 %v8693_v21  ;;  %6875 = vmatprep.subr.bf16.mxu1 %v9253_v58 }
0x1133   :  { %6848 = vmatpush3.bf16.msra.mxu0 %v9254_v23  ;;  %6876 = vmatpush3.bf16.msra.mxu1 %v9255_v62 }
0x1134   :  { %6849 = vmatprep.subr.bf16.mxu0 %v9256_v43  ;;  %6877 = vmatprep.subr.bf16.mxu1 %v9257_v24 }
0x1137   :  { %6850 = vmatpush3.bf16.msra.mxu0 %v9265_v50  ;;  %6878 = vmatpush3.bf16.msra.mxu1 %v9266_v36 }
0x11dc   :  { %v6795_v54 = vpop.f32.mrb[116].mxu0  ;;  %v6823_v30 = vpop.f32.mrb[116].mxu1 }
0x11dd   :  { %v6796_v11 = vpop.f32.mrb[117].mxu0  ;;  %v6824_v22 = vpop.f32.mrb[117].mxu1 }
0x11de   :  { %v6797_v31 = vadd.f32 %v6796_v11, %v6795_v54  ;;  %v6825_v5 = vadd.f32 %v6824_v22, %v6823_v30  ;;  %v6798_v60 = vpop.f32.mrb[118].mxu0  ;;  %v6826_v8 = vpop.f32.mrb[118].mxu1 }
0x11df   :  { %v6799_v27 = vpop.f32.mrb[119].mxu0  ;;  %v6827_v32 = vpop.f32.mrb[119].mxu1 }
0x11e0   :  { %v5830_v25 = vadd.f32 %v6797_v31, %v9267_v12  ;;  %v6800_v53 = vadd.f32 %v6799_v27, %v6798_v60  ;;  %v6828_v35 = vadd.f32 %v6827_v32, %v6826_v8 }
0x11e2   :  { %v5879_v37 = vadd.f32 %v6825_v5, %v5830_v25  ;;  %v5833_v28 = vadd.f32 %v6800_v53, %v9267_v12 }
0x11e4   :  { %5893 = vst [vmem:[#allocation22 + $0x20] sm:$0xff] %v5879_v37  ;;  %v5882_v34 = vadd.f32 %v6828_v35, %v5833_v28  ;;  %v6801_v4 = vpop.f32.mrb[120].mxu0  ;;  %v6829_v3 = vpop.f32.mrb[120].mxu1 }
0x11e5   :  { %v6802_v38 = vpop.f32.mrb[121].mxu0  ;;  %v6830_v39 = vpop.f32.mrb[121].mxu1 }
0x11e6   :  { %5894 = vst [vmem:[#allocation22 + $0x28] sm:$0xff] %v5882_v34  ;;  %v6803_v19 = vadd.f32 %v6802_v38, %v6801_v4  ;;  %v6831_v2 = vadd.f32 %v6830_v39, %v6829_v3  ;;  %v6804_v0 = vpop.f32.mrb[122].mxu0  ;;  %v6832_v55 = vpop.f32.mrb[122].mxu1 }
0x11e7   :  { %v6805_v21 = vpop.f32.mrb[123].mxu0  ;;  %v6833_v58 = vpop.f32.mrb[123].mxu1 }
0x11e8   :  { %v5838_v23 = vadd.f32 %v6803_v19, %v9267_v12  ;;  %v6806_v62 = vadd.f32 %v6805_v21, %v6804_v0  ;;  %v6834_v43 = vadd.f32 %v6833_v58, %v6832_v55 }
0x11ea   :  { %v5887_v24 = vadd.f32 %v6831_v2, %v5838_v23  ;;  %v5841_v7 = vadd.f32 %v6806_v62, %v9267_v12 }
0x11ec   :  { %5895 = vst [vmem:[#allocation22 + $0x60] sm:$0xff] %v5887_v24  ;;  %v5890_v44 = vadd.f32 %v6834_v43, %v5841_v7  ;;  %v5947_v63 = vpop.f32.mrb[124].mxu0  ;;  %v6000_v51 = vpop.f32.mrb[124].mxu1 }
0x11ed   :  { %v5949_v52 = vpop.f32.mrb[125].mxu0  ;;  %v6002_v48 = vpop.f32.mrb[125].mxu1 }
0x11ee   :  { %5896 = vst [vmem:[#allocation22 + $0x68] sm:$0xff] %v5890_v44  ;;  %v5951_v59 = vpop.f32.mrb[126].mxu0  ;;  %v6004_v47 = vpop.f32.mrb[126].mxu1 }
0x11ef   :  { %v6600_v49 = vpack.c.bf16 %v5951_v59, %v5947_v63  ;;  %v6612_v16 = vpack.c.bf16 %v6004_v47, %v6000_v51  ;;  %v5953_v14 = vpop.f32.mrb[127].mxu0  ;;  %v6006_v6 = vpop.f32.mrb[127].mxu1 }
0x11f0   :  { %v6597_v45 = vpack.c.bf16 %v5953_v14, %v5949_v52  ;;  %v6609_v61 = vpack.c.bf16 %v6006_v6, %v6002_v48 }
0x11f2   :  { %6598 = vmatprep.mubr.msk.bf16.mxu0 %vm8021_vm6, %v6597_v45  ;;  %6610 = vmatprep.mubr.msk.bf16.mxu1 %vm8025_vm9, %v6609_v61 }
0x11f3   :  { %6601 = vmatmul.mubr.msk.bf16.vlgmr.msra.gmra.mrb[132].mxu0 %vm8033_vm10, %v6600_v49  ;;  %6613 = vmatmul.mubr.msk.bf16.vlgmr.msra.gmra.mrb[132].mxu1 %vm8037_vm11, %v6612_v16 }
0x11f4   :  { %v5957_v15 = vpop.f32.mrb[128].mxu0  ;;  %v6010_v29 = vpop.f32.mrb[128].mxu1 }
0x11f5   :  { %v5959_v9 = vpop.f32.mrb[129].mxu0  ;;  %v6012_v20 = vpop.f32.mrb[129].mxu1 }
0x11f6   :  { %v5961_v1 = vpop.f32.mrb[130].mxu0  ;;  %v6014_v57 = vpop.f32.mrb[130].mxu1 }
0x11f7   :  { %v6606_v42 = vpack.c.bf16 %v5961_v1, %v5957_v15  ;;  %v6618_v18 = vpack.c.bf16 %v6014_v57, %v6010_v29  ;;  %v5963_v10 = vpop.f32.mrb[131].mxu0  ;;  %v6016_v41 = vpop.f32.mrb[131].mxu1 }
0x11f8   :  { %v6603_v50 = vpack.c.bf16 %v5963_v10, %v5959_v9  ;;  %v6615_v36 = vpack.c.bf16 %v6016_v41, %v6012_v20 }
0x11fa   :  { %6604 = vmatprep.mubr.msk.bf16.mxu0 %vm8051_vm3, %v6603_v50  ;;  %6616 = vmatprep.mubr.msk.bf16.mxu1 %vm8055_vm7, %v6615_v36 }
0x11fb   :  { %6607 = vmatmul.mubr.msk.bf16.gmra.mrb[136].mxu0 %vm8060_vm8, %v6606_v42  ;;  %6619 = vmatmul.mubr.msk.bf16.gmra.mrb[136].mxu1 %vm8065_vm12, %v6618_v18 }
0x12c6   :  { %v6851_v40 = vpop.f32.mrb[132].mxu0  ;;  %v6879_v33 = vpop.f32.mrb[132].mxu1 }
0x12c7   :  { %v6852_v17 = vpop.f32.mrb[133].mxu0  ;;  %v6880_v54 = vpop.f32.mrb[133].mxu1 }
0x12c8   :  { %v6853_v30 = vadd.f32 %v6852_v17, %v6851_v40  ;;  %v6881_v11 = vadd.f32 %v6880_v54, %v6879_v33  ;;  %v6854_v22 = vpop.f32.mrb[134].mxu0  ;;  %v6882_v31 = vpop.f32.mrb[134].mxu1 }
0x12c9   :  { %v6855_v5 = vpop.f32.mrb[135].mxu0  ;;  %v6883_v46 = vpop.f32.mrb[135].mxu1 }
0x12ca   :  { %v6078_v60 = vadd.f32 %v6853_v30, %v9267_v12  ;;  %v6856_v13 = vadd.f32 %v6855_v5, %v6854_v22  ;;  %v6884_v8 = vadd.f32 %v6883_v46, %v6882_v31 }
0x12cc   :  { %v6127_v27 = vadd.f32 %v6881_v11, %v6078_v60  ;;  %v6081_v56 = vadd.f32 %v6856_v13, %v9267_v12 }
0x12ce   :  { %6141 = vst [vmem:[#allocation22 + $0x30] sm:$0xff] %v6127_v27  ;;  %v6130_v26 = vadd.f32 %v6884_v8, %v6081_v56  ;;  %v6857_v32 = vpop.f32.mrb[136].mxu0  ;;  %v6885_v25 = vpop.f32.mrb[136].mxu1 }
0x12cf   :  { %v6858_v53 = vpop.f32.mrb[137].mxu0  ;;  %v6886_v35 = vpop.f32.mrb[137].mxu1 }
0x12d0   :  { %6142 = vst [vmem:[#allocation22 + $0x38] sm:$0xff] %v6130_v26  ;;  %v6859_v37 = vadd.f32 %v6858_v53, %v6857_v32  ;;  %v6887_v28 = vadd.f32 %v6886_v35, %v6885_v25  ;;  %v6860_v34 = vpop.f32.mrb[138].mxu0  ;;  %v6888_v4 = vpop.f32.mrb[138].mxu1 }
0x12d1   :  { %v6861_v3 = vpop.f32.mrb[139].mxu0  ;;  %v6889_v38 = vpop.f32.mrb[139].mxu1 }
0x12d2   :  { %v6086_v39 = vadd.f32 %v6859_v37, %v9267_v12  ;;  %v6862_v19 = vadd.f32 %v6861_v3, %v6860_v34  ;;  %v6890_v2 = vadd.f32 %v6889_v38, %v6888_v4 }
0x12d4   :  { %v6135_v0 = vadd.f32 %v6887_v28, %v6086_v39  ;;  %v6089_v55 = vadd.f32 %v6862_v19, %v9267_v12 }
0x12d6   :  { %6143 = vst [vmem:[#allocation22 + $0x70] sm:$0xff] %v6135_v0  ;;  %v6138_v21 = vadd.f32 %v6890_v2, %v6089_v55 }
0x12d8   :  { %6144 = vst [vmem:[#allocation22 + $0x78] sm:$0xff] %v6138_v21 }
0x12d9   :  { %7403 = shalt.err (!%p7400_p0)
}
0x12da   :  { %s7404_s7 = scalar_lea.hbm %s9036_s12, 2048 }
0x12db   :  { %p7405_p1 = scmp.ne.s32.totalorder %s9036_s12, %s7404_s7  ;;  %p7408_p2 = scmp.lt.u32.totalorder %s7404_s7, %s9036_s12 }
0x12dd   :  { %p7410_p3 = pnand %p7408_p2, %p7405_p1 }
0x12df   :  { %7413 = shalt.err (!%p7410_p3)
}
0x12e0   :  { %6156 = dma.vmem_to_hbm [thread:$0]  %s6151_s1, 2048, %s9036_s12, [#allocation7], %s7452_s20, %s7452_s20, %s7458_s15  }
0x12e1   :  { %7432 = dma.done.wait [#allocation7], 2048  }
0x12e2   :  { %7433 = vsyncadd [#allocation7], 4294965248 }
0x12e3   :  { %6160 = vsyncpa [#allocation6], 1 }
0x12e4   :  { %6161 = vsyncpa [#allocation9], 1 }
0x12e5   :  { %6162 = vsyncpa [#allocation12], 1 }
0x12e6   :  { %6163 = vsyncpa [#allocation15], 1 }
0x12e7   :  { %6164 = vsyncpa [#allocation18], 1 }
0x12e8   :  { %6165 = vsyncpa [#allocation21], 1 }
0x12e9   :  { %6166 = vsyncpa [#allocation7], 1 }
0x12ea   :  { %6167 = vsyncmov [#allocation4] }
0x12ed   :  { %s6168_s23 = vpop.sfrf %6167 }
0x12ee   :  { %p6620_p4 = scmp.ne.s32.totalorder %s6168_s23, 0 }
0x12f0   :  { %6172 = shalt.err (%p6620_p4)  }
0x12f1   :  { %6174 = vsyncmov [#allocation4 + $0x1] }
0x12f4   :  { %s6175_s5 = vpop.sfrf %6174 }
0x12f5   :  { %p6621_p5 = scmp.ne.s32.totalorder %s6175_s5, 0 }
0x12f7   :  { %6179 = shalt.err (%p6621_p5)  }
0x12f8   :  { %6181 = vsyncmov [#allocation4 + $0x2] }
0x12fb   :  { %s6182_s6 = vpop.sfrf %6181 }
0x12fc   :  { %p6622_p6 = scmp.ne.s32.totalorder %s6182_s6, 0 }
0x12fe   :  { %6186 = shalt.err (%p6622_p6)  }

</bundles_post_ra>
